<compile_context>
chip_gen: v6e
topology: v6e:2x2x1
jax: 0.10.0
libtpu: 0.0.40
codegen_flags: <defaults>
</compile_context>

<pallas_src>
import functools

import jax
import jax.numpy as jnp
from jax.experimental import pallas as pl
from jax.experimental.pallas import tpu as pltpu


def _round_up(x, m):
    return (x + m - 1) // m * m


def _softplus_f32(x):
    # PyTorch nn.Softplus(beta=1, threshold=20): x if x > 20 else log(1 + e^x)
    safe = jnp.where(x > 20.0, 0.0, x)
    return jnp.where(x > 20.0, x, jnp.log1p(jnp.exp(safe)))


_COMPILER_PARAMS = pltpu.CompilerParams(
    dimension_semantics=("parallel",),      # row tiles are independent
    vmem_limit_bytes=32 * 1024 * 1024,      # safe on v5e/v6e/v7x for these tiles
)


def _pick_tm(m):
    # 256-aligned row tiles keep the 256-wide MXU (v6e/v7x) full and are a
    # multiple of v5e's 128; small problems use a single full-height block.
    # 256 rows also caps the per-step VMEM working set for v7x's 64 MiB.
    if m >= 256:
        return 256
    return _round_up(m, 8)


# ---------------------------------------------------------------------------
# Pallas kernels
# ---------------------------------------------------------------------------
def _linear_kernel(x_ref, w_ref, b_ref, o_ref, *, apply_softplus):
    # bf16 operands -> MXU, f32 accumulation; epilogue in f32.
    acc = jnp.dot(x_ref[...], w_ref[...], preferred_element_type=jnp.float32)
    acc = acc + b_ref[...]
    if apply_softplus:
        acc = _softplus_f32(acc)
    o_ref[...] = acc.astype(o_ref.dtype)


def _fused_classifier_kernel(x_ref, w1_ref, b1_ref, w2_ref, b2_ref, o_ref):
    # fc1 + Softplus + fc2 fused; both weight matrices stay resident in VMEM.
    h = jnp.dot(x_ref[...], w1_ref[...], preferred_element_type=jnp.float32)
    h = _softplus_f32(h + b1_ref[...])
    q = jnp.dot(h.astype(jnp.bfloat16), w2_ref[...],
                preferred_element_type=jnp.float32)
    o_ref[...] = (q + b2_ref[...]).astype(o_ref.dtype)


# ---------------------------------------------------------------------------
# Pallas wrappers (M-tiled grids, pre-padded bf16 weights)
# ---------------------------------------------------------------------------
def linear_pallas(x, w_p, b_p, n_out, *, apply_softplus, out_dtype):
    """x: (M, K); w_p: (Kp, Np) bf16 pre-padded; b_p: (1, Np) f32 pre-padded."""
    M, K = x.shape
    Kp, Np = w_p.shape
    TM = _pick_tm(M)
    Mp = _round_up(M, TM)
    xp = jnp.zeros((Mp, Kp), jnp.bfloat16).at[:M, :K].set(
        x.astype(jnp.bfloat16))
    kernel = functools.partial(_linear_kernel, apply_softplus=apply_softplus)
    out = pl.pallas_call(
        kernel,
        out_shape=jax.ShapeDtypeStruct((Mp, Np), out_dtype),
        grid=(Mp // TM,),
        in_specs=[
            pl.BlockSpec((TM, Kp), lambda i: (i, 0)),     # streamed activations
            pl.BlockSpec((Kp, Np), lambda i: (0, 0)),     # constant weight block
            pl.BlockSpec((1, Np), lambda i: (0, 0)),      # constant bias block
        ],
        out_specs=pl.BlockSpec((TM, Np), lambda i: (i, 0)),
        compiler_params=_COMPILER_PARAMS,
    )(xp, w_p, b_p)
    return out[:M, :n_out]


def classifier_pallas(x, w1_p, b1_p, w2_p, b2_p, n_out):
    """Fused fc1 -> Softplus -> fc2. x: (M, 3136), output (M, n_out) f32."""
    M, K = x.shape
    K1p, H = w1_p.shape
    _, N2p = w2_p.shape
    TM = _pick_tm(M)
    Mp = _round_up(M, TM)
    xp = jnp.zeros((Mp, K1p), jnp.bfloat16).at[:M, :K].set(
        x.astype(jnp.bfloat16))
    out = pl.pallas_call(
        _fused_classifier_kernel,
        out_shape=jax.ShapeDtypeStruct((Mp, N2p), jnp.float32),
        grid=(Mp // TM,),
        in_specs=[
            pl.BlockSpec((TM, K1p), lambda i: (i, 0)),
            pl.BlockSpec((K1p, H), lambda i: (0, 0)),
            pl.BlockSpec((1, H), lambda i: (0, 0)),
            pl.BlockSpec((H, N2p), lambda i: (0, 0)),
            pl.BlockSpec((1, N2p), lambda i: (0, 0)),
        ],
        out_specs=pl.BlockSpec((TM, N2p), lambda i: (i, 0)),
        compiler_params=_COMPILER_PARAMS,
    )(xp, w1_p, b1_p, w2_p, b2_p)
    return out[:M, :n_out]


# ---------------------------------------------------------------------------
# Conv2d (valid padding, stride s) via bf16 im2col + the tiled Pallas matmul
# ---------------------------------------------------------------------------
def _im2col(x, kh, kw, stride):
    # x: (B, H, W, C) -> (B*OH*OW, kh*kw*C), patch features ordered (kh, kw, C)
    B, H, W, C = x.shape
    OH = (H - kh) // stride + 1
    OW = (W - kw) // stride + 1
    cols = []
    for i in range(kh):
        for j in range(kw):
            cols.append(x[:, i:i + stride * OH:stride,
                          j:j + stride * OW:stride, :])
    p = jnp.stack(cols, axis=3)                        # (B, OH, OW, kh*kw, C)
    return p.reshape(B * OH * OW, kh * kw * C), OH, OW
# TODO(synk): fuse im2col into the conv kernel as an implicit GEMM to avoid
# materializing the patch matrix in HBM (bf16 patches already halve it).


def conv2d_softplus(x, w_p, b_p, kh, kw, oc, stride):
    # x: (B, H, W, C) bf16; w_p: pre-padded (kh*kw*C -> Kp, oc -> Np) bf16
    B = x.shape[0]
    flat, OH, OW = _im2col(x, kh, kw, stride)
    out = linear_pallas(flat, w_p, b_p, oc,
                        apply_softplus=True, out_dtype=jnp.bfloat16)
    return out.reshape(B, OH, OW, oc)


# ---------------------------------------------------------------------------
# Parameter init (xavier_normal_ weights, zero bias) + one-time TPU prep
# ---------------------------------------------------------------------------
def _xavier_normal(key, shape, fan_in, fan_out):
    std = (2.0 / (fan_in + fan_out)) ** 0.5
    return std * jax.random.normal(key, shape, jnp.float32)


def init_dqn_params(key, in_channels, num_actions):
    """Raw f32 parameters, mirroring the PyTorch module's init scheme.

    Conv weights are HWIO; fc1 rows are in the PyTorch (C, H, W) flatten order
    (as they would be if exported from torch); fc weights are (in, out).
    """
    ks = jax.random.split(key, 5)
    return {
        "w1": _xavier_normal(ks[0], (8, 8, in_channels, 32),
                             fan_in=in_channels * 64, fan_out=32 * 64),
        "b1": jnp.zeros((32,), jnp.float32),
        "w2": _xavier_normal(ks[1], (4, 4, 32, 64),
                             fan_in=32 * 16, fan_out=64 * 16),
        "b2": jnp.zeros((64,), jnp.float32),
        "w3": _xavier_normal(ks[2], (3, 3, 64, 64),
                             fan_in=64 * 9, fan_out=64 * 9),
        "b3": jnp.zeros((64,), jnp.float32),
        "wfc1": _xavier_normal(ks[3], (7 * 7 * 64, 512),
                               fan_in=7 * 7 * 64, fan_out=512),
        "bfc1": jnp.zeros((512,), jnp.float32),
        "wfc2": _xavier_normal(ks[4], (512, num_actions),
                               fan_in=512, fan_out=num_actions),
        "bfc2": jnp.zeros((num_actions,), jnp.float32),
    }


def _pad_weight(w2d, b1d):
    K, N = w2d.shape
    Kp, Np = _round_up(K, 128), _round_up(N, 128)
    wp = jnp.zeros((Kp, Np), jnp.bfloat16).at[:K, :N].set(
        w2d.astype(jnp.bfloat16))
    bp = jnp.zeros((1, Np), jnp.float32).at[0, :N].set(b1d.astype(jnp.float32))
    return wp, bp


def prepare_params(params):
    """One-time: fold /255 into conv1, flatten+pad+cast all weights to bf16
    TPU layouts, and row-permute fc1 from (C,H,W) to the NHWC (H,W,C) flatten
    order so the per-forward transpose disappears.  Only arrays go in here
    (the result is passed through jax.jit)."""
    def conv_entry(w_hwio, b, scale=None):
        kh, kw, ic, oc = w_hwio.shape
        w = w_hwio if scale is None else w_hwio * scale
        wp, bp = _pad_weight(w.reshape(kh * kw * ic, oc), b)
        return {"w": wp, "b": bp}

    prep = {
        "conv1": conv_entry(params["w1"], params["b1"], scale=1.0 / 255.0),
        "conv2": conv_entry(params["w2"], params["b2"]),
        "conv3": conv_entry(params["w3"], params["b3"]),
    }
    # fc1: permute rows (c, h, w) -> (h, w, c) to consume the NHWC flatten.
    wfc1_hwc = (params["wfc1"].reshape(64, 7, 7, 512)
                .transpose(1, 2, 0, 3).reshape(7 * 7 * 64, 512))
    w1p, b1p = _pad_weight(wfc1_hwc, params["bfc1"])
    w2p, b2p = _pad_weight(params["wfc2"], params["bfc2"])
    prep["fc"] = {"w1": w1p, "b1": b1p, "w2": w2p, "b2": b2p}
    return prep


# ---------------------------------------------------------------------------
# DQN forward
# ---------------------------------------------------------------------------
_CONV_CFG = (
    ("conv1", 8, 8, 32, 4),   # (name, kh, kw, out_channels, stride)
    ("conv2", 4, 4, 64, 2),
    ("conv3", 3, 3, 64, 1),
)


@functools.partial(jax.jit, static_argnums=(2,))
def dqn_forward(obs, prep, num_actions):
    # obs: (B, 84, 84, C) uint8 NHWC (same layout the PyTorch module receives).
    x = obs.astype(jnp.bfloat16)            # /255 is folded into conv1 weights
    for name, kh, kw, oc, stride in _CONV_CFG:
        x = conv2d_softplus(x, prep[name]["w"], prep[name]["b"],
                            kh, kw, oc, stride)
    # (B, 7, 7, 64) -> (B, 3136); fc1 rows were permuted to the NHWC order,
    # so no NCHW transpose is needed to keep PyTorch-equivalent semantics.
    B = x.shape[0]
    feats = x.reshape(B, 7 * 7 * 64)
    return classifier_pallas(feats, prep["fc"]["w1"], prep["fc"]["b1"],
                             prep["fc"]["w2"], prep["fc"]["b2"], num_actions)


if __name__ == "__main__":
    batch = 2
    in_channels = 4
    num_actions = 6
    # 84x84 spatial input is required by the module's 7*7*64 classifier width.
    key = jax.random.PRNGKey(0)
    k_obs, k_params = jax.random.split(key)
    obs = jax.random.randint(k_obs, (batch, 84, 84, in_channels), 0, 256,
                             dtype=jnp.int32).astype(jnp.uint8)
    params = init_dqn_params(k_params, in_channels, num_actions)
    prep = prepare_params(params)           # one-time pad / cast / permutation

    q_values = jax.block_until_ready(dqn_forward(obs, prep, num_actions))
    assert q_values.shape == (batch, num_actions)
    assert q_values.dtype == jnp.float32
    print("KERNEL_OK")
</pallas_src>

<mosaic_0001>
module attributes {stable_mosaic.version = 11 : i64} {
  func.func @_linear_kernel(%arg0: i32, %arg1: memref<256x256xbf16, #tpu.memory_space<vmem>>, %arg2: memref<256x128xbf16, #tpu.memory_space<vmem>>, %arg3: memref<1x128xf32, #tpu.memory_space<vmem>>, %arg4: memref<256x128xbf16, #tpu.memory_space<vmem>>) attributes {dimension_semantics = [#tpu.dimension_semantics<parallel>], iteration_bounds = array<i64: 4>, scalar_prefetch = 0 : i64, scratch_operands = 0 : i64, tpu.core_type = #tpu.core_type<tc>, window_params = [{transform_indices = @transform_0, window_bounds = array<i64: 256, 256>}, {pipeline_mode = #tpu.pipeline_mode<synchronous>, transform_indices = @transform_1, window_bounds = array<i64: 256, 128>}, {pipeline_mode = #tpu.pipeline_mode<synchronous>, transform_indices = @transform_2, window_bounds = array<i64: 1, 128>}, {transform_indices = @transform_3, window_bounds = array<i64: 256, 128>}]} {
    %c0 = arith.constant 0 : index
    %c0_0 = arith.constant 0 : index
    %0 = vector.load %arg1[%c0, %c0_0] : memref<256x256xbf16, #tpu.memory_space<vmem>>, vector<256x256xbf16>
    %c0_1 = arith.constant 0 : index
    %c0_2 = arith.constant 0 : index
    %1 = vector.load %arg2[%c0_1, %c0_2] : memref<256x128xbf16, #tpu.memory_space<vmem>>, vector<256x128xbf16>
    %cst = arith.constant dense<0.000000e+00> : vector<256x128xf32>
    %2 = tpu.matmul %0, %1, %cst {dimension_numbers = #tpu.dot_dimension_numbers<[1], [0], [0], [1], [0, 0, 1, 1], [], []>} : vector<256x256xbf16>, vector<256x128xbf16>, vector<256x128xf32> -> vector<256x128xf32>
    %c0_3 = arith.constant 0 : index
    %c0_4 = arith.constant 0 : index
    %3 = vector.load %arg3[%c0_3, %c0_4] : memref<1x128xf32, #tpu.memory_space<vmem>>, vector<1x128xf32>
    %4 = vector.broadcast %3 : vector<1x128xf32> to vector<256x128xf32>
    %5 = arith.addf %2, %4 : vector<256x128xf32>
    %cst_5 = arith.constant 2.000000e+01 : f32
    %6 = vector.broadcast %cst_5 : f32 to vector<256x128xf32>
    %7 = arith.cmpf ogt, %5, %6 : vector<256x128xf32>
    %cst_6 = arith.constant 0.000000e+00 : f32
    %8 = vector.broadcast %cst_6 : f32 to vector<256x128xf32>
    %9 = arith.select %7, %8, %5 : vector<256x128xi1>, vector<256x128xf32>
    %cst_7 = arith.constant 2.000000e+01 : f32
    %10 = vector.broadcast %cst_7 : f32 to vector<256x128xf32>
    %11 = arith.cmpf ogt, %5, %10 : vector<256x128xf32>
    %12 = math.exp %9 : vector<256x128xf32>
    %13 = math.log1p %12 : vector<256x128xf32>
    %14 = arith.select %11, %5, %13 : vector<256x128xi1>, vector<256x128xf32>
    %15 = arith.truncf %14 : vector<256x128xf32> to vector<256x128xbf16>
    %c0_8 = arith.constant 0 : index
    %c0_9 = arith.constant 0 : index
    %16 = vector.load %arg4[%c0_8, %c0_9] : memref<256x128xbf16, #tpu.memory_space<vmem>>, vector<256x128xbf16>
    tpu.vector_store %arg4[%c0_8, %c0_9], %15 {strides = array<i32>} : memref<256x128xbf16, #tpu.memory_space<vmem>>, vector<256x128xbf16>,
    return
  }
  func.func @transform_0(%arg0: i32) -> (i32, i32) {
    %c0_i32 = arith.constant 0 : i32
    %c0_i32_0 = arith.constant 0 : i32
    return %arg0, %c0_i32 : i32, i32
  }
  func.func @transform_1(%arg0: i32) -> (i32, i32) {
    %c0_i32 = arith.constant 0 : i32
    %c0_i32_0 = arith.constant 0 : i32
    %c0_i32_1 = arith.constant 0 : i32
    return %c0_i32, %c0_i32_0 : i32, i32
  }
  func.func @transform_2(%arg0: i32) -> (i32, i32) {
    %c0_i32 = arith.constant 0 : i32
    %c0_i32_0 = arith.constant 0 : i32
    %c0_i32_1 = arith.constant 0 : i32
    return %c0_i32, %c0_i32_0 : i32, i32
  }
  func.func @transform_3(%arg0: i32) -> (i32, i32) {
    %c0_i32 = arith.constant 0 : i32
    %c0_i32_0 = arith.constant 0 : i32
    return %arg0, %c0_i32 : i32, i32
  }
}

module attributes {stable_mosaic.version = 11 : i64} {
  func.func @_linear_kernel(%arg0: i32, %arg1: memref<168x512xbf16, #tpu.memory_space<vmem>>, %arg2: memref<512x128xbf16, #tpu.memory_space<vmem>>, %arg3: memref<1x128xf32, #tpu.memory_space<vmem>>, %arg4: memref<168x128xbf16, #tpu.memory_space<vmem>>) attributes {dimension_semantics = [#tpu.dimension_semantics<parallel>], iteration_bounds = array<i64: 1>, scalar_prefetch = 0 : i64, scratch_operands = 0 : i64, tpu.core_type = #tpu.core_type<tc>, window_params = [{transform_indices = @transform_0, window_bounds = array<i64: 168, 512>}, {pipeline_mode = #tpu.pipeline_mode<synchronous>, transform_indices = @transform_1, window_bounds = array<i64: 512, 128>}, {pipeline_mode = #tpu.pipeline_mode<synchronous>, transform_indices = @transform_2, window_bounds = array<i64: 1, 128>}, {transform_indices = @transform_3, window_bounds = array<i64: 168, 128>}]} {
    %c0 = arith.constant 0 : index
    %c0_0 = arith.constant 0 : index
    %0 = vector.load %arg1[%c0, %c0_0] : memref<168x512xbf16, #tpu.memory_space<vmem>>, vector<168x512xbf16>
    %c0_1 = arith.constant 0 : index
    %c0_2 = arith.constant 0 : index
    %1 = vector.load %arg2[%c0_1, %c0_2] : memref<512x128xbf16, #tpu.memory_space<vmem>>, vector<512x128xbf16>
    %cst = arith.constant dense<0.000000e+00> : vector<168x128xf32>
    %2 = tpu.matmul %0, %1, %cst {dimension_numbers = #tpu.dot_dimension_numbers<[1], [0], [0], [1], [0, 0, 1, 1], [], []>} : vector<168x512xbf16>, vector<512x128xbf16>, vector<168x128xf32> -> vector<168x128xf32>
    %c0_3 = arith.constant 0 : index
    %c0_4 = arith.constant 0 : index
    %3 = vector.load %arg3[%c0_3, %c0_4] : memref<1x128xf32, #tpu.memory_space<vmem>>, vector<1x128xf32>
    %4 = vector.broadcast %3 : vector<1x128xf32> to vector<168x128xf32>
    %5 = arith.addf %2, %4 : vector<168x128xf32>
    %cst_5 = arith.constant 2.000000e+01 : f32
    %6 = vector.broadcast %cst_5 : f32 to vector<168x128xf32>
    %7 = arith.cmpf ogt, %5, %6 : vector<168x128xf32>
    %cst_6 = arith.constant 0.000000e+00 : f32
    %8 = vector.broadcast %cst_6 : f32 to vector<168x128xf32>
    %9 = arith.select %7, %8, %5 : vector<168x128xi1>, vector<168x128xf32>
    %cst_7 = arith.constant 2.000000e+01 : f32
    %10 = vector.broadcast %cst_7 : f32 to vector<168x128xf32>
    %11 = arith.cmpf ogt, %5, %10 : vector<168x128xf32>
    %12 = math.exp %9 : vector<168x128xf32>
    %13 = math.log1p %12 : vector<168x128xf32>
    %14 = arith.select %11, %5, %13 : vector<168x128xi1>, vector<168x128xf32>
    %15 = arith.truncf %14 : vector<168x128xf32> to vector<168x128xbf16>
    %c0_8 = arith.constant 0 : index
    %c0_9 = arith.constant 0 : index
    %16 = vector.load %arg4[%c0_8, %c0_9] : memref<168x128xbf16, #tpu.memory_space<vmem>>, vector<168x128xbf16>
    tpu.vector_store %arg4[%c0_8, %c0_9], %15 {strides = array<i32>} : memref<168x128xbf16, #tpu.memory_space<vmem>>, vector<168x128xbf16>,
    return
  }
  func.func @transform_0(%arg0: i32) -> (i32, i32) {
    %c0_i32 = arith.constant 0 : i32
    %c0_i32_0 = arith.constant 0 : i32
    return %arg0, %c0_i32 : i32, i32
  }
  func.func @transform_1(%arg0: i32) -> (i32, i32) {
    %c0_i32 = arith.constant 0 : i32
    %c0_i32_0 = arith.constant 0 : i32
    %c0_i32_1 = arith.constant 0 : i32
    return %c0_i32, %c0_i32_0 : i32, i32
  }
  func.func @transform_2(%arg0: i32) -> (i32, i32) {
    %c0_i32 = arith.constant 0 : i32
    %c0_i32_0 = arith.constant 0 : i32
    %c0_i32_1 = arith.constant 0 : i32
    return %c0_i32, %c0_i32_0 : i32, i32
  }
  func.func @transform_3(%arg0: i32) -> (i32, i32) {
    %c0_i32 = arith.constant 0 : i32
    %c0_i32_0 = arith.constant 0 : i32
    return %arg0, %c0_i32 : i32, i32
  }
}

module attributes {stable_mosaic.version = 11 : i64} {
  func.func @_linear_kernel(%arg0: i32, %arg1: memref<104x640xbf16, #tpu.memory_space<vmem>>, %arg2: memref<640x128xbf16, #tpu.memory_space<vmem>>, %arg3: memref<1x128xf32, #tpu.memory_space<vmem>>, %arg4: memref<104x128xbf16, #tpu.memory_space<vmem>>) attributes {dimension_semantics = [#tpu.dimension_semantics<parallel>], iteration_bounds = array<i64: 1>, scalar_prefetch = 0 : i64, scratch_operands = 0 : i64, tpu.core_type = #tpu.core_type<tc>, window_params = [{transform_indices = @transform_0, window_bounds = array<i64: 104, 640>}, {pipeline_mode = #tpu.pipeline_mode<synchronous>, transform_indices = @transform_1, window_bounds = array<i64: 640, 128>}, {pipeline_mode = #tpu.pipeline_mode<synchronous>, transform_indices = @transform_2, window_bounds = array<i64: 1, 128>}, {transform_indices = @transform_3, window_bounds = array<i64: 104, 128>}]} {
    %c0 = arith.constant 0 : index
    %c0_0 = arith.constant 0 : index
    %0 = vector.load %arg1[%c0, %c0_0] : memref<104x640xbf16, #tpu.memory_space<vmem>>, vector<104x640xbf16>
    %c0_1 = arith.constant 0 : index
    %c0_2 = arith.constant 0 : index
    %1 = vector.load %arg2[%c0_1, %c0_2] : memref<640x128xbf16, #tpu.memory_space<vmem>>, vector<640x128xbf16>
    %cst = arith.constant dense<0.000000e+00> : vector<104x128xf32>
    %2 = tpu.matmul %0, %1, %cst {dimension_numbers = #tpu.dot_dimension_numbers<[1], [0], [0], [1], [0, 0, 1, 1], [], []>} : vector<104x640xbf16>, vector<640x128xbf16>, vector<104x128xf32> -> vector<104x128xf32>
    %c0_3 = arith.constant 0 : index
    %c0_4 = arith.constant 0 : index
    %3 = vector.load %arg3[%c0_3, %c0_4] : memref<1x128xf32, #tpu.memory_space<vmem>>, vector<1x128xf32>
    %4 = vector.broadcast %3 : vector<1x128xf32> to vector<104x128xf32>
    %5 = arith.addf %2, %4 : vector<104x128xf32>
    %cst_5 = arith.constant 2.000000e+01 : f32
    %6 = vector.broadcast %cst_5 : f32 to vector<104x128xf32>
    %7 = arith.cmpf ogt, %5, %6 : vector<104x128xf32>
    %cst_6 = arith.constant 0.000000e+00 : f32
    %8 = vector.broadcast %cst_6 : f32 to vector<104x128xf32>
    %9 = arith.select %7, %8, %5 : vector<104x128xi1>, vector<104x128xf32>
    %cst_7 = arith.constant 2.000000e+01 : f32
    %10 = vector.broadcast %cst_7 : f32 to vector<104x128xf32>
    %11 = arith.cmpf ogt, %5, %10 : vector<104x128xf32>
    %12 = math.exp %9 : vector<104x128xf32>
    %13 = math.log1p %12 : vector<104x128xf32>
    %14 = arith.select %11, %5, %13 : vector<104x128xi1>, vector<104x128xf32>
    %15 = arith.truncf %14 : vector<104x128xf32> to vector<104x128xbf16>
    %c0_8 = arith.constant 0 : index
    %c0_9 = arith.constant 0 : index
    %16 = vector.load %arg4[%c0_8, %c0_9] : memref<104x128xbf16, #tpu.memory_space<vmem>>, vector<104x128xbf16>
    tpu.vector_store %arg4[%c0_8, %c0_9], %15 {strides = array<i32>} : memref<104x128xbf16, #tpu.memory_space<vmem>>, vector<104x128xbf16>,
    return
  }
  func.func @transform_0(%arg0: i32) -> (i32, i32) {
    %c0_i32 = arith.constant 0 : i32
    %c0_i32_0 = arith.constant 0 : i32
    return %arg0, %c0_i32 : i32, i32
  }
  func.func @transform_1(%arg0: i32) -> (i32, i32) {
    %c0_i32 = arith.constant 0 : i32
    %c0_i32_0 = arith.constant 0 : i32
    %c0_i32_1 = arith.constant 0 : i32
    return %c0_i32, %c0_i32_0 : i32, i32
  }
  func.func @transform_2(%arg0: i32) -> (i32, i32) {
    %c0_i32 = arith.constant 0 : i32
    %c0_i32_0 = arith.constant 0 : i32
    %c0_i32_1 = arith.constant 0 : i32
    return %c0_i32, %c0_i32_0 : i32, i32
  }
  func.func @transform_3(%arg0: i32) -> (i32, i32) {
    %c0_i32 = arith.constant 0 : i32
    %c0_i32_0 = arith.constant 0 : i32
    return %arg0, %c0_i32 : i32, i32
  }
}

module attributes {stable_mosaic.version = 11 : i64} {
  func.func @_fused_classifier_kernel(%arg0: i32, %arg1: memref<8x3200xbf16, #tpu.memory_space<vmem>>, %arg2: memref<3200x512xbf16, #tpu.memory_space<vmem>>, %arg3: memref<1x512xf32, #tpu.memory_space<vmem>>, %arg4: memref<512x128xbf16, #tpu.memory_space<vmem>>, %arg5: memref<1x128xf32, #tpu.memory_space<vmem>>, %arg6: memref<8x128xf32, #tpu.memory_space<vmem>>) attributes {dimension_semantics = [#tpu.dimension_semantics<parallel>], iteration_bounds = array<i64: 1>, scalar_prefetch = 0 : i64, scratch_operands = 0 : i64, tpu.core_type = #tpu.core_type<tc>, window_params = [{transform_indices = @transform_0, window_bounds = array<i64: 8, 3200>}, {pipeline_mode = #tpu.pipeline_mode<synchronous>, transform_indices = @transform_1, window_bounds = array<i64: 3200, 512>}, {pipeline_mode = #tpu.pipeline_mode<synchronous>, transform_indices = @transform_2, window_bounds = array<i64: 1, 512>}, {pipeline_mode = #tpu.pipeline_mode<synchronous>, transform_indices = @transform_3, window_bounds = array<i64: 512, 128>}, {pipeline_mode = #tpu.pipeline_mode<synchronous>, transform_indices = @transform_4, window_bounds = array<i64: 1, 128>}, {transform_indices = @transform_5, window_bounds = array<i64: 8, 128>}]} {
    %c0 = arith.constant 0 : index
    %c0_0 = arith.constant 0 : index
    %0 = vector.load %arg1[%c0, %c0_0] : memref<8x3200xbf16, #tpu.memory_space<vmem>>, vector<8x3200xbf16>
    %c0_1 = arith.constant 0 : index
    %c0_2 = arith.constant 0 : index
    %1 = vector.load %arg2[%c0_1, %c0_2] : memref<3200x512xbf16, #tpu.memory_space<vmem>>, vector<3200x512xbf16>
    %cst = arith.constant dense<0.000000e+00> : vector<8x512xf32>
    %2 = tpu.matmul %0, %1, %cst {dimension_numbers = #tpu.dot_dimension_numbers<[1], [0], [0], [1], [0, 0, 1, 1], [], []>} : vector<8x3200xbf16>, vector<3200x512xbf16>, vector<8x512xf32> -> vector<8x512xf32>
    %c0_3 = arith.constant 0 : index
    %c0_4 = arith.constant 0 : index
    %3 = vector.load %arg3[%c0_3, %c0_4] : memref<1x512xf32, #tpu.memory_space<vmem>>, vector<1x512xf32>
    %4 = vector.broadcast %3 : vector<1x512xf32> to vector<8x512xf32>
    %5 = arith.addf %2, %4 : vector<8x512xf32>
    %cst_5 = arith.constant 2.000000e+01 : f32
    %6 = vector.broadcast %cst_5 : f32 to vector<8x512xf32>
    %7 = arith.cmpf ogt, %5, %6 : vector<8x512xf32>
    %cst_6 = arith.constant 0.000000e+00 : f32
    %8 = vector.broadcast %cst_6 : f32 to vector<8x512xf32>
    %9 = arith.select %7, %8, %5 : vector<8x512xi1>, vector<8x512xf32>
    %cst_7 = arith.constant 2.000000e+01 : f32
    %10 = vector.broadcast %cst_7 : f32 to vector<8x512xf32>
    %11 = arith.cmpf ogt, %5, %10 : vector<8x512xf32>
    %12 = math.exp %9 : vector<8x512xf32>
    %13 = math.log1p %12 : vector<8x512xf32>
    %14 = arith.select %11, %5, %13 : vector<8x512xi1>, vector<8x512xf32>
    %15 = arith.truncf %14 : vector<8x512xf32> to vector<8x512xbf16>
    %c0_8 = arith.constant 0 : index
    %c0_9 = arith.constant 0 : index
    %16 = vector.load %arg4[%c0_8, %c0_9] : memref<512x128xbf16, #tpu.memory_space<vmem>>, vector<512x128xbf16>
    %cst_10 = arith.constant dense<0.000000e+00> : vector<8x128xf32>
    %17 = tpu.matmul %15, %16, %cst_10 {dimension_numbers = #tpu.dot_dimension_numbers<[1], [0], [0], [1], [0, 0, 1, 1], [], []>} : vector<8x512xbf16>, vector<512x128xbf16>, vector<8x128xf32> -> vector<8x128xf32>
    %c0_11 = arith.constant 0 : index
    %c0_12 = arith.constant 0 : index
    %18 = vector.load %arg5[%c0_11, %c0_12] : memref<1x128xf32, #tpu.memory_space<vmem>>, vector<1x128xf32>
    %19 = vector.broadcast %18 : vector<1x128xf32> to vector<8x128xf32>
    %20 = arith.addf %17, %19 : vector<8x128xf32>
    %c0_13 = arith.constant 0 : index
    %c0_14 = arith.constant 0 : index
    %21 = vector.load %arg6[%c0_13, %c0_14] : memref<8x128xf32, #tpu.memory_space<vmem>>, vector<8x128xf32>
    tpu.vector_store %arg6[%c0_13, %c0_14], %20 {strides = array<i32>} : memref<8x128xf32, #tpu.memory_space<vmem>>, vector<8x128xf32>,
    return
  }
  func.func @transform_0(%arg0: i32) -> (i32, i32) {
    %c0_i32 = arith.constant 0 : i32
    %c0_i32_0 = arith.constant 0 : i32
    return %arg0, %c0_i32 : i32, i32
  }
  func.func @transform_1(%arg0: i32) -> (i32, i32) {
    %c0_i32 = arith.constant 0 : i32
    %c0_i32_0 = arith.constant 0 : i32
    %c0_i32_1 = arith.constant 0 : i32
    return %c0_i32, %c0_i32_0 : i32, i32
  }
  func.func @transform_2(%arg0: i32) -> (i32, i32) {
    %c0_i32 = arith.constant 0 : i32
    %c0_i32_0 = arith.constant 0 : i32
    %c0_i32_1 = arith.constant 0 : i32
    return %c0_i32, %c0_i32_0 : i32, i32
  }
  func.func @transform_3(%arg0: i32) -> (i32, i32) {
    %c0_i32 = arith.constant 0 : i32
    %c0_i32_0 = arith.constant 0 : i32
    %c0_i32_1 = arith.constant 0 : i32
    return %c0_i32, %c0_i32_0 : i32, i32
  }
  func.func @transform_4(%arg0: i32) -> (i32, i32) {
    %c0_i32 = arith.constant 0 : i32
    %c0_i32_0 = arith.constant 0 : i32
    %c0_i32_1 = arith.constant 0 : i32
    return %c0_i32, %c0_i32_0 : i32, i32
  }
  func.func @transform_5(%arg0: i32) -> (i32, i32) {
    %c0_i32 = arith.constant 0 : i32
    %c0_i32_0 = arith.constant 0 : i32
    return %arg0, %c0_i32 : i32, i32
  }
}

</mosaic_0001>

<bundles_post_ra>
// kernel: dqn_forward.4
= control target key start
LH: loop header
LB: loop body
LE: loop exit
PB: predicated region body
PF: predicated region fallthrough
CT: control target
= control target key end

     0   :  { %s1908_s12 = smov 0   ;;  %s2654_s0 = inlined_call_operand.vmem [shape: bf16[1024,256], index: 0, kind: input, shape index: {}]   ;;  %s2655_s1 = inlined_call_operand.vmem [shape: bf16[256,128], index: 1, kind: input, shape index: {}]   ;;  %s2656_s2 = inlined_call_operand.vmem [shape: f32[1,128], index: 2, kind: input, shape index: {}]   ;;  %s2657_s3 = inlined_call_operand.vmem [shape: bf16[1024,128], index: 3, kind: output, shape index: {}]  }
   0x1 LB: > { %s1330_s13 = sadd.s32 4294967295, %s1886_s12   ;;  %p1334_p0 = scmp.ge.s32.totalorder %s1886_s12, 1  ;;  %s1886_s12 = sphi %s1908_s12, %s13_s12  }
   0x2   : > { %p139_p1 = scmp.lt.s32.totalorder %s1886_s12, 5 }
   0x4   : > { %p140_p2 = pnand %p1334_p0, %p139_p1 }
   0x5   : > { %s1335_s16 = sshll.u32 (!%p140_p2), %s1330_s13, 5 }
   0x6   : > { %143 = sbr.rel (%p140_p2) target bundleno = 395 (0x18b), region = 32  ;;  %p165_p3 = scmp.lt.s32.totalorder (!%p140_p2), %s1335_s16, 127 }
   0xb   : > { %v1687_v0 = vld [vmem:[%s2655_s1 + $0x78] sm:$0xff]   ;;  %v1689_v2 = vld [vmem:[%s2655_s1 + $0x70] sm:$0xff]   ;;  %v1691_v4 = vld [vmem:[%s2655_s1 + $0x68] sm:$0xff]   ;;  %s2699_s16 = smov (!%p165_p3, %s1335_s16), 127 }
   0xc   : > { %v1688_v1 = vld [vmem:[%s2655_s1 + $0x38] sm:$0xff]   ;;  %1551 = vmatprep.subr.bf16.mxu0 %v1687_v0  ;;  %1663 = vmatprep.subr.bf16.mxu1 %v1687_v0  ;;  %v1690_v3 = vld [vmem:[%s2655_s1 + $0x30] sm:$0xff]   ;;  %v1692_v5 = vld [vmem:[%s2655_s1 + $0x28] sm:$0xff]   ;;  %s1423_s4 = sshll.u32 %s2699_s16, 3  ;;  %s1339_s28 = sshll.u32 %s2699_s16, 2 }
   0xd   : > { %1552 = vmatpush3.bf16.msra.mxu0 %v1688_v1  ;;  %1671 = vmatpush3.bf16.msra.mxu1 %v1688_v1  ;;  %v1693_v6 = vld [vmem:[%s2655_s1 + $0x60] sm:$0xff]   ;;  %v1695_v8 = vld [vmem:[%s2655_s1 + $0x58] sm:$0xff]   ;;  %s1949_s9 = scalar_lea.vmem %s2654_s0, %s1423_s4  ;;  %v1697_v10 = vld [vmem:[%s2655_s1 + $0x50] sm:$0xff]   ;;  %s2170_s30 = scalar_lea.vmem %s2657_s3, %s1339_s28 }
   0xe   : > { %1553 = vmatprep.subr.bf16.mxu0 %v1689_v2  ;;  %1664 = vmatprep.subr.bf16.mxu1 %v1689_v2  ;;  %v1694_v7 = vld [vmem:[%s2655_s1 + $0x20] sm:$0xff]   ;;  %v1696_v9 = vld [vmem:[%s2655_s1 + $0x18] sm:$0xff]   ;;  %v1698_v13 = vld [vmem:[%s2655_s1 + $0x10] sm:$0xff]  }
   0xf   : > { %v1705_v11 = vld [vmem:[%s1949_s9 + $0x4] ss:$8 sps:$4 sm:$0xff]   ;;  %v1703_v18 = vld [vmem:[%s1949_s9] ss:$8 sps:$4 sm:$0xff]   ;;  %v1709_v20 = vld [vmem:[%s1949_s9 + $0x14] ss:$8 sps:$4 sm:$0xff]  }
  0x10   : > { %v1708_v12 = vld [vmem:[%s1949_s9 + $0x84] ss:$8 sps:$4 sm:$0xff]   ;;  %537 = vmatprep.mubr.bf16.mxu0 %v1705_v11  ;;  %v1706_v19 = vld [vmem:[%s1949_s9 + $0x80] ss:$8 sps:$4 sm:$0xff]   ;;  %v1711_v21 = vld [vmem:[%s1949_s9 + $0x94] ss:$8 sps:$4 sm:$0xff]  }
  0x11   : > { %1554 = vmatpush3.bf16.msra.mxu0 %v1690_v3  ;;  %1672 = vmatpush3.bf16.msra.mxu1 %v1690_v3  ;;  %v1699_v14 = vld [vmem:[%s2655_s1 + $0x48] sm:$0xff]   ;;  %v1701_v16 = vld [vmem:[%s2655_s1 + $0x40] sm:$0xff]   ;;  %v1713_v22 = vld [vmem:[%s1949_s9 + $0x10] ss:$8 sps:$4 sm:$0xff]  }
  0x12   : > { %1555 = vmatprep.subr.bf16.mxu0 %v1691_v4  ;;  %1665 = vmatprep.subr.bf16.mxu1 %v1691_v4  ;;  %v1700_v15 = vld [vmem:[%s2655_s1 + $0x8] sm:$0xff]   ;;  %v1702_v17 = vld [vmem:[%s2655_s1] sm:$0xff]   ;;  %v1714_v23 = vld [vmem:[%s1949_s9 + $0x90] ss:$8 sps:$4 sm:$0xff]  }
  0x13   : > { %601 = vmatprep.mubr.bf16.mxu1 %v1708_v12  ;;  %v1715_v24 = vld [vmem:[%s1949_s9 + $0x24] ss:$8 sps:$4 sm:$0xff]   ;;  %v1719_v26 = vld [vmem:[%s1949_s9 + $0x20] ss:$8 sps:$4 sm:$0xff]   ;;  %v1721_v28 = vld [vmem:[%s1949_s9 + $0x34] ss:$8 sps:$4 sm:$0xff]  }
  0x14   : > { %v1717_v25 = vld [vmem:[%s1949_s9 + $0xa4] ss:$8 sps:$4 sm:$0xff]   ;;  %v1720_v27 = vld [vmem:[%s1949_s9 + $0xa0] ss:$8 sps:$4 sm:$0xff]   ;;  %v1723_v29 = vld [vmem:[%s1949_s9 + $0xb4] ss:$8 sps:$4 sm:$0xff]  }
  0x15   : > { %1556 = vmatpush3.bf16.msra.mxu0 %v1692_v5  ;;  %1673 = vmatpush3.bf16.msra.mxu1 %v1692_v5  ;;  %v1725_v30 = vld [vmem:[%s1949_s9 + $0x30] ss:$8 sps:$4 sm:$0xff]   ;;  %v1727_v32 = vld [vmem:[%s1949_s9 + $0x44] ss:$8 sps:$4 sm:$0xff]   ;;  %v1731_v34 = vld [vmem:[%s1949_s9 + $0x40] ss:$8 sps:$4 sm:$0xff]  }
  0x16   : > { %1557 = vmatprep.subr.bf16.mxu0 %v1693_v6  ;;  %1666 = vmatprep.subr.bf16.mxu1 %v1693_v6  ;;  %v1726_v31 = vld [vmem:[%s1949_s9 + $0xb0] ss:$8 sps:$4 sm:$0xff]   ;;  %v1729_v33 = vld [vmem:[%s1949_s9 + $0xc4] ss:$8 sps:$4 sm:$0xff]   ;;  %v1732_v35 = vld [vmem:[%s1949_s9 + $0xc0] ss:$8 sps:$4 sm:$0xff]  }
  0x17   : > { %v1733_v36 = vld [vmem:[%s1949_s9 + $0x54] ss:$8 sps:$4 sm:$0xff]   ;;  %v1737_v38 = vld [vmem:[%s1949_s9 + $0x50] ss:$8 sps:$4 sm:$0xff]   ;;  %v1739_v40 = vld [vmem:[%s1949_s9 + $0x64] ss:$8 sps:$4 sm:$0xff]  }
  0x18   : > { %v1735_v37 = vld [vmem:[%s1949_s9 + $0xd4] ss:$8 sps:$4 sm:$0xff]   ;;  %v1738_v39 = vld [vmem:[%s1949_s9 + $0xd0] ss:$8 sps:$4 sm:$0xff]   ;;  %v1741_v41 = vld [vmem:[%s1949_s9 + $0xe4] ss:$8 sps:$4 sm:$0xff]  }
  0x19   : > { %1558 = vmatpush3.bf16.msra.mxu0 %v1694_v7  ;;  %1674 = vmatpush3.bf16.msra.mxu1 %v1694_v7  ;;  %v1743_v42 = vld [vmem:[%s1949_s9 + $0x60] ss:$8 sps:$4 sm:$0xff]   ;;  %v1745_v44 = vld [vmem:[%s1949_s9 + $0x74] ss:$8 sps:$4 sm:$0xff]   ;;  %v1749_v46 = vld [vmem:[%s1949_s9 + $0x70] ss:$8 sps:$4 sm:$0xff]  }
  0x1a   : > { %1559 = vmatprep.subr.bf16.mxu0 %v1695_v8  ;;  %1667 = vmatprep.subr.bf16.mxu1 %v1695_v8  ;;  %v1744_v43 = vld [vmem:[%s1949_s9 + $0xe0] ss:$8 sps:$4 sm:$0xff]   ;;  %v1747_v45 = vld [vmem:[%s1949_s9 + $0xf4] ss:$8 sps:$4 sm:$0xff]   ;;  %v1750_v47 = vld [vmem:[%s1949_s9 + $0xf0] ss:$8 sps:$4 sm:$0xff]  }
  0x1b   : > { %v2007_v50 = vld [vmem:[%s2656_s2] ss:$0 sm:$0xff] }
  0x1d   : > { %1560 = vmatpush3.bf16.msra.mxu0 %v1696_v9  ;;  %1675 = vmatpush3.bf16.msra.mxu1 %v1696_v9 }
  0x1e   : > { %1561 = vmatprep.subr.bf16.mxu0 %v1697_v10  ;;  %1668 = vmatprep.subr.bf16.mxu1 %v1697_v10 }
  0x21   : > { %1562 = vmatpush3.bf16.msra.mxu0 %v1698_v13  ;;  %1676 = vmatpush3.bf16.msra.mxu1 %v1698_v13 }
  0x22   : > { %1563 = vmatprep.subr.bf16.mxu0 %v1699_v14  ;;  %1669 = vmatprep.subr.bf16.mxu1 %v1699_v14 }
  0x25   : > { %1564 = vmatpush3.bf16.msra.mxu0 %v1700_v15  ;;  %1677 = vmatpush3.bf16.msra.mxu1 %v1700_v15 }
  0x26   : > { %1565 = vmatprep.subr.bf16.mxu0 %v1701_v16  ;;  %1670 = vmatprep.subr.bf16.mxu1 %v1701_v16 }
  0x29   : > { %1566 = vmatpush3.bf16.msra.mxu0 %v1702_v17  ;;  %1678 = vmatpush3.bf16.msra.mxu1 %v1702_v17 }
  0x2c   : > { %538 = vmatmul.mubr.bf16.vlgmr.msra.gmra.mxu0 %v1703_v18  ;;  %602 = vmatmul.mubr.bf16.vlgmr.msra.gmra.mxu1 %v1706_v19 }
  0x2d   : > { %545 = vmatprep.mubr.bf16.mxu0 %v1709_v20  ;;  %609 = vmatprep.mubr.bf16.mxu1 %v1711_v21 }
  0x34   : > { %546 = vmatmul.mubr.bf16.gmra.mxu0 %v1713_v22  ;;  %610 = vmatmul.mubr.bf16.gmra.mxu1 %v1714_v23 }
  0x35   : > { %553 = vmatprep.mubr.bf16.mxu0 %v1715_v24  ;;  %617 = vmatprep.mubr.bf16.mxu1 %v1717_v25 }
  0x3c   : > { %554 = vmatmul.mubr.bf16.gmra.mxu0 %v1719_v26  ;;  %618 = vmatmul.mubr.bf16.gmra.mxu1 %v1720_v27 }
  0x3d   : > { %561 = vmatprep.mubr.bf16.mxu0 %v1721_v28  ;;  %625 = vmatprep.mubr.bf16.mxu1 %v1723_v29 }
  0x44   : > { %562 = vmatmul.mubr.bf16.gmra.mxu0 %v1725_v30  ;;  %626 = vmatmul.mubr.bf16.gmra.mxu1 %v1726_v31 }
  0x45   : > { %569 = vmatprep.mubr.bf16.mxu0 %v1727_v32  ;;  %633 = vmatprep.mubr.bf16.mxu1 %v1729_v33 }
  0x4c   : > { %570 = vmatmul.mubr.bf16.gmra.mxu0 %v1731_v34  ;;  %634 = vmatmul.mubr.bf16.gmra.mxu1 %v1732_v35 }
  0x4d   : > { %577 = vmatprep.mubr.bf16.mxu0 %v1733_v36  ;;  %641 = vmatprep.mubr.bf16.mxu1 %v1735_v37 }
  0x54   : > { %578 = vmatmul.mubr.bf16.gmra.mxu0 %v1737_v38  ;;  %642 = vmatmul.mubr.bf16.gmra.mxu1 %v1738_v39 }
  0x55   : > { %585 = vmatprep.mubr.bf16.mxu0 %v1739_v40  ;;  %649 = vmatprep.mubr.bf16.mxu1 %v1741_v41 }
  0x5c   : > { %586 = vmatmul.mubr.bf16.gmra.mxu0 %v1743_v42  ;;  %650 = vmatmul.mubr.bf16.gmra.mxu1 %v1744_v43 }
  0x5d   : > { %593 = vmatprep.mubr.bf16.mxu0 %v1745_v44  ;;  %657 = vmatprep.mubr.bf16.mxu1 %v1747_v45 }
  0x64   : > { %594 = vmatmul.mubr.bf16.gmra.mxu0 %v1749_v46  ;;  %658 = vmatmul.mubr.bf16.gmra.mxu1 %v1750_v47 }
  0xec   : > { %v1567_v48 = vpop.f32.mrf.mxu0  ;;  %v1615_v49 = vpop.f32.mrf.mxu1 }
  0xee   : > { %v1568_v51 = vpop.f32.mrf.mxu0  ;;  %v1616_v52 = vpop.f32.mrf.mxu1 }
  0xef   : > { %v1569_v53 = vadd.f32 %v1568_v51, %v1567_v48  ;;  %v1617_v54 = vadd.f32 %v1616_v52, %v1615_v49 }
  0xf0   : > { %v1570_v55 = vpop.f32.mrf.mxu0  ;;  %v1618_v56 = vpop.f32.mrf.mxu1 }
  0xf1   : > { %v2010_v57 = vadd.f32 %v1569_v53, %v2007_v50  ;;  %v2013_v58 = vadd.f32 %v1617_v54, %v2007_v50 }
  0xf2   : > { %v1571_v59 = vpop.f32.mrf.mxu0  ;;  %v1619_v60 = vpop.f32.mrf.mxu1 }
  0xf3   : > { %vm666_vm0 = vcmp.gt.f32.partialorder %v2010_v57, 20.0  ;;  %vm682_vm1 = vcmp.gt.f32.partialorder %v2013_v58, 20.0  ;;  %v1572_v61 = vadd.f32 %v1571_v59, %v1570_v55  ;;  %v1620_v62 = vadd.f32 %v1619_v60, %v1618_v56 }
  0xf4   : > { %v698_v63 = vsel %vm666_vm0, 0.0, %v2010_v57  ;;  %v714_v0 = vsel %vm682_vm1, 0.0, %v2013_v58  ;;  %v1573_v1 = vpop.f32.mrf.mxu0  ;;  %v1621_v2 = vpop.f32.mrf.mxu1 }
  0xf5   : > { %v730_v3 = vmul.f32 1.442695, %v698_v63  ;;  %v762_v4 = vmul.f32 1.442695, %v714_v0  ;;  %v2024_v5 = vadd.f32 %v1572_v61, %v2007_v50  ;;  %v2027_v6 = vadd.f32 %v1620_v62, %v2007_v50 }
  0xf6   : > { %v1574_v7 = vpop.f32.mrf.mxu0  ;;  %v1622_v8 = vpop.f32.mrf.mxu1 }
  0xf7   : > { %1751 = vpow2.f32 %v730_v3  ;;  %vm667_vm2 = vcmp.gt.f32.partialorder %v2024_v5, 20.0  ;;  %vm683_vm3 = vcmp.gt.f32.partialorder %v2027_v6, 20.0  ;;  %v1575_v9 = vadd.f32 %v1574_v7, %v1573_v1 }
  0xf8   : > { %1753 = vpow2.f32 %v762_v4  ;;  %v699_v10 = vsel %vm667_vm2, 0.0, %v2024_v5  ;;  %v715_v11 = vsel %vm683_vm3, 0.0, %v2027_v6  ;;  %v1623_v12 = vadd.f32 %v1622_v8, %v1621_v2  ;;  %v1576_v13 = vpop.f32.mrf.mxu0  ;;  %v1624_v14 = vpop.f32.mrf.mxu1 }
  0xf9   : > { %v732_v15 = vmul.f32 1.442695, %v699_v10  ;;  %v764_v16 = vmul.f32 1.442695, %v715_v11  ;;  %v2038_v17 = vadd.f32 %v1575_v9, %v2007_v50 }
  0xfa   : > { %v2041_v18 = vadd.f32 %v1623_v12, %v2007_v50  ;;  %v1577_v19 = vpop.f32.mrf.mxu0  ;;  %v1625_v20 = vpop.f32.mrf.mxu1 }
  0xfb   : > { %1755 = vpow2.f32 %v732_v15  ;;  %vm668_vm4 = vcmp.gt.f32.partialorder %v2038_v17, 20.0  ;;  %v1578_v21 = vadd.f32 %v1577_v19, %v1576_v13  ;;  %v1626_v22 = vadd.f32 %v1625_v20, %v1624_v14 }
  0xfc   : > { %1757 = vpow2.f32 %v764_v16  ;;  %v700_v23 = vsel %vm668_vm4, 0.0, %v2038_v17  ;;  %vm684_vm5 = vcmp.gt.f32.partialorder %v2041_v18, 20.0  ;;  %v1579_v24 = vpop.f32.mrf.mxu0  ;;  %v1627_v25 = vpop.f32.mrf.mxu1 }
  0xfd   : > { %v734_v26 = vmul.f32 1.442695, %v700_v23  ;;  %v716_v27 = vsel %vm684_vm5, 0.0, %v2041_v18  ;;  %v2052_v28 = vadd.f32 %v1578_v21, %v2007_v50  ;;  %v2055_v29 = vadd.f32 %v1626_v22, %v2007_v50 }
  0xfe   : > { %v766_v30 = vmul.f32 1.442695, %v716_v27  ;;  %v1580_v31 = vpop.f32.mrf.mxu0  ;;  %v1628_v32 = vpop.f32.mrf.mxu1 }
  0xff   : > { %1759 = vpow2.f32 %v734_v26  ;;  %vm669_vm6 = vcmp.gt.f32.partialorder %v2052_v28, 20.0  ;;  %vm685_vm7 = vcmp.gt.f32.partialorder %v2055_v29, 20.0  ;;  %v1581_v33 = vadd.f32 %v1580_v31, %v1579_v24 }
 0x100   : > { %1761 = vpow2.f32 %v766_v30  ;;  %v701_v34 = vsel %vm669_vm6, 0.0, %v2052_v28  ;;  %v717_v35 = vsel %vm685_vm7, 0.0, %v2055_v29  ;;  %v1629_v36 = vadd.f32 %v1628_v32, %v1627_v25  ;;  %v1582_v37 = vpop.f32.mrf.mxu0  ;;  %v1630_v43 = vpop.f32.mrf.mxu1 }
 0x101   : > { %v736_v38 = vmul.f32 1.442695, %v701_v34  ;;  %v768_v39 = vmul.f32 1.442695, %v717_v35  ;;  %v2066_v40 = vadd.f32 %v1581_v33, %v2007_v50 }
 0x102   : > { %v2069_v41 = vadd.f32 %v1629_v36, %v2007_v50  ;;  %v1583_v42 = vpop.f32.mrf.mxu0  ;;  %v1631_v51 = vpop.f32.mrf.mxu1 }
 0x103   : > { %1763 = vpow2.f32 %v736_v38  ;;  %v1584_v45 = vadd.f32 %v1583_v42, %v1582_v37  ;;  %vm670_vm8 = vcmp.gt.f32.partialorder %v2066_v40, 20.0  ;;  %v1632_v2 = vadd.f32 %v1631_v51, %v1630_v43 }
 0x104   : > { %v1752_v44 = vpop.eup %1751  ;;  %1765 = vpow2.f32 %v768_v39  ;;  %vm686_vm9 = vcmp.gt.f32.partialorder %v2069_v41, 20.0  ;;  %v702_v54 = vsel %vm670_vm8, 0.0, %v2066_v40  ;;  %v2079_v56 = vpop.f32.mrf.mxu0 }
 0x105   : > { %v1754_v46 = vpop.eup %1753  ;;  %v794_v47 = vadd.f32 1.0, %v1752_v44  ;;  %v797_v49 = vmul.f32 -0.5, %v1752_v44  ;;  %v2077_v55 = vadd.f32 %v1584_v45, %v2007_v50  ;;  %v718_v62 = vsel %vm686_vm9, 0.0, %v2069_v41  ;;  %v1633_v8 = vpop.f32.mrf.mxu1 }
 0x106   : > { %v938_v48 = vadd.f32 1.0, %v1754_v46  ;;  %v941_v53 = vmul.f32 -0.5, %v1754_v46  ;;  %v800_v63 = vand.u32 2147483647, %v1752_v44  ;;  %v944_v4 = vand.u32 2147483647, %v1754_v46  ;;  %v1586_v12 = vpop.f32.mrf.mxu0 }
 0x107   : > { %1767 = vlog2.f32 %v794_v47  ;;  %v798_v3 = vadd.f32 1.0, %v797_v49  ;;  %v738_v7 = vmul.f32 1.442695, %v702_v54  ;;  %v770_v11 = vmul.f32 1.442695, %v718_v62  ;;  %v1634_v30 = vpop.f32.mrf.mxu1 }
 0x108   : > { %v1756_v52 = vpop.eup %1755  ;;  %1769 = vlog2.f32 %v938_v48  ;;  %v942_v10 = vadd.f32 1.0, %v941_v53  ;;  %vm671_vm10 = vcmp.gt.f32.partialorder %v2077_v55, 20.0  ;;  %vm2091_vm11 = vcmp.lt.f32.partialorder %v800_v63, 0.0004427343  ;;  %v1588_v35 = vpop.f32.mrf.mxu0 }
 0x109   : > { %v1758_v59 = vpop.eup %1757  ;;  %v803_v60 = vadd.f32 1.0, %v1756_v52  ;;  %v806_v61 = vmul.f32 -0.5, %v1756_v52  ;;  %v809_v21 = vand.u32 2147483647, %v1756_v52  ;;  %vm2096_vm12 = vcmp.lt.f32.partialorder %v944_v4, 0.0004427343 }
 0x10a   : > { %v947_v0 = vadd.f32 1.0, %v1758_v59  ;;  %v950_v1 = vmul.f32 -0.5, %v1758_v59  ;;  %v953_v22 = vand.u32 2147483647, %v1758_v59  ;;  %v703_v27 = vsel %vm671_vm10, 0.0, %v2077_v55 }
 0x10b   : > { %1771 = vlog2.f32 %v803_v60  ;;  %v807_v14 = vadd.f32 1.0, %v806_v61  ;;  %v799_v32 = vmul.f32 %v1752_v44, %v798_v3  ;;  %v943_v33 = vmul.f32 %v1754_v46, %v942_v10  ;;  %v1589_v61 = vpop.f32.mrf.mxu0 }
 0x10c   : > { %v2084_v9 = vpop.eup %1759  ;;  %1773 = vlog2.f32 %v947_v0  ;;  %v951_v15 = vadd.f32 1.0, %v950_v1  ;;  %v2107_v34 = vadd.f32 %v1632_v2, %v2007_v50  ;;  %vm2115_vm13 = vcmp.lt.f32.partialorder %v809_v21, 0.0004427343 }
 0x10d   : > { %v2087_v13 = vpop.eup %1761  ;;  %v812_v16 = vadd.f32 1.0, %v2084_v9  ;;  %v815_v19 = vmul.f32 -0.5, %v2084_v9  ;;  %v808_v37 = vmul.f32 %v1756_v52, %v807_v14  ;;  %v818_v39 = vand.u32 2147483647, %v2084_v9  ;;  %v1636_v52 = vpop.f32.mrf.mxu1 }
 0x10e   : > { %v956_v23 = vadd.f32 1.0, %v2087_v13  ;;  %v959_v26 = vmul.f32 -0.5, %v2087_v13  ;;  %v2111_v38 = vmul.f32 %v1758_v59, %v951_v15  ;;  %v962_v44 = vand.u32 2147483647, %v2087_v13 }
 0x10f   : > { %1775 = vlog2.f32 %v812_v16  ;;  %v816_v25 = vadd.f32 1.0, %v815_v19  ;;  %v740_v47 = vmul.f32 1.442695, %v703_v27  ;;  %vm2122_vm14 = vcmp.lt.f32.partialorder %v953_v22, 0.0004427343  ;;  %v1637_v16 = vpop.f32.mrf.mxu1 }
 0x110   : > { %v2104_v31 = vpop.eup %1763  ;;  %1777 = vlog2.f32 %v956_v23  ;;  %v2129_v51 = vadd.f32 1.0, %v959_v26  ;;  %vm687_vm15 = vcmp.gt.f32.partialorder %v2107_v34, 20.0  ;;  %v1587_v4 = vadd.f32 %v1586_v12, %v2079_v56  ;;  %v1591_v23 = vpop.f32.mrf.mxu0 }
 0x111   : > { %v2109_v36 = vpop.eup %1765  ;;  %v821_v42 = vadd.f32 1.0, %v2104_v31  ;;  %v824_v45 = vmul.f32 -0.5, %v2104_v31  ;;  %v2127_v49 = vmul.f32 %v2084_v9, %v816_v25  ;;  %v827_v54 = vand.u32 2147483647, %v2104_v31 }
 0x112   : > { %v965_v46 = vadd.f32 1.0, %v2109_v36  ;;  %v968_v59 = vmul.f32 -0.5, %v2109_v36  ;;  %v719_v60 = vsel %vm687_vm15, 0.0, %v2107_v34  ;;  %v971_v0 = vand.u32 2147483647, %v2109_v36 }
 0x113   : > { %1779 = vlog2.f32 %v821_v42  ;;  %v772_v1 = vmul.f32 1.442695, %v719_v60  ;;  %v825_v3 = vadd.f32 1.0, %v824_v45  ;;  %v1635_v14 = vadd.f32 %v1634_v30, %v1633_v8  ;;  %v1592_v42 = vpop.f32.mrf.mxu0 }
 0x114   : > { %v1768_v53 = vpop.eup %1767  ;;  %1781 = vlog2.f32 %v965_v46  ;;  %v1590_v15 = vadd.f32 %v1589_v61, %v1588_v35  ;;  %v969_v22 = vadd.f32 1.0, %v968_v59  ;;  %v1638_v26 = vadd.f32 %v1637_v16, %v1636_v52 }
 0x115   : > { %v1770_v62 = vpop.eup %1769  ;;  %v796_v63 = vmul.f32 0.6931472, %v1768_v53  ;;  %1783 = vpow2.f32 %v738_v7  ;;  %v2144_v7 = vadd.f32 %v1587_v4, %v2007_v50  ;;  %v2151_v8 = vadd.f32 %v1635_v14, %v2007_v50  ;;  %v2223_v14 = vpop.f32.mrf.mxu0 }
 0x116   : > { %v940_v2 = vmul.f32 0.6931472, %v1770_v62  ;;  %1785 = vpow2.f32 %v770_v11  ;;  %v2154_v20 = vadd.f32 %v1590_v15, %v2007_v50  ;;  %v1593_v60 = vadd.f32 %v1592_v42, %v1591_v23 }
 0x117   : > { %v802_v10 = vsel %vm2091_vm11, %v799_v32, %v796_v63  ;;  %1787 = vpow2.f32 %v740_v47  ;;  %vm672_vm11 = vcmp.gt.f32.partialorder %v2144_v7, 20.0  ;;  %v961_v62 = vmul.f32 %v2087_v13, %v2129_v51 }
 0x118   : > { %v1772_v19 = vpop.eup %1771  ;;  %v946_v21 = vsel %vm2096_vm12, %v943_v33, %v940_v2  ;;  %1789 = vpow2.f32 %v772_v1  ;;  %v1082_v56 = vsel %vm666_vm0, %v2010_v57, %v802_v10  ;;  %v704_v57 = vsel %vm672_vm11, 0.0, %v2144_v7 }
 0x119   : > { %v1774_v11 = vpop.eup %1773  ;;  %v805_v12 = vmul.f32 0.6931472, %v1772_v19  ;;  %v1098_v24 = vsel %vm682_vm1, %v2013_v58, %v946_v21  ;;  %vm688_vm0 = vcmp.gt.f32.partialorder %v2151_v8, 20.0  ;;  %vm673_vm12 = vcmp.gt.f32.partialorder %v2154_v20, 20.0 }
 0x11a   : > { %v949_v25 = vmul.f32 0.6931472, %v1774_v11  ;;  %v742_v33 = vmul.f32 1.442695, %v704_v57  ;;  %v720_v35 = vsel %vm688_vm0, 0.0, %v2151_v8  ;;  %v826_v4 = vmul.f32 %v2104_v31, %v825_v3 }
 0x11b   : > { %v811_v27 = vsel %vm2115_vm13, %v808_v37, %v805_v12  ;;  %v1639_v37 = vpop.f32.mrf.mxu1  ;;  %vm2190_vm1 = vcmp.lt.f32.partialorder %v818_v39, 0.0004427343  ;;  %v2207_v39 = vadd.f32 %v1638_v26, %v2007_v50  ;;  %v970_v51 = vmul.f32 %v2109_v36, %v969_v22 }
 0x11c   : > { %v1776_v30 = vpop.eup %1775  ;;  %v1083_v58 = vsel %vm667_vm2, %v2024_v5, %v811_v27  ;;  %v955_v32 = vsel %vm2122_vm14, %v2111_v38, %v949_v25  ;;  %v774_v5 = vmul.f32 1.442695, %v720_v35  ;;  %1791 = vpow2.f32 %v742_v33 }
 0x11d   : > { %v1778_v43 = vpop.eup %1777  ;;  %v1459_v45 = vpack.c.bf16 %v1083_v58, %v1082_v56  ;;  %v1099_v46 = vsel %vm683_vm3, %v2027_v6, %v955_v32  ;;  %v814_v47 = vmul.f32 0.6931472, %v1776_v30  ;;  %v705_v38 = vsel %vm673_vm12, 0.0, %v2154_v20  ;;  %v1640_v63 = vpop.f32.mrf.mxu1 }
 0x11e   : > { %v1499_v52 = vpack.c.bf16 %v1099_v46, %v1098_v24  ;;  %v958_v53 = vmul.f32 0.6931472, %v1778_v43  ;;  %1793 = vpow2.f32 %v774_v5  ;;  %v744_v59 = vmul.f32 1.442695, %v705_v38  ;;  %v1595_v24 = vpop.f32.mrf.mxu0 }
 0x11f   : > { %1460 = vst [vmem:[%s2170_s30] sm:$0xff] %v1459_v45   ;;  %v820_v61 = vsel %vm2190_vm1, %v2127_v49, %v814_v47  ;;  %vm2202_vm2 = vcmp.lt.f32.partialorder %v962_v44, 0.0004427343  ;;  %vm828_vm3 = vcmp.lt.f32.partialorder %v827_v54, 0.0004427343  ;;  %vm2219_vm13 = vcmp.lt.f32.partialorder %v971_v0, 0.0004427343 }
 0x120   : > { %v1780_v6 = vpop.eup %1779  ;;  %1543 = vst [vmem:[%s2170_s30 + $0x40] sm:$0xff] %v1499_v52   ;;  %1795 = vpow2.f32 %v744_v59  ;;  %v964_v13 = vsel %vm2202_vm2, %v961_v62, %v958_v53  ;;  %v1084_v31 = vsel %vm668_vm4, %v2038_v17, %v820_v61  ;;  %v2230_v16 = vadd.f32 %v1593_v60, %v2007_v50  ;;  %v2238_v17 = vpop.f32.mrf.mxu1 }
 0x121   : > { %v1782_v1 = vpop.eup %1781  ;;  %v823_v2 = vmul.f32 0.6931472, %v1780_v6  ;;  %vm689_vm14 = vcmp.gt.f32.partialorder %v2207_v39, 20.0  ;;  %v1100_v23 = vsel %vm684_vm5, %v2041_v18, %v964_v13  ;;  %v1641_v12 = vadd.f32 %v1640_v63, %v1639_v37  ;;  %v1597_v37 = vpop.f32.mrf.mxu0 }
 0x122   : > { %v2212_v49 = vpop.eup %1783  ;;  %v967_v44 = vmul.f32 0.6931472, %v1782_v1  ;;  %v721_v57 = vsel %vm689_vm14, 0.0, %v2207_v39  ;;  %vm674_vm4 = vcmp.gt.f32.partialorder %v2230_v16, 20.0 }
 0x123   : > { %v1786_v3 = vpop.eup %1785  ;;  %v829_v54 = vsel %vm828_vm3, %v826_v4, %v823_v2  ;;  %v830_v15 = vadd.f32 1.0, %v2212_v49  ;;  %v833_v25 = vmul.f32 -0.5, %v2212_v49  ;;  %v836_v32 = vand.u32 2147483647, %v2212_v49  ;;  %v1598_v63 = vpop.f32.mrf.mxu0 }
 0x124   : > { %v1788_v19 = vpop.eup %1787  ;;  %v1085_v36 = vsel %vm669_vm6, %v2052_v28, %v829_v54  ;;  %v973_v0 = vsel %vm2219_vm13, %v970_v51, %v967_v44  ;;  %v974_v21 = vadd.f32 1.0, %v1786_v3  ;;  %v977_v26 = vmul.f32 -0.5, %v1786_v3 }
 0x125   : > { %v1790_v22 = vpop.eup %1789  ;;  %v1464_v11 = vpack.c.bf16 %v1085_v36, %v1084_v31  ;;  %v1101_v56 = vsel %vm685_vm7, %v2055_v29, %v973_v0  ;;  %1797 = vlog2.f32 %v830_v15  ;;  %v839_v27 = vadd.f32 1.0, %v1788_v19  ;;  %v1643_v29 = vpop.f32.mrf.mxu1 }
 0x126   : > { %v1504_v28 = vpack.c.bf16 %v1101_v56, %v1100_v23  ;;  %1799 = vlog2.f32 %v974_v21  ;;  %v842_v18 = vmul.f32 -0.5, %v1788_v19  ;;  %v983_v30 = vadd.f32 1.0, %v1790_v22  ;;  %v2295_v23 = vpop.f32.mrf.mxu0 }
 0x127   : > { %1536 = vst [vmem:[%s2170_s30 + $0x8] sm:$0xff] %v1464_v11   ;;  %v986_v58 = vmul.f32 -0.5, %v1790_v22  ;;  %1801 = vlog2.f32 %v839_v27  ;;  %v776_v33 = vmul.f32 1.442695, %v721_v57  ;;  %v2255_v35 = vadd.f32 %v1641_v12, %v2007_v50  ;;  %v1645_v59 = vpop.f32.mrf.mxu1 }
 0x128   : > { %1544 = vst [vmem:[%s2170_s30 + $0x48] sm:$0xff] %v1504_v28   ;;  %1803 = vlog2.f32 %v983_v30  ;;  %v834_v43 = vadd.f32 1.0, %v833_v25  ;;  %v978_v45 = vadd.f32 1.0, %v977_v26  ;;  %v980_v46 = vand.u32 2147483647, %v1786_v3 }
 0x129   : > { %v2257_v42 = vpop.eup %1791  ;;  %v706_v47 = vsel %vm674_vm4, 0.0, %v2230_v16  ;;  %v843_v52 = vadd.f32 1.0, %v842_v18  ;;  %v845_v53 = vand.u32 2147483647, %v1788_v19  ;;  %v987_v38 = vadd.f32 1.0, %v986_v58  ;;  %v1646_v54 = vpop.f32.mrf.mxu1 }
 0x12a   : > { %v848_v48 = vadd.f32 1.0, %v2257_v42  ;;  %vm2265_vm5 = vcmp.lt.f32.partialorder %v836_v32, 0.0004427343  ;;  %v989_v6 = vand.u32 2147483647, %v1790_v22  ;;  %1805 = vpow2.f32 %v776_v33  ;;  %v1601_v33 = vpop.f32.mrf.mxu0 }
 0x12b   : > { %v2262_v5 = vpop.eup %1793  ;;  %v746_v9 = vmul.f32 1.442695, %v706_v47  ;;  %vm690_vm6 = vcmp.gt.f32.partialorder %v2255_v35, 20.0  ;;  %v835_v1 = vmul.f32 %v2212_v49, %v834_v43  ;;  %v979_v2 = vmul.f32 %v1786_v3, %v978_v45  ;;  %v1648_v18 = vpop.f32.mrf.mxu1 }
 0x12c   : > { %1807 = vlog2.f32 %v848_v48  ;;  %v992_v62 = vadd.f32 1.0, %v2262_v5  ;;  %vm2274_vm7 = vcmp.lt.f32.partialorder %v980_v46, 0.0004427343  ;;  %v844_v44 = vmul.f32 %v1788_v19, %v843_v52 }
 0x12d   : > { %v2269_v61 = vpop.eup %1795  ;;  %vm2279_vm1 = vcmp.lt.f32.partialorder %v845_v53, 0.0004427343  ;;  %v988_v10 = vmul.f32 %v1790_v22, %v987_v38  ;;  %v851_v31 = vmul.f32 -0.5, %v2257_v42  ;;  %1809 = vpow2.f32 %v746_v9  ;;  %v1603_v9 = vpop.f32.mrf.mxu0 }
 0x12e   : > { %v857_v13 = vadd.f32 1.0, %v2269_v61  ;;  %vm2284_vm2 = vcmp.lt.f32.partialorder %v989_v6, 0.0004427343  ;;  %v854_v49 = vand.u32 2147483647, %v2257_v42  ;;  %v722_v3 = vsel %vm690_vm6, 0.0, %v2255_v35 }
 0x12f   : > { %v1596_v19 = vadd.f32 %v1595_v24, %v2223_v14  ;;  %v860_v0 = vmul.f32 -0.5, %v2269_v61  ;;  %v778_v21 = vmul.f32 1.442695, %v722_v3  ;;  %v1644_v22 = vadd.f32 %v1643_v29, %v2238_v17 }
 0x130   : > { %1811 = vlog2.f32 %v857_v13  ;;  %v1599_v12 = vadd.f32 %v1598_v63, %v1597_v37  ;;  %v1647_v25 = vadd.f32 %v1646_v54, %v1645_v59  ;;  %v852_v27 = vadd.f32 1.0, %v851_v31  ;;  %v1649_v59 = vpop.f32.mrf.mxu1 }
 0x131   : > { %1813 = vlog2.f32 %v992_v62  ;;  %v2298_v28 = vadd.f32 %v1596_v19, %v2007_v50  ;;  %v2301_v14 = vadd.f32 %v1644_v22, %v2007_v50  ;;  %v861_v29 = vadd.f32 1.0, %v860_v0  ;;  %v1604_v0 = vpop.f32.mrf.mxu0 }
 0x132   : > { %v1798_v36 = vpop.eup %1797  ;;  %1815 = vpow2.f32 %v778_v21  ;;  %v2307_v17 = vadd.f32 %v1599_v12, %v2007_v50  ;;  %v2310_v57 = vadd.f32 %v1647_v25, %v2007_v50  ;;  %v995_v51 = vmul.f32 -0.5, %v2262_v5  ;;  %v1651_v15 = vpop.f32.mrf.mxu1 }
 0x133   : > { %v1800_v11 = vpop.eup %1799  ;;  %v832_v56 = vmul.f32 0.6931472, %v1798_v36  ;;  %vm675_vm3 = vcmp.gt.f32.partialorder %v2298_v28, 20.0  ;;  %vm691_vm13 = vcmp.gt.f32.partialorder %v2301_v14, 20.0  ;;  %v853_v54 = vmul.f32 %v2257_v42, %v852_v27 }
 0x134   : > { %v976_v26 = vmul.f32 0.6931472, %v1800_v11  ;;  %v1802_v30 = vpop.eup %1801  ;;  %v707_v32 = vsel %vm675_vm3, 0.0, %v2298_v28  ;;  %v723_v47 = vsel %vm691_vm13, 0.0, %v2301_v14  ;;  %v996_v12 = vadd.f32 1.0, %v995_v51 }
 0x135   : > { %v838_v24 = vsel %vm2265_vm5, %v835_v1, %v832_v56  ;;  %v1804_v37 = vpop.eup %1803  ;;  %v841_v45 = vmul.f32 0.6931472, %v1802_v30  ;;  %v748_v46 = vmul.f32 1.442695, %v707_v32  ;;  %v780_v53 = vmul.f32 1.442695, %v723_v47  ;;  %v1652_v30 = vpop.f32.mrf.mxu1 }
 0x136   : > { %v982_v58 = vsel %vm2274_vm7, %v979_v2, %v976_v26  ;;  %v1086_v43 = vsel %vm670_vm8, %v2066_v40, %v838_v24  ;;  %v985_v52 = vmul.f32 0.6931472, %v1804_v37  ;;  %vm676_vm5 = vcmp.gt.f32.partialorder %v2307_v17, 20.0  ;;  %v2377_v32 = vpop.f32.mrf.mxu0 }
 0x137   : > { %vm692_vm7 = vcmp.gt.f32.partialorder %v2310_v57, 20.0  ;;  %v1102_v38 = vsel %vm686_vm9, %v2069_v41, %v982_v58  ;;  %v847_v48 = vsel %vm2279_vm1, %v844_v44, %v841_v45  ;;  %1817 = vpow2.f32 %v748_v46  ;;  %v2334_v60 = vpop.eup %1805  ;;  %v2393_v46 = vpop.f32.mrf.mxu1 }
 0x138   : > { %v708_v40 = vsel %vm676_vm5, 0.0, %v2307_v17  ;;  %v1087_v6 = vsel %vm671_vm10, %v2077_v55, %v847_v48  ;;  %v991_v62 = vsel %vm2284_vm2, %v988_v10, %v985_v52  ;;  %1819 = vpow2.f32 %v780_v53 }
 0x139   : > { %v724_v41 = vsel %vm692_vm7, 0.0, %v2310_v57  ;;  %v1808_v63 = vpop.eup %1807  ;;  %v1469_v1 = vpack.c.bf16 %v1087_v6, %v1086_v43  ;;  %v1103_v2 = vsel %vm687_vm15, %v2107_v34, %v991_v62  ;;  %v1001_v4 = vadd.f32 1.0, %v2334_v60 }
 0x13a   : > { %v750_v13 = vmul.f32 1.442695, %v708_v40  ;;  %v1509_v55 = vpack.c.bf16 %v1103_v2, %v1102_v38  ;;  %v850_v44 = vmul.f32 0.6931472, %v1808_v63  ;;  %v863_v10 = vand.u32 2147483647, %v2269_v61  ;;  %v2350_v31 = vpop.eup %1809 }
 0x13b   : > { %1537 = vst [vmem:[%s2170_s30 + $0x10] sm:$0xff] %v1469_v1   ;;  %1821 = vlog2.f32 %v1001_v4  ;;  %vm2357_vm8 = vcmp.lt.f32.partialorder %v854_v49, 0.0004427343  ;;  %v866_v19 = vadd.f32 1.0, %v2350_v31  ;;  %v782_v36 = vmul.f32 1.442695, %v724_v41 }
 0x13c   : > { %1545 = vst [vmem:[%s2170_s30 + $0x50] sm:$0xff] %v1509_v55   ;;  %v856_v22 = vsel %vm2357_vm8, %v853_v54, %v850_v44  ;;  %v862_v56 = vmul.f32 %v2269_v61, %v861_v29  ;;  %1823 = vpow2.f32 %v750_v13  ;;  %v998_v25 = vand.u32 2147483647, %v2262_v5  ;;  %v1655_v13 = vpop.f32.mrf.mxu1 }
 0x13d   : > { %v1812_v3 = vpop.eup %1811  ;;  %vm864_vm9 = vcmp.lt.f32.partialorder %v863_v10, 0.0004427343  ;;  %v1004_v42 = vmul.f32 -0.5, %v2334_v60  ;;  %1825 = vlog2.f32 %v866_v19  ;;  %v1602_v27 = vadd.f32 %v1601_v33, %v2295_v23 }
 0x13e   : > { %v1814_v21 = vpop.eup %1813  ;;  %v859_v11 = vmul.f32 0.6931472, %v1812_v3  ;;  %v1650_v24 = vadd.f32 %v1649_v59, %v1648_v18  ;;  %v1088_v61 = vsel %vm672_vm11, %v2144_v7, %v856_v22  ;;  %1827 = vpow2.f32 %v782_v36 }
 0x13f   : > { %v2367_v49 = vpop.eup %1815  ;;  %v994_v37 = vmul.f32 0.6931472, %v1814_v21  ;;  %v869_v23 = vmul.f32 -0.5, %v2350_v31  ;;  %v2381_v18 = vadd.f32 %v1602_v27, %v2007_v50  ;;  %v1605_v7 = vadd.f32 %v1604_v0, %v1603_v9 }
 0x140   : > { %v865_v26 = vsel %vm864_vm9, %v862_v56, %v859_v11  ;;  %v1010_v29 = vadd.f32 1.0, %v2367_v49  ;;  %v2384_v33 = vadd.f32 %v1650_v24, %v2007_v50  ;;  %v997_v45 = vmul.f32 %v2262_v5, %v996_v12  ;;  %v1607_v5 = vpop.f32.mrf.mxu0  ;;  %v1657_v56 = vpop.f32.mrf.mxu1 }
 0x141   : > { %v1089_v58 = vsel %vm673_vm12, %v2154_v20, %v865_v26  ;;  %vm2387_vm10 = vcmp.lt.f32.partialorder %v998_v25, 0.0004427343  ;;  %vm677_vm15 = vcmp.gt.f32.partialorder %v2381_v18, 20.0  ;;  %v1005_v52 = vadd.f32 1.0, %v1004_v42 }
 0x142   : > { %v1474_v43 = vpack.c.bf16 %v1089_v58, %v1088_v61  ;;  %1829 = vlog2.f32 %v1010_v29  ;;  %v1007_v53 = vand.u32 2147483647, %v2334_v60  ;;  %v709_v38 = vsel %vm677_vm15, 0.0, %v2381_v18  ;;  %v1609_v54 = vpop.f32.mrf.mxu0 }
 0x143   : > { %vm693_vm11 = vcmp.gt.f32.partialorder %v2384_v33, 20.0  ;;  %v1000_v40 = vsel %vm2387_vm10, %v997_v45, %v994_v37  ;;  %v870_v59 = vadd.f32 1.0, %v869_v23  ;;  %v1013_v6 = vmul.f32 -0.5, %v2367_v49 }
 0x144   : > { %1538 = vst [vmem:[%s2170_s30 + $0x18] sm:$0xff] %v1474_v43   ;;  %v2395_v47 = vpop.eup %1817  ;;  %v872_v41 = vand.u32 2147483647, %v2350_v31  ;;  %v2411_v63 = vadd.f32 %v1605_v7, %v2007_v50  ;;  %v1653_v1 = vadd.f32 %v1652_v30, %v1651_v15  ;;  %v752_v2 = vmul.f32 1.442695, %v709_v38  ;;  %v1610_v27 = vpop.f32.mrf.mxu0 }
 0x145   : > { %v2402_v48 = vpop.eup %1819  ;;  %v875_v62 = vadd.f32 1.0, %v2395_v47  ;;  %v725_v4 = vsel %vm693_vm11, 0.0, %v2384_v33  ;;  %v1006_v44 = vmul.f32 %v2334_v60, %v1005_v52  ;;  %vm2417_vm12 = vcmp.lt.f32.partialorder %v1007_v53, 0.0004427343  ;;  %v1658_v52 = vpop.f32.mrf.mxu1 }
 0x146   : > { %v1019_v9 = vadd.f32 1.0, %v2402_v48  ;;  %v1016_v10 = vand.u32 2147483647, %v2367_v49  ;;  %v1104_v15 = vsel %vm688_vm0, %v2151_v8, %v1000_v40  ;;  %v2426_v34 = vmul.f32 %v2350_v31, %v870_v59 }
 0x147   : > { %1831 = vlog2.f32 %v875_v62  ;;  %v1014_v19 = vadd.f32 1.0, %v1013_v6  ;;  %vm2430_vm1 = vcmp.lt.f32.partialorder %v872_v41, 0.0004427343  ;;  %v878_v0 = vmul.f32 -0.5, %v2395_v47 }
 0x148   : > { %v1822_v55 = vpop.eup %1821  ;;  %1833 = vlog2.f32 %v1019_v9  ;;  %v784_v21 = vmul.f32 1.442695, %v725_v4  ;;  %vm678_vm2 = vcmp.gt.f32.partialorder %v2411_v63, 20.0  ;;  %v2437_v22 = vadd.f32 %v1653_v1, %v2007_v50 }
 0x149   : > { %v1003_v3 = vmul.f32 0.6931472, %v1822_v55  ;;  %v2428_v36 = vpop.eup %1823  ;;  %v881_v31 = vand.u32 2147483647, %v2395_v47  ;;  %v1022_v11 = vmul.f32 -0.5, %v2402_v48  ;;  %1835 = vpow2.f32 %v752_v2 }
 0x14a   : > { %v1826_v12 = vpop.eup %1825  ;;  %vm2446_vm0 = vcmp.lt.f32.partialorder %v1016_v10, 0.0004427343  ;;  %1837 = vpow2.f32 %v784_v21  ;;  %v710_v26 = vsel %vm678_vm2, 0.0, %v2411_v63  ;;  %v1015_v61 = vmul.f32 %v2367_v49, %v1014_v19 }
 0x14b   : > { %v1009_v8 = vsel %vm2417_vm12, %v1006_v44, %v1003_v3  ;;  %v2453_v24 = vpop.eup %1827  ;;  %v884_v58 = vadd.f32 1.0, %v2428_v36  ;;  %v1608_v29 = vadd.f32 %v1607_v5, %v2377_v32  ;;  %v1025_v37 = vand.u32 2147483647, %v2402_v48  ;;  %v1612_v5 = vpop.f32.mrf.mxu0 }
 0x14c   : > { %v1105_v25 = vsel %vm689_vm14, %v2207_v39, %v1009_v8  ;;  %v879_v39 = vadd.f32 1.0, %v878_v0  ;;  %v754_v43 = vmul.f32 1.442695, %v710_v26  ;;  %vm694_vm14 = vcmp.gt.f32.partialorder %v2437_v22, 20.0  ;;  %v1660_v0 = vpop.f32.mrf.mxu1 }
 0x14d   : > { %v1514_v30 = vpack.c.bf16 %v1105_v25, %v1104_v15  ;;  %v868_v7 = vmul.f32 0.6931472, %v1826_v12  ;;  %vm2461_vm8 = vcmp.lt.f32.partialorder %v881_v31, 0.0004427343  ;;  %v1023_v20 = vadd.f32 1.0, %v1022_v11  ;;  %v1613_v44 = vpop.f32.mrf.mxu0 }
 0x14e   : > { %v726_v49 = vsel %vm694_vm14, 0.0, %v2437_v22  ;;  %v1028_v53 = vadd.f32 1.0, %v2453_v24  ;;  %1839 = vpow2.f32 %v754_v43  ;;  %v2470_v40 = vadd.f32 %v1608_v29, %v2007_v50 }
 0x14f   : > { %v1830_v23 = vpop.eup %1829  ;;  %1546 = vst [vmem:[%s2170_s30 + $0x58] sm:$0xff] %v1514_v30   ;;  %v786_v38 = vmul.f32 1.442695, %v726_v49  ;;  %1841 = vlog2.f32 %v884_v58  ;;  %v1656_v59 = vadd.f32 %v1655_v13, %v2393_v46  ;;  %v1611_v6 = vadd.f32 %v1610_v27, %v1609_v54  ;;  %v1661_v58 = vpop.f32.mrf.mxu1 }
 0x150   : > { %v1012_v32 = vmul.f32 0.6931472, %v1830_v23  ;;  %v880_v62 = vmul.f32 %v2395_v47, %v879_v39  ;;  %vm2474_vm9 = vcmp.lt.f32.partialorder %v1025_v37, 0.0004427343  ;;  %v1659_v9 = vadd.f32 %v1658_v52, %v1657_v56 }
 0x151   : > { %1843 = vpow2.f32 %v786_v38  ;;  %v874_v1 = vsel %vm2430_vm1, %v2426_v34, %v868_v7  ;;  %vm679_vm10 = vcmp.gt.f32.partialorder %v2470_v40, 20.0  ;;  %v2483_v2 = vadd.f32 %v1656_v59, %v2007_v50 }
 0x152   : > { %v2486_v46 = vadd.f32 %v1611_v6, %v2007_v50  ;;  %v1018_v47 = vsel %vm2446_vm0, %v1015_v61, %v1012_v32  ;;  %1845 = vlog2.f32 %v1028_v53  ;;  %v711_v13 = vsel %vm679_vm10, 0.0, %v2470_v40 }
 0x153   : > { %v2494_v55 = vadd.f32 %v1659_v9, %v2007_v50  ;;  %v756_v54 = vmul.f32 1.442695, %v711_v13  ;;  %vm695_vm12 = vcmp.gt.f32.partialorder %v2483_v2, 20.0  ;;  %v1090_v15 = vsel %vm674_vm4, %v2230_v16, %v874_v1 }
 0x154   : > { %v1832_v4 = vpop.eup %1831  ;;  %vm680_vm1 = vcmp.gt.f32.partialorder %v2486_v46, 20.0  ;;  %v1024_v34 = vmul.f32 %v2402_v48, %v1023_v20  ;;  %v727_v19 = vsel %vm695_vm12, 0.0, %v2483_v2  ;;  %v1614_v21 = vadd.f32 %v1613_v44, %v1612_v5  ;;  %v1879_v5 = vld [vmem:[%s2656_s2] ss:$0 sm:$0xff] }
 0x155   : > { %v1834_v51 = vpop.eup %1833  ;;  %v877_v10 = vmul.f32 0.6931472, %v1832_v4  ;;  %1847 = vpow2.f32 %v756_v54  ;;  %vm696_vm0 = vcmp.gt.f32.partialorder %v2494_v55, 20.0  ;;  %v1106_v16 = vsel %vm690_vm6, %v2255_v35, %v1018_v47 }
 0x156   : > { %v1021_v3 = vmul.f32 0.6931472, %v1834_v51  ;;  %v2508_v8 = vpop.eup %1835  ;;  %v712_v11 = vsel %vm680_vm1, 0.0, %v2486_v46  ;;  %v788_v42 = vmul.f32 1.442695, %v727_v19  ;;  %v728_v27 = vsel %vm696_vm0, 0.0, %v2494_v55 }
 0x157   : > { %v883_v60 = vsel %vm2461_vm8, %v880_v62, %v877_v10  ;;  %v2521_v56 = vpop.eup %1837  ;;  %v893_v35 = vadd.f32 1.0, %v2508_v8  ;;  %v758_v30 = vmul.f32 1.442695, %v712_v11  ;;  %v2533_v61 = vadd.f32 %v1614_v21, %v2007_v50 }
 0x158   : > { %v1091_v48 = vsel %vm675_vm3, %v2298_v28, %v883_v60  ;;  %v1027_v31 = vsel %vm2474_vm9, %v1024_v34, %v1021_v3  ;;  %v1037_v28 = vadd.f32 1.0, %v2521_v56  ;;  %v790_v39 = vmul.f32 1.442695, %v728_v27 }
 0x159   : > { %v1479_v12 = vpack.c.bf16 %v1091_v48, %v1090_v15  ;;  %v1107_v25 = vsel %vm691_vm13, %v2301_v14, %v1027_v31  ;;  %1849 = vlog2.f32 %v893_v35  ;;  %v887_v14 = vmul.f32 -0.5, %v2428_v36 }
 0x15a   : > { %v1519_v26 = vpack.c.bf16 %v1107_v25, %v1106_v16  ;;  %1851 = vlog2.f32 %v1037_v28  ;;  %v1662_v23 = vadd.f32 %v1661_v58, %v1660_v0  ;;  %v890_v45 = vand.u32 2147483647, %v2428_v36 }
 0x15b   : > { %1539 = vst [vmem:[%s2170_s30 + $0x20] sm:$0xff] %v1479_v12   ;;  %v2537_v29 = vpop.eup %1839  ;;  %1853 = vpow2.f32 %v788_v42  ;;  %v1031_v50 = vmul.f32 -0.5, %v2453_v24  ;;  %vm681_vm4 = vcmp.gt.f32.partialorder %v2533_v61, 20.0  ;;  %v888_v20 = vadd.f32 1.0, %v887_v14 }
 0x15c   : > { %1547 = vst [vmem:[%s2170_s30 + $0x60] sm:$0xff] %v1519_v26   ;;  %v1842_v37 = vpop.eup %1841  ;;  %v902_v43 = vadd.f32 1.0, %v2537_v29  ;;  %1855 = vpow2.f32 %v758_v30  ;;  %v896_v52 = vmul.f32 -0.5, %v2508_v8  ;;  %v1040_v53 = vmul.f32 -0.5, %v2521_v56 }
 0x15d   : > { %v713_v38 = vsel %vm681_vm4, 0.0, %v2533_v61  ;;  %v2554_v59 = vadd.f32 %v1879_v5, %v1662_v23  ;;  %vm2556_vm6 = vcmp.lt.f32.partialorder %v890_v45, 0.0004427343  ;;  %v1032_v62 = vadd.f32 1.0, %v1031_v50 }
 0x15e   : > { %v2540_v7 = vpop.eup %1843  ;;  %1857 = vlog2.f32 %v902_v43  ;;  %v760_v41 = vmul.f32 1.442695, %v713_v38  ;;  %v886_v1 = vmul.f32 0.6931472, %v1842_v37  ;;  %v889_v4 = vmul.f32 %v2428_v36, %v888_v20 }
 0x15f   : > { %v1846_v49 = vpop.eup %1845  ;;  %v1046_v32 = vadd.f32 1.0, %v2540_v7  ;;  %1859 = vpow2.f32 %v790_v39  ;;  %v1034_v47 = vand.u32 2147483647, %v2453_v24  ;;  %vm697_vm3 = vcmp.gt.f32.partialorder %v2554_v59, 20.0 }
 0x160   : > { %v1030_v13 = vmul.f32 0.6931472, %v1846_v49  ;;  %v897_v44 = vadd.f32 1.0, %v896_v52  ;;  %v899_v10 = vand.u32 2147483647, %v2508_v8  ;;  %v1041_v54 = vadd.f32 1.0, %v1040_v53 }
 0x161   : > { %1861 = vlog2.f32 %v1046_v32  ;;  %v729_v15 = vsel %vm697_vm3, 0.0, %v2554_v59  ;;  %v1033_v3 = vmul.f32 %v2453_v24, %v1032_v62  ;;  %v1043_v36 = vand.u32 2147483647, %v2521_v56 }
 0x162   : > { %v2560_v9 = vpop.eup %1847  ;;  %1863 = vpow2.f32 %v760_v41  ;;  %v792_v34 = vmul.f32 1.442695, %v729_v15  ;;  %v892_v60 = vsel %vm2556_vm6, %v889_v4, %v886_v1  ;;  %vm2574_vm13 = vcmp.lt.f32.partialorder %v1034_v47, 0.0004427343 }
 0x163   : > { %v911_v51 = vadd.f32 1.0, %v2560_v9  ;;  %v1036_v16 = vsel %vm2574_vm13, %v1033_v3, %v1030_v13  ;;  %v898_v31 = vmul.f32 %v2508_v8, %v897_v44  ;;  %vm900_vm8 = vcmp.lt.f32.partialorder %v899_v10, 0.0004427343 }
 0x164   : > { %v1042_v12 = vmul.f32 %v2521_v56, %v1041_v54  ;;  %vm1044_vm9 = vcmp.lt.f32.partialorder %v1043_v36, 0.0004427343  ;;  %v905_v35 = vmul.f32 -0.5, %v2537_v29  ;;  %v1092_v8 = vsel %vm676_vm5, %v2307_v17, %v892_v60 }
 0x165   : > { %1865 = vlog2.f32 %v911_v51  ;;  %v1108_v28 = vsel %vm692_vm7, %v2310_v57, %v1036_v16  ;;  %v914_v39 = vmul.f32 -0.5, %v2560_v9  ;;  %v1049_v50 = vmul.f32 -0.5, %v2540_v7 }
 0x166   : > { %v1850_v19 = vpop.eup %1849  ;;  %1867 = vpow2.f32 %v792_v34  ;;  %v906_v57 = vadd.f32 1.0, %v905_v35  ;;  %v917_v49 = vand.u32 2147483647, %v2560_v9  ;;  %v1052_v47 = vand.u32 2147483647, %v2540_v7 }
 0x167   : > { %v1852_v21 = vpop.eup %1851  ;;  %v895_v48 = vmul.f32 0.6931472, %v1850_v19  ;;  %v1050_v62 = vadd.f32 1.0, %v1049_v50 }
 0x168   : > { %v2581_v24 = vpop.eup %1853  ;;  %v1039_v11 = vmul.f32 0.6931472, %v1852_v21  ;;  %v907_v32 = vmul.f32 %v2537_v29, %v906_v57  ;;  %vm918_vm7 = vcmp.lt.f32.partialorder %v917_v49, 0.0004427343 }
 0x169   : > { %v901_v25 = vsel %vm900_vm8, %v898_v31, %v895_v48  ;;  %v1055_v42 = vadd.f32 1.0, %v2581_v24  ;;  %v2586_v26 = vpop.eup %1855  ;;  %v1058_v53 = vmul.f32 -0.5, %v2581_v24  ;;  %v1051_v15 = vmul.f32 %v2540_v7, %v1050_v62 }
 0x16a   : > { %v1093_v56 = vsel %vm677_vm15, %v2381_v18, %v901_v25  ;;  %v1045_v27 = vsel %vm1044_vm9, %v1042_v12, %v1039_v11  ;;  %v920_v43 = vadd.f32 1.0, %v2586_v26  ;;  %v908_v18 = vand.u32 2147483647, %v2537_v29 }
 0x16b   : > { %v1858_v30 = vpop.eup %1857  ;;  %v1484_v58 = vpack.c.bf16 %v1093_v56, %v1092_v8  ;;  %v1109_v14 = vsel %vm693_vm11, %v2384_v33, %v1045_v27  ;;  %1869 = vlog2.f32 %v1055_v42  ;;  %v915_v33 = vadd.f32 1.0, %v914_v39 }
 0x16c   : > { %v2601_v37 = vpop.eup %1859  ;;  %v1524_v17 = vpack.c.bf16 %v1109_v14, %v1108_v28  ;;  %1871 = vlog2.f32 %v920_v43  ;;  %v904_v45 = vmul.f32 0.6931472, %v1858_v30  ;;  %vm909_vm5 = vcmp.lt.f32.partialorder %v908_v18, 0.0004427343 }
 0x16d   : > { %1540 = vst [vmem:[%s2170_s30 + $0x28] sm:$0xff] %v1484_v58   ;;  %v1064_v23 = vadd.f32 1.0, %v2601_v37  ;;  %v916_v1 = vmul.f32 %v2560_v9, %v915_v33  ;;  %v1059_v29 = vadd.f32 1.0, %v1058_v53  ;;  %v1061_v9 = vand.u32 2147483647, %v2581_v24 }
 0x16e   : > { %1548 = vst [vmem:[%s2170_s30 + $0x68] sm:$0xff] %v1524_v17   ;;  %v1862_v20 = vpop.eup %1861  ;;  %v910_v6 = vsel %vm909_vm5, %v907_v32, %v904_v45  ;;  %vm1053_vm15 = vcmp.lt.f32.partialorder %v1052_v47, 0.0004427343  ;;  %v923_v34 = vmul.f32 -0.5, %v2586_v26  ;;  %v1067_v16 = vmul.f32 -0.5, %v2601_v37 }
 0x16f   : > { %v1864_v52 = vpop.eup %1863  ;;  %1873 = vlog2.f32 %v1064_v23  ;;  %v1048_v13 = vmul.f32 0.6931472, %v1862_v20  ;;  %v1094_v10 = vsel %vm678_vm2, %v2411_v63, %v910_v6  ;;  %v1060_v63 = vmul.f32 %v2581_v24, %v1059_v29 }
 0x170   : > { %v929_v5 = vadd.f32 1.0, %v1864_v52  ;;  %vm1062_vm11 = vcmp.lt.f32.partialorder %v1061_v9, 0.0004427343  ;;  %v932_v0 = vmul.f32 -0.5, %v1864_v52  ;;  %v924_v31 = vadd.f32 1.0, %v923_v34 }
 0x171   : > { %v1054_v19 = vsel %vm1053_vm15, %v1051_v15, %v1048_v13  ;;  %v926_v25 = vand.u32 2147483647, %v2586_v26  ;;  %v1068_v8 = vadd.f32 1.0, %v1067_v16  ;;  %v935_v28 = vand.u32 2147483647, %v1864_v52 }
 0x172   : > { %v1866_v38 = vpop.eup %1865  ;;  %1875 = vlog2.f32 %v929_v5  ;;  %v1110_v7 = vsel %vm694_vm14, %v2437_v22, %v1054_v19  ;;  %v933_v42 = vadd.f32 1.0, %v932_v0  ;;  %v925_v56 = vmul.f32 %v2586_v26, %v924_v31 }
 0x173   : > { %v913_v41 = vmul.f32 0.6931472, %v1866_v38  ;;  %v1868_v4 = vpop.eup %1867  ;;  %v1070_v27 = vand.u32 2147483647, %v2601_v37  ;;  %vm927_vm2 = vcmp.lt.f32.partialorder %v926_v25, 0.0004427343  ;;  %v1069_v43 = vmul.f32 %v2601_v37, %v1068_v8 }
 0x174   : > { %v1073_v51 = vadd.f32 1.0, %v1868_v4  ;;  %v1076_v11 = vmul.f32 -0.5, %v1868_v4  ;;  %v934_v39 = vmul.f32 %v1864_v52, %v933_v42  ;;  %v1079_v17 = vand.u32 2147483647, %v1868_v4 }
 0x175   : > { %v919_v44 = vsel %vm918_vm7, %v916_v1, %v913_v41  ;;  %vm936_vm14 = vcmp.lt.f32.partialorder %v935_v28, 0.0004427343 }
 0x176   : > { %v1095_v54 = vsel %vm679_vm10, %v2470_v40, %v919_v44  ;;  %1877 = vlog2.f32 %v1073_v51  ;;  %v1077_v22 = vadd.f32 1.0, %v1076_v11  ;;  %vm1071_vm10 = vcmp.lt.f32.partialorder %v1070_v27, 0.0004427343 }
 0x177   : > { %v1489_v3 = vpack.c.bf16 %v1095_v54, %v1094_v10 }
 0x178   : > { %v1870_v36 = vpop.eup %1869  ;;  %v1078_v18 = vmul.f32 %v1868_v4, %v1077_v22 }
 0x179   : > { %1541 = vst [vmem:[%s2170_s30 + $0x30] sm:$0xff] %v1489_v3   ;;  %v1057_v60 = vmul.f32 0.6931472, %v1870_v36  ;;  %v1872_v21 = vpop.eup %1871 }
 0x17a   : > { %v922_v35 = vmul.f32 0.6931472, %v1872_v21 }
 0x17b   : > { %v1063_v40 = vsel %vm1062_vm11, %v1060_v63, %v1057_v60 }
 0x17c   : > { %v1111_v48 = vsel %vm695_vm12, %v2483_v2, %v1063_v40  ;;  %v1874_v24 = vpop.eup %1873  ;;  %v928_v2 = vsel %vm927_vm2, %v925_v56, %v922_v35  ;;  %vm1080_vm12 = vcmp.lt.f32.partialorder %v1079_v17, 0.0004427343 }
 0x17d   : > { %v1529_v12 = vpack.c.bf16 %v1111_v48, %v1110_v7  ;;  %v1066_v58 = vmul.f32 0.6931472, %v1874_v24  ;;  %v1096_v26 = vsel %vm680_vm1, %v2486_v46, %v928_v2 }
 0x17f   : > { %1549 = vst [vmem:[%s2170_s30 + $0x70] sm:$0xff] %v1529_v12   ;;  %v1876_v30 = vpop.eup %1875  ;;  %v1072_v45 = vsel %vm1071_vm10, %v1069_v43, %v1066_v58 }
 0x180   : > { %v931_v14 = vmul.f32 0.6931472, %v1876_v30  ;;  %v1112_v37 = vsel %vm696_vm0, %v2494_v55, %v1072_v45 }
 0x182   : > { %v937_v23 = vsel %vm936_vm14, %v934_v39, %v931_v14 }
 0x183   : > { %v1878_v57 = vpop.eup %1877  ;;  %v1097_v50 = vsel %vm681_vm4, %v2533_v61, %v937_v23 }
 0x184   : > { %v1075_v33 = vmul.f32 0.6931472, %v1878_v57  ;;  %v1494_v20 = vpack.c.bf16 %v1097_v50, %v1096_v26 }
 0x186   : > { %v1081_v49 = vsel %vm1080_vm12, %v1078_v18, %v1075_v33  ;;  %1542 = vst [vmem:[%s2170_s30 + $0x38] sm:$0xff] %v1494_v20  }
 0x187   : > { %v1113_v52 = vsel %vm697_vm3, %v2554_v59, %v1081_v49 }
 0x188   : > { %v1534_v32 = vpack.c.bf16 %v1113_v52, %v1112_v37 }
 0x18a   : > { %1550 = vst [vmem:[%s2170_s30 + $0x78] sm:$0xff] %v1534_v32  }
 0x18b PF: > { %s13_s12 = sadd.s32 1, %s1886_s12  }
 0x18c   : > { %p10_p4 = scmp.ge.s32.totalorder %s13_s12, 6  }
 0x18e   :  { %12 = sbr.rel (!%p10_p4) target bundleno = 1 (0x1), region = 62 }

// kernel: dqn_forward.5
= control target key start
LH: loop header
LB: loop body
LE: loop exit
PB: predicated region body
PF: predicated region fallthrough
CT: control target
= control target key end

     0   :  { %s2367_s1 = inlined_call_operand.vmem [shape: bf16[512,128], index: 1, kind: input, shape index: {}]   ;;  %s2368_s0 = inlined_call_operand.vmem [shape: bf16[168,512], index: 0, kind: input, shape index: {}]   ;;  %s2369_s2 = inlined_call_operand.vmem [shape: f32[1,128], index: 2, kind: input, shape index: {}]   ;;  %s2370_s3 = inlined_call_operand.vmem [shape: bf16[168,128], index: 3, kind: output, shape index: {}]  }
   0x1   :  { %v1520_v0 = vld [vmem:[%s2367_s1 + $0x78] sm:$0xff]   ;;  %v1524_v4 = vld [vmem:[%s2367_s1 + $0x70] sm:$0xff]   ;;  %v1528_v8 = vld [vmem:[%s2367_s1 + $0x68] sm:$0xff]  }
   0x2   :  { %v1521_v1 = vld [vmem:[%s2367_s1 + $0xf8] sm:$0xff]   ;;  %1356 = vmatprep.subr.bf16.mxu0 %v1520_v0  ;;  %v1525_v5 = vld [vmem:[%s2367_s1 + $0xf0] sm:$0xff]   ;;  %v1529_v9 = vld [vmem:[%s2367_s1 + $0xe8] sm:$0xff]  }
   0x3   :  { %v1522_v2 = vld [vmem:[%s2367_s1 + $0x38] sm:$0xff]   ;;  %1438 = vmatprep.subr.bf16.mxu1 %v1521_v1  ;;  %v1526_v6 = vld [vmem:[%s2367_s1 + $0x30] sm:$0xff]   ;;  %v1530_v10 = vld [vmem:[%s2367_s1 + $0x28] sm:$0xff]  }
   0x4   :  { %v1523_v3 = vld [vmem:[%s2367_s1 + $0xb8] sm:$0xff]   ;;  %1357 = vmatpush3.bf16.msra.mxu0 %v1522_v2  ;;  %v1527_v7 = vld [vmem:[%s2367_s1 + $0xb0] sm:$0xff]   ;;  %v1531_v11 = vld [vmem:[%s2367_s1 + $0xa8] sm:$0xff]  }
   0x5   :  { %1439 = vmatpush3.bf16.msra.mxu1 %v1523_v3  ;;  %1358 = vmatprep.subr.bf16.mxu0 %v1524_v4  ;;  %v1532_v12 = vld [vmem:[%s2367_s1 + $0x60] sm:$0xff]   ;;  %v1536_v16 = vld [vmem:[%s2367_s1 + $0x58] sm:$0xff]   ;;  %v1540_v20 = vld [vmem:[%s2367_s1 + $0x50] sm:$0xff]  }
   0x6   :  { %1440 = vmatprep.subr.bf16.mxu1 %v1525_v5  ;;  %v1533_v13 = vld [vmem:[%s2367_s1 + $0xe0] sm:$0xff]   ;;  %v1537_v17 = vld [vmem:[%s2367_s1 + $0xd8] sm:$0xff]   ;;  %v1541_v21 = vld [vmem:[%s2367_s1 + $0xd0] sm:$0xff]  }
   0x7   :  { %v1534_v14 = vld [vmem:[%s2367_s1 + $0x20] sm:$0xff]   ;;  %v1538_v18 = vld [vmem:[%s2367_s1 + $0x18] sm:$0xff]   ;;  %v1542_v22 = vld [vmem:[%s2367_s1 + $0x10] sm:$0xff]  }
   0x8   :  { %1359 = vmatpush3.bf16.msra.mxu0 %v1526_v6  ;;  %v1535_v15 = vld [vmem:[%s2367_s1 + $0xa0] sm:$0xff]   ;;  %v1539_v19 = vld [vmem:[%s2367_s1 + $0x98] sm:$0xff]   ;;  %v1543_v23 = vld [vmem:[%s2367_s1 + $0x90] sm:$0xff]  }
   0x9   :  { %1441 = vmatpush3.bf16.msra.mxu1 %v1527_v7  ;;  %1360 = vmatprep.subr.bf16.mxu0 %v1528_v8  ;;  %v1544_v24 = vld [vmem:[%s2367_s1 + $0x48] sm:$0xff]   ;;  %v1548_v28 = vld [vmem:[%s2367_s1 + $0x40] sm:$0xff]  }
   0xa   :  { %1442 = vmatprep.subr.bf16.mxu1 %v1529_v9  ;;  %v1545_v25 = vld [vmem:[%s2367_s1 + $0xc8] sm:$0xff]   ;;  %v1549_v29 = vld [vmem:[%s2367_s1 + $0xc0] sm:$0xff]  }
   0xb   :  { %v1546_v26 = vld [vmem:[%s2367_s1 + $0x8] sm:$0xff]   ;;  %v1550_v30 = vld [vmem:[%s2367_s1] sm:$0xff]  }
   0xc   :  { %1361 = vmatpush3.bf16.msra.mxu0 %v1530_v10  ;;  %v1547_v27 = vld [vmem:[%s2367_s1 + $0x88] sm:$0xff]   ;;  %v1551_v31 = vld [vmem:[%s2367_s1 + $0x80] sm:$0xff]  }
   0xd   :  { %1443 = vmatpush3.bf16.msra.mxu1 %v1531_v11  ;;  %1362 = vmatprep.subr.bf16.mxu0 %v1532_v12  ;;  %v1552_v32 = vld [vmem:[%s2368_s0] ss:$16 sps:$4 sm:$0xff]   ;;  %v1554_v33 = vld [vmem:[%s2368_s0 + $0x4] ss:$16 sps:$4 sm:$0xff]   ;;  %v1555_v34 = vld [vmem:[%s2368_s0 + $0x8] ss:$16 sps:$4 sm:$0xff]  }
   0xe   :  { %1444 = vmatprep.subr.bf16.mxu1 %v1533_v13  ;;  %v1557_v35 = vld [vmem:[%s2368_s0 + $0xc] ss:$16 sps:$4 sm:$0xff]   ;;  %566 = vmatprep.mubr.bf16.mxu0 %v1554_v33  ;;  %v1558_v36 = vld [vmem:[%s2368_s0 + $0x24] ss:$16 sps:$4 sm:$0xff]   ;;  %v1562_v38 = vld [vmem:[%s2368_s0 + $0x20] ss:$16 sps:$4 sm:$0xff]  }
   0xf   :  { %686 = vmatprep.mubr.bf16.mxu1 %v1557_v35  ;;  %v1560_v37 = vld [vmem:[%s2368_s0 + $0x2c] ss:$16 sps:$4 sm:$0xff]   ;;  %v1563_v39 = vld [vmem:[%s2368_s0 + $0x28] ss:$16 sps:$4 sm:$0xff]   ;;  %v1564_v40 = vld [vmem:[%s2368_s0 + $0x44] ss:$16 sps:$4 sm:$0xff]  }
  0x10   :  { %1363 = vmatpush3.bf16.msra.mxu0 %v1534_v14  ;;  %v1566_v41 = vld [vmem:[%s2368_s0 + $0x4c] ss:$16 sps:$4 sm:$0xff]   ;;  %v1568_v42 = vld [vmem:[%s2368_s0 + $0x40] ss:$16 sps:$4 sm:$0xff]   ;;  %v1569_v43 = vld [vmem:[%s2368_s0 + $0x48] ss:$16 sps:$4 sm:$0xff]  }
  0x11   :  { %1445 = vmatpush3.bf16.msra.mxu1 %v1535_v15  ;;  %1364 = vmatprep.subr.bf16.mxu0 %v1536_v16  ;;  %v1570_v44 = vld [vmem:[%s2368_s0 + $0x64] ss:$16 sps:$4 sm:$0xff]   ;;  %v1572_v45 = vld [vmem:[%s2368_s0 + $0x6c] ss:$16 sps:$4 sm:$0xff]   ;;  %v1574_v46 = vld [vmem:[%s2368_s0 + $0x60] ss:$16 sps:$4 sm:$0xff]  }
  0x12   :  { %1446 = vmatprep.subr.bf16.mxu1 %v1537_v17  ;;  %v1575_v47 = vld [vmem:[%s2368_s0 + $0x68] ss:$16 sps:$4 sm:$0xff]   ;;  %v1576_v48 = vld [vmem:[%s2368_s0 + $0x84] ss:$16 sps:$4 sm:$0xff]   ;;  %v1578_v49 = vld [vmem:[%s2368_s0 + $0x8c] ss:$16 sps:$4 sm:$0xff]  }
  0x13   :  { %v1580_v50 = vld [vmem:[%s2368_s0 + $0x80] ss:$16 sps:$4 sm:$0xff]   ;;  %v1581_v51 = vld [vmem:[%s2368_s0 + $0x88] ss:$16 sps:$4 sm:$0xff]   ;;  %v1582_v52 = vld [vmem:[%s2368_s0 + $0xa4] ss:$16 sps:$4 sm:$0xff]  }
  0x14   :  { %1365 = vmatpush3.bf16.msra.mxu0 %v1538_v18  ;;  %v1584_v53 = vld [vmem:[%s2368_s0 + $0xac] ss:$16 sps:$4 sm:$0xff]   ;;  %v1586_v54 = vld [vmem:[%s2368_s0 + $0xa0] ss:$16 sps:$4 sm:$0xff]   ;;  %v1587_v55 = vld [vmem:[%s2368_s0 + $0xa8] ss:$16 sps:$4 sm:$0xff]  }
  0x15   :  { %1447 = vmatpush3.bf16.msra.mxu1 %v1539_v19  ;;  %1366 = vmatprep.subr.bf16.mxu0 %v1540_v20  ;;  %v1588_v56 = vld [vmem:[%s2368_s0 + $0xc4] ss:$16 sps:$4 sm:$0xff]   ;;  %v1590_v57 = vld [vmem:[%s2368_s0 + $0xcc] ss:$16 sps:$4 sm:$0xff]   ;;  %v1592_v58 = vld [vmem:[%s2368_s0 + $0xc0] ss:$16 sps:$4 sm:$0xff]  }
  0x16   :  { %1448 = vmatprep.subr.bf16.mxu1 %v1541_v21  ;;  %v1593_v59 = vld [vmem:[%s2368_s0 + $0xc8] ss:$16 sps:$4 sm:$0xff]   ;;  %v1594_v60 = vld [vmem:[%s2368_s0 + $0xe4] ss:$16 sps:$4 sm:$0xff]   ;;  %v1596_v61 = vld [vmem:[%s2368_s0 + $0xec] ss:$16 sps:$4 sm:$0xff]  }
  0x17   :  { %v1598_v62 = vld [vmem:[%s2368_s0 + $0xe0] ss:$16 sps:$4 sm:$0xff]   ;;  %v1599_v63 = vld [vmem:[%s2368_s0 + $0xe8] ss:$16 sps:$4 sm:$0xff]   ;;  %v1600_v0 = vld [vmem:[%s2368_s0 + $0x104] ss:$16 sps:$4 sm:$0xff]  }
  0x18   :  { %1367 = vmatpush3.bf16.msra.mxu0 %v1542_v22  ;;  %v1602_v1 = vld [vmem:[%s2368_s0 + $0x10c] ss:$16 sps:$4 sm:$0xff]   ;;  %v1604_v2 = vld [vmem:[%s2368_s0 + $0x100] ss:$16 sps:$4 sm:$0xff]   ;;  %v1605_v3 = vld [vmem:[%s2368_s0 + $0x108] ss:$16 sps:$4 sm:$0xff]  }
  0x19   :  { %1449 = vmatpush3.bf16.msra.mxu1 %v1543_v23  ;;  %1368 = vmatprep.subr.bf16.mxu0 %v1544_v24  ;;  %v1606_v4 = vld [vmem:[%s2368_s0 + $0x124] ss:$16 sps:$4 sm:$0xff]   ;;  %v1608_v5 = vld [vmem:[%s2368_s0 + $0x12c] ss:$16 sps:$4 sm:$0xff]   ;;  %v1610_v8 = vld [vmem:[%s2368_s0 + $0x120] ss:$16 sps:$4 sm:$0xff]  }
  0x1a   :  { %1450 = vmatprep.subr.bf16.mxu1 %v1545_v25  ;;  %v55_v6 = vld [vmem:[%s2368_s0 + $0x140] sm:$0xff]  ;;  %v56_v7 = vld [vmem:[%s2368_s0 + $0x148] sm:$0xff] }
  0x1b   :  { %v1611_v9 = vld [vmem:[%s2368_s0 + $0x128] ss:$16 sps:$4 sm:$0xff]   ;;  %v1220_v10 = vcombine.high %v55_v6, %v55_v6  ;;  %v1222_v11 = vcombine.high %v56_v7, %v56_v7  ;;  %v1219_v12 = vcombine.low %v55_v6, %v55_v6  ;;  %v1221_v13 = vcombine.low %v56_v7, %v56_v7  ;;  %v1945_v16 = vld [vmem:[%s2369_s2] ss:$0 sm:$0xff] }
  0x1c   :  { %1369 = vmatpush3.bf16.msra.mxu0 %v1546_v26 }
  0x1d   :  { %1451 = vmatpush3.bf16.msra.mxu1 %v1547_v27  ;;  %1370 = vmatprep.subr.bf16.mxu0 %v1548_v28 }
  0x1e   :  { %1452 = vmatprep.subr.bf16.mxu1 %v1549_v29 }
  0x20   :  { %1371 = vmatpush3.bf16.msra.mxu0 %v1550_v30 }
  0x21   :  { %1453 = vmatpush3.bf16.msra.mxu1 %v1551_v31 }
  0x23   :  { %567 = vmatmul.mubr.bf16.vlgmr.msra.gmra.mxu0 %v1552_v32 }
  0x24   :  { %687 = vmatmul.mubr.bf16.vlgmr.msra.gmra.mxu1 %v1555_v34  ;;  %574 = vmatprep.mubr.bf16.mxu0 %v1558_v36 }
  0x25   :  { %694 = vmatprep.mubr.bf16.mxu1 %v1560_v37 }
  0x2b   :  { %575 = vmatmul.mubr.bf16.gmra.mxu0 %v1562_v38 }
  0x2c   :  { %695 = vmatmul.mubr.bf16.gmra.mxu1 %v1563_v39  ;;  %582 = vmatprep.mubr.bf16.mxu0 %v1564_v40 }
  0x2d   :  { %702 = vmatprep.mubr.bf16.mxu1 %v1566_v41 }
  0x33   :  { %583 = vmatmul.mubr.bf16.gmra.mxu0 %v1568_v42 }
  0x34   :  { %703 = vmatmul.mubr.bf16.gmra.mxu1 %v1569_v43  ;;  %590 = vmatprep.mubr.bf16.mxu0 %v1570_v44 }
  0x35   :  { %710 = vmatprep.mubr.bf16.mxu1 %v1572_v45 }
  0x3b   :  { %591 = vmatmul.mubr.bf16.gmra.mxu0 %v1574_v46 }
  0x3c   :  { %711 = vmatmul.mubr.bf16.gmra.mxu1 %v1575_v47  ;;  %598 = vmatprep.mubr.bf16.mxu0 %v1576_v48 }
  0x3d   :  { %718 = vmatprep.mubr.bf16.mxu1 %v1578_v49 }
  0x43   :  { %599 = vmatmul.mubr.bf16.gmra.mxu0 %v1580_v50 }
  0x44   :  { %719 = vmatmul.mubr.bf16.gmra.mxu1 %v1581_v51  ;;  %606 = vmatprep.mubr.bf16.mxu0 %v1582_v52 }
  0x45   :  { %726 = vmatprep.mubr.bf16.mxu1 %v1584_v53 }
  0x4b   :  { %607 = vmatmul.mubr.bf16.gmra.mxu0 %v1586_v54 }
  0x4c   :  { %727 = vmatmul.mubr.bf16.gmra.mxu1 %v1587_v55  ;;  %614 = vmatprep.mubr.bf16.mxu0 %v1588_v56 }
  0x4d   :  { %734 = vmatprep.mubr.bf16.mxu1 %v1590_v57 }
  0x53   :  { %615 = vmatmul.mubr.bf16.gmra.mxu0 %v1592_v58 }
  0x54   :  { %735 = vmatmul.mubr.bf16.gmra.mxu1 %v1593_v59  ;;  %622 = vmatprep.mubr.bf16.mxu0 %v1594_v60 }
  0x55   :  { %742 = vmatprep.mubr.bf16.mxu1 %v1596_v61 }
  0x5b   :  { %623 = vmatmul.mubr.bf16.gmra.mxu0 %v1598_v62 }
  0x5c   :  { %743 = vmatmul.mubr.bf16.gmra.mxu1 %v1599_v63  ;;  %630 = vmatprep.mubr.bf16.mxu0 %v1600_v0 }
  0x5d   :  { %750 = vmatprep.mubr.bf16.mxu1 %v1602_v1 }
  0x63   :  { %631 = vmatmul.mubr.bf16.gmra.mxu0 %v1604_v2 }
  0x64   :  { %751 = vmatmul.mubr.bf16.gmra.mxu1 %v1605_v3  ;;  %638 = vmatprep.mubr.bf16.mxu0 %v1606_v4 }
  0x65   :  { %758 = vmatprep.mubr.bf16.mxu1 %v1608_v5 }
  0x6b   :  { %639 = vmatmul.mubr.bf16.gmra.mxu0 %v1610_v8 }
  0x6c   :  { %759 = vmatmul.mubr.bf16.gmra.mxu1 %v1611_v9  ;;  %646 = vmatprep.mubr.bf16.mxu0 %v1220_v10 }
  0x6d   :  { %766 = vmatprep.mubr.bf16.mxu1 %v1222_v11 }
  0x73   :  { %647 = vmatmul.mubr.bf16.gmra.mxu0 %v1219_v12 }
  0x74   :  { %767 = vmatmul.mubr.bf16.gmra.mxu1 %v1221_v13 }
  0xe3   :  { %v1372_v14 = vpop.f32.mrf.mxu0 }
  0xe4   :  { %v1454_v15 = vpop.f32.mrf.mxu1 }
  0xe5   :  { %v1373_v17 = vpop.f32.mrf.mxu0 }
  0xe6   :  { %v1374_v18 = vadd.f32 %v1373_v17, %v1372_v14  ;;  %v1455_v19 = vpop.f32.mrf.mxu1 }
  0xe7   :  { %v1375_v20 = vpop.f32.mrf.mxu0  ;;  %v1456_v22 = vadd.f32 %v1455_v19, %v1454_v15 }
  0xe8   :  { %v569_v21 = vadd.f32 %v1374_v18, %v1945_v16  ;;  %v1457_v23 = vpop.f32.mrf.mxu1 }
  0xe9   :  { %v1376_v24 = vpop.f32.mrf.mxu0 }
  0xea   :  { %v1948_v25 = vadd.f32 %v1456_v22, %v569_v21  ;;  %v1377_v26 = vadd.f32 %v1376_v24, %v1375_v20  ;;  %v1458_v27 = vpop.f32.mrf.mxu1 }
  0xeb   :  { %v1378_v28 = vpop.f32.mrf.mxu0  ;;  %v1459_v30 = vadd.f32 %v1458_v27, %v1457_v23 }
  0xec   :  { %vm774_vm0 = vcmp.gt.f32.partialorder %v1948_v25, 20.0  ;;  %v572_v29 = vadd.f32 %v1377_v26, %v1945_v16  ;;  %v1460_v31 = vpop.f32.mrf.mxu1 }
  0xed   :  { %v795_v32 = vsel %vm774_vm0, 0.0, %v1948_v25  ;;  %v1379_v33 = vpop.f32.mrf.mxu0 }
  0xee   :  { %v816_v34 = vmul.f32 1.442695, %v795_v32  ;;  %v1955_v35 = vadd.f32 %v1459_v30, %v572_v29  ;;  %v1380_v36 = vadd.f32 %v1379_v33, %v1378_v28  ;;  %v1461_v37 = vpop.f32.mrf.mxu1 }
  0xef   :  { %v1381_v38 = vpop.f32.mrf.mxu0  ;;  %v1462_v40 = vadd.f32 %v1461_v37, %v1460_v31 }
  0xf0   :  { %1616 = vpow2.f32 %v816_v34  ;;  %vm775_vm1 = vcmp.gt.f32.partialorder %v1955_v35, 20.0  ;;  %v577_v39 = vadd.f32 %v1380_v36, %v1945_v16  ;;  %v1463_v41 = vpop.f32.mrf.mxu1 }
  0xf1   :  { %v796_v42 = vsel %vm775_vm1, 0.0, %v1955_v35  ;;  %v1382_v43 = vpop.f32.mrf.mxu0 }
  0xf2   :  { %v818_v44 = vmul.f32 1.442695, %v796_v42  ;;  %v1962_v45 = vadd.f32 %v1462_v40, %v577_v39  ;;  %v1383_v46 = vadd.f32 %v1382_v43, %v1381_v38  ;;  %v1464_v47 = vpop.f32.mrf.mxu1 }
  0xf3   :  { %v1384_v48 = vpop.f32.mrf.mxu0  ;;  %v1465_v50 = vadd.f32 %v1464_v47, %v1463_v41 }
  0xf4   :  { %1618 = vpow2.f32 %v818_v44  ;;  %vm776_vm2 = vcmp.gt.f32.partialorder %v1962_v45, 20.0  ;;  %v580_v49 = vadd.f32 %v1383_v46, %v1945_v16  ;;  %v1466_v51 = vpop.f32.mrf.mxu1 }
  0xf5   :  { %v797_v52 = vsel %vm776_vm2, 0.0, %v1962_v45  ;;  %v1385_v53 = vpop.f32.mrf.mxu0 }
  0xf6   :  { %v820_v54 = vmul.f32 1.442695, %v797_v52  ;;  %v1969_v55 = vadd.f32 %v1465_v50, %v580_v49  ;;  %v1386_v56 = vadd.f32 %v1385_v53, %v1384_v48  ;;  %v1467_v57 = vpop.f32.mrf.mxu1 }
  0xf7   :  { %v1387_v58 = vpop.f32.mrf.mxu0  ;;  %v1468_v60 = vadd.f32 %v1467_v57, %v1466_v51 }
  0xf8   :  { %1620 = vpow2.f32 %v820_v54  ;;  %vm777_vm3 = vcmp.gt.f32.partialorder %v1969_v55, 20.0  ;;  %v585_v59 = vadd.f32 %v1386_v56, %v1945_v16  ;;  %v1469_v61 = vpop.f32.mrf.mxu1 }
  0xf9   :  { %v798_v62 = vsel %vm777_vm3, 0.0, %v1969_v55  ;;  %v1388_v63 = vpop.f32.mrf.mxu0 }
  0xfa   :  { %v822_v0 = vmul.f32 1.442695, %v798_v62  ;;  %v1976_v1 = vadd.f32 %v1468_v60, %v585_v59  ;;  %v1389_v2 = vadd.f32 %v1388_v63, %v1387_v58  ;;  %v1470_v3 = vpop.f32.mrf.mxu1 }
  0xfb   :  { %v1390_v4 = vpop.f32.mrf.mxu0  ;;  %v1471_v9 = vadd.f32 %v1470_v3, %v1469_v61 }
  0xfc   :  { %1622 = vpow2.f32 %v822_v0  ;;  %vm778_vm4 = vcmp.gt.f32.partialorder %v1976_v1, 20.0  ;;  %v588_v5 = vadd.f32 %v1389_v2, %v1945_v16  ;;  %v1472_v6 = vpop.f32.mrf.mxu1 }
  0xfd   :  { %v1980_v7 = vpop.eup %1616  ;;  %v799_v8 = vsel %vm778_vm4, 0.0, %v1976_v1  ;;  %v1391_v10 = vpop.f32.mrf.mxu0 }
  0xfe   :  { %v858_v11 = vadd.f32 1.0, %v1980_v7  ;;  %v824_v12 = vmul.f32 1.442695, %v799_v8  ;;  %v1473_v13 = vpop.f32.mrf.mxu1  ;;  %v1986_v14 = vadd.f32 %v1471_v9, %v588_v5  ;;  %v1392_v15 = vadd.f32 %v1391_v10, %v1390_v4 }
  0xff   :  { %v1393_v17 = vpop.f32.mrf.mxu0  ;;  %v1474_v21 = vadd.f32 %v1473_v13, %v1472_v6  ;;  %v861_v37 = vmul.f32 -0.5, %v1980_v7  ;;  %v864_v49 = vand.u32 2147483647, %v1980_v7 }
 0x100   :  { %1624 = vlog2.f32 %v858_v11  ;;  %v1475_v18 = vpop.f32.mrf.mxu1  ;;  %vm779_vm5 = vcmp.gt.f32.partialorder %v1986_v14, 20.0  ;;  %v593_v20 = vadd.f32 %v1392_v15, %v1945_v16 }
 0x101   :  { %v1988_v19 = vpop.eup %1618  ;;  %1626 = vpow2.f32 %v824_v12  ;;  %v1394_v22 = vpop.f32.mrf.mxu0  ;;  %v800_v26 = vsel %vm779_vm5, 0.0, %v1986_v14  ;;  %v862_v53 = vadd.f32 1.0, %v861_v37  ;;  %vm2023_vm8 = vcmp.lt.f32.partialorder %v864_v49, 0.0004427343 }
 0x102   :  { %v867_v23 = vadd.f32 1.0, %v1988_v19  ;;  %v1476_v24 = vpop.f32.mrf.mxu1  ;;  %v1996_v27 = vadd.f32 %v1474_v21, %v593_v20  ;;  %v1395_v28 = vadd.f32 %v1394_v22, %v1393_v17  ;;  %v826_v30 = vmul.f32 1.442695, %v800_v26 }
 0x103   :  { %v1396_v29 = vpop.f32.mrf.mxu0  ;;  %v1477_v34 = vadd.f32 %v1476_v24, %v1475_v18  ;;  %v870_v44 = vmul.f32 -0.5, %v1988_v19  ;;  %v873_v63 = vand.u32 2147483647, %v1988_v19  ;;  %v863_v13 = vmul.f32 %v1980_v7, %v862_v53 }
 0x104   :  { %1628 = vlog2.f32 %v867_v23  ;;  %v1478_v31 = vpop.f32.mrf.mxu1  ;;  %vm780_vm6 = vcmp.gt.f32.partialorder %v1996_v27, 20.0  ;;  %v596_v33 = vadd.f32 %v1395_v28, %v1945_v16 }
 0x105   :  { %v1998_v32 = vpop.eup %1620  ;;  %v1397_v36 = vpop.f32.mrf.mxu0  ;;  %1630 = vpow2.f32 %v826_v30  ;;  %v801_v40 = vsel %vm780_vm6, 0.0, %v1996_v27  ;;  %v871_v62 = vadd.f32 1.0, %v870_v44  ;;  %vm2037_vm10 = vcmp.lt.f32.partialorder %v873_v63, 0.0004427343 }
 0x106   :  { %v876_v38 = vadd.f32 1.0, %v1998_v32  ;;  %v1479_v39 = vpop.f32.mrf.mxu1  ;;  %v2007_v41 = vadd.f32 %v1477_v34, %v596_v33  ;;  %v1398_v42 = vadd.f32 %v1397_v36, %v1396_v29  ;;  %v828_v46 = vmul.f32 1.442695, %v801_v40 }
 0x107   :  { %v1399_v43 = vpop.f32.mrf.mxu0  ;;  %v1480_v51 = vadd.f32 %v1479_v39, %v1478_v31  ;;  %v879_v54 = vmul.f32 -0.5, %v1998_v32  ;;  %v872_v21 = vmul.f32 %v1988_v19, %v871_v62  ;;  %v882_v37 = vand.u32 2147483647, %v1998_v32 }
 0x108   :  { %1632 = vlog2.f32 %v876_v38  ;;  %v1481_v47 = vpop.f32.mrf.mxu1  ;;  %vm781_vm7 = vcmp.gt.f32.partialorder %v2007_v41, 20.0  ;;  %v601_v50 = vadd.f32 %v1398_v42, %v1945_v16 }
 0x109   :  { %v2010_v48 = vpop.eup %1622  ;;  %v1400_v52 = vpop.f32.mrf.mxu0  ;;  %1634 = vpow2.f32 %v828_v46  ;;  %v802_v58 = vsel %vm781_vm7, 0.0, %v2007_v41  ;;  %v880_v15 = vadd.f32 1.0, %v879_v54  ;;  %vm2079_vm13 = vcmp.lt.f32.partialorder %v882_v37, 0.0004427343 }
 0x10a   :  { %v885_v56 = vadd.f32 1.0, %v2010_v48  ;;  %v1482_v57 = vpop.f32.mrf.mxu1  ;;  %v2020_v59 = vadd.f32 %v1480_v51, %v601_v50  ;;  %v1401_v60 = vadd.f32 %v1400_v52, %v1399_v43  ;;  %v830_v0 = vmul.f32 1.442695, %v802_v58 }
 0x10b   :  { %v1402_v61 = vpop.f32.mrf.mxu0  ;;  %v1483_v11 = vadd.f32 %v1482_v57, %v1481_v47  ;;  %v888_v7 = vmul.f32 -0.5, %v2010_v48  ;;  %v881_v36 = vmul.f32 %v1998_v32, %v880_v15  ;;  %v891_v38 = vand.u32 2147483647, %v2010_v48 }
 0x10c   :  { %1636 = vlog2.f32 %v885_v56  ;;  %v1484_v2 = vpop.f32.mrf.mxu1  ;;  %vm782_vm9 = vcmp.gt.f32.partialorder %v2020_v59, 20.0  ;;  %v604_v5 = vadd.f32 %v1401_v60, %v1945_v16 }
 0x10d   :  { %v1625_v3 = vpop.eup %1624  ;;  %v1403_v6 = vpop.f32.mrf.mxu0  ;;  %1638 = vpow2.f32 %v830_v0  ;;  %v803_v10 = vsel %vm782_vm9, 0.0, %v2020_v59  ;;  %v889_v52 = vadd.f32 1.0, %v888_v7  ;;  %vm2084_vm14 = vcmp.lt.f32.partialorder %v891_v38, 0.0004427343 }
 0x10e   :  { %v2029_v8 = vpop.eup %1626  ;;  %v860_v9 = vmul.f32 0.6931472, %v1625_v3  ;;  %v1485_v12 = vpop.f32.mrf.mxu1  ;;  %v832_v18 = vmul.f32 1.442695, %v803_v10  ;;  %v2041_v23 = vadd.f32 %v1483_v11, %v604_v5  ;;  %v1404_v24 = vadd.f32 %v1403_v6, %v1402_v61 }
 0x10f   :  { %v894_v17 = vadd.f32 1.0, %v2029_v8  ;;  %v1405_v20 = vpop.f32.mrf.mxu0  ;;  %v1486_v30 = vadd.f32 %v1485_v12, %v1484_v2  ;;  %v897_v60 = vmul.f32 -0.5, %v2029_v8 }
 0x110   :  { %v1487_v26 = vpop.f32.mrf.mxu1  ;;  %v866_v29 = vsel %vm2023_vm8, %v863_v13, %v860_v9  ;;  %vm783_vm11 = vcmp.gt.f32.partialorder %v2041_v23, 20.0  ;;  %v609_v19 = vadd.f32 %v1404_v24, %v1945_v16  ;;  %v890_v9 = vmul.f32 %v2010_v48, %v889_v52 }
 0x111   :  { %v1629_v28 = vpop.eup %1628  ;;  %1640 = vlog2.f32 %v894_v17  ;;  %v1406_v31 = vpop.f32.mrf.mxu0  ;;  %v804_v39 = vsel %vm783_vm11, 0.0, %v2041_v23  ;;  %v1047_v32 = vsel %vm774_vm0, %v1948_v25, %v866_v29  ;;  %v900_v48 = vand.u32 2147483647, %v2029_v8 }
 0x112   :  { %v869_v33 = vmul.f32 0.6931472, %v1629_v28  ;;  %1642 = vpow2.f32 %v832_v18  ;;  %v1488_v34 = vpop.f32.mrf.mxu1  ;;  %v2054_v42 = vpop.eup %1630  ;;  %v834_v44 = vmul.f32 1.442695, %v804_v39  ;;  %v2058_v46 = vadd.f32 %v1486_v30, %v609_v19 }
 0x113   :  { %v1408_v40 = vpop.f32.mrf.mxu0  ;;  %v1407_v47 = vadd.f32 %v1406_v31, %v1405_v20  ;;  %v903_v53 = vadd.f32 1.0, %v2054_v42  ;;  %v1489_v61 = vadd.f32 %v1488_v34, %v1487_v26  ;;  %v906_v63 = vmul.f32 -0.5, %v2054_v42 }
 0x114   :  { %v875_v43 = vsel %vm2037_vm10, %v872_v21, %v869_v33  ;;  %v1490_v49 = vpop.f32.mrf.mxu1  ;;  %1644 = vpow2.f32 %v834_v44  ;;  %vm784_vm12 = vcmp.gt.f32.partialorder %v2058_v46, 20.0  ;;  %v898_v21 = vadd.f32 1.0, %v897_v60 }
 0x115   :  { %v1633_v50 = vpop.eup %1632  ;;  %v1048_v51 = vsel %vm775_vm1, %v1955_v35, %v875_v43  ;;  %v1409_v54 = vpop.f32.mrf.mxu0  ;;  %1646 = vlog2.f32 %v903_v53  ;;  %v805_v25 = vsel %vm784_vm12, 0.0, %v2058_v46  ;;  %v612_v2 = vadd.f32 %v1407_v47, %v1945_v16 }
 0x116   :  { %v1300_v56 = vpack.c.bf16 %v1048_v51, %v1047_v32  ;;  %v878_v57 = vmul.f32 0.6931472, %v1633_v50  ;;  %v1491_v58 = vpop.f32.mrf.mxu1  ;;  %v2072_v35 = vpop.eup %1634  ;;  %v836_v0 = vmul.f32 1.442695, %v805_v25  ;;  %v1410_v3 = vadd.f32 %v1409_v54, %v1408_v40 }
 0x117   :  { %v1411_v62 = vpop.f32.mrf.mxu0  ;;  %v912_v11 = vadd.f32 1.0, %v2072_v35  ;;  %v2091_v17 = vadd.f32 %v1489_v61, %v612_v2  ;;  %v907_v28 = vadd.f32 1.0, %v906_v63  ;;  %v909_v29 = vand.u32 2147483647, %v2054_v42 }
 0x118   :  { %1301 = vst [vmem:[%s2370_s3] sm:$0xff] %v1300_v56   ;;  %v1493_v4 = vpop.f32.mrf.mxu1  ;;  %v884_v13 = vsel %vm2079_vm13, %v881_v36, %v878_v57  ;;  %1648 = vpow2.f32 %v836_v0  ;;  %v617_v22 = vadd.f32 %v1410_v3, %v1945_v16  ;;  %v1492_v19 = vadd.f32 %v1491_v58, %v1490_v49 }
 0x119   :  { %v1637_v5 = vpop.eup %1636  ;;  %v1412_v12 = vpop.f32.mrf.mxu0  ;;  %1650 = vlog2.f32 %v912_v11  ;;  %v1049_v31 = vsel %vm776_vm2, %v1962_v45, %v884_v13  ;;  %vm785_vm15 = vcmp.gt.f32.partialorder %v2091_v17, 20.0  ;;  %v915_v38 = vmul.f32 -0.5, %v2072_v35 }
 0x11a   :  { %v887_v15 = vmul.f32 0.6931472, %v1637_v5  ;;  %v1494_v18 = vpop.f32.mrf.mxu1  ;;  %v2093_v20 = vpop.eup %1638  ;;  %v806_v39 = vsel %vm785_vm15, 0.0, %v2091_v17  ;;  %vm2116_vm0 = vcmp.lt.f32.partialorder %v900_v48, 0.0004427343  ;;  %v2120_v44 = vadd.f32 %v1492_v19, %v617_v22 }
 0x11b   :  { %v1414_v24 = vpop.f32.mrf.mxu0  ;;  %v921_v7 = vadd.f32 1.0, %v2093_v20  ;;  %v899_v49 = vmul.f32 %v2029_v8, %v898_v21  ;;  %v918_v50 = vand.u32 2147483647, %v2072_v35  ;;  %v924_v32 = vmul.f32 -0.5, %v2093_v20 }
 0x11c   :  { %v893_v26 = vsel %vm2084_vm14, %v890_v9, %v887_v15  ;;  %v2101_v30 = vpop.f32.mrf.mxu1  ;;  %vm786_vm1 = vcmp.gt.f32.partialorder %v2120_v44, 20.0  ;;  %v1413_v54 = vadd.f32 %v1412_v12, %v1411_v62  ;;  %v908_v57 = vmul.f32 %v2054_v42, %v907_v28 }
 0x11d   :  { %v1050_v33 = vsel %vm777_vm3, %v1969_v55, %v893_v26  ;;  %v1415_v34 = vpop.f32.mrf.mxu0  ;;  %1652 = vlog2.f32 %v921_v7  ;;  %v838_v55 = vmul.f32 1.442695, %v806_v39  ;;  %vm2131_vm2 = vcmp.lt.f32.partialorder %v909_v29, 0.0004427343 }
 0x11e   :  { %v1641_v36 = vpop.eup %1640  ;;  %v1305_v37 = vpack.c.bf16 %v1050_v33, %v1049_v31  ;;  %v1497_v40 = vpop.f32.mrf.mxu1  ;;  %v916_v8 = vadd.f32 1.0, %v915_v38  ;;  %v807_v61 = vsel %vm786_vm1, 0.0, %v2120_v44  ;;  %v620_v63 = vadd.f32 %v1413_v54, %v1945_v16 }
 0x11f   :  { %v2114_v43 = vpop.eup %1642  ;;  %v1417_v47 = vpop.f32.mrf.mxu0  ;;  %v896_v53 = vmul.f32 0.6931472, %v1641_v36  ;;  %1654 = vpow2.f32 %v838_v55  ;;  %v1495_v0 = vadd.f32 %v1494_v18, %v1493_v4  ;;  %v1416_v62 = vadd.f32 %v1415_v34, %v1414_v24 }
 0x120   :  { %1347 = vst [vmem:[%s2370_s3 + $0x8] sm:$0xff] %v1305_v37   ;;  %v930_v51 = vadd.f32 1.0, %v2114_v43  ;;  %v1499_v52 = vpop.f32.mrf.mxu1  ;;  %vm2141_vm3 = vcmp.lt.f32.partialorder %v918_v50, 0.0004427343  ;;  %v925_v5 = vadd.f32 1.0, %v924_v32  ;;  %v933_v18 = vmul.f32 -0.5, %v2114_v43 }
 0x121   :  { %v1418_v56 = vpop.f32.mrf.mxu0  ;;  %v2135_v25 = vpop.eup %1644  ;;  %v927_v6 = vand.u32 2147483647, %v2093_v20  ;;  %v902_v11 = vsel %vm2116_vm0, %v899_v49, %v896_v53  ;;  %v840_v13 = vmul.f32 1.442695, %v807_v61  ;;  %v2151_v4 = vadd.f32 %v1495_v0, %v620_v63 }
 0x122   :  { %1656 = vlog2.f32 %v930_v51  ;;  %v1500_v60 = vpop.f32.mrf.mxu1  ;;  %v1647_v3 = vpop.eup %1646  ;;  %v939_v9 = vadd.f32 1.0, %v2135_v25  ;;  %v936_v21 = vand.u32 2147483647, %v2114_v43  ;;  %v625_v48 = vadd.f32 %v1416_v62, %v1945_v16 }
 0x123   :  { %v1420_v2 = vpop.f32.mrf.mxu0  ;;  %v905_v12 = vmul.f32 0.6931472, %v1647_v3  ;;  %vm787_vm8 = vcmp.gt.f32.partialorder %v2151_v4, 20.0  ;;  %v1419_v28 = vadd.f32 %v1418_v56, %v1417_v47  ;;  %v1051_v31 = vsel %vm778_vm4, %v1976_v1, %v902_v11 }
 0x124   :  { %v2147_v10 = vpop.f32.mrf.mxu1  ;;  %1658 = vlog2.f32 %v939_v9  ;;  %v1498_v34 = vadd.f32 %v1497_v40, %v2101_v30  ;;  %v942_v39 = vmul.f32 -0.5, %v2135_v25  ;;  %v808_v45 = vsel %vm787_vm8, 0.0, %v2151_v4 }
 0x125   :  { %v1421_v15 = vpop.f32.mrf.mxu0  ;;  %v2158_v24 = vpop.eup %1648  ;;  %v911_v26 = vsel %vm2131_vm2, %v908_v57, %v905_v12  ;;  %1660 = vpow2.f32 %v840_v13  ;;  %v917_v1 = vmul.f32 %v2072_v35, %v916_v8  ;;  %v934_v47 = vadd.f32 1.0, %v933_v18 }
 0x126   :  { %v2156_v22 = vpop.f32.mrf.mxu1  ;;  %v1651_v7 = vpop.eup %1650  ;;  %v1052_v33 = vsel %vm779_vm5, %v1986_v14, %v911_v26  ;;  %v948_v19 = vadd.f32 1.0, %v2158_v24  ;;  %v842_v49 = vmul.f32 1.442695, %v808_v45  ;;  %v2176_v50 = vadd.f32 %v1498_v34, %v625_v48 }
 0x127   :  { %v1423_v29 = vpop.f32.mrf.mxu0  ;;  %v1310_v37 = vpack.c.bf16 %v1052_v33, %v1051_v31  ;;  %v914_v38 = vmul.f32 0.6931472, %v1651_v7  ;;  %vm2181_vm4 = vcmp.lt.f32.partialorder %v927_v6, 0.0004427343  ;;  %v628_v40 = vadd.f32 %v1419_v28, %v1945_v16 }
 0x128   :  { %v1505_v36 = vpop.f32.mrf.mxu1  ;;  %1662 = vlog2.f32 %v948_v19  ;;  %v1501_v51 = vadd.f32 %v1500_v60, %v1499_v52  ;;  %v926_v56 = vmul.f32 %v2093_v20, %v925_v5  ;;  %vm2189_vm5 = vcmp.lt.f32.partialorder %v936_v21, 0.0004427343 }
 0x129   :  { %v1424_v55 = vpop.f32.mrf.mxu0  ;;  %1348 = vst [vmem:[%s2370_s3 + $0x10] sm:$0xff] %v1310_v37   ;;  %v920_v35 = vsel %vm2141_vm3, %v917_v1, %v914_v38  ;;  %1664 = vpow2.f32 %v842_v49  ;;  %v943_v8 = vadd.f32 1.0, %v942_v39  ;;  %vm788_vm10 = vcmp.gt.f32.partialorder %v2176_v50, 20.0 }
 0x12a   :  { %v1506_v14 = vpop.f32.mrf.mxu1  ;;  %v1653_v32 = vpop.eup %1652  ;;  %v2194_v61 = vadd.f32 %v1501_v51, %v628_v40  ;;  %v935_v0 = vmul.f32 %v2114_v43, %v934_v47  ;;  %v809_v20 = vsel %vm788_vm10, 0.0, %v2176_v50  ;;  %v1422_v62 = vadd.f32 %v1421_v15, %v1420_v2 }
 0x12b   :  { %v1426_v53 = vpop.f32.mrf.mxu0  ;;  %v923_v54 = vmul.f32 0.6931472, %v1653_v32  ;;  %v1053_v5 = vsel %vm780_vm6, %v1996_v27, %v920_v35  ;;  %v1425_v11 = vadd.f32 %v1424_v55, %v1423_v29  ;;  %v844_v18 = vmul.f32 1.442695, %v809_v20 }
 0x12c   :  { %v1508_v57 = vpop.f32.mrf.mxu1  ;;  %v2196_v52 = vpop.eup %1654  ;;  %vm789_vm13 = vcmp.gt.f32.partialorder %v2194_v61, 20.0  ;;  %v944_v15 = vmul.f32 %v2135_v25, %v943_v8  ;;  %v945_v21 = vand.u32 2147483647, %v2135_v25  ;;  %v633_v26 = vadd.f32 %v1422_v62, %v1945_v16 }
 0x12d   :  { %v1427_v63 = vpop.f32.mrf.mxu0  ;;  %v929_v60 = vsel %vm2181_vm4, %v926_v56, %v923_v54  ;;  %v957_v9 = vadd.f32 1.0, %v2196_v52  ;;  %v810_v27 = vsel %vm789_vm13, 0.0, %v2194_v61  ;;  %v1504_v28 = vadd.f32 %v2156_v22, %v2147_v10 }
 0x12e   :  { %v1509_v3 = vpop.f32.mrf.mxu1  ;;  %v1054_v6 = vsel %vm781_vm7, %v2007_v41, %v929_v60  ;;  %v846_v48 = vmul.f32 1.442695, %v810_v27  ;;  %v951_v25 = vmul.f32 -0.5, %v2158_v24  ;;  %v636_v31 = vadd.f32 %v1425_v11, %v1945_v16 }
 0x12f   :  { %v1657_v42 = vpop.eup %1656  ;;  %v1429_v12 = vpop.f32.mrf.mxu0  ;;  %v1315_v43 = vpack.c.bf16 %v1054_v6, %v1053_v5  ;;  %1666 = vlog2.f32 %v957_v9  ;;  %v1507_v33 = vadd.f32 %v1506_v14, %v1505_v36  ;;  %v1428_v19 = vadd.f32 %v1427_v63, %v1426_v53 }
 0x130   :  { %v932_v13 = vmul.f32 0.6931472, %v1657_v42  ;;  %v2212_v2 = vpop.f32.mrf.mxu1  ;;  %1668 = vpow2.f32 %v844_v18  ;;  %v2231_v45 = vadd.f32 %v1504_v28, %v633_v26  ;;  %vm946_vm6 = vcmp.lt.f32.partialorder %v945_v21, 0.0004427343 }
 0x131   :  { %v1430_v41 = vpop.f32.mrf.mxu0  ;;  %1349 = vst [vmem:[%s2370_s3 + $0x18] sm:$0xff] %v1315_v43   ;;  %v1659_v7 = vpop.eup %1658  ;;  %1670 = vpow2.f32 %v846_v48  ;;  %v2236_v22 = vadd.f32 %v1507_v33, %v636_v31  ;;  %v960_v47 = vmul.f32 -0.5, %v2196_v52  ;;  %v641_v49 = vadd.f32 %v1428_v19, %v1945_v16 }
 0x132   :  { %v1512_v29 = vpop.f32.mrf.mxu1  ;;  %v2227_v37 = vpop.eup %1660  ;;  %v938_v38 = vsel %vm2189_vm5, %v935_v0, %v932_v13  ;;  %v941_v39 = vmul.f32 0.6931472, %v1659_v7  ;;  %vm790_vm7 = vcmp.gt.f32.partialorder %v2231_v45, 20.0  ;;  %v1510_v40 = vadd.f32 %v1509_v3, %v1508_v57 }
 0x133   :  { %v1432_v34 = vpop.f32.mrf.mxu0  ;;  %v966_v10 = vadd.f32 1.0, %v2227_v37  ;;  %v1055_v32 = vsel %vm782_vm9, %v2020_v59, %v938_v38  ;;  %v952_v54 = vadd.f32 1.0, %v951_v25  ;;  %v811_v56 = vsel %vm790_vm7, 0.0, %v2231_v45 }
 0x134   :  { %v2233_v55 = vpop.f32.mrf.mxu1  ;;  %v947_v36 = vsel %vm946_vm6, %v944_v15, %v941_v39  ;;  %vm791_vm14 = vcmp.gt.f32.partialorder %v2236_v22, 20.0  ;;  %v848_v59 = vmul.f32 1.442695, %v811_v56  ;;  %v2256_v63 = vadd.f32 %v1510_v40, %v641_v49 }
 0x135   :  { %v1433_v1 = vpop.f32.mrf.mxu0  ;;  %v1056_v30 = vsel %vm783_vm11, %v2041_v23, %v947_v36  ;;  %1672 = vlog2.f32 %v966_v10  ;;  %v1663_v53 = vpop.eup %1662  ;;  %v812_v23 = vsel %vm791_vm14, 0.0, %v2236_v22  ;;  %v1431_v57 = vadd.f32 %v1430_v41, %v1429_v12 }
 0x136   :  { %v1515_v14 = vpop.f32.mrf.mxu1  ;;  %v1320_v35 = vpack.c.bf16 %v1056_v30, %v1055_v32  ;;  %v2251_v8 = vpop.eup %1664  ;;  %v954_v0 = vand.u32 2147483647, %v2158_v24  ;;  %v961_v20 = vadd.f32 1.0, %v960_v47  ;;  %v950_v42 = vmul.f32 0.6931472, %v1663_v53 }
 0x137   :  { %v1435_v51 = vpop.f32.mrf.mxu0  ;;  %v975_v62 = vadd.f32 1.0, %v2251_v8  ;;  %1674 = vpow2.f32 %v848_v59  ;;  %v850_v5 = vmul.f32 1.442695, %v812_v23  ;;  %vm792_vm9 = vcmp.gt.f32.partialorder %v2256_v63, 20.0 }
 0x138   :  { %v1517_v58 = vpop.f32.mrf.mxu1  ;;  %1350 = vst [vmem:[%s2370_s3 + $0x20] sm:$0xff] %v1320_v35   ;;  %v953_v6 = vmul.f32 %v2158_v24, %v952_v54  ;;  %v963_v9 = vand.u32 2147483647, %v2196_v52  ;;  %v813_v11 = vsel %vm792_vm9, 0.0, %v2256_v63  ;;  %v644_v43 = vadd.f32 %v1431_v57, %v1945_v16 }
 0x139   :  { %v1436_v60 = vpop.f32.mrf.mxu0  ;;  %1676 = vlog2.f32 %v975_v62  ;;  %v852_v12 = vmul.f32 1.442695, %v813_v11  ;;  %v1513_v13 = vadd.f32 %v1512_v29, %v2212_v2  ;;  %vm2271_vm11 = vcmp.lt.f32.partialorder %v954_v0, 0.0004427343 }
 0x13a   :  { %v1518_v3 = vpop.f32.mrf.mxu1  ;;  %1678 = vpow2.f32 %v850_v5  ;;  %v962_v24 = vmul.f32 %v2196_v52, %v961_v20  ;;  %v1434_v21 = vadd.f32 %v1433_v1, %v1432_v34  ;;  %v956_v41 = vsel %vm2271_vm11, %v953_v6, %v950_v42 }
 0x13b   :  { %1680 = vpow2.f32 %v852_v12  ;;  %v2280_v26 = vadd.f32 %v1513_v13, %v644_v43  ;;  %vm964_vm0 = vcmp.lt.f32.partialorder %v963_v9, 0.0004427343  ;;  %v969_v2 = vmul.f32 -0.5, %v2227_v37 }
 0x13c   :  { %v1667_v18 = vpop.eup %1666  ;;  %v649_v29 = vadd.f32 %v1434_v21, %v1945_v16  ;;  %v978_v25 = vmul.f32 -0.5, %v2251_v8  ;;  %v1057_v31 = vsel %vm784_vm12, %v2058_v46, %v956_v41  ;;  %v1516_v19 = vadd.f32 %v1515_v14, %v2233_v55 }
 0x13d   :  { %v2276_v27 = vpop.eup %1668  ;;  %v959_v48 = vmul.f32 0.6931472, %v1667_v18  ;;  %vm793_vm2 = vcmp.gt.f32.partialorder %v2280_v26, 20.0  ;;  %v970_v39 = vadd.f32 1.0, %v969_v2  ;;  %v972_v46 = vand.u32 2147483647, %v2227_v37 }
 0x13e   :  { %v984_v28 = vadd.f32 1.0, %v2276_v27  ;;  %v2285_v7 = vpop.eup %1670  ;;  %v814_v10 = vsel %vm793_vm2, 0.0, %v2280_v26  ;;  %v2300_v1 = vadd.f32 %v1516_v19, %v649_v29  ;;  %v979_v55 = vadd.f32 1.0, %v978_v25 }
 0x13f   :  { %v965_v52 = vsel %vm964_vm0, %v962_v24, %v959_v48  ;;  %v993_v16 = vadd.f32 1.0, %v2285_v7  ;;  %v854_v36 = vmul.f32 1.442695, %v814_v10  ;;  %v981_v47 = vand.u32 2147483647, %v2251_v8 }
 0x140   :  { %v1058_v33 = vsel %vm785_vm15, %v2091_v17, %v965_v52  ;;  %1682 = vlog2.f32 %v984_v28  ;;  %vm794_vm12 = vcmp.gt.f32.partialorder %v2300_v1, 20.0  ;;  %v971_v32 = vmul.f32 %v2227_v37, %v970_v39 }
 0x141   :  { %v1325_v34 = vpack.c.bf16 %v1058_v33, %v1057_v31  ;;  %1684 = vlog2.f32 %v993_v16  ;;  %v815_v49 = vsel %vm794_vm12, 0.0, %v2300_v1  ;;  %vm973_vm15 = vcmp.lt.f32.partialorder %v972_v46, 0.0004427343 }
 0x142   :  { %v1673_v38 = vpop.eup %1672  ;;  %1686 = vpow2.f32 %v854_v36  ;;  %v856_v30 = vmul.f32 1.442695, %v815_v49  ;;  %v987_v51 = vmul.f32 -0.5, %v2276_v27  ;;  %v980_v58 = vmul.f32 %v2251_v8, %v979_v55 }
 0x143   :  { %1351 = vst [vmem:[%s2370_s3 + $0x28] sm:$0xff] %v1325_v34   ;;  %v968_v17 = vmul.f32 0.6931472, %v1673_v38  ;;  %vm982_vm3 = vcmp.lt.f32.partialorder %v981_v47, 0.0004427343  ;;  %v996_v59 = vmul.f32 -0.5, %v2285_v7 }
 0x144   :  { %v1675_v14 = vpop.eup %1674  ;;  %1688 = vpow2.f32 %v856_v30  ;;  %v988_v20 = vadd.f32 1.0, %v987_v51  ;;  %v990_v62 = vand.u32 2147483647, %v2276_v27 }
 0x145   :  { %v1002_v53 = vadd.f32 1.0, %v1675_v14  ;;  %v974_v54 = vsel %vm973_vm15, %v971_v32, %v968_v17  ;;  %v997_v5 = vadd.f32 1.0, %v996_v59  ;;  %v1005_v11 = vmul.f32 -0.5, %v1675_v14 }
 0x146   :  { %v1677_v40 = vpop.eup %1676  ;;  %v1059_v60 = vsel %vm786_vm1, %v2120_v44, %v974_v54  ;;  %v999_v44 = vand.u32 2147483647, %v2285_v7  ;;  %v989_v9 = vmul.f32 %v2276_v27, %v988_v20  ;;  %vm991_vm1 = vcmp.lt.f32.partialorder %v990_v62, 0.0004427343 }
 0x147   :  { %v1679_v35 = vpop.eup %1678  ;;  %v977_v56 = vmul.f32 0.6931472, %v1677_v40  ;;  %1690 = vlog2.f32 %v1002_v53  ;;  %v998_v13 = vmul.f32 %v2285_v7, %v997_v5  ;;  %v1006_v21 = vadd.f32 1.0, %v1005_v11 }
 0x148   :  { %v1011_v23 = vadd.f32 1.0, %v1679_v35  ;;  %v2315_v57 = vpop.eup %1680  ;;  %v1014_v18 = vmul.f32 -0.5, %v1679_v35  ;;  %v1008_v48 = vand.u32 2147483647, %v1675_v14  ;;  %v1017_v7 = vand.u32 2147483647, %v1679_v35 }
 0x149   :  { %v983_v37 = vsel %vm982_vm3, %v980_v58, %v977_v56  ;;  %v1020_v3 = vadd.f32 1.0, %v2315_v57  ;;  %v1007_v19 = vmul.f32 %v1675_v14, %v1006_v21  ;;  %v1023_v38 = vmul.f32 -0.5, %v2315_v57 }
 0x14a   :  { %v1060_v0 = vsel %vm787_vm8, %v2151_v4, %v983_v37  ;;  %1692 = vlog2.f32 %v1011_v23  ;;  %vm1000_vm8 = vcmp.lt.f32.partialorder %v999_v44, 0.0004427343  ;;  %v1015_v52 = vadd.f32 1.0, %v1014_v18 }
 0x14b   :  { %v1330_v8 = vpack.c.bf16 %v1060_v0, %v1059_v60  ;;  %1694 = vlog2.f32 %v1020_v3  ;;  %vm1009_vm4 = vcmp.lt.f32.partialorder %v1008_v48, 0.0004427343  ;;  %vm1018_vm5 = vcmp.lt.f32.partialorder %v1017_v7, 0.0004427343 }
 0x14c   :  { %v1016_v16 = vmul.f32 %v1679_v35, %v1015_v52  ;;  %v1024_v47 = vadd.f32 1.0, %v1023_v38  ;;  %v1026_v14 = vand.u32 2147483647, %v2315_v57 }
 0x14d   :  { %v1683_v42 = vpop.eup %1682  ;;  %1352 = vst [vmem:[%s2370_s3 + $0x30] sm:$0xff] %v1330_v8  }
 0x14e   :  { %v986_v6 = vmul.f32 0.6931472, %v1683_v42  ;;  %v1685_v4 = vpop.eup %1684 }
 0x14f   :  { %v995_v43 = vmul.f32 0.6931472, %v1685_v4  ;;  %v1687_v15 = vpop.eup %1686 }
 0x150   :  { %v992_v12 = vsel %vm991_vm1, %v989_v9, %v986_v6  ;;  %v1029_v2 = vadd.f32 1.0, %v1687_v15  ;;  %v1032_v17 = vmul.f32 -0.5, %v1687_v15  ;;  %v1035_v40 = vand.u32 2147483647, %v1687_v15 }
 0x151   :  { %v1001_v24 = vsel %vm1000_vm8, %v998_v13, %v995_v43  ;;  %v1061_v41 = vsel %vm788_vm10, %v2176_v50, %v992_v12  ;;  %v1689_v28 = vpop.eup %1688  ;;  %vm1027_vm10 = vcmp.lt.f32.partialorder %v1026_v14, 0.0004427343 }
 0x152   :  { %v1062_v27 = vsel %vm789_vm13, %v2194_v61, %v1001_v24  ;;  %1696 = vlog2.f32 %v1029_v2  ;;  %v1038_v31 = vadd.f32 1.0, %v1689_v28  ;;  %v1041_v49 = vmul.f32 -0.5, %v1689_v28 }
 0x153   :  { %v1335_v29 = vpack.c.bf16 %v1062_v27, %v1061_v41  ;;  %v1033_v30 = vadd.f32 1.0, %v1032_v17  ;;  %vm1036_vm13 = vcmp.lt.f32.partialorder %v1035_v40, 0.0004427343 }
 0x154   :  { %v1691_v25 = vpop.eup %1690  ;;  %1698 = vlog2.f32 %v1038_v31  ;;  %v1042_v51 = vadd.f32 1.0, %v1041_v49 }
 0x155   :  { %1353 = vst [vmem:[%s2370_s3 + $0x38] sm:$0xff] %v1335_v29   ;;  %v1004_v33 = vmul.f32 0.6931472, %v1691_v25  ;;  %v1034_v56 = vmul.f32 %v1687_v15, %v1033_v30 }
 0x156   :  { %v1043_v37 = vmul.f32 %v1689_v28, %v1042_v51 }
 0x157   :  { %v1693_v50 = vpop.eup %1692  ;;  %v1010_v34 = vsel %vm1009_vm4, %v1007_v19, %v1004_v33 }
 0x158   :  { %v1013_v61 = vmul.f32 0.6931472, %v1693_v50  ;;  %v1063_v10 = vsel %vm790_vm7, %v2231_v45, %v1010_v34  ;;  %v1695_v55 = vpop.eup %1694  ;;  %v1025_v45 = vmul.f32 %v2315_v57, %v1024_v47 }
 0x159   :  { %v1022_v32 = vmul.f32 0.6931472, %v1695_v55 }
 0x15a   :  { %v1019_v39 = vsel %vm1018_vm5, %v1016_v16, %v1013_v61 }
 0x15b   :  { %v1064_v46 = vsel %vm791_vm14, %v2236_v22, %v1019_v39  ;;  %v1044_v22 = vand.u32 2147483647, %v1689_v28  ;;  %v1028_v35 = vsel %vm1027_vm10, %v1025_v45, %v1022_v32 }
 0x15c   :  { %v1340_v36 = vpack.c.bf16 %v1064_v46, %v1063_v10  ;;  %v1065_v60 = vsel %vm792_vm9, %v2256_v63, %v1028_v35 }
 0x15d   :  { %vm1045_vm6 = vcmp.lt.f32.partialorder %v1044_v22, 0.0004427343 }
 0x15e   :  { %1354 = vst [vmem:[%s2370_s3 + $0x40] sm:$0xff] %v1340_v36  }
 0x15f   :  { %v1697_v53 = vpop.eup %1696 }
 0x160   :  { %v1031_v54 = vmul.f32 0.6931472, %v1697_v53 }
 0x161   :  { %v1699_v58 = vpop.eup %1698 }
 0x162   :  { %v1037_v59 = vsel %vm1036_vm13, %v1034_v56, %v1031_v54  ;;  %v1040_v23 = vmul.f32 0.6931472, %v1699_v58 }
 0x163   :  { %v1066_v57 = vsel %vm793_vm2, %v2280_v26, %v1037_v59 }
 0x164   :  { %v1345_v0 = vpack.c.bf16 %v1066_v57, %v1065_v60  ;;  %v1046_v20 = vsel %vm1045_vm6, %v1043_v37, %v1040_v23 }
 0x165   :  { %v1067_v8 = vsel %vm794_vm12, %v2300_v1, %v1046_v20 }
 0x166   :  { %1355 = vst [vmem:[%s2370_s3 + $0x48] sm:$0xff] %v1345_v0   ;;  %v1296_v62 = vpack.c.bf16 %v1067_v8, %v1067_v8 }
 0x168   :  { %1173 = vst [vmem:[%s2370_s3 + $0x50] sm:$0xf] %v1296_v62 }

// kernel: dqn_forward.6
= control target key start
LH: loop header
LB: loop body
LE: loop exit
PB: predicated region body
PF: predicated region fallthrough
CT: control target
= control target key end

     0   :  { %v1540_v24 = vmov 0.0   ;;  %vm1541_vm0 = vmmov 0   ;;  %s2064_s1 = inlined_call_operand.vmem [shape: bf16[640,128], index: 1, kind: input, shape index: {}]   ;;  %s2065_s0 = inlined_call_operand.vmem [shape: bf16[104,640], index: 0, kind: input, shape index: {}]   ;;  %s2066_s2 = inlined_call_operand.vmem [shape: f32[1,128], index: 2, kind: input, shape index: {}]   ;;  %s2067_s3 = inlined_call_operand.vmem [shape: bf16[104,128], index: 3, kind: output, shape index: {}]  }
   0x1   :  { %v1401_v0 = vld [vmem:[%s2064_s1 + $0x78] sm:$0xff]   ;;  %v1403_v2 = vld [vmem:[%s2064_s1 + $0x70] sm:$0xff]   ;;  %v1405_v4 = vld [vmem:[%s2064_s1 + $0x68] sm:$0xff]  }
   0x2   :  { %v1402_v1 = vld [vmem:[%s2064_s1 + $0x38] sm:$0xff]   ;;  %1208 = vmatprep.subr.bf16.mxu0 %v1401_v0  ;;  %1383 = vmatprep.subr.bf16.mxu1 %v1401_v0  ;;  %v1404_v3 = vld [vmem:[%s2064_s1 + $0x30] sm:$0xff]   ;;  %v1406_v5 = vld [vmem:[%s2064_s1 + $0x28] sm:$0xff]  }
   0x3   :  { %1209 = vmatpush3.bf16.msra.mxu0 %v1402_v1  ;;  %1391 = vmatpush3.bf16.msra.mxu1 %v1402_v1  ;;  %v1407_v6 = vld [vmem:[%s2064_s1 + $0x60] sm:$0xff]   ;;  %v1409_v8 = vld [vmem:[%s2064_s1 + $0x58] sm:$0xff]   ;;  %v1411_v10 = vld [vmem:[%s2064_s1 + $0x50] sm:$0xff]  }
   0x4   :  { %1210 = vmatprep.subr.bf16.mxu0 %v1403_v2  ;;  %1384 = vmatprep.subr.bf16.mxu1 %v1403_v2  ;;  %v1408_v7 = vld [vmem:[%s2064_s1 + $0x20] sm:$0xff]   ;;  %v1410_v9 = vld [vmem:[%s2064_s1 + $0x18] sm:$0xff]   ;;  %v1412_v13 = vld [vmem:[%s2064_s1 + $0x10] sm:$0xff]  }
   0x5   :  { %v1419_v11 = vld [vmem:[%s2065_s0 + $0x4] ss:$20 sps:$4 sm:$0xff]   ;;  %v1413_v14 = vld [vmem:[%s2064_s1 + $0x48] sm:$0xff]   ;;  %v1417_v18 = vld [vmem:[%s2065_s0] ss:$20 sps:$4 sm:$0xff]  }
   0x6   :  { %v1422_v12 = vld [vmem:[%s2065_s0 + $0xa4] ss:$20 sps:$4 sm:$0xff]   ;;  %587 = vmatprep.mubr.bf16.mxu0 %v1419_v11  ;;  %v1414_v15 = vld [vmem:[%s2064_s1 + $0x8] sm:$0xff]   ;;  %v1420_v19 = vld [vmem:[%s2065_s0 + $0xa0] ss:$20 sps:$4 sm:$0xff]  }
   0x7   :  { %1211 = vmatpush3.bf16.msra.mxu0 %v1404_v3  ;;  %1392 = vmatpush3.bf16.msra.mxu1 %v1404_v3  ;;  %v1415_v16 = vld [vmem:[%s2064_s1 + $0x40] sm:$0xff]   ;;  %v1423_v20 = vld [vmem:[%s2064_s1 + $0xf8] sm:$0xff]   ;;  %v1426_v23 = vld [vmem:[%s2064_s1 + $0xf0] sm:$0xff]  }
   0x8   :  { %1212 = vmatprep.subr.bf16.mxu0 %v1405_v4  ;;  %1385 = vmatprep.subr.bf16.mxu1 %v1405_v4  ;;  %v1416_v17 = vld [vmem:[%s2064_s1] sm:$0xff]   ;;  %v1424_v21 = vld [vmem:[%s2064_s1 + $0xb8] sm:$0xff]   ;;  %v1427_v27 = vld [vmem:[%s2064_s1 + $0xb0] sm:$0xff]  }
   0x9   :  { %619 = vmatprep.mubr.bf16.mxu1 %v1422_v12  ;;  %v1425_v22 = vld [vmem:[%s2064_s1 + $0x138] sm:$0xff]   ;;  %v1429_v25 = vld [vmem:[%s2065_s0 + $0x2c] ss:$20 sps:$4 sm:$0xff]   ;;  %v1428_v28 = vld [vmem:[%s2064_s1 + $0x130] sm:$0xff]  }
   0xa   :  { %v1433_v26 = vld [vmem:[%s2065_s0 + $0xcc] ss:$20 sps:$4 sm:$0xff]   ;;  %v1431_v29 = vld [vmem:[%s2065_s0 + $0x28] ss:$20 sps:$4 sm:$0xff]   ;;  %v51_v33 = vld [vmem:[%s2065_s0 + $0xf0] sm:$0xff] }
   0xb   :  { %1213 = vmatpush3.bf16.msra.mxu0 %v1406_v5  ;;  %1393 = vmatpush3.bf16.msra.mxu1 %v1406_v5  ;;  %v1432_v30 = vld [vmem:[%s2064_s1 + $0xe8] sm:$0xff]   ;;  %v1438_v35 = vld [vmem:[%s2064_s1 + $0xe0] sm:$0xff]   ;;  %v1103_v37 = vcombine.high %v51_v33, %v51_v33  ;;  %v1444_v40 = vld [vmem:[%s2064_s1 + $0xd8] sm:$0xff]   ;;  %v1102_v43 = vcombine.low %v51_v33, %v51_v33 }
   0xc   :  { %1214 = vmatprep.subr.bf16.mxu0 %v1407_v6  ;;  %1386 = vmatprep.subr.bf16.mxu1 %v1407_v6  ;;  %v1435_v31 = vld [vmem:[%s2064_s1 + $0xa8] sm:$0xff]   ;;  %v1439_v38 = vld [vmem:[%s2064_s1 + $0xa0] sm:$0xff]   ;;  %v1446_v42 = vld [vmem:[%s2064_s1 + $0x98] sm:$0xff]  }
   0xd   :  { %v1437_v32 = vld [vmem:[%s2065_s0 + $0xc8] ss:$20 sps:$4 sm:$0xff]   ;;  %v1440_v39 = vld [vmem:[%s2064_s1 + $0x120] sm:$0xff]   ;;  %v1449_v45 = vld [vmem:[%s2064_s1 + $0xd0] sm:$0xff]  }
   0xe   :  { %v1436_v34 = vld [vmem:[%s2064_s1 + $0x128] sm:$0xff]   ;;  %v1443_v41 = vld [vmem:[%s2065_s0 + $0x50] ss:$20 sps:$4 sm:$0xff]   ;;  %v1447_v44 = vld [vmem:[%s2064_s1 + $0x118] sm:$0xff]  }
   0xf   :  { %1215 = vmatpush3.bf16.msra.mxu0 %v1408_v7  ;;  %1394 = vmatpush3.bf16.msra.mxu1 %v1408_v7  ;;  %v1441_v36 = vld [vmem:[%s2065_s0 + $0x54] ss:$20 sps:$4 sm:$0xff]   ;;  %v1452_v46 = vld [vmem:[%s2065_s0 + $0x7c] ss:$20 sps:$4 sm:$0xff]   ;;  %v1463_v47 = vld [vmem:[%s2065_s0 + $0xc] ss:$20 sps:$4 sm:$0xff]  }
  0x10   :  { %1216 = vmatprep.subr.bf16.mxu0 %v1409_v8  ;;  %1387 = vmatprep.subr.bf16.mxu1 %v1409_v8  ;;  %v1450_v48 = vld [vmem:[%s2064_s1 + $0x90] sm:$0xff]   ;;  %v1455_v50 = vld [vmem:[%s2064_s1 + $0xc8] sm:$0xff]   ;;  %v1458_v54 = vld [vmem:[%s2064_s1 + $0xc0] sm:$0xff]  }
  0x11   :  { %v1451_v49 = vld [vmem:[%s2064_s1 + $0x110] sm:$0xff]   ;;  %v1454_v51 = vld [vmem:[%s2065_s0 + $0x78] ss:$20 sps:$4 sm:$0xff]   ;;  %v1459_v55 = vld [vmem:[%s2064_s1 + $0x80] sm:$0xff]  }
  0x12   :  { %v1456_v52 = vld [vmem:[%s2064_s1 + $0x88] sm:$0xff]   ;;  %v1460_v56 = vld [vmem:[%s2064_s1 + $0x100] sm:$0xff]   ;;  %v1469_v62 = vld [vmem:[%s2065_s0 + $0x5c] ss:$20 sps:$4 sm:$0xff]  }
  0x13   :  { %1217 = vmatpush3.bf16.msra.mxu0 %v1410_v9  ;;  %1395 = vmatpush3.bf16.msra.mxu1 %v1410_v9  ;;  %v1457_v53 = vld [vmem:[%s2064_s1 + $0x108] sm:$0xff]   ;;  %v1464_v58 = vld [vmem:[%s2065_s0 + $0x10] ss:$20 sps:$4 sm:$0xff]   ;;  %v1472_v0 = vld [vmem:[%s2065_s0 + $0x60] ss:$20 sps:$4 sm:$0xff]  }
  0x14   :  { %1218 = vmatprep.subr.bf16.mxu0 %v1411_v10  ;;  %1388 = vmatprep.subr.bf16.mxu1 %v1411_v10  ;;  %v1461_v57 = vld [vmem:[%s2065_s0 + $0x8] ss:$20 sps:$4 sm:$0xff]   ;;  %v1467_v60 = vld [vmem:[%s2065_s0 + $0x30] ss:$20 sps:$4 sm:$0xff]   ;;  %v1468_v61 = vld [vmem:[%s2065_s0 + $0x38] ss:$20 sps:$4 sm:$0xff]  }
  0x15   :  { %v1465_v59 = vld [vmem:[%s2065_s0 + $0x34] ss:$20 sps:$4 sm:$0xff]   ;;  %v1471_v63 = vld [vmem:[%s2065_s0 + $0x58] ss:$20 sps:$4 sm:$0xff]   ;;  %v1480_v6 = vld [vmem:[%s2065_s0 + $0xb0] ss:$20 sps:$4 sm:$0xff]  }
  0x16   :  { %v1473_v1 = vld [vmem:[%s2065_s0 + $0x84] ss:$20 sps:$4 sm:$0xff]   ;;  %v1475_v2 = vld [vmem:[%s2065_s0 + $0x80] ss:$20 sps:$4 sm:$0xff]   ;;  %v1476_v3 = vld [vmem:[%s2065_s0 + $0x88] ss:$20 sps:$4 sm:$0xff]  }
  0x17   :  { %1219 = vmatpush3.bf16.msra.mxu0 %v1412_v13  ;;  %1396 = vmatpush3.bf16.msra.mxu1 %v1412_v13  ;;  %v1477_v4 = vld [vmem:[%s2065_s0 + $0xac] ss:$20 sps:$4 sm:$0xff]   ;;  %v1479_v5 = vld [vmem:[%s2065_s0 + $0xa8] ss:$20 sps:$4 sm:$0xff]   ;;  %v1483_v9 = vld [vmem:[%s2065_s0 + $0xd0] ss:$20 sps:$4 sm:$0xff]  }
  0x18   :  { %1220 = vmatprep.subr.bf16.mxu0 %v1413_v14  ;;  %1389 = vmatprep.subr.bf16.mxu1 %v1413_v14  ;;  %v1481_v7 = vld [vmem:[%s2065_s0 + $0xd4] ss:$20 sps:$4 sm:$0xff]   ;;  %v52_v8 = vld [vmem:[%s2065_s0 + $0xf8] sm:$0xff]  ;;  %v1487_v13 = vld [vmem:[%s2065_s0 + $0x100] ss:$0 sps:$4 sm:$0xff]  }
  0x19   :  { %v1484_v10 = vld [vmem:[%s2065_s0 + $0xd8] ss:$20 sps:$4 sm:$0xff]   ;;  %v1105_v11 = vcombine.high %v52_v8, %v52_v8  ;;  %v1104_v12 = vcombine.low %v52_v8, %v52_v8 }
  0x1b   :  { %1221 = vmatpush3.bf16.msra.mxu0 %v1414_v15  ;;  %1397 = vmatpush3.bf16.msra.mxu1 %v1414_v15 }
  0x1c   :  { %1222 = vmatprep.subr.bf16.mxu0 %v1415_v16  ;;  %1390 = vmatprep.subr.bf16.mxu1 %v1415_v16 }
  0x1f   :  { %1223 = vmatpush3.bf16.msra.mxu0 %v1416_v17  ;;  %1398 = vmatpush3.bf16.msra.mxu1 %v1416_v17 }
  0x20   :  { %1266 = vmatprep.subr.bf16.mxu1 %v1423_v20  ;;  %1339 = vmatprep.subr.bf16.mxu0 %v1540_v24 }
  0x22   :  { %588 = vmatmul.mubr.bf16.vlgmr.msra.gmra.mxu0 %v1417_v18  ;;  %620 = vmatmul.mubr.bf16.vlgmr.msra.gmra.mxu1 %v1420_v19 }
  0x23   :  { %1267 = vmatpush3.bf16.msra.mxu1 %v1424_v21  ;;  %1340 = vmatpush3.bf16.msra.mxu0 %v1425_v22 }
  0x24   :  { %1268 = vmatprep.subr.bf16.mxu1 %v1426_v23  ;;  %1341 = vmatprep.subr.bf16.mxu0 %v1540_v24 }
  0x25   :  { %595 = vmatprep.mubr.bf16.mxu0 %v1429_v25  ;;  %627 = vmatprep.mubr.bf16.mxu1 %v1433_v26 }
  0x27   :  { %1269 = vmatpush3.bf16.msra.mxu1 %v1427_v27  ;;  %1342 = vmatpush3.bf16.msra.mxu0 %v1428_v28 }
  0x28   :  { %1270 = vmatprep.subr.bf16.mxu1 %v1432_v30  ;;  %1343 = vmatprep.subr.bf16.mxu0 %v1540_v24 }
  0x2a   :  { %596 = vmatmul.mubr.bf16.gmra.mxu0 %v1431_v29  ;;  %628 = vmatmul.mubr.bf16.gmra.mxu1 %v1437_v32 }
  0x2b   :  { %1271 = vmatpush3.bf16.msra.mxu1 %v1435_v31  ;;  %1344 = vmatpush3.bf16.msra.mxu0 %v1436_v34 }
  0x2c   :  { %1272 = vmatprep.subr.bf16.mxu1 %v1438_v35  ;;  %1345 = vmatprep.subr.bf16.mxu0 %v1540_v24 }
  0x2d   :  { %603 = vmatprep.mubr.bf16.mxu0 %v1441_v36  ;;  %635 = vmatprep.mubr.bf16.mxu1 %v1103_v37 }
  0x2f   :  { %1273 = vmatpush3.bf16.msra.mxu1 %v1439_v38  ;;  %1346 = vmatpush3.bf16.msra.mxu0 %v1440_v39 }
  0x30   :  { %1274 = vmatprep.subr.bf16.mxu1 %v1444_v40  ;;  %1347 = vmatprep.subr.bf16.mxu0 %v1540_v24 }
  0x32   :  { %604 = vmatmul.mubr.bf16.gmra.mxu0 %v1443_v41  ;;  %636 = vmatmul.mubr.bf16.gmra.mxu1 %v1102_v43 }
  0x33   :  { %1275 = vmatpush3.bf16.msra.mxu1 %v1446_v42  ;;  %1348 = vmatpush3.bf16.msra.mxu0 %v1447_v44 }
  0x34   :  { %1276 = vmatprep.subr.bf16.mxu1 %v1449_v45  ;;  %1349 = vmatprep.subr.bf16.mxu0 %v1540_v24 }
  0x35   :  { %611 = vmatprep.mubr.bf16.mxu0 %v1452_v46  ;;  %675 = vmatprep.mubr.bf16.mxu1 %v1463_v47 }
  0x37   :  { %1277 = vmatpush3.bf16.msra.mxu1 %v1450_v48  ;;  %1350 = vmatpush3.bf16.msra.mxu0 %v1451_v49 }
  0x38   :  { %1278 = vmatprep.subr.bf16.mxu1 %v1455_v50  ;;  %1351 = vmatprep.subr.bf16.mxu0 %v1540_v24  ;;  %v1824_v50 = vld [vmem:[%s2066_s2] ss:$0 sm:$0xff] }
  0x3a   :  { %612 = vmatmul.mubr.bf16.gmra.mxu0 %v1454_v51 }
  0x3b   :  { %1279 = vmatpush3.bf16.msra.mxu1 %v1456_v52  ;;  %1352 = vmatpush3.bf16.msra.mxu0 %v1457_v53 }
  0x3c   :  { %1280 = vmatprep.subr.bf16.mxu1 %v1458_v54  ;;  %1353 = vmatprep.subr.bf16.mxu0 %v1540_v24 }
  0x3d   :  { %1355 = vmatprep.mubr.msk.bf16.mxu0 %vm1541_vm0, %v1540_v24 }
  0x3f   :  { %1281 = vmatpush3.bf16.msra.mxu1 %v1459_v55  ;;  %1354 = vmatpush3.bf16.msra.mxu0 %v1460_v56 }
  0x42   :  { %676 = vmatmul.mubr.bf16.vlgmr.msra.gmra.mxu1 %v1461_v57  ;;  %1356 = vmatmul.mubr.bf16.vlgmr.msra.gmra.mxu0 %v1464_v58 }
  0x43   :  { %683 = vmatprep.mubr.bf16.mxu1 %v1465_v59  ;;  %1359 = vmatprep.mubr.msk.bf16.mxu0 %vm1541_vm0, %v1540_v24 }
  0x4a   :  { %684 = vmatmul.mubr.bf16.gmra.mxu1 %v1467_v60  ;;  %1360 = vmatmul.mubr.bf16.gmra.mxu0 %v1468_v61 }
  0x4b   :  { %691 = vmatprep.mubr.bf16.mxu1 %v1469_v62  ;;  %1363 = vmatprep.mubr.msk.bf16.mxu0 %vm1541_vm0, %v1540_v24 }
  0x52   :  { %692 = vmatmul.mubr.bf16.gmra.mxu1 %v1471_v63  ;;  %1364 = vmatmul.mubr.bf16.gmra.mxu0 %v1472_v0 }
  0x53   :  { %699 = vmatprep.mubr.bf16.mxu1 %v1473_v1  ;;  %1367 = vmatprep.mubr.msk.bf16.mxu0 %vm1541_vm0, %v1540_v24 }
  0x5a   :  { %700 = vmatmul.mubr.bf16.gmra.mxu1 %v1475_v2  ;;  %1368 = vmatmul.mubr.bf16.gmra.mxu0 %v1476_v3 }
  0x5b   :  { %707 = vmatprep.mubr.bf16.mxu1 %v1477_v4  ;;  %1371 = vmatprep.mubr.msk.bf16.mxu0 %vm1541_vm0, %v1540_v24 }
  0x62   :  { %708 = vmatmul.mubr.bf16.gmra.mxu1 %v1479_v5  ;;  %1372 = vmatmul.mubr.bf16.gmra.mxu0 %v1480_v6 }
  0x63   :  { %715 = vmatprep.mubr.bf16.mxu1 %v1481_v7  ;;  %1375 = vmatprep.mubr.msk.bf16.mxu0 %vm1541_vm0, %v1540_v24 }
  0x6a   :  { %716 = vmatmul.mubr.bf16.gmra.mxu1 %v1483_v9  ;;  %1376 = vmatmul.mubr.bf16.gmra.mxu0 %v1484_v10 }
  0x6b   :  { %723 = vmatprep.mubr.bf16.mxu1 %v1105_v11  ;;  %1379 = vmatprep.mubr.msk.bf16.mxu0 %vm1541_vm0, %v1540_v24 }
  0x72   :  { %724 = vmatmul.mubr.bf16.gmra.mxu1 %v1104_v12  ;;  %1380 = vmatmul.mubr.bf16.gmra.mxu0 %v1487_v13 }
  0xe2   :  { %v1224_v14 = vpop.f32.mrf.mxu0  ;;  %v1248_v15 = vpop.f32.mrf.mxu1 }
  0xe4   :  { %v1225_v16 = vpop.f32.mrf.mxu0  ;;  %v1249_v17 = vpop.f32.mrf.mxu1 }
  0xe5   :  { %v1803_v18 = vadd.f32 %v1249_v17, %v1248_v15  ;;  %v1226_v47 = vadd.f32 %v1225_v16, %v1224_v14 }
  0xe6   :  { %v1227_v19 = vpop.f32.mrf.mxu0  ;;  %v1251_v20 = vpop.f32.mrf.mxu1 }
  0xe7   :  { %v590_v53 = vadd.f32 %v1226_v47, %v1824_v50 }
  0xe8   :  { %v1228_v21 = vpop.f32.mrf.mxu0  ;;  %v1252_v22 = vpop.f32.mrf.mxu1 }
  0xe9   :  { %v1805_v23 = vadd.f32 %v1252_v22, %v1251_v20  ;;  %v1229_v54 = vadd.f32 %v1228_v21, %v1227_v19 }
  0xea   :  { %v1230_v24 = vpop.f32.mrf.mxu0  ;;  %v1254_v25 = vpop.f32.mrf.mxu1 }
  0xeb   :  { %v593_v62 = vadd.f32 %v1229_v54, %v1824_v50 }
  0xec   :  { %v1231_v26 = vpop.f32.mrf.mxu0  ;;  %v1255_v27 = vpop.f32.mrf.mxu1 }
  0xed   :  { %v1807_v28 = vadd.f32 %v1255_v27, %v1254_v25  ;;  %v1232_v59 = vadd.f32 %v1231_v26, %v1230_v24 }
  0xee   :  { %v1233_v29 = vpop.f32.mrf.mxu0  ;;  %v1257_v30 = vpop.f32.mrf.mxu1 }
  0xef   :  { %v598_v4 = vadd.f32 %v1232_v59, %v1824_v50 }
  0xf0   :  { %v1234_v31 = vpop.f32.mrf.mxu0  ;;  %v1258_v32 = vpop.f32.mrf.mxu1 }
  0xf1   :  { %v1809_v33 = vadd.f32 %v1258_v32, %v1257_v30  ;;  %v1235_v8 = vadd.f32 %v1234_v31, %v1233_v29 }
  0xf2   :  { %v1236_v34 = vpop.f32.mrf.mxu0  ;;  %v1260_v35 = vpop.f32.mrf.mxu1 }
  0xf3   :  { %v601_v20 = vadd.f32 %v1235_v8, %v1824_v50 }
  0xf4   :  { %v1237_v36 = vpop.f32.mrf.mxu0  ;;  %v1261_v37 = vpop.f32.mrf.mxu1 }
  0xf5   :  { %v1811_v38 = vadd.f32 %v1261_v37, %v1260_v35  ;;  %v1238_v15 = vadd.f32 %v1237_v36, %v1236_v34 }
  0xf6   :  { %v1239_v39 = vpop.f32.mrf.mxu0  ;;  %v1263_v40 = vpop.f32.mrf.mxu1 }
  0xf7   :  { %v606_v29 = vadd.f32 %v1238_v15, %v1824_v50 }
  0xf8   :  { %v1240_v41 = vpop.f32.mrf.mxu0  ;;  %v1264_v42 = vpop.f32.mrf.mxu1 }
  0xf9   :  { %v1241_v34 = vadd.f32 %v1240_v41, %v1239_v39 }
  0xfa   :  { %v1813_v43 = vpop.f32.mrf.mxu0 }
  0xfc   :  { %v1815_v44 = vpop.f32.mrf.mxu0 }
  0xfd   :  { %v1244_v54 = vadd.f32 %v1815_v44, %v1813_v43 }
  0xfe   :  { %v1817_v45 = vpop.f32.mrf.mxu0 }
 0x100   :  { %v1819_v46 = vpop.f32.mrf.mxu0 }
 0x101   :  { %v1247_v43 = vadd.f32 %v1819_v46, %v1817_v45 }
 0x102   :  { %v1282_v48 = vpop.f32.mrf.mxu1  ;;  %v765_v49 = vpop.f32.mrf.mxu0 }
 0x104   :  { %v1283_v51 = vpop.f32.mrf.mxu1  ;;  %v1357_v52 = vpop.f32.mrf.mxu0 }
 0x105   :  { %v1284_v55 = vadd.f32 %v1283_v51, %v1282_v48  ;;  %v609_v52 = vadd.f32 %v1241_v34, %v1824_v50 }
 0x106   :  { %v1285_v56 = vpop.f32.mrf.mxu1  ;;  %v768_v57 = vpop.f32.mrf.mxu0 }
 0x107   :  { %v678_v58 = vadd.f32 %v1284_v55, %v590_v53 }
 0x108   :  { %v1286_v60 = vpop.f32.mrf.mxu1  ;;  %v1358_v61 = vpop.f32.mrf.mxu0 }
 0x109   :  { %v1828_v63 = vadd.f32 %v765_v49, %v678_v58  ;;  %v1287_v0 = vadd.f32 %v1286_v60, %v1285_v56 }
 0x10a   :  { %v1288_v1 = vpop.f32.mrf.mxu1  ;;  %v773_v2 = vpop.f32.mrf.mxu0 }
 0x10b   :  { %vm819_vm1 = vcmp.gt.f32.partialorder %v1828_v63, 20.0  ;;  %v681_v3 = vadd.f32 %v1287_v0, %v593_v62 }
 0x10c   :  { %v832_v5 = vsel %vm819_vm1, 0.0, %v1828_v63  ;;  %v1289_v6 = vpop.f32.mrf.mxu1  ;;  %v1361_v7 = vpop.f32.mrf.mxu0 }
 0x10d   :  { %v845_v9 = vmul.f32 1.442695, %v832_v5  ;;  %v1835_v10 = vadd.f32 %v768_v57, %v681_v3  ;;  %v1290_v11 = vadd.f32 %v1289_v6, %v1288_v1  ;;  %v614_v1 = vadd.f32 %v1244_v54, %v1824_v50 }
 0x10e   :  { %v1291_v12 = vpop.f32.mrf.mxu1  ;;  %v776_v13 = vpop.f32.mrf.mxu0 }
 0x10f   :  { %1488 = vpow2.f32 %v845_v9  ;;  %vm820_vm2 = vcmp.gt.f32.partialorder %v1835_v10, 20.0  ;;  %v686_v14 = vadd.f32 %v1290_v11, %v598_v4  ;;  %v617_v11 = vadd.f32 %v1247_v43, %v1824_v50 }
 0x110   :  { %v833_v16 = vsel %vm820_vm2, 0.0, %v1835_v10  ;;  %v1292_v17 = vpop.f32.mrf.mxu1  ;;  %v1362_v19 = vpop.f32.mrf.mxu0 }
 0x111   :  { %v847_v21 = vmul.f32 1.442695, %v833_v16  ;;  %v1842_v22 = vadd.f32 %v773_v2, %v686_v14  ;;  %v1293_v24 = vadd.f32 %v1292_v17, %v1291_v12 }
 0x112   :  { %v1294_v25 = vpop.f32.mrf.mxu1  ;;  %v781_v26 = vpop.f32.mrf.mxu0 }
 0x113   :  { %1490 = vpow2.f32 %v847_v21  ;;  %vm821_vm3 = vcmp.gt.f32.partialorder %v1842_v22, 20.0  ;;  %v689_v27 = vadd.f32 %v1293_v24, %v601_v20  ;;  %v622_v21 = vadd.f32 %v1803_v18, %v1824_v50 }
 0x114   :  { %v834_v30 = vsel %vm821_vm3, 0.0, %v1842_v22  ;;  %v1295_v31 = vpop.f32.mrf.mxu1  ;;  %v1365_v32 = vpop.f32.mrf.mxu0 }
 0x115   :  { %v849_v35 = vmul.f32 1.442695, %v834_v30  ;;  %v1849_v36 = vadd.f32 %v776_v13, %v689_v27  ;;  %v1296_v37 = vadd.f32 %v1295_v31, %v1294_v25 }
 0x116   :  { %v1297_v40 = vpop.f32.mrf.mxu1  ;;  %v784_v42 = vpop.f32.mrf.mxu0 }
 0x117   :  { %1492 = vpow2.f32 %v849_v35  ;;  %vm822_vm4 = vcmp.gt.f32.partialorder %v1849_v36, 20.0  ;;  %v694_v47 = vadd.f32 %v1296_v37, %v606_v29 }
 0x118   :  { %v835_v48 = vsel %vm822_vm4, 0.0, %v1849_v36  ;;  %v1298_v49 = vpop.f32.mrf.mxu1  ;;  %v1366_v51 = vpop.f32.mrf.mxu0 }
 0x119   :  { %v851_v53 = vmul.f32 1.442695, %v835_v48  ;;  %v1856_v39 = vadd.f32 %v781_v26, %v694_v47  ;;  %v1299_v41 = vadd.f32 %v1298_v49, %v1297_v40 }
 0x11a   :  { %v1300_v55 = vpop.f32.mrf.mxu1  ;;  %v789_v56 = vpop.f32.mrf.mxu0 }
 0x11b   :  { %1494 = vpow2.f32 %v851_v53  ;;  %vm823_vm5 = vcmp.gt.f32.partialorder %v1856_v39, 20.0  ;;  %v697_v57 = vadd.f32 %v1299_v41, %v609_v52 }
 0x11c   :  { %v1861_v58 = vpop.eup %1488  ;;  %v836_v59 = vsel %vm823_vm5, 0.0, %v1856_v39  ;;  %v1301_v60 = vpop.f32.mrf.mxu1 }
 0x11d   :  { %v1369_v61 = vpop.f32.mrf.mxu0  ;;  %v871_v62 = vadd.f32 1.0, %v1861_v58  ;;  %v853_v0 = vmul.f32 1.442695, %v836_v59  ;;  %v1870_v44 = vadd.f32 %v784_v42, %v697_v57  ;;  %v1302_v2 = vadd.f32 %v1301_v60, %v1300_v55 }
 0x11e   :  { %v1303_v3 = vpop.f32.mrf.mxu1  ;;  %v874_v24 = vmul.f32 -0.5, %v1861_v58  ;;  %v625_v42 = vadd.f32 %v1805_v23, %v1824_v50  ;;  %v877_v54 = vand.u32 2147483647, %v1861_v58  ;;  %v630_v23 = vadd.f32 %v1807_v28, %v1824_v50 }
 0x11f   :  { %v792_v4 = vpop.f32.mrf.mxu0  ;;  %1496 = vlog2.f32 %v871_v62  ;;  %vm824_vm6 = vcmp.gt.f32.partialorder %v1870_v44, 20.0  ;;  %v702_v6 = vadd.f32 %v1302_v2, %v614_v1 }
 0x120   :  { %v1872_v5 = vpop.eup %1490  ;;  %1498 = vpow2.f32 %v853_v0  ;;  %v1304_v7 = vpop.f32.mrf.mxu1  ;;  %v837_v45 = vsel %vm824_vm6, 0.0, %v1870_v44  ;;  %v875_v47 = vadd.f32 1.0, %v874_v24  ;;  %vm1921_vm10 = vcmp.lt.f32.partialorder %v877_v54, 0.0004427343 }
 0x121   :  { %v1370_v8 = vpop.f32.mrf.mxu0  ;;  %v880_v9 = vadd.f32 1.0, %v1872_v5  ;;  %v1880_v46 = vadd.f32 %v789_v56, %v702_v6  ;;  %v1305_v12 = vadd.f32 %v1304_v7, %v1303_v3  ;;  %v855_v15 = vmul.f32 1.442695, %v837_v45 }
 0x122   :  { %v1306_v13 = vpop.f32.mrf.mxu1  ;;  %v883_v18 = vmul.f32 -0.5, %v1872_v5  ;;  %v876_v1 = vmul.f32 %v1861_v58, %v875_v47  ;;  %v886_v2 = vand.u32 2147483647, %v1872_v5  ;;  %v633_v8 = vadd.f32 %v1809_v33, %v1824_v50 }
 0x123   :  { %v797_v14 = vpop.f32.mrf.mxu0  ;;  %1500 = vlog2.f32 %v880_v9  ;;  %vm825_vm7 = vcmp.gt.f32.partialorder %v1880_v46, 20.0  ;;  %v705_v17 = vadd.f32 %v1305_v12, %v617_v11 }
 0x124   :  { %v1882_v16 = vpop.eup %1492  ;;  %v1307_v19 = vpop.f32.mrf.mxu1  ;;  %1502 = vpow2.f32 %v855_v15  ;;  %v838_v26 = vsel %vm825_vm7, 0.0, %v1880_v46  ;;  %v884_v57 = vadd.f32 1.0, %v883_v18  ;;  %vm887_vm12 = vcmp.lt.f32.partialorder %v886_v2, 0.0004427343 }
 0x125   :  { %v1373_v20 = vpop.f32.mrf.mxu0  ;;  %v889_v25 = vadd.f32 1.0, %v1882_v16  ;;  %v1892_v27 = vadd.f32 %v792_v4, %v705_v17  ;;  %v1308_v29 = vadd.f32 %v1307_v19, %v1306_v13  ;;  %v857_v32 = vmul.f32 1.442695, %v838_v26 }
 0x126   :  { %v1309_v30 = vpop.f32.mrf.mxu1  ;;  %v892_v28 = vmul.f32 -0.5, %v1882_v16  ;;  %v885_v13 = vmul.f32 %v1872_v5, %v884_v57 }
 0x127   :  { %v800_v31 = vpop.f32.mrf.mxu0  ;;  %1504 = vlog2.f32 %v889_v25  ;;  %vm826_vm8 = vcmp.gt.f32.partialorder %v1892_v27, 20.0  ;;  %v710_v35 = vadd.f32 %v1308_v29, %v622_v21  ;;  %v895_v21 = vand.u32 2147483647, %v1882_v16 }
 0x128   :  { %v1894_v34 = vpop.eup %1494  ;;  %v1310_v37 = vpop.f32.mrf.mxu1  ;;  %1506 = vpow2.f32 %v857_v32  ;;  %v839_v49 = vsel %vm826_vm8, 0.0, %v1892_v27  ;;  %v893_v20 = vadd.f32 1.0, %v892_v28 }
 0x129   :  { %v1374_v40 = vpop.f32.mrf.mxu0  ;;  %v898_v48 = vadd.f32 1.0, %v1894_v34  ;;  %v1904_v51 = vadd.f32 %v797_v14, %v710_v35  ;;  %v1311_v52 = vadd.f32 %v1310_v37, %v1309_v30  ;;  %v859_v55 = vmul.f32 1.442695, %v839_v49 }
 0x12a   :  { %v1312_v53 = vpop.f32.mrf.mxu1  ;;  %v901_v14 = vmul.f32 -0.5, %v1894_v34  ;;  %vm1960_vm14 = vcmp.lt.f32.partialorder %v895_v21, 0.0004427343 }
 0x12b   :  { %v805_v41 = vpop.f32.mrf.mxu0  ;;  %1508 = vlog2.f32 %v898_v48  ;;  %vm827_vm9 = vcmp.gt.f32.partialorder %v1904_v51, 20.0  ;;  %v713_v59 = vadd.f32 %v1311_v52, %v625_v42 }
 0x12c   :  { %v1497_v56 = vpop.eup %1496  ;;  %v1313_v60 = vpop.f32.mrf.mxu1  ;;  %1510 = vpow2.f32 %v859_v55  ;;  %v840_v43 = vsel %vm827_vm9, 0.0, %v1904_v51  ;;  %v902_v40 = vadd.f32 1.0, %v901_v14  ;;  %v894_v55 = vmul.f32 %v1882_v16, %v893_v20 }
 0x12d   :  { %v1377_v61 = vpop.f32.mrf.mxu0  ;;  %v1910_v62 = vpop.eup %1498  ;;  %v873_v0 = vmul.f32 0.6931472, %v1497_v56  ;;  %v861_v4 = vmul.f32 1.442695, %v840_v43  ;;  %v1925_v58 = vadd.f32 %v800_v31, %v713_v59  ;;  %v1314_v11 = vadd.f32 %v1313_v60, %v1312_v53 }
 0x12e   :  { %v907_v3 = vadd.f32 1.0, %v1910_v62  ;;  %v1315_v6 = vpop.f32.mrf.mxu1  ;;  %v904_v53 = vand.u32 2147483647, %v1894_v34  ;;  %v638_v60 = vadd.f32 %v1811_v38, %v1824_v50  ;;  %v910_v38 = vmul.f32 -0.5, %v1910_v62 }
 0x12f   :  { %v808_v7 = vpop.f32.mrf.mxu0  ;;  %v879_v12 = vsel %vm1921_vm10, %v876_v1, %v873_v0  ;;  %vm828_vm11 = vcmp.gt.f32.partialorder %v1925_v58, 20.0  ;;  %v718_v33 = vadd.f32 %v1314_v11, %v630_v23  ;;  %v903_v0 = vmul.f32 %v1894_v34, %v902_v40 }
 0x130   :  { %v1501_v45 = vpop.eup %1500  ;;  %1512 = vlog2.f32 %v907_v3  ;;  %v1316_v15 = vpop.f32.mrf.mxu1  ;;  %v841_v24 = vsel %vm828_vm11, 0.0, %v1925_v58  ;;  %v988_v35 = vsel %vm819_vm1, %v1828_v63, %v879_v12  ;;  %vm905_vm15 = vcmp.lt.f32.partialorder %v904_v53, 0.0004427343 }
 0x131   :  { %v1378_v17 = vpop.f32.mrf.mxu0  ;;  %v882_v19 = vmul.f32 0.6931472, %v1501_v45  ;;  %1514 = vpow2.f32 %v861_v4  ;;  %v1936_v26 = vpop.eup %1502  ;;  %v863_v30 = vmul.f32 1.442695, %v841_v24  ;;  %v1938_v31 = vadd.f32 %v805_v41, %v718_v33 }
 0x132   :  { %v1318_v25 = vpop.f32.mrf.mxu1  ;;  %v1317_v32 = vadd.f32 %v1316_v15, %v1315_v6  ;;  %v916_v42 = vadd.f32 1.0, %v1936_v26  ;;  %v911_v14 = vadd.f32 1.0, %v910_v38  ;;  %v922_v20 = vand.u32 2147483647, %v1936_v26 }
 0x133   :  { %v813_v5 = vpop.f32.mrf.mxu0  ;;  %v888_v29 = vsel %vm887_vm12, %v885_v13, %v882_v19  ;;  %1516 = vpow2.f32 %v863_v30  ;;  %vm829_vm13 = vcmp.gt.f32.partialorder %v1938_v31, 20.0 }
 0x134   :  { %v1505_v18 = vpop.eup %1504  ;;  %v989_v37 = vsel %vm820_vm2, %v1835_v10, %v888_v29  ;;  %v1319_v47 = vpop.f32.mrf.mxu1  ;;  %1518 = vlog2.f32 %v916_v42  ;;  %v842_v63 = vsel %vm829_vm13, 0.0, %v1938_v31  ;;  %v721_v23 = vadd.f32 %v1317_v32, %v633_v8 }
 0x135   :  { %v1381_v48 = vpop.f32.mrf.mxu0  ;;  %v1176_v49 = vpack.c.bf16 %v989_v37, %v988_v35  ;;  %v891_v52 = vmul.f32 0.6931472, %v1505_v18  ;;  %v1952_v10 = vpop.eup %1506  ;;  %v865_v56 = vmul.f32 1.442695, %v842_v63  ;;  %v1320_v57 = vadd.f32 %v1319_v47, %v1318_v25 }
 0x136   :  { %v1321_v41 = vpop.f32.mrf.mxu1  ;;  %v925_v1 = vadd.f32 1.0, %v1952_v10  ;;  %v1968_v3 = vadd.f32 %v808_v7, %v721_v23  ;;  %v919_v7 = vmul.f32 -0.5, %v1936_v26  ;;  %v928_v21 = vmul.f32 -0.5, %v1952_v10 }
 0x137   :  { %v816_v54 = vpop.f32.mrf.mxu0  ;;  %1177 = vst [vmem:[%s2067_s3] sm:$0xff] %v1176_v49   ;;  %v897_v16 = vsel %vm1960_vm14, %v894_v55, %v891_v52  ;;  %1520 = vpow2.f32 %v865_v56  ;;  %v726_v50 = vadd.f32 %v1320_v57, %v638_v60  ;;  %v912_v25 = vmul.f32 %v1910_v62, %v911_v14 }
 0x138   :  { %v1509_v59 = vpop.eup %1508  ;;  %v1322_v43 = vpop.f32.mrf.mxu1  ;;  %1522 = vlog2.f32 %v925_v1  ;;  %v990_v8 = vsel %vm821_vm3, %v1842_v22, %v897_v16  ;;  %vm830_vm0 = vcmp.gt.f32.partialorder %v1968_v3, 20.0  ;;  %v920_v33 = vadd.f32 1.0, %v919_v7 }
 0x139   :  { %v1382_v2 = vpop.f32.mrf.mxu0  ;;  %v900_v28 = vmul.f32 0.6931472, %v1509_v59  ;;  %v1970_v4 = vpop.eup %1510  ;;  %v843_v12 = vsel %vm830_vm0, 0.0, %v1968_v3  ;;  %v1987_v22 = vadd.f32 %v813_v5, %v726_v50  ;;  %vm923_vm3 = vcmp.lt.f32.partialorder %v922_v20, 0.0004427343 }
 0x13a   :  { %v934_v34 = vadd.f32 1.0, %v1970_v4  ;;  %v867_v15 = vmul.f32 1.442695, %v843_v12  ;;  %v937_v32 = vmul.f32 -0.5, %v1970_v4  ;;  %v921_v40 = vmul.f32 %v1936_v26, %v920_v33 }
 0x13b   :  { %v906_v6 = vsel %vm905_vm15, %v903_v0, %v900_v28  ;;  %vm831_vm1 = vcmp.gt.f32.partialorder %v1987_v22, 20.0  ;;  %v931_v49 = vand.u32 2147483647, %v1952_v10  ;;  %v940_v56 = vand.u32 2147483647, %v1970_v4 }
 0x13c   :  { %v991_v9 = vsel %vm822_vm4, %v1849_v36, %v906_v6  ;;  %1524 = vlog2.f32 %v934_v34  ;;  %v913_v36 = vand.u32 2147483647, %v1910_v62  ;;  %v844_v5 = vsel %vm831_vm1, 0.0, %v1987_v22 }
 0x13d   :  { %v1513_v11 = vpop.eup %1512  ;;  %v1181_v45 = vpack.c.bf16 %v991_v9, %v990_v8  ;;  %1526 = vpow2.f32 %v867_v15  ;;  %v869_v42 = vmul.f32 1.442695, %v844_v5  ;;  %v929_v62 = vadd.f32 1.0, %v928_v21 }
 0x13e   :  { %v1985_v13 = vpop.eup %1514  ;;  %v909_v19 = vmul.f32 0.6931472, %v1513_v11  ;;  %vm2001_vm2 = vcmp.lt.f32.partialorder %v913_v36, 0.0004427343  ;;  %v938_v26 = vadd.f32 1.0, %v937_v32 }
 0x13f   :  { %1203 = vst [vmem:[%s2067_s3 + $0x8] sm:$0xff] %v1181_v45   ;;  %v943_v17 = vadd.f32 1.0, %v1985_v13  ;;  %v930_v23 = vmul.f32 %v1952_v10, %v929_v62  ;;  %v946_v57 = vmul.f32 -0.5, %v1985_v13  ;;  %vm932_vm4 = vcmp.lt.f32.partialorder %v931_v49, 0.0004427343 }
 0x140   :  { %v1517_v24 = vpop.eup %1516  ;;  %v915_v35 = vsel %vm2001_vm2, %v912_v25, %v909_v19  ;;  %v939_v60 = vmul.f32 %v1970_v4, %v938_v26  ;;  %v949_v28 = vand.u32 2147483647, %v1985_v13 }
 0x141   :  { %1528 = vlog2.f32 %v943_v17  ;;  %v1519_v29 = vpop.eup %1518  ;;  %v952_v18 = vadd.f32 1.0, %v1517_v24  ;;  %v992_v53 = vsel %vm823_vm5, %v1856_v39, %v915_v35  ;;  %v955_v61 = vmul.f32 -0.5, %v1517_v24 }
 0x142   :  { %v918_v37 = vmul.f32 0.6931472, %v1519_v29  ;;  %vm941_vm5 = vcmp.lt.f32.partialorder %v940_v56, 0.0004427343  ;;  %v947_v43 = vadd.f32 1.0, %v946_v57 }
 0x143   :  { %1530 = vlog2.f32 %v952_v18  ;;  %v956_v4 = vadd.f32 1.0, %v955_v61  ;;  %v958_v34 = vand.u32 2147483647, %v1517_v24 }
 0x144   :  { %v2009_v47 = vpop.eup %1520  ;;  %v924_v48 = vsel %vm923_vm3, %v921_v40, %v918_v37  ;;  %1532 = vpow2.f32 %v869_v42  ;;  %v948_v8 = vmul.f32 %v1985_v13, %v947_v43 }
 0x145   :  { %v1523_v52 = vpop.eup %1522  ;;  %v993_v63 = vsel %vm824_vm6, %v1870_v44, %v924_v48  ;;  %v961_v41 = vadd.f32 1.0, %v2009_v47  ;;  %vm950_vm6 = vcmp.lt.f32.partialorder %v949_v28, 0.0004427343  ;;  %v964_v45 = vmul.f32 -0.5, %v2009_v47 }
 0x146   :  { %v1186_v54 = vpack.c.bf16 %v993_v63, %v992_v53  ;;  %v927_v55 = vmul.f32 0.6931472, %v1523_v52  ;;  %v967_v20 = vand.u32 2147483647, %v2009_v47 }
 0x147   :  { %1534 = vlog2.f32 %v961_v41  ;;  %v965_v33 = vadd.f32 1.0, %v964_v45 }
 0x148   :  { %1204 = vst [vmem:[%s2067_s3 + $0x10] sm:$0xff] %v1186_v54   ;;  %v933_v39 = vsel %vm932_vm4, %v930_v23, %v927_v55 }
 0x149   :  { %v1525_v59 = vpop.eup %1524  ;;  %v994_v10 = vsel %vm825_vm7, %v1880_v46, %v933_v39  ;;  %vm959_vm7 = vcmp.lt.f32.partialorder %v958_v34, 0.0004427343 }
 0x14a   :  { %v936_v44 = vmul.f32 0.6931472, %v1525_v59  ;;  %v1527_v0 = vpop.eup %1526 }
 0x14b   :  { %v970_v38 = vadd.f32 1.0, %v1527_v0  ;;  %v973_v13 = vmul.f32 -0.5, %v1527_v0  ;;  %v976_v25 = vand.u32 2147483647, %v1527_v0 }
 0x14c   :  { %v942_v1 = vsel %vm941_vm5, %v939_v60, %v936_v44 }
 0x14d   :  { %v995_v16 = vsel %vm826_vm8, %v1892_v27, %v942_v1  ;;  %1536 = vlog2.f32 %v970_v38  ;;  %v957_v27 = vmul.f32 %v1517_v24, %v956_v4  ;;  %v974_v24 = vadd.f32 1.0, %v973_v13 }
 0x14e   :  { %v1529_v2 = vpop.eup %1528  ;;  %v1191_v50 = vpack.c.bf16 %v995_v16, %v994_v10  ;;  %vm968_vm8 = vcmp.lt.f32.partialorder %v967_v20, 0.0004427343 }
 0x14f   :  { %v945_v6 = vmul.f32 0.6931472, %v1529_v2  ;;  %v975_v32 = vmul.f32 %v1527_v0, %v974_v24 }
 0x150   :  { %1205 = vst [vmem:[%s2067_s3 + $0x18] sm:$0xff] %v1191_v50   ;;  %v1531_v9 = vpop.eup %1530 }
 0x151   :  { %v1533_v46 = vpop.eup %1532  ;;  %v951_v7 = vsel %vm950_vm6, %v948_v8, %v945_v6  ;;  %v954_v11 = vmul.f32 0.6931472, %v1531_v9 }
 0x152   :  { %v979_v12 = vadd.f32 1.0, %v1533_v46  ;;  %v996_v15 = vsel %vm827_vm9, %v1904_v51, %v951_v7  ;;  %v966_v51 = vmul.f32 %v2009_v47, %v965_v33  ;;  %v982_v5 = vmul.f32 -0.5, %v1533_v46 }
 0x153   :  { %v960_v14 = vsel %vm959_vm7, %v957_v27, %v954_v11  ;;  %vm977_vm9 = vcmp.lt.f32.partialorder %v976_v25, 0.0004427343  ;;  %v985_v42 = vand.u32 2147483647, %v1533_v46 }
 0x154   :  { %v997_v36 = vsel %vm828_vm11, %v1925_v58, %v960_v14  ;;  %1538 = vlog2.f32 %v979_v12  ;;  %v1535_v17 = vpop.eup %1534  ;;  %v983_v35 = vadd.f32 1.0, %v982_v5 }
 0x155   :  { %v1196_v19 = vpack.c.bf16 %v997_v36, %v996_v15  ;;  %v963_v21 = vmul.f32 0.6931472, %v1535_v17  ;;  %vm986_vm10 = vcmp.lt.f32.partialorder %v985_v42, 0.0004427343 }
 0x156   :  { %v984_v49 = vmul.f32 %v1533_v46, %v983_v35 }
 0x157   :  { %1206 = vst [vmem:[%s2067_s3 + $0x20] sm:$0xff] %v1196_v19   ;;  %v969_v58 = vsel %vm968_vm8, %v966_v51, %v963_v21 }
 0x158   :  { %v998_v37 = vsel %vm829_vm13, %v1938_v31, %v969_v58 }
 0x15a   :  { %v1537_v29 = vpop.eup %1536 }
 0x15b   :  { %v972_v30 = vmul.f32 0.6931472, %v1537_v29 }
 0x15d   :  { %v978_v18 = vsel %vm977_vm9, %v975_v32, %v972_v30 }
 0x15e   :  { %v999_v40 = vsel %vm830_vm0, %v1968_v3, %v978_v18 }
 0x15f   :  { %v1201_v62 = vpack.c.bf16 %v999_v40, %v998_v37 }
 0x161   :  { %v1539_v47 = vpop.eup %1538  ;;  %1207 = vst [vmem:[%s2067_s3 + $0x28] sm:$0xff] %v1201_v62  }
 0x162   :  { %v981_v48 = vmul.f32 0.6931472, %v1539_v47 }
 0x164   :  { %v987_v52 = vsel %vm986_vm10, %v984_v49, %v981_v48 }
 0x165   :  { %v1000_v53 = vsel %vm831_vm1, %v1987_v22, %v987_v52 }
 0x166   :  { %v1172_v31 = vpack.c.bf16 %v1000_v53, %v1000_v53 }
 0x168   :  { %1066 = vst [vmem:[%s2067_s3 + $0x30] sm:$0xf] %v1172_v31 }

// kernel: dqn_forward.7
= control target key start
LH: loop header
LB: loop body
LE: loop exit
PB: predicated region body
PF: predicated region fallthrough
CT: control target
= control target key end

     0   :  { %s11435_s1 = inlined_call_operand.vmem [shape: bf16[3200,512], index: 1, kind: input, shape index: {}]   ;;  %s11436_s0 = inlined_call_operand.vmem [shape: bf16[8,3200], index: 0, kind: input, shape index: {}]   ;;  %s11437_s2 = inlined_call_operand.vmem [shape: f32[1,512], index: 2, kind: input, shape index: {}]   ;;  %s11438_s3 = inlined_call_operand.vmem [shape: bf16[512,128], index: 3, kind: input, shape index: {}]   ;;  %s11439_s4 = inlined_call_operand.vmem [shape: f32[1,128], index: 4, kind: input, shape index: {}]   ;;  %s11440_s5 = inlined_call_operand.vmem [shape: f32[8,128], index: 5, kind: output, shape index: {}]  }
   0x1   :  { %v7321_v0 = vld [vmem:[%s11435_s1 + $0xe4] ss:$16 sps:$4 sm:$0xff]   ;;  %v7325_v2 = vld [vmem:[%s11435_s1 + $0xe0] ss:$16 sps:$4 sm:$0xff]   ;;  %v22_v48 = vld [vmem:[%s11436_s0 + $0x8] sm:$0xff] }
   0x2   :  { %v7323_v1 = vld [vmem:[%s11435_s1 + $0x2e4] ss:$16 sps:$4 sm:$0xff]   ;;  %4944 = vmatprep.subr.bf16.mxu0 %v7321_v0  ;;  %v7326_v3 = vld [vmem:[%s11435_s1 + $0x2e0] ss:$16 sps:$4 sm:$0xff]   ;;  %v8779_v51 = vcombine.high %v22_v48, %v22_v48 }
   0x3   :  { %4985 = vmatprep.subr.bf16.mxu1 %v7323_v1  ;;  %v7327_v4 = vld [vmem:[%s11435_s1 + $0xc4] ss:$16 sps:$4 sm:$0xff]   ;;  %4945 = vmatpush1.bf16.msra.mxu0 %v7325_v2  ;;  %v7331_v6 = vld [vmem:[%s11435_s1 + $0xc0] ss:$16 sps:$4 sm:$0xff]  }
   0x4   :  { %4986 = vmatpush1.bf16.msra.mxu1 %v7326_v3  ;;  %v7329_v5 = vld [vmem:[%s11435_s1 + $0x2c4] ss:$16 sps:$4 sm:$0xff]   ;;  %4946 = vmatprep.subr.bf16.mxu0 %v7327_v4  ;;  %v7332_v7 = vld [vmem:[%s11435_s1 + $0x2c0] ss:$16 sps:$4 sm:$0xff]  }
   0x5   :  { %4987 = vmatprep.subr.bf16.mxu1 %v7329_v5  ;;  %v7333_v8 = vld [vmem:[%s11435_s1 + $0xa4] ss:$16 sps:$4 sm:$0xff]   ;;  %v7337_v10 = vld [vmem:[%s11435_s1 + $0xa0] ss:$16 sps:$4 sm:$0xff]   ;;  %5017 = vmatprep.mubr.bf16.mxu1 %v8779_v51 }
   0x6   :  { %v7335_v9 = vld [vmem:[%s11435_s1 + $0x2a4] ss:$16 sps:$4 sm:$0xff]   ;;  %v7338_v11 = vld [vmem:[%s11435_s1 + $0x2a0] ss:$16 sps:$4 sm:$0xff]  }
   0x7   :  { %4947 = vmatpush1.bf16.msra.mxu0 %v7331_v6  ;;  %v7339_v12 = vld [vmem:[%s11435_s1 + $0x84] ss:$16 sps:$4 sm:$0xff]   ;;  %v7343_v14 = vld [vmem:[%s11435_s1 + $0x80] ss:$16 sps:$4 sm:$0xff]  }
   0x8   :  { %4988 = vmatpush1.bf16.msra.mxu1 %v7332_v7  ;;  %4948 = vmatprep.subr.bf16.mxu0 %v7333_v8  ;;  %v7341_v13 = vld [vmem:[%s11435_s1 + $0x284] ss:$16 sps:$4 sm:$0xff]   ;;  %v7344_v15 = vld [vmem:[%s11435_s1 + $0x280] ss:$16 sps:$4 sm:$0xff]   ;;  %v8839_v7 = vcombine.low %v22_v48, %v22_v48 }
   0x9   :  { %4989 = vmatprep.subr.bf16.mxu1 %v7335_v9  ;;  %v7345_v16 = vld [vmem:[%s11435_s1 + $0x64] ss:$16 sps:$4 sm:$0xff]   ;;  %v7349_v18 = vld [vmem:[%s11435_s1 + $0x60] ss:$16 sps:$4 sm:$0xff]  }
   0xa   :  { %v7347_v17 = vld [vmem:[%s11435_s1 + $0x264] ss:$16 sps:$4 sm:$0xff]   ;;  %v7350_v19 = vld [vmem:[%s11435_s1 + $0x260] ss:$16 sps:$4 sm:$0xff]  }
   0xb   :  { %4949 = vmatpush1.bf16.msra.mxu0 %v7337_v10  ;;  %v7351_v20 = vld [vmem:[%s11435_s1 + $0x44] ss:$16 sps:$4 sm:$0xff]   ;;  %v7355_v22 = vld [vmem:[%s11435_s1 + $0x40] ss:$16 sps:$4 sm:$0xff]  }
   0xc   :  { %4990 = vmatpush1.bf16.msra.mxu1 %v7338_v11  ;;  %4950 = vmatprep.subr.bf16.mxu0 %v7339_v12  ;;  %v7353_v21 = vld [vmem:[%s11435_s1 + $0x244] ss:$16 sps:$4 sm:$0xff]   ;;  %v7356_v23 = vld [vmem:[%s11435_s1 + $0x240] ss:$16 sps:$4 sm:$0xff]  }
   0xd   :  { %4991 = vmatprep.subr.bf16.mxu1 %v7341_v13  ;;  %v7357_v24 = vld [vmem:[%s11435_s1 + $0x24] ss:$16 sps:$4 sm:$0xff]   ;;  %v7361_v26 = vld [vmem:[%s11435_s1 + $0x20] ss:$16 sps:$4 sm:$0xff]  }
   0xe   :  { %v7359_v25 = vld [vmem:[%s11435_s1 + $0x224] ss:$16 sps:$4 sm:$0xff]   ;;  %v7362_v27 = vld [vmem:[%s11435_s1 + $0x220] ss:$16 sps:$4 sm:$0xff]  }
   0xf   :  { %4951 = vmatpush1.bf16.msra.mxu0 %v7343_v14  ;;  %v7363_v28 = vld [vmem:[%s11435_s1 + $0x4] ss:$16 sps:$4 sm:$0xff]   ;;  %v7367_v30 = vld [vmem:[%s11435_s1] ss:$16 sps:$4 sm:$0xff]  }
  0x10   :  { %4992 = vmatpush1.bf16.msra.mxu1 %v7344_v15  ;;  %4952 = vmatprep.subr.bf16.mxu0 %v7345_v16  ;;  %v7365_v29 = vld [vmem:[%s11435_s1 + $0x204] ss:$16 sps:$4 sm:$0xff]   ;;  %v7368_v31 = vld [vmem:[%s11435_s1 + $0x200] ss:$16 sps:$4 sm:$0xff]  }
  0x11   :  { %4993 = vmatprep.subr.bf16.mxu1 %v7347_v17  ;;  %v7369_v32 = vld [vmem:[%s11435_s1 + $0x1e4] ss:$16 sps:$4 sm:$0xff]   ;;  %v7373_v34 = vld [vmem:[%s11435_s1 + $0x1e0] ss:$16 sps:$4 sm:$0xff]  }
  0x12   :  { %v7371_v33 = vld [vmem:[%s11435_s1 + $0x3e4] ss:$16 sps:$4 sm:$0xff]   ;;  %v7374_v35 = vld [vmem:[%s11435_s1 + $0x3e0] ss:$16 sps:$4 sm:$0xff]  }
  0x13   :  { %4953 = vmatpush1.bf16.msra.mxu0 %v7349_v18  ;;  %v7375_v36 = vld [vmem:[%s11435_s1 + $0x1c4] ss:$16 sps:$4 sm:$0xff]   ;;  %v7379_v38 = vld [vmem:[%s11435_s1 + $0x1c0] ss:$16 sps:$4 sm:$0xff]  }
  0x14   :  { %4994 = vmatpush1.bf16.msra.mxu1 %v7350_v19  ;;  %4954 = vmatprep.subr.bf16.mxu0 %v7351_v20  ;;  %v7377_v37 = vld [vmem:[%s11435_s1 + $0x3c4] ss:$16 sps:$4 sm:$0xff]   ;;  %v7380_v39 = vld [vmem:[%s11435_s1 + $0x3c0] ss:$16 sps:$4 sm:$0xff]  }
  0x15   :  { %4995 = vmatprep.subr.bf16.mxu1 %v7353_v21  ;;  %v7381_v40 = vld [vmem:[%s11435_s1 + $0x1a4] ss:$16 sps:$4 sm:$0xff]   ;;  %v7385_v42 = vld [vmem:[%s11435_s1 + $0x1a0] ss:$16 sps:$4 sm:$0xff]  }
  0x16   :  { %v7383_v41 = vld [vmem:[%s11435_s1 + $0x3a4] ss:$16 sps:$4 sm:$0xff]   ;;  %v7386_v43 = vld [vmem:[%s11435_s1 + $0x3a0] ss:$16 sps:$4 sm:$0xff]  }
  0x17   :  { %4955 = vmatpush1.bf16.msra.mxu0 %v7355_v22  ;;  %v7387_v44 = vld [vmem:[%s11435_s1 + $0x184] ss:$16 sps:$4 sm:$0xff]   ;;  %v7391_v49 = vld [vmem:[%s11435_s1 + $0x180] ss:$16 sps:$4 sm:$0xff]  }
  0x18   :  { %4996 = vmatpush1.bf16.msra.mxu1 %v7356_v23  ;;  %4956 = vmatprep.subr.bf16.mxu0 %v7357_v24  ;;  %v7389_v45 = vld [vmem:[%s11435_s1 + $0x384] ss:$16 sps:$4 sm:$0xff]   ;;  %v7392_v50 = vld [vmem:[%s11435_s1 + $0x380] ss:$16 sps:$4 sm:$0xff]  }
  0x19   :  { %4997 = vmatprep.subr.bf16.mxu1 %v7359_v25  ;;  %v21_v46 = vld [vmem:[%s11436_s0] sm:$0xff] }
  0x1a   :  { %v8768_v47 = vcombine.high %v21_v46, %v21_v46  ;;  %v7393_v52 = vld [vmem:[%s11435_s1 + $0x164] ss:$16 sps:$4 sm:$0xff]   ;;  %v7397_v54 = vld [vmem:[%s11435_s1 + $0x160] ss:$16 sps:$4 sm:$0xff]   ;;  %v8837_v6 = vcombine.low %v21_v46, %v21_v46 }
  0x1b   :  { %4957 = vmatpush1.bf16.msra.mxu0 %v7361_v26  ;;  %v7395_v53 = vld [vmem:[%s11435_s1 + $0x364] ss:$16 sps:$4 sm:$0xff]   ;;  %v7398_v55 = vld [vmem:[%s11435_s1 + $0x360] ss:$16 sps:$4 sm:$0xff]  }
  0x1c   :  { %4998 = vmatpush1.bf16.msra.mxu1 %v7362_v27  ;;  %4958 = vmatprep.subr.bf16.mxu0 %v7363_v28  ;;  %v7399_v56 = vld [vmem:[%s11435_s1 + $0x144] ss:$16 sps:$4 sm:$0xff]   ;;  %v7403_v58 = vld [vmem:[%s11435_s1 + $0x140] ss:$16 sps:$4 sm:$0xff]  }
  0x1d   :  { %4999 = vmatprep.subr.bf16.mxu1 %v7365_v29  ;;  %4976 = vmatprep.mubr.bf16.mxu0 %v8768_v47  ;;  %v7401_v57 = vld [vmem:[%s11435_s1 + $0x344] ss:$16 sps:$4 sm:$0xff]   ;;  %v7404_v59 = vld [vmem:[%s11435_s1 + $0x340] ss:$16 sps:$4 sm:$0xff]  }
  0x1e   :  { %v7405_v60 = vld [vmem:[%s11435_s1 + $0x124] ss:$16 sps:$4 sm:$0xff]   ;;  %v7409_v62 = vld [vmem:[%s11435_s1 + $0x120] ss:$16 sps:$4 sm:$0xff]  }
  0x1f   :  { %4959 = vmatpush1.bf16.msra.mxu0 %v7367_v30  ;;  %v7407_v61 = vld [vmem:[%s11435_s1 + $0x324] ss:$16 sps:$4 sm:$0xff]   ;;  %v7410_v63 = vld [vmem:[%s11435_s1 + $0x320] ss:$16 sps:$4 sm:$0xff]  }
  0x20   :  { %5000 = vmatpush1.bf16.msra.mxu1 %v7368_v31  ;;  %4960 = vmatprep.subr.bf16.mxu0 %v7369_v32  ;;  %v7411_v0 = vld [vmem:[%s11435_s1 + $0x104] ss:$16 sps:$4 sm:$0xff]   ;;  %v7415_v2 = vld [vmem:[%s11435_s1 + $0x100] ss:$16 sps:$4 sm:$0xff]  }
  0x21   :  { %5001 = vmatprep.subr.bf16.mxu1 %v7371_v33  ;;  %v7413_v1 = vld [vmem:[%s11435_s1 + $0x304] ss:$16 sps:$4 sm:$0xff]   ;;  %v7416_v3 = vld [vmem:[%s11435_s1 + $0x300] ss:$16 sps:$4 sm:$0xff]   ;;  %v8923_v33 = vld [vmem:[%s11436_s0 + $0x18] sm:$0xff] }
  0x22   :  { %v7423_v4 = vld [vmem:[%s11435_s1 + $0x4e4] ss:$16 sps:$4 sm:$0xff]   ;;  %v7421_v8 = vld [vmem:[%s11435_s1 + $0x4e0] ss:$16 sps:$4 sm:$0xff]  }
  0x23   :  { %4961 = vmatpush2.bf16.msra.mxu0 %v7373_v34  ;;  %v7426_v5 = vld [vmem:[%s11435_s1 + $0x6e4] ss:$16 sps:$4 sm:$0xff]   ;;  %v7424_v9 = vld [vmem:[%s11435_s1 + $0x6e0] ss:$16 sps:$4 sm:$0xff]  }
  0x24   :  { %5002 = vmatpush2.bf16.msra.mxu1 %v7374_v35  ;;  %4962 = vmatprep.subr.bf16.mxu0 %v7375_v36  ;;  %v7429_v10 = vld [vmem:[%s11435_s1 + $0x4c4] ss:$16 sps:$4 sm:$0xff]   ;;  %v7427_v12 = vld [vmem:[%s11435_s1 + $0x4c0] ss:$16 sps:$4 sm:$0xff]  }
  0x25   :  { %5003 = vmatprep.subr.bf16.mxu1 %v7377_v37  ;;  %v7432_v11 = vld [vmem:[%s11435_s1 + $0x6c4] ss:$16 sps:$4 sm:$0xff]   ;;  %v7430_v13 = vld [vmem:[%s11435_s1 + $0x6c0] ss:$16 sps:$4 sm:$0xff]   ;;  %v8937_v37 = vcombine.high %v8923_v33, %v8923_v33 }
  0x26   :  { %v7435_v14 = vld [vmem:[%s11435_s1 + $0x4a4] ss:$16 sps:$4 sm:$0xff]   ;;  %v7433_v16 = vld [vmem:[%s11435_s1 + $0x4a0] ss:$16 sps:$4 sm:$0xff]  }
  0x27   :  { %4963 = vmatpush2.bf16.msra.mxu0 %v7379_v38  ;;  %v7438_v15 = vld [vmem:[%s11435_s1 + $0x6a4] ss:$16 sps:$4 sm:$0xff]   ;;  %v7436_v17 = vld [vmem:[%s11435_s1 + $0x6a0] ss:$16 sps:$4 sm:$0xff]  }
  0x28   :  { %5004 = vmatpush2.bf16.msra.mxu1 %v7380_v39  ;;  %4964 = vmatprep.subr.bf16.mxu0 %v7381_v40  ;;  %v7441_v18 = vld [vmem:[%s11435_s1 + $0x484] ss:$16 sps:$4 sm:$0xff]   ;;  %v7439_v20 = vld [vmem:[%s11435_s1 + $0x480] ss:$16 sps:$4 sm:$0xff]  }
  0x29   :  { %5005 = vmatprep.subr.bf16.mxu1 %v7383_v41  ;;  %v7444_v19 = vld [vmem:[%s11435_s1 + $0x684] ss:$16 sps:$4 sm:$0xff]   ;;  %v7442_v21 = vld [vmem:[%s11435_s1 + $0x680] ss:$16 sps:$4 sm:$0xff]  }
  0x2a   :  { %v7447_v22 = vld [vmem:[%s11435_s1 + $0x464] ss:$16 sps:$4 sm:$0xff]   ;;  %v7445_v24 = vld [vmem:[%s11435_s1 + $0x460] ss:$16 sps:$4 sm:$0xff]  }
  0x2b   :  { %4965 = vmatpush2.bf16.msra.mxu0 %v7385_v42  ;;  %v7450_v23 = vld [vmem:[%s11435_s1 + $0x664] ss:$16 sps:$4 sm:$0xff]   ;;  %v7448_v25 = vld [vmem:[%s11435_s1 + $0x660] ss:$16 sps:$4 sm:$0xff]  }
  0x2c   :  { %5006 = vmatpush2.bf16.msra.mxu1 %v7386_v43  ;;  %4966 = vmatprep.subr.bf16.mxu0 %v7387_v44  ;;  %v7453_v26 = vld [vmem:[%s11435_s1 + $0x444] ss:$16 sps:$4 sm:$0xff]   ;;  %v7451_v28 = vld [vmem:[%s11435_s1 + $0x440] ss:$16 sps:$4 sm:$0xff]  }
  0x2d   :  { %5007 = vmatprep.subr.bf16.mxu1 %v7389_v45  ;;  %v7456_v27 = vld [vmem:[%s11435_s1 + $0x644] ss:$16 sps:$4 sm:$0xff]   ;;  %v7454_v29 = vld [vmem:[%s11435_s1 + $0x640] ss:$16 sps:$4 sm:$0xff]  }
  0x2e   :  { %v7459_v30 = vld [vmem:[%s11435_s1 + $0x424] ss:$16 sps:$4 sm:$0xff]   ;;  %v7457_v34 = vld [vmem:[%s11435_s1 + $0x420] ss:$16 sps:$4 sm:$0xff]  }
  0x2f   :  { %4967 = vmatpush2.bf16.msra.mxu0 %v7391_v49  ;;  %v7462_v31 = vld [vmem:[%s11435_s1 + $0x624] ss:$16 sps:$4 sm:$0xff]   ;;  %v7460_v35 = vld [vmem:[%s11435_s1 + $0x620] ss:$16 sps:$4 sm:$0xff]  }
  0x30   :  { %5008 = vmatpush2.bf16.msra.mxu1 %v7392_v50  ;;  %4968 = vmatprep.subr.bf16.mxu0 %v7393_v52  ;;  %v8918_v32 = vld [vmem:[%s11436_s0 + $0x10] sm:$0xff] }
  0x31   :  { %5009 = vmatprep.subr.bf16.mxu1 %v7395_v53  ;;  %v8933_v36 = vcombine.high %v8918_v32, %v8918_v32  ;;  %v7465_v38 = vld [vmem:[%s11435_s1 + $0x404] ss:$16 sps:$4 sm:$0xff]   ;;  %v7463_v40 = vld [vmem:[%s11435_s1 + $0x400] ss:$16 sps:$4 sm:$0xff]  }
  0x32   :  { %v7468_v39 = vld [vmem:[%s11435_s1 + $0x604] ss:$16 sps:$4 sm:$0xff]   ;;  %v7466_v41 = vld [vmem:[%s11435_s1 + $0x600] ss:$16 sps:$4 sm:$0xff]  }
  0x33   :  { %4969 = vmatpush2.bf16.msra.mxu0 %v7397_v54  ;;  %v7471_v42 = vld [vmem:[%s11435_s1 + $0x5e4] ss:$16 sps:$4 sm:$0xff]   ;;  %v7469_v44 = vld [vmem:[%s11435_s1 + $0x5e0] ss:$16 sps:$4 sm:$0xff]  }
  0x34   :  { %5010 = vmatpush2.bf16.msra.mxu1 %v7398_v55  ;;  %4970 = vmatprep.subr.bf16.mxu0 %v7399_v56  ;;  %v7474_v43 = vld [vmem:[%s11435_s1 + $0x7e4] ss:$16 sps:$4 sm:$0xff]   ;;  %v7472_v45 = vld [vmem:[%s11435_s1 + $0x7e0] ss:$16 sps:$4 sm:$0xff]  }
  0x35   :  { %5011 = vmatprep.subr.bf16.mxu1 %v7401_v57  ;;  %v7477_v46 = vld [vmem:[%s11435_s1 + $0x5c4] ss:$16 sps:$4 sm:$0xff]   ;;  %v7475_v49 = vld [vmem:[%s11435_s1 + $0x5c0] ss:$16 sps:$4 sm:$0xff]  }
  0x36   :  { %v7480_v48 = vld [vmem:[%s11435_s1 + $0x7c4] ss:$16 sps:$4 sm:$0xff]   ;;  %v7478_v50 = vld [vmem:[%s11435_s1 + $0x7c0] ss:$16 sps:$4 sm:$0xff]  }
  0x37   :  { %4971 = vmatpush2.bf16.msra.mxu0 %v7403_v58  ;;  %v7483_v52 = vld [vmem:[%s11435_s1 + $0x5a4] ss:$16 sps:$4 sm:$0xff]   ;;  %v7481_v54 = vld [vmem:[%s11435_s1 + $0x5a0] ss:$16 sps:$4 sm:$0xff]  }
  0x38   :  { %5012 = vmatpush2.bf16.msra.mxu1 %v7404_v59  ;;  %4972 = vmatprep.subr.bf16.mxu0 %v7405_v60  ;;  %v7486_v53 = vld [vmem:[%s11435_s1 + $0x7a4] ss:$16 sps:$4 sm:$0xff]   ;;  %v7484_v55 = vld [vmem:[%s11435_s1 + $0x7a0] ss:$16 sps:$4 sm:$0xff]  }
  0x39   :  { %5013 = vmatprep.subr.bf16.mxu1 %v7407_v61  ;;  %v7489_v56 = vld [vmem:[%s11435_s1 + $0x584] ss:$16 sps:$4 sm:$0xff]   ;;  %v7487_v58 = vld [vmem:[%s11435_s1 + $0x580] ss:$16 sps:$4 sm:$0xff]  }
  0x3a   :  { %v7492_v57 = vld [vmem:[%s11435_s1 + $0x784] ss:$16 sps:$4 sm:$0xff]   ;;  %v7490_v59 = vld [vmem:[%s11435_s1 + $0x780] ss:$16 sps:$4 sm:$0xff]  }
  0x3b   :  { %4973 = vmatpush2.bf16.msra.mxu0 %v7409_v62  ;;  %v7495_v60 = vld [vmem:[%s11435_s1 + $0x564] ss:$16 sps:$4 sm:$0xff]   ;;  %v7493_v62 = vld [vmem:[%s11435_s1 + $0x560] ss:$16 sps:$4 sm:$0xff]  }
  0x3c   :  { %5014 = vmatpush2.bf16.msra.mxu1 %v7410_v63  ;;  %4974 = vmatprep.subr.bf16.mxu0 %v7411_v0  ;;  %v7498_v61 = vld [vmem:[%s11435_s1 + $0x764] ss:$16 sps:$4 sm:$0xff]   ;;  %v7496_v63 = vld [vmem:[%s11435_s1 + $0x760] ss:$16 sps:$4 sm:$0xff]  }
  0x3d   :  { %5015 = vmatprep.subr.bf16.mxu1 %v7413_v1  ;;  %v7501_v0 = vld [vmem:[%s11435_s1 + $0x544] ss:$16 sps:$4 sm:$0xff]  }
  0x3e   :  { %v7504_v1 = vld [vmem:[%s11435_s1 + $0x744] ss:$16 sps:$4 sm:$0xff]  }
  0x3f   :  { %4975 = vmatpush2.bf16.msra.mxu0 %v7415_v2  ;;  %v7499_v2 = vld [vmem:[%s11435_s1 + $0x540] ss:$16 sps:$4 sm:$0xff]  }
  0x40   :  { %5016 = vmatpush2.bf16.msra.mxu1 %v7416_v3  ;;  %5026 = vmatprep.subr.bf16.mxu0 %v7423_v4  ;;  %v7502_v3 = vld [vmem:[%s11435_s1 + $0x740] ss:$16 sps:$4 sm:$0xff]   ;;  %v7507_v4 = vld [vmem:[%s11435_s1 + $0x524] ss:$16 sps:$4 sm:$0xff]  }
  0x41   :  { %5067 = vmatprep.subr.bf16.mxu1 %v7426_v5  ;;  %v7510_v5 = vld [vmem:[%s11435_s1 + $0x724] ss:$16 sps:$4 sm:$0xff]  }
  0x42   :  { %4977 = vmatmul.mubr.bf16.vlgmr.msra.gmra.mxu0 %v8837_v6 }
  0x43   :  { %5018 = vmatmul.mubr.bf16.vlgmr.msra.gmra.mxu1 %v8839_v7  ;;  %5027 = vmatpush1.bf16.msra.mxu0 %v7421_v8  ;;  %v7505_v8 = vld [vmem:[%s11435_s1 + $0x520] ss:$16 sps:$4 sm:$0xff]  }
  0x44   :  { %5068 = vmatpush1.bf16.msra.mxu1 %v7424_v9  ;;  %5028 = vmatprep.subr.bf16.mxu0 %v7429_v10  ;;  %v7508_v9 = vld [vmem:[%s11435_s1 + $0x720] ss:$16 sps:$4 sm:$0xff]   ;;  %v7513_v10 = vld [vmem:[%s11435_s1 + $0x504] ss:$16 sps:$4 sm:$0xff]  }
  0x45   :  { %5069 = vmatprep.subr.bf16.mxu1 %v7432_v11  ;;  %5058 = vmatprep.mubr.bf16.mxu0 %v8933_v36  ;;  %v7516_v11 = vld [vmem:[%s11435_s1 + $0x704] ss:$16 sps:$4 sm:$0xff]  }
  0x46   :  { %5099 = vmatprep.mubr.bf16.mxu1 %v8937_v37 }
  0x47   :  { %5029 = vmatpush1.bf16.msra.mxu0 %v7427_v12  ;;  %v7511_v12 = vld [vmem:[%s11435_s1 + $0x500] ss:$16 sps:$4 sm:$0xff]  }
  0x48   :  { %5070 = vmatpush1.bf16.msra.mxu1 %v7430_v13  ;;  %5030 = vmatprep.subr.bf16.mxu0 %v7435_v14  ;;  %v7514_v13 = vld [vmem:[%s11435_s1 + $0x700] ss:$16 sps:$4 sm:$0xff]   ;;  %v7523_v14 = vld [vmem:[%s11435_s1 + $0x8e4] ss:$16 sps:$4 sm:$0xff]  }
  0x49   :  { %5071 = vmatprep.subr.bf16.mxu1 %v7438_v15  ;;  %v7526_v15 = vld [vmem:[%s11435_s1 + $0xae4] ss:$16 sps:$4 sm:$0xff]  }
  0x4b   :  { %5031 = vmatpush1.bf16.msra.mxu0 %v7433_v16  ;;  %v9057_v16 = vcombine.low %v8918_v32, %v8918_v32  ;;  %v7541_v32 = vld [vmem:[%s11435_s1 + $0x884] ss:$16 sps:$4 sm:$0xff]  }
  0x4c   :  { %5072 = vmatpush1.bf16.msra.mxu1 %v7436_v17  ;;  %5032 = vmatprep.subr.bf16.mxu0 %v7441_v18  ;;  %v9061_v17 = vcombine.low %v8923_v33, %v8923_v33  ;;  %v7521_v18 = vld [vmem:[%s11435_s1 + $0x8e0] ss:$16 sps:$4 sm:$0xff]   ;;  %v7544_v33 = vld [vmem:[%s11435_s1 + $0xa84] ss:$16 sps:$4 sm:$0xff]  }
  0x4d   :  { %5073 = vmatprep.subr.bf16.mxu1 %v7444_v19  ;;  %v7524_v19 = vld [vmem:[%s11435_s1 + $0xae0] ss:$16 sps:$4 sm:$0xff]  }
  0x4f   :  { %5033 = vmatpush1.bf16.msra.mxu0 %v7439_v20  ;;  %v7529_v20 = vld [vmem:[%s11435_s1 + $0x8c4] ss:$16 sps:$4 sm:$0xff]  }
  0x50   :  { %5074 = vmatpush1.bf16.msra.mxu1 %v7442_v21  ;;  %5034 = vmatprep.subr.bf16.mxu0 %v7447_v22  ;;  %v7532_v21 = vld [vmem:[%s11435_s1 + $0xac4] ss:$16 sps:$4 sm:$0xff]  }
  0x51   :  { %5075 = vmatprep.subr.bf16.mxu1 %v7450_v23  ;;  %v9078_v22 = vld [vmem:[%s11436_s0 + $0x20] sm:$0xff]  ;;  %v9083_v23 = vld [vmem:[%s11436_s0 + $0x28] sm:$0xff] }
  0x53   :  { %5035 = vmatpush1.bf16.msra.mxu0 %v7445_v24  ;;  %v9087_v24 = vcombine.high %v9078_v22, %v9078_v22 }
  0x54   :  { %5076 = vmatpush1.bf16.msra.mxu1 %v7448_v25  ;;  %5036 = vmatprep.subr.bf16.mxu0 %v7453_v26  ;;  %v9091_v25 = vcombine.high %v9083_v23, %v9083_v23  ;;  %v7527_v26 = vld [vmem:[%s11435_s1 + $0x8c0] ss:$16 sps:$4 sm:$0xff]  }
  0x55   :  { %5077 = vmatprep.subr.bf16.mxu1 %v7456_v27  ;;  %v7530_v27 = vld [vmem:[%s11435_s1 + $0xac0] ss:$16 sps:$4 sm:$0xff]  }
  0x57   :  { %5037 = vmatpush1.bf16.msra.mxu0 %v7451_v28  ;;  %v7535_v28 = vld [vmem:[%s11435_s1 + $0x8a4] ss:$16 sps:$4 sm:$0xff]  }
  0x58   :  { %5078 = vmatpush1.bf16.msra.mxu1 %v7454_v29  ;;  %5038 = vmatprep.subr.bf16.mxu0 %v7459_v30  ;;  %v7538_v29 = vld [vmem:[%s11435_s1 + $0xaa4] ss:$16 sps:$4 sm:$0xff]   ;;  %v7533_v30 = vld [vmem:[%s11435_s1 + $0x8a0] ss:$16 sps:$4 sm:$0xff]  }
  0x59   :  { %5079 = vmatprep.subr.bf16.mxu1 %v7462_v31  ;;  %v7536_v31 = vld [vmem:[%s11435_s1 + $0xaa0] ss:$16 sps:$4 sm:$0xff]  }
  0x5b   :  { %5039 = vmatpush1.bf16.msra.mxu0 %v7457_v34  ;;  %v7539_v34 = vld [vmem:[%s11435_s1 + $0x880] ss:$16 sps:$4 sm:$0xff]  }
  0x5c   :  { %5080 = vmatpush1.bf16.msra.mxu1 %v7460_v35  ;;  %5040 = vmatprep.subr.bf16.mxu0 %v7465_v38  ;;  %v7542_v35 = vld [vmem:[%s11435_s1 + $0xa80] ss:$16 sps:$4 sm:$0xff]   ;;  %v7547_v38 = vld [vmem:[%s11435_s1 + $0x864] ss:$16 sps:$4 sm:$0xff]  }
  0x5d   :  { %5081 = vmatprep.subr.bf16.mxu1 %v7468_v39  ;;  %v7550_v39 = vld [vmem:[%s11435_s1 + $0xa64] ss:$16 sps:$4 sm:$0xff]  }
  0x5f   :  { %5041 = vmatpush1.bf16.msra.mxu0 %v7463_v40  ;;  %v7545_v40 = vld [vmem:[%s11435_s1 + $0x860] ss:$16 sps:$4 sm:$0xff]  }
  0x60   :  { %5082 = vmatpush1.bf16.msra.mxu1 %v7466_v41  ;;  %5042 = vmatprep.subr.bf16.mxu0 %v7471_v42  ;;  %v7548_v41 = vld [vmem:[%s11435_s1 + $0xa60] ss:$16 sps:$4 sm:$0xff]   ;;  %v7553_v42 = vld [vmem:[%s11435_s1 + $0x844] ss:$16 sps:$4 sm:$0xff]  }
  0x61   :  { %5083 = vmatprep.subr.bf16.mxu1 %v7474_v43  ;;  %v7556_v43 = vld [vmem:[%s11435_s1 + $0xa44] ss:$16 sps:$4 sm:$0xff]  }
  0x63   :  { %5043 = vmatpush2.bf16.msra.mxu0 %v7469_v44  ;;  %v7551_v44 = vld [vmem:[%s11435_s1 + $0x840] ss:$16 sps:$4 sm:$0xff]  }
  0x64   :  { %5084 = vmatpush2.bf16.msra.mxu1 %v7472_v45  ;;  %5044 = vmatprep.subr.bf16.mxu0 %v7477_v46  ;;  %v7554_v45 = vld [vmem:[%s11435_s1 + $0xa40] ss:$16 sps:$4 sm:$0xff]   ;;  %v7559_v46 = vld [vmem:[%s11435_s1 + $0x824] ss:$16 sps:$4 sm:$0xff]  }
  0x65   :  { %5085 = vmatprep.subr.bf16.mxu1 %v7480_v48  ;;  %v7562_v48 = vld [vmem:[%s11435_s1 + $0xa24] ss:$16 sps:$4 sm:$0xff]  }
  0x67   :  { %5045 = vmatpush2.bf16.msra.mxu0 %v7475_v49  ;;  %v7557_v49 = vld [vmem:[%s11435_s1 + $0x820] ss:$16 sps:$4 sm:$0xff]  }
  0x68   :  { %5086 = vmatpush2.bf16.msra.mxu1 %v7478_v50  ;;  %5046 = vmatprep.subr.bf16.mxu0 %v7483_v52  ;;  %v7560_v50 = vld [vmem:[%s11435_s1 + $0xa20] ss:$16 sps:$4 sm:$0xff]   ;;  %v7565_v52 = vld [vmem:[%s11435_s1 + $0x804] ss:$16 sps:$4 sm:$0xff]  }
  0x69   :  { %5087 = vmatprep.subr.bf16.mxu1 %v7486_v53  ;;  %v7568_v53 = vld [vmem:[%s11435_s1 + $0xa04] ss:$16 sps:$4 sm:$0xff]  }
  0x6b   :  { %5047 = vmatpush2.bf16.msra.mxu0 %v7481_v54  ;;  %v7563_v54 = vld [vmem:[%s11435_s1 + $0x800] ss:$16 sps:$4 sm:$0xff]  }
  0x6c   :  { %5088 = vmatpush2.bf16.msra.mxu1 %v7484_v55  ;;  %5048 = vmatprep.subr.bf16.mxu0 %v7489_v56  ;;  %v7566_v55 = vld [vmem:[%s11435_s1 + $0xa00] ss:$16 sps:$4 sm:$0xff]   ;;  %v7571_v56 = vld [vmem:[%s11435_s1 + $0x9e4] ss:$16 sps:$4 sm:$0xff]  }
  0x6d   :  { %5089 = vmatprep.subr.bf16.mxu1 %v7492_v57  ;;  %v7574_v57 = vld [vmem:[%s11435_s1 + $0xbe4] ss:$16 sps:$4 sm:$0xff]  }
  0x6f   :  { %5049 = vmatpush2.bf16.msra.mxu0 %v7487_v58  ;;  %v7569_v58 = vld [vmem:[%s11435_s1 + $0x9e0] ss:$16 sps:$4 sm:$0xff]  }
  0x70   :  { %5090 = vmatpush2.bf16.msra.mxu1 %v7490_v59  ;;  %5050 = vmatprep.subr.bf16.mxu0 %v7495_v60  ;;  %v7572_v59 = vld [vmem:[%s11435_s1 + $0xbe0] ss:$16 sps:$4 sm:$0xff]   ;;  %v7577_v60 = vld [vmem:[%s11435_s1 + $0x9c4] ss:$16 sps:$4 sm:$0xff]  }
  0x71   :  { %5091 = vmatprep.subr.bf16.mxu1 %v7498_v61  ;;  %v7580_v61 = vld [vmem:[%s11435_s1 + $0xbc4] ss:$16 sps:$4 sm:$0xff]  }
  0x73   :  { %5051 = vmatpush2.bf16.msra.mxu0 %v7493_v62  ;;  %v7575_v62 = vld [vmem:[%s11435_s1 + $0x9c0] ss:$16 sps:$4 sm:$0xff]  }
  0x74   :  { %5092 = vmatpush2.bf16.msra.mxu1 %v7496_v63  ;;  %5052 = vmatprep.subr.bf16.mxu0 %v7501_v0  ;;  %v7578_v63 = vld [vmem:[%s11435_s1 + $0xbc0] ss:$16 sps:$4 sm:$0xff]   ;;  %v7583_v0 = vld [vmem:[%s11435_s1 + $0x9a4] ss:$16 sps:$4 sm:$0xff]  }
  0x75   :  { %5093 = vmatprep.subr.bf16.mxu1 %v7504_v1  ;;  %v7586_v1 = vld [vmem:[%s11435_s1 + $0xba4] ss:$16 sps:$4 sm:$0xff]  }
  0x77   :  { %5053 = vmatpush2.bf16.msra.mxu0 %v7499_v2  ;;  %v7581_v2 = vld [vmem:[%s11435_s1 + $0x9a0] ss:$16 sps:$4 sm:$0xff]  }
  0x78   :  { %5094 = vmatpush2.bf16.msra.mxu1 %v7502_v3  ;;  %5054 = vmatprep.subr.bf16.mxu0 %v7507_v4  ;;  %v7584_v3 = vld [vmem:[%s11435_s1 + $0xba0] ss:$16 sps:$4 sm:$0xff]   ;;  %v7589_v4 = vld [vmem:[%s11435_s1 + $0x984] ss:$16 sps:$4 sm:$0xff]  }
  0x79   :  { %5095 = vmatprep.subr.bf16.mxu1 %v7510_v5  ;;  %v7592_v5 = vld [vmem:[%s11435_s1 + $0xb84] ss:$16 sps:$4 sm:$0xff]  }
  0x7b   :  { %5055 = vmatpush2.bf16.msra.mxu0 %v7505_v8  ;;  %v7587_v8 = vld [vmem:[%s11435_s1 + $0x980] ss:$16 sps:$4 sm:$0xff]  }
  0x7c   :  { %5096 = vmatpush2.bf16.msra.mxu1 %v7508_v9  ;;  %5056 = vmatprep.subr.bf16.mxu0 %v7513_v10  ;;  %v7590_v9 = vld [vmem:[%s11435_s1 + $0xb80] ss:$16 sps:$4 sm:$0xff]   ;;  %v7595_v10 = vld [vmem:[%s11435_s1 + $0x964] ss:$16 sps:$4 sm:$0xff]  }
  0x7d   :  { %5097 = vmatprep.subr.bf16.mxu1 %v7516_v11  ;;  %v7598_v11 = vld [vmem:[%s11435_s1 + $0xb64] ss:$16 sps:$4 sm:$0xff]  }
  0x7f   :  { %5057 = vmatpush2.bf16.msra.mxu0 %v7511_v12  ;;  %v7593_v12 = vld [vmem:[%s11435_s1 + $0x960] ss:$16 sps:$4 sm:$0xff]  }
  0x80   :  { %5098 = vmatpush2.bf16.msra.mxu1 %v7514_v13  ;;  %5108 = vmatprep.subr.bf16.mxu0 %v7523_v14  ;;  %v7596_v13 = vld [vmem:[%s11435_s1 + $0xb60] ss:$16 sps:$4 sm:$0xff]   ;;  %v7601_v14 = vld [vmem:[%s11435_s1 + $0x944] ss:$16 sps:$4 sm:$0xff]  }
  0x81   :  { %5149 = vmatprep.subr.bf16.mxu1 %v7526_v15  ;;  %v7604_v15 = vld [vmem:[%s11435_s1 + $0xb44] ss:$16 sps:$4 sm:$0xff]  }
  0x82   :  { %5059 = vmatmul.mubr.bf16.vlgmr.msra.gmra.mxu0 %v9057_v16 }
  0x83   :  { %5100 = vmatmul.mubr.bf16.vlgmr.msra.gmra.mxu1 %v9061_v17  ;;  %5109 = vmatpush1.bf16.msra.mxu0 %v7521_v18  ;;  %v7599_v18 = vld [vmem:[%s11435_s1 + $0x940] ss:$16 sps:$4 sm:$0xff]  }
  0x84   :  { %5150 = vmatpush1.bf16.msra.mxu1 %v7524_v19  ;;  %5110 = vmatprep.subr.bf16.mxu0 %v7529_v20  ;;  %v7602_v19 = vld [vmem:[%s11435_s1 + $0xb40] ss:$16 sps:$4 sm:$0xff]   ;;  %v7607_v20 = vld [vmem:[%s11435_s1 + $0x924] ss:$16 sps:$4 sm:$0xff]  }
  0x85   :  { %5151 = vmatprep.subr.bf16.mxu1 %v7532_v21  ;;  %5140 = vmatprep.mubr.bf16.mxu0 %v9087_v24  ;;  %v7610_v21 = vld [vmem:[%s11435_s1 + $0xb24] ss:$16 sps:$4 sm:$0xff]  }
  0x86   :  { %5181 = vmatprep.mubr.bf16.mxu1 %v9091_v25 }
  0x87   :  { %5111 = vmatpush1.bf16.msra.mxu0 %v7527_v26  ;;  %v7605_v26 = vld [vmem:[%s11435_s1 + $0x920] ss:$16 sps:$4 sm:$0xff]  }
  0x88   :  { %5152 = vmatpush1.bf16.msra.mxu1 %v7530_v27  ;;  %5112 = vmatprep.subr.bf16.mxu0 %v7535_v28  ;;  %v7608_v27 = vld [vmem:[%s11435_s1 + $0xb20] ss:$16 sps:$4 sm:$0xff]   ;;  %v7613_v28 = vld [vmem:[%s11435_s1 + $0x904] ss:$16 sps:$4 sm:$0xff]  }
  0x89   :  { %5153 = vmatprep.subr.bf16.mxu1 %v7538_v29  ;;  %v7616_v29 = vld [vmem:[%s11435_s1 + $0xb04] ss:$16 sps:$4 sm:$0xff]  }
  0x8b   :  { %5113 = vmatpush1.bf16.msra.mxu0 %v7533_v30  ;;  %v7611_v30 = vld [vmem:[%s11435_s1 + $0x900] ss:$16 sps:$4 sm:$0xff]  }
  0x8c   :  { %5154 = vmatpush1.bf16.msra.mxu1 %v7536_v31  ;;  %5114 = vmatprep.subr.bf16.mxu0 %v7541_v32  ;;  %v7614_v31 = vld [vmem:[%s11435_s1 + $0xb00] ss:$16 sps:$4 sm:$0xff]   ;;  %v7623_v32 = vld [vmem:[%s11435_s1 + $0xce4] ss:$16 sps:$4 sm:$0xff]  }
  0x8d   :  { %5155 = vmatprep.subr.bf16.mxu1 %v7544_v33  ;;  %v7626_v33 = vld [vmem:[%s11435_s1 + $0xee4] ss:$16 sps:$4 sm:$0xff]  }
  0x8f   :  { %5115 = vmatpush1.bf16.msra.mxu0 %v7539_v34  ;;  %v7621_v34 = vld [vmem:[%s11435_s1 + $0xce0] ss:$16 sps:$4 sm:$0xff]  }
  0x90   :  { %5156 = vmatpush1.bf16.msra.mxu1 %v7542_v35  ;;  %5116 = vmatprep.subr.bf16.mxu0 %v7547_v38  ;;  %v9283_v35 = vld [vmem:[%s11436_s0 + $0x30] sm:$0xff]  ;;  %v9287_v38 = vcombine.low %v9078_v22, %v9078_v22 }
  0x91   :  { %5157 = vmatprep.subr.bf16.mxu1 %v7550_v39  ;;  %v9291_v39 = vcombine.low %v9083_v23, %v9083_v23  ;;  %v7629_v22 = vld [vmem:[%s11435_s1 + $0xcc4] ss:$16 sps:$4 sm:$0xff]  }
  0x92   :  { %v7632_v23 = vld [vmem:[%s11435_s1 + $0xec4] ss:$16 sps:$4 sm:$0xff]  }
  0x93   :  { %5117 = vmatpush1.bf16.msra.mxu0 %v7545_v40  ;;  %v9296_v40 = vld [vmem:[%s11436_s0 + $0x38] sm:$0xff] }
  0x94   :  { %5158 = vmatpush1.bf16.msra.mxu1 %v7548_v41  ;;  %5118 = vmatprep.subr.bf16.mxu0 %v7553_v42  ;;  %v7624_v41 = vld [vmem:[%s11435_s1 + $0xee0] ss:$16 sps:$4 sm:$0xff]   ;;  %v9309_v42 = vcombine.high %v9283_v35, %v9283_v35 }
  0x95   :  { %5159 = vmatprep.subr.bf16.mxu1 %v7556_v43  ;;  %v9313_v43 = vcombine.high %v9296_v40, %v9296_v40 }
  0x97   :  { %5119 = vmatpush1.bf16.msra.mxu0 %v7551_v44  ;;  %v7627_v44 = vld [vmem:[%s11435_s1 + $0xcc0] ss:$16 sps:$4 sm:$0xff]  }
  0x98   :  { %5160 = vmatpush1.bf16.msra.mxu1 %v7554_v45  ;;  %5120 = vmatprep.subr.bf16.mxu0 %v7559_v46  ;;  %v7630_v45 = vld [vmem:[%s11435_s1 + $0xec0] ss:$16 sps:$4 sm:$0xff]   ;;  %v7635_v46 = vld [vmem:[%s11435_s1 + $0xca4] ss:$16 sps:$4 sm:$0xff]  }
  0x99   :  { %5161 = vmatprep.subr.bf16.mxu1 %v7562_v48  ;;  %v7638_v48 = vld [vmem:[%s11435_s1 + $0xea4] ss:$16 sps:$4 sm:$0xff]  }
  0x9b   :  { %5121 = vmatpush1.bf16.msra.mxu0 %v7557_v49  ;;  %v7633_v49 = vld [vmem:[%s11435_s1 + $0xca0] ss:$16 sps:$4 sm:$0xff]  }
  0x9c   :  { %5162 = vmatpush1.bf16.msra.mxu1 %v7560_v50  ;;  %5122 = vmatprep.subr.bf16.mxu0 %v7565_v52  ;;  %v7636_v50 = vld [vmem:[%s11435_s1 + $0xea0] ss:$16 sps:$4 sm:$0xff]   ;;  %v7641_v52 = vld [vmem:[%s11435_s1 + $0xc84] ss:$16 sps:$4 sm:$0xff]  }
  0x9d   :  { %5163 = vmatprep.subr.bf16.mxu1 %v7568_v53  ;;  %v7644_v53 = vld [vmem:[%s11435_s1 + $0xe84] ss:$16 sps:$4 sm:$0xff]  }
  0x9f   :  { %5123 = vmatpush1.bf16.msra.mxu0 %v7563_v54  ;;  %v7639_v54 = vld [vmem:[%s11435_s1 + $0xc80] ss:$16 sps:$4 sm:$0xff]  }
  0xa0   :  { %5164 = vmatpush1.bf16.msra.mxu1 %v7566_v55  ;;  %5124 = vmatprep.subr.bf16.mxu0 %v7571_v56  ;;  %v7642_v55 = vld [vmem:[%s11435_s1 + $0xe80] ss:$16 sps:$4 sm:$0xff]   ;;  %v7647_v56 = vld [vmem:[%s11435_s1 + $0xc64] ss:$16 sps:$4 sm:$0xff]  }
  0xa1   :  { %5165 = vmatprep.subr.bf16.mxu1 %v7574_v57  ;;  %v7650_v57 = vld [vmem:[%s11435_s1 + $0xe64] ss:$16 sps:$4 sm:$0xff]  }
  0xa3   :  { %5125 = vmatpush2.bf16.msra.mxu0 %v7569_v58  ;;  %v7645_v58 = vld [vmem:[%s11435_s1 + $0xc60] ss:$16 sps:$4 sm:$0xff]  }
  0xa4   :  { %5166 = vmatpush2.bf16.msra.mxu1 %v7572_v59  ;;  %5126 = vmatprep.subr.bf16.mxu0 %v7577_v60  ;;  %v7648_v59 = vld [vmem:[%s11435_s1 + $0xe60] ss:$16 sps:$4 sm:$0xff]   ;;  %v7653_v60 = vld [vmem:[%s11435_s1 + $0xc44] ss:$16 sps:$4 sm:$0xff]  }
  0xa5   :  { %5167 = vmatprep.subr.bf16.mxu1 %v7580_v61  ;;  %v7656_v61 = vld [vmem:[%s11435_s1 + $0xe44] ss:$16 sps:$4 sm:$0xff]  }
  0xa7   :  { %5127 = vmatpush2.bf16.msra.mxu0 %v7575_v62  ;;  %v7651_v62 = vld [vmem:[%s11435_s1 + $0xc40] ss:$16 sps:$4 sm:$0xff]  }
  0xa8   :  { %5168 = vmatpush2.bf16.msra.mxu1 %v7578_v63  ;;  %5128 = vmatprep.subr.bf16.mxu0 %v7583_v0  ;;  %v7654_v63 = vld [vmem:[%s11435_s1 + $0xe40] ss:$16 sps:$4 sm:$0xff]   ;;  %v7659_v0 = vld [vmem:[%s11435_s1 + $0xc24] ss:$16 sps:$4 sm:$0xff]  }
  0xa9   :  { %5169 = vmatprep.subr.bf16.mxu1 %v7586_v1  ;;  %v7662_v1 = vld [vmem:[%s11435_s1 + $0xe24] ss:$16 sps:$4 sm:$0xff]  }
  0xab   :  { %5129 = vmatpush2.bf16.msra.mxu0 %v7581_v2  ;;  %v7657_v2 = vld [vmem:[%s11435_s1 + $0xc20] ss:$16 sps:$4 sm:$0xff]  }
  0xac   :  { %5170 = vmatpush2.bf16.msra.mxu1 %v7584_v3  ;;  %5130 = vmatprep.subr.bf16.mxu0 %v7589_v4  ;;  %v7660_v3 = vld [vmem:[%s11435_s1 + $0xe20] ss:$16 sps:$4 sm:$0xff]   ;;  %v7665_v4 = vld [vmem:[%s11435_s1 + $0xc04] ss:$16 sps:$4 sm:$0xff]  }
  0xad   :  { %5171 = vmatprep.subr.bf16.mxu1 %v7592_v5  ;;  %v7668_v5 = vld [vmem:[%s11435_s1 + $0xe04] ss:$16 sps:$4 sm:$0xff]  }
  0xaf   :  { %5131 = vmatpush2.bf16.msra.mxu0 %v7587_v8  ;;  %v7663_v8 = vld [vmem:[%s11435_s1 + $0xc00] ss:$16 sps:$4 sm:$0xff]  }
  0xb0   :  { %5172 = vmatpush2.bf16.msra.mxu1 %v7590_v9  ;;  %5132 = vmatprep.subr.bf16.mxu0 %v7595_v10  ;;  %v7666_v9 = vld [vmem:[%s11435_s1 + $0xe00] ss:$16 sps:$4 sm:$0xff]   ;;  %v7671_v10 = vld [vmem:[%s11435_s1 + $0xde4] ss:$16 sps:$4 sm:$0xff]  }
  0xb1   :  { %5173 = vmatprep.subr.bf16.mxu1 %v7598_v11  ;;  %v7674_v11 = vld [vmem:[%s11435_s1 + $0xfe4] ss:$16 sps:$4 sm:$0xff]  }
  0xb3   :  { %5133 = vmatpush2.bf16.msra.mxu0 %v7593_v12  ;;  %v7669_v12 = vld [vmem:[%s11435_s1 + $0xde0] ss:$16 sps:$4 sm:$0xff]  }
  0xb4   :  { %5174 = vmatpush2.bf16.msra.mxu1 %v7596_v13  ;;  %5134 = vmatprep.subr.bf16.mxu0 %v7601_v14  ;;  %v7672_v13 = vld [vmem:[%s11435_s1 + $0xfe0] ss:$16 sps:$4 sm:$0xff]   ;;  %v7677_v14 = vld [vmem:[%s11435_s1 + $0xdc4] ss:$16 sps:$4 sm:$0xff]  }
  0xb5   :  { %5175 = vmatprep.subr.bf16.mxu1 %v7604_v15  ;;  %v7680_v15 = vld [vmem:[%s11435_s1 + $0xfc4] ss:$16 sps:$4 sm:$0xff]  }
  0xb7   :  { %5135 = vmatpush2.bf16.msra.mxu0 %v7599_v18  ;;  %v7675_v18 = vld [vmem:[%s11435_s1 + $0xdc0] ss:$16 sps:$4 sm:$0xff]  }
  0xb8   :  { %5176 = vmatpush2.bf16.msra.mxu1 %v7602_v19  ;;  %5136 = vmatprep.subr.bf16.mxu0 %v7607_v20  ;;  %v7678_v19 = vld [vmem:[%s11435_s1 + $0xfc0] ss:$16 sps:$4 sm:$0xff]   ;;  %v7683_v20 = vld [vmem:[%s11435_s1 + $0xda4] ss:$16 sps:$4 sm:$0xff]  }
  0xb9   :  { %5177 = vmatprep.subr.bf16.mxu1 %v7610_v21  ;;  %v7686_v21 = vld [vmem:[%s11435_s1 + $0xfa4] ss:$16 sps:$4 sm:$0xff]  }
  0xbb   :  { %5137 = vmatpush2.bf16.msra.mxu0 %v7605_v26  ;;  %v7681_v26 = vld [vmem:[%s11435_s1 + $0xda0] ss:$16 sps:$4 sm:$0xff]  }
  0xbc   :  { %5178 = vmatpush2.bf16.msra.mxu1 %v7608_v27  ;;  %5138 = vmatprep.subr.bf16.mxu0 %v7613_v28  ;;  %v7684_v27 = vld [vmem:[%s11435_s1 + $0xfa0] ss:$16 sps:$4 sm:$0xff]   ;;  %v7689_v28 = vld [vmem:[%s11435_s1 + $0xd84] ss:$16 sps:$4 sm:$0xff]  }
  0xbd   :  { %5179 = vmatprep.subr.bf16.mxu1 %v7616_v29  ;;  %v7692_v29 = vld [vmem:[%s11435_s1 + $0xf84] ss:$16 sps:$4 sm:$0xff]  }
  0xbf   :  { %5139 = vmatpush2.bf16.msra.mxu0 %v7611_v30  ;;  %v7687_v30 = vld [vmem:[%s11435_s1 + $0xd80] ss:$16 sps:$4 sm:$0xff]  }
  0xc0   :  { %5180 = vmatpush2.bf16.msra.mxu1 %v7614_v31  ;;  %5190 = vmatprep.subr.bf16.mxu0 %v7623_v32  ;;  %v7690_v31 = vld [vmem:[%s11435_s1 + $0xf80] ss:$16 sps:$4 sm:$0xff]   ;;  %v7695_v32 = vld [vmem:[%s11435_s1 + $0xd64] ss:$16 sps:$4 sm:$0xff]  }
  0xc1   :  { %5231 = vmatprep.subr.bf16.mxu1 %v7626_v33  ;;  %v7698_v33 = vld [vmem:[%s11435_s1 + $0xf64] ss:$16 sps:$4 sm:$0xff]  }
  0xc2   :  { %5141 = vmatmul.mubr.bf16.vlgmr.msra.gmra.mxu0 %v9287_v38 }
  0xc3   :  { %5182 = vmatmul.mubr.bf16.vlgmr.msra.gmra.mxu1 %v9291_v39  ;;  %5191 = vmatpush1.bf16.msra.mxu0 %v7621_v34  ;;  %v7693_v34 = vld [vmem:[%s11435_s1 + $0xd60] ss:$16 sps:$4 sm:$0xff]  }
  0xc4   :  { %5232 = vmatpush1.bf16.msra.mxu1 %v7624_v41  ;;  %5192 = vmatprep.subr.bf16.mxu0 %v7629_v22  ;;  %v7696_v41 = vld [vmem:[%s11435_s1 + $0xf60] ss:$16 sps:$4 sm:$0xff]   ;;  %v7701_v22 = vld [vmem:[%s11435_s1 + $0xd44] ss:$16 sps:$4 sm:$0xff]  }
  0xc5   :  { %5233 = vmatprep.subr.bf16.mxu1 %v7632_v23  ;;  %5222 = vmatprep.mubr.bf16.mxu0 %v9309_v42  ;;  %v7704_v23 = vld [vmem:[%s11435_s1 + $0xf44] ss:$16 sps:$4 sm:$0xff]  }
  0xc6   :  { %5263 = vmatprep.mubr.bf16.mxu1 %v9313_v43 }
  0xc7   :  { %5193 = vmatpush1.bf16.msra.mxu0 %v7627_v44  ;;  %v7699_v44 = vld [vmem:[%s11435_s1 + $0xd40] ss:$16 sps:$4 sm:$0xff]  }
  0xc8   :  { %5234 = vmatpush1.bf16.msra.mxu1 %v7630_v45  ;;  %5194 = vmatprep.subr.bf16.mxu0 %v7635_v46  ;;  %v7702_v45 = vld [vmem:[%s11435_s1 + $0xf40] ss:$16 sps:$4 sm:$0xff]   ;;  %v7707_v46 = vld [vmem:[%s11435_s1 + $0xd24] ss:$16 sps:$4 sm:$0xff]  }
  0xc9   :  { %5235 = vmatprep.subr.bf16.mxu1 %v7638_v48  ;;  %v836_v48 = vlaneseq }
  0xcb   :  { %5195 = vmatpush1.bf16.msra.mxu0 %v7633_v49  ;;  %v7710_v49 = vld [vmem:[%s11435_s1 + $0xf24] ss:$16 sps:$4 sm:$0xff]  }
  0xcc   :  { %5236 = vmatpush1.bf16.msra.mxu1 %v7636_v50  ;;  %5196 = vmatprep.subr.bf16.mxu0 %v7641_v52  ;;  %v7705_v50 = vld [vmem:[%s11435_s1 + $0xd20] ss:$16 sps:$4 sm:$0xff]  }
  0xcd   :  { %5237 = vmatprep.subr.bf16.mxu1 %v7644_v53  ;;  %v7708_v52 = vld [vmem:[%s11435_s1 + $0xf20] ss:$16 sps:$4 sm:$0xff]   ;;  %v7713_v53 = vld [vmem:[%s11435_s1 + $0xd04] ss:$16 sps:$4 sm:$0xff]  }
  0xcf   :  { %5197 = vmatpush1.bf16.msra.mxu0 %v7639_v54  ;;  %v9484_v54 = vshrl.u32 %v836_v48, 7  ;;  %v7745_v48 = vld [vmem:[%s11435_s1 + $0x1060] ss:$16 sps:$4 sm:$0xff]  }
  0xd0   :  { %5238 = vmatpush1.bf16.msra.mxu1 %v7642_v55  ;;  %5198 = vmatprep.subr.bf16.mxu0 %v7647_v56  ;;  %v7716_v55 = vld [vmem:[%s11435_s1 + $0xf04] ss:$16 sps:$4 sm:$0xff]   ;;  %v7711_v56 = vld [vmem:[%s11435_s1 + $0xd00] ss:$16 sps:$4 sm:$0xff]  }
  0xd1   :  { %5239 = vmatprep.subr.bf16.mxu1 %v7650_v57  ;;  %v7714_v57 = vld [vmem:[%s11435_s1 + $0xf00] ss:$16 sps:$4 sm:$0xff]  }
  0xd3   :  { %5199 = vmatpush1.bf16.msra.mxu0 %v7645_v58  ;;  %v834_v58 = vld [vmem:[%s11437_s2] sm:$0xf] }
  0xd4   :  { %5240 = vmatpush1.bf16.msra.mxu1 %v7648_v59  ;;  %5200 = vmatprep.subr.bf16.mxu0 %v7653_v60  ;;  %v838_v59 = vsub.s32 0, %v9484_v54  ;;  %v7723_v60 = vld [vmem:[%s11435_s1 + $0x10e4] ss:$16 sps:$4 sm:$0xff]  }
  0xd5   :  { %5241 = vmatprep.subr.bf16.mxu1 %v7656_v61  ;;  %v7726_v61 = vld [vmem:[%s11435_s1 + $0x12e4] ss:$16 sps:$4 sm:$0xff]  }
  0xd7   :  { %5201 = vmatpush1.bf16.msra.mxu0 %v7651_v62  ;;  %v7721_v62 = vld [vmem:[%s11435_s1 + $0x10e0] ss:$16 sps:$4 sm:$0xff]  }
  0xd8   :  { %5242 = vmatpush1.bf16.msra.mxu1 %v7654_v63  ;;  %5202 = vmatprep.subr.bf16.mxu0 %v7659_v0  ;;  %v842_v63 = vsub.s32 1, %v9484_v54  ;;  %v9511_v0 = vcombine.low %v9283_v35, %v9283_v35  ;;  %v7724_v35 = vld [vmem:[%s11435_s1 + $0x12e0] ss:$16 sps:$4 sm:$0xff]  }
  0xd9   :  { %5243 = vmatprep.subr.bf16.mxu1 %v7662_v1  ;;  %v9515_v1 = vcombine.low %v9296_v40, %v9296_v40  ;;  %v7729_v40 = vld [vmem:[%s11435_s1 + $0x10c4] ss:$16 sps:$4 sm:$0xff]  }
  0xdb   :  { %5203 = vmatpush1.bf16.msra.mxu0 %v7657_v2  ;;  %v9520_v2 = vld [vmem:[%s11436_s0 + $0x40] sm:$0xff] }
  0xdc   :  { %5244 = vmatpush1.bf16.msra.mxu1 %v7660_v3  ;;  %5204 = vmatprep.subr.bf16.mxu0 %v7665_v4  ;;  %v9525_v3 = vld [vmem:[%s11436_s0 + $0x48] sm:$0xff]  ;;  %v839_v4 = vrot.slane %v834_v58, %v838_v59  ;;  %v7760_v59 = vld [vmem:[%s11435_s1 + $0x1220] ss:$16 sps:$4 sm:$0xff]  }
  0xdd   :  { %5245 = vmatprep.subr.bf16.mxu1 %v7668_v5  ;;  %v7732_v5 = vld [vmem:[%s11435_s1 + $0x12c4] ss:$16 sps:$4 sm:$0xff]  }
  0xdf   :  { %5205 = vmatpush1.bf16.msra.mxu0 %v7663_v8  ;;  %v843_v8 = vrot.slane %v834_v58, %v842_v63  ;;  %v7757_v58 = vld [vmem:[%s11435_s1 + $0x1020] ss:$16 sps:$4 sm:$0xff]  }
  0xe0   :  { %5246 = vmatpush1.bf16.msra.mxu1 %v7666_v9  ;;  %5206 = vmatprep.subr.bf16.mxu0 %v7671_v10  ;;  %v9538_v9 = vcombine.high %v9520_v2, %v9520_v2  ;;  %v9542_v10 = vcombine.high %v9525_v3, %v9525_v3  ;;  %v7766_v63 = vld [vmem:[%s11435_s1 + $0x1200] ss:$16 sps:$4 sm:$0xff]  }
  0xe1   :  { %5247 = vmatprep.subr.bf16.mxu1 %v7674_v11 }
  0xe3   :  { %5207 = vmatpush2.bf16.msra.mxu0 %v7669_v12 }
  0xe4   :  { %5248 = vmatpush2.bf16.msra.mxu1 %v7672_v13  ;;  %5208 = vmatprep.subr.bf16.mxu0 %v7677_v14  ;;  %v7727_v13 = vld [vmem:[%s11435_s1 + $0x10c0] ss:$16 sps:$4 sm:$0xff]  }
  0xe5   :  { %5249 = vmatprep.subr.bf16.mxu1 %v7680_v15  ;;  %v7730_v15 = vld [vmem:[%s11435_s1 + $0x12c0] ss:$16 sps:$4 sm:$0xff]  }
  0xe7   :  { %5209 = vmatpush2.bf16.msra.mxu0 %v7675_v18 }
  0xe8   :  { %5250 = vmatpush2.bf16.msra.mxu1 %v7678_v19  ;;  %5210 = vmatprep.subr.bf16.mxu0 %v7683_v20  ;;  %v7735_v20 = vld [vmem:[%s11435_s1 + $0x10a4] ss:$16 sps:$4 sm:$0xff]  }
  0xe9   :  { %5251 = vmatprep.subr.bf16.mxu1 %v7686_v21  ;;  %v7738_v21 = vld [vmem:[%s11435_s1 + $0x12a4] ss:$16 sps:$4 sm:$0xff]  }
  0xeb   :  { %5211 = vmatpush2.bf16.msra.mxu0 %v7681_v26 }
  0xec   :  { %5252 = vmatpush2.bf16.msra.mxu1 %v7684_v27  ;;  %5212 = vmatprep.subr.bf16.mxu0 %v7689_v28 }
  0xed   :  { %5253 = vmatprep.subr.bf16.mxu1 %v7692_v29 }
  0xef   :  { %5213 = vmatpush2.bf16.msra.mxu0 %v7687_v30  ;;  %v7733_v30 = vld [vmem:[%s11435_s1 + $0x10a0] ss:$16 sps:$4 sm:$0xff]  }
  0xf0   :  { %5254 = vmatpush2.bf16.msra.mxu1 %v7690_v31  ;;  %5214 = vmatprep.subr.bf16.mxu0 %v7695_v32  ;;  %v7736_v32 = vld [vmem:[%s11435_s1 + $0x12a0] ss:$16 sps:$4 sm:$0xff]  }
  0xf1   :  { %5255 = vmatprep.subr.bf16.mxu1 %v7698_v33 }
  0xf3   :  { %5215 = vmatpush2.bf16.msra.mxu0 %v7693_v34 }
  0xf4   :  { %5256 = vmatpush2.bf16.msra.mxu1 %v7696_v41  ;;  %5216 = vmatprep.subr.bf16.mxu0 %v7701_v22  ;;  %v7741_v41 = vld [vmem:[%s11435_s1 + $0x1084] ss:$16 sps:$4 sm:$0xff]  }
  0xf5   :  { %5257 = vmatprep.subr.bf16.mxu1 %v7704_v23  ;;  %v7744_v22 = vld [vmem:[%s11435_s1 + $0x1284] ss:$16 sps:$4 sm:$0xff]   ;;  %v7739_v23 = vld [vmem:[%s11435_s1 + $0x1080] ss:$16 sps:$4 sm:$0xff]  }
  0xf7   :  { %5217 = vmatpush2.bf16.msra.mxu0 %v7699_v44  ;;  %v7742_v44 = vld [vmem:[%s11435_s1 + $0x1280] ss:$16 sps:$4 sm:$0xff]  }
  0xf8   :  { %5258 = vmatpush2.bf16.msra.mxu1 %v7702_v45  ;;  %5218 = vmatprep.subr.bf16.mxu0 %v7707_v46  ;;  %v7747_v45 = vld [vmem:[%s11435_s1 + $0x1064] ss:$16 sps:$4 sm:$0xff]  }
  0xf9   :  { %5259 = vmatprep.subr.bf16.mxu1 %v7710_v49  ;;  %v7750_v46 = vld [vmem:[%s11435_s1 + $0x1264] ss:$16 sps:$4 sm:$0xff]   ;;  %v7748_v49 = vld [vmem:[%s11435_s1 + $0x1260] ss:$16 sps:$4 sm:$0xff]  }
  0xfb   :  { %5219 = vmatpush2.bf16.msra.mxu0 %v7705_v50  ;;  %v7753_v50 = vld [vmem:[%s11435_s1 + $0x1044] ss:$16 sps:$4 sm:$0xff]  }
  0xfc   :  { %5260 = vmatpush2.bf16.msra.mxu1 %v7708_v52  ;;  %5220 = vmatprep.subr.bf16.mxu0 %v7713_v53  ;;  %v7756_v52 = vld [vmem:[%s11435_s1 + $0x1244] ss:$16 sps:$4 sm:$0xff]   ;;  %v7751_v53 = vld [vmem:[%s11435_s1 + $0x1040] ss:$16 sps:$4 sm:$0xff]  }
  0xfd   :  { %5261 = vmatprep.subr.bf16.mxu1 %v7716_v55  ;;  %v7754_v55 = vld [vmem:[%s11435_s1 + $0x1240] ss:$16 sps:$4 sm:$0xff]  }
  0xff   :  { %5221 = vmatpush2.bf16.msra.mxu0 %v7711_v56  ;;  %v7759_v56 = vld [vmem:[%s11435_s1 + $0x1024] ss:$16 sps:$4 sm:$0xff]  }
 0x100   :  { %5262 = vmatpush2.bf16.msra.mxu1 %v7714_v57  ;;  %5272 = vmatprep.subr.bf16.mxu0 %v7723_v60  ;;  %v7762_v57 = vld [vmem:[%s11435_s1 + $0x1224] ss:$16 sps:$4 sm:$0xff]  }
 0x101   :  { %5313 = vmatprep.subr.bf16.mxu1 %v7726_v61  ;;  %v7765_v60 = vld [vmem:[%s11435_s1 + $0x1004] ss:$16 sps:$4 sm:$0xff]  }
 0x102   :  { %v4978_v11 = vpop.f32.mrf.mxu0  ;;  %5223 = vmatmul.mubr.bf16.vlgmr.msra.gmra.mxu0 %v9511_v0  ;;  %v7768_v61 = vld [vmem:[%s11435_s1 + $0x1204] ss:$16 sps:$4 sm:$0xff]  }
 0x103   :  { %v5019_v12 = vpop.f32.mrf.mxu1  ;;  %5264 = vmatmul.mubr.bf16.vlgmr.msra.gmra.mxu1 %v9515_v1  ;;  %v4979_v14 = vadd.f32 %v4978_v11, %v839_v4  ;;  %5273 = vmatpush1.bf16.msra.mxu0 %v7721_v62  ;;  %v7763_v62 = vld [vmem:[%s11435_s1 + $0x1000] ss:$16 sps:$4 sm:$0xff]   ;;  %v7771_v4 = vld [vmem:[%s11435_s1 + $0x11e4] ss:$16 sps:$4 sm:$0xff]  }
 0x104   :  { %5314 = vmatpush1.bf16.msra.mxu1 %v7724_v35  ;;  %v4980_v18 = vpop.f32.mrf.mxu0  ;;  %5274 = vmatprep.subr.bf16.mxu0 %v7729_v40  ;;  %v7774_v35 = vld [vmem:[%s11435_s1 + $0x13e4] ss:$16 sps:$4 sm:$0xff]   ;;  %v7769_v40 = vld [vmem:[%s11435_s1 + $0x11e0] ss:$16 sps:$4 sm:$0xff]  }
 0x105   :  { %v5021_v19 = vpop.f32.mrf.mxu1  ;;  %5315 = vmatprep.subr.bf16.mxu1 %v7732_v5  ;;  %v9558_v26 = vadd.f32 %v5019_v12, %v4979_v14  ;;  %v4981_v27 = vadd.f32 %v4980_v18, %v843_v8  ;;  %5304 = vmatprep.mubr.bf16.mxu0 %v9538_v9  ;;  %v7772_v5 = vld [vmem:[%s11435_s1 + $0x13e0] ss:$16 sps:$4 sm:$0xff]   ;;  %v7777_v8 = vld [vmem:[%s11435_s1 + $0x11c4] ss:$16 sps:$4 sm:$0xff]  }
 0x106   :  { %5345 = vmatprep.mubr.bf16.mxu1 %v9542_v10  ;;  %v4982_v28 = vpop.f32.mrf.mxu0  ;;  %v7780_v11 = vld [vmem:[%s11435_s1 + $0x13c4] ss:$16 sps:$4 sm:$0xff]   ;;  %v7775_v12 = vld [vmem:[%s11435_s1 + $0x11c0] ss:$16 sps:$4 sm:$0xff]  }
 0x107   :  { %v5023_v29 = vpop.f32.mrf.mxu1  ;;  %v9565_v31 = vadd.f32 %v5021_v19, %v4981_v27  ;;  %5275 = vmatpush1.bf16.msra.mxu0 %v7727_v13  ;;  %v7778_v13 = vld [vmem:[%s11435_s1 + $0x13c0] ss:$16 sps:$4 sm:$0xff]   ;;  %v7783_v14 = vld [vmem:[%s11435_s1 + $0x11a4] ss:$16 sps:$4 sm:$0xff]  }
 0x108   :  { %5316 = vmatpush1.bf16.msra.mxu1 %v7730_v15  ;;  %v4983_v33 = vpop.f32.mrf.mxu0  ;;  %5276 = vmatprep.subr.bf16.mxu0 %v7735_v20  ;;  %v7786_v15 = vld [vmem:[%s11435_s1 + $0x13a4] ss:$16 sps:$4 sm:$0xff]   ;;  %v7781_v18 = vld [vmem:[%s11435_s1 + $0x11a0] ss:$16 sps:$4 sm:$0xff]  }
 0x109   :  { %v5024_v34 = vpop.f32.mrf.mxu1  ;;  %5317 = vmatprep.subr.bf16.mxu1 %v7738_v21  ;;  %v7784_v19 = vld [vmem:[%s11435_s1 + $0x13a0] ss:$16 sps:$4 sm:$0xff]   ;;  %v7789_v20 = vld [vmem:[%s11435_s1 + $0x1184] ss:$16 sps:$4 sm:$0xff]  }
 0x10a   :  { %v7792_v21 = vld [vmem:[%s11435_s1 + $0x1384] ss:$16 sps:$4 sm:$0xff]   ;;  %v7787_v27 = vld [vmem:[%s11435_s1 + $0x1180] ss:$16 sps:$4 sm:$0xff]  }
 0x10b   :  { %5277 = vmatpush1.bf16.msra.mxu0 %v7733_v30  ;;  %v7790_v28 = vld [vmem:[%s11435_s1 + $0x1380] ss:$16 sps:$4 sm:$0xff]   ;;  %v7795_v29 = vld [vmem:[%s11435_s1 + $0x1164] ss:$16 sps:$4 sm:$0xff]  }
 0x10c   :  { %5318 = vmatpush1.bf16.msra.mxu1 %v7736_v32  ;;  %5278 = vmatprep.subr.bf16.mxu0 %v7741_v41  ;;  %v7798_v30 = vld [vmem:[%s11435_s1 + $0x1364] ss:$16 sps:$4 sm:$0xff]   ;;  %v7793_v32 = vld [vmem:[%s11435_s1 + $0x1160] ss:$16 sps:$4 sm:$0xff]  }
 0x10d   :  { %5319 = vmatprep.subr.bf16.mxu1 %v7744_v22  ;;  %v7796_v33 = vld [vmem:[%s11435_s1 + $0x1360] ss:$16 sps:$4 sm:$0xff]   ;;  %v7801_v34 = vld [vmem:[%s11435_s1 + $0x1144] ss:$16 sps:$4 sm:$0xff]  }
 0x10e   :  { %v7804_v41 = vld [vmem:[%s11435_s1 + $0x1344] ss:$16 sps:$4 sm:$0xff]   ;;  %v7799_v22 = vld [vmem:[%s11435_s1 + $0x1140] ss:$16 sps:$4 sm:$0xff]  }
 0x10f   :  { %5279 = vmatpush1.bf16.msra.mxu0 %v7739_v23  ;;  %v7802_v23 = vld [vmem:[%s11435_s1 + $0x1340] ss:$16 sps:$4 sm:$0xff]  }
 0x110   :  { %5320 = vmatpush1.bf16.msra.mxu1 %v7742_v44  ;;  %5280 = vmatprep.subr.bf16.mxu0 %v7747_v45  ;;  %v7807_v44 = vld [vmem:[%s11435_s1 + $0x1124] ss:$16 sps:$4 sm:$0xff]  }
 0x111   :  { %5321 = vmatprep.subr.bf16.mxu1 %v7750_v46  ;;  %v7810_v45 = vld [vmem:[%s11435_s1 + $0x1324] ss:$16 sps:$4 sm:$0xff]   ;;  %v7805_v46 = vld [vmem:[%s11435_s1 + $0x1120] ss:$16 sps:$4 sm:$0xff]  }
 0x113   :  { %5281 = vmatpush1.bf16.msra.mxu0 %v7745_v48  ;;  %v7808_v48 = vld [vmem:[%s11435_s1 + $0x1320] ss:$16 sps:$4 sm:$0xff]  }
 0x114   :  { %5322 = vmatpush1.bf16.msra.mxu1 %v7748_v49  ;;  %5282 = vmatprep.subr.bf16.mxu0 %v7753_v50  ;;  %v7813_v49 = vld [vmem:[%s11435_s1 + $0x1104] ss:$16 sps:$4 sm:$0xff]  }
 0x115   :  { %5323 = vmatprep.subr.bf16.mxu1 %v7756_v52  ;;  %v7816_v50 = vld [vmem:[%s11435_s1 + $0x1304] ss:$16 sps:$4 sm:$0xff]   ;;  %v7811_v52 = vld [vmem:[%s11435_s1 + $0x1100] ss:$16 sps:$4 sm:$0xff]  }
 0x117   :  { %5283 = vmatpush1.bf16.msra.mxu0 %v7751_v53  ;;  %v7814_v53 = vld [vmem:[%s11435_s1 + $0x1300] ss:$16 sps:$4 sm:$0xff]  }
 0x118   :  { %5324 = vmatpush1.bf16.msra.mxu1 %v7754_v55  ;;  %5284 = vmatprep.subr.bf16.mxu0 %v7759_v56  ;;  %v7823_v55 = vld [vmem:[%s11435_s1 + $0x14e4] ss:$16 sps:$4 sm:$0xff]  }
 0x119   :  { %5325 = vmatprep.subr.bf16.mxu1 %v7762_v57  ;;  %v7826_v56 = vld [vmem:[%s11435_s1 + $0x16e4] ss:$16 sps:$4 sm:$0xff]  }
 0x11a   :  { %v9735_v57 = vld [vmem:[%s11436_s0 + $0x50] sm:$0xff] }
 0x11b   :  { %5285 = vmatpush1.bf16.msra.mxu0 %v7757_v58  ;;  %v9740_v58 = vld [vmem:[%s11436_s0 + $0x58] sm:$0xff] }
 0x11c   :  { %5326 = vmatpush1.bf16.msra.mxu1 %v7760_v59  ;;  %5286 = vmatprep.subr.bf16.mxu0 %v7765_v60  ;;  %v7821_v59 = vld [vmem:[%s11435_s1 + $0x14e0] ss:$16 sps:$4 sm:$0xff]  }
 0x11d   :  { %5327 = vmatprep.subr.bf16.mxu1 %v7768_v61  ;;  %v7824_v60 = vld [vmem:[%s11435_s1 + $0x16e0] ss:$16 sps:$4 sm:$0xff]   ;;  %v9750_v61 = vcombine.low %v9520_v2, %v9520_v2 }
 0x11e   :  { %v7827_v2 = vld [vmem:[%s11435_s1 + $0x14c0] ss:$16 sps:$4 sm:$0xff]  }
 0x11f   :  { %5287 = vmatpush1.bf16.msra.mxu0 %v7763_v62  ;;  %v9754_v62 = vcombine.low %v9525_v3, %v9525_v3  ;;  %v7830_v3 = vld [vmem:[%s11435_s1 + $0x16c0] ss:$16 sps:$4 sm:$0xff]  }
 0x120   :  { %5328 = vmatpush1.bf16.msra.mxu1 %v7766_v63  ;;  %5288 = vmatprep.subr.bf16.mxu0 %v7771_v4  ;;  %v7829_v63 = vld [vmem:[%s11435_s1 + $0x14c4] ss:$16 sps:$4 sm:$0xff]  }
 0x121   :  { %5329 = vmatprep.subr.bf16.mxu1 %v7774_v35  ;;  %v7832_v4 = vld [vmem:[%s11435_s1 + $0x16c4] ss:$16 sps:$4 sm:$0xff]   ;;  %v9770_v35 = vcombine.high %v9735_v57, %v9735_v57 }
 0x123   :  { %5289 = vmatpush2.bf16.msra.mxu0 %v7769_v40  ;;  %v9774_v40 = vcombine.high %v9740_v58, %v9740_v58 }
 0x124   :  { %5330 = vmatpush2.bf16.msra.mxu1 %v7772_v5  ;;  %5290 = vmatprep.subr.bf16.mxu0 %v7777_v8 }
 0x125   :  { %5331 = vmatprep.subr.bf16.mxu1 %v7780_v11 }
 0x127   :  { %5291 = vmatpush2.bf16.msra.mxu0 %v7775_v12 }
 0x128   :  { %5332 = vmatpush2.bf16.msra.mxu1 %v7778_v13  ;;  %5292 = vmatprep.subr.bf16.mxu0 %v7783_v14  ;;  %v7835_v14 = vld [vmem:[%s11435_s1 + $0x14a4] ss:$16 sps:$4 sm:$0xff]  }
 0x129   :  { %5333 = vmatprep.subr.bf16.mxu1 %v7786_v15  ;;  %v7838_v15 = vld [vmem:[%s11435_s1 + $0x16a4] ss:$16 sps:$4 sm:$0xff]  }
 0x12b   :  { %5293 = vmatpush2.bf16.msra.mxu0 %v7781_v18 }
 0x12c   :  { %5334 = vmatpush2.bf16.msra.mxu1 %v7784_v19  ;;  %5294 = vmatprep.subr.bf16.mxu0 %v7789_v20  ;;  %v7836_v20 = vld [vmem:[%s11435_s1 + $0x16a0] ss:$16 sps:$4 sm:$0xff]  }
 0x12d   :  { %5335 = vmatprep.subr.bf16.mxu1 %v7792_v21 }
 0x12f   :  { %5295 = vmatpush2.bf16.msra.mxu0 %v7787_v27 }
 0x130   :  { %5336 = vmatpush2.bf16.msra.mxu1 %v7790_v28  ;;  %5296 = vmatprep.subr.bf16.mxu0 %v7795_v29 }
 0x131   :  { %5337 = vmatprep.subr.bf16.mxu1 %v7798_v30  ;;  %v7841_v30 = vld [vmem:[%s11435_s1 + $0x1484] ss:$16 sps:$4 sm:$0xff]  }
 0x133   :  { %5297 = vmatpush2.bf16.msra.mxu0 %v7793_v32  ;;  %v7844_v32 = vld [vmem:[%s11435_s1 + $0x1684] ss:$16 sps:$4 sm:$0xff]  }
 0x134   :  { %5338 = vmatpush2.bf16.msra.mxu1 %v7796_v33  ;;  %5298 = vmatprep.subr.bf16.mxu0 %v7801_v34  ;;  %v7839_v33 = vld [vmem:[%s11435_s1 + $0x1480] ss:$16 sps:$4 sm:$0xff]  }
 0x135   :  { %5339 = vmatprep.subr.bf16.mxu1 %v7804_v41  ;;  %v7842_v34 = vld [vmem:[%s11435_s1 + $0x1680] ss:$16 sps:$4 sm:$0xff]   ;;  %v7847_v41 = vld [vmem:[%s11435_s1 + $0x1464] ss:$16 sps:$4 sm:$0xff]  }
 0x137   :  { %5299 = vmatpush2.bf16.msra.mxu0 %v7799_v22  ;;  %v7850_v22 = vld [vmem:[%s11435_s1 + $0x1664] ss:$16 sps:$4 sm:$0xff]  }
 0x138   :  { %5340 = vmatpush2.bf16.msra.mxu1 %v7802_v23  ;;  %5300 = vmatprep.subr.bf16.mxu0 %v7807_v44  ;;  %v7845_v23 = vld [vmem:[%s11435_s1 + $0x1460] ss:$16 sps:$4 sm:$0xff]  }
 0x139   :  { %5341 = vmatprep.subr.bf16.mxu1 %v7810_v45  ;;  %v7848_v44 = vld [vmem:[%s11435_s1 + $0x1660] ss:$16 sps:$4 sm:$0xff]   ;;  %v7853_v45 = vld [vmem:[%s11435_s1 + $0x1444] ss:$16 sps:$4 sm:$0xff]  }
 0x13b   :  { %5301 = vmatpush2.bf16.msra.mxu0 %v7805_v46  ;;  %v7856_v46 = vld [vmem:[%s11435_s1 + $0x1644] ss:$16 sps:$4 sm:$0xff]  }
 0x13c   :  { %5342 = vmatpush2.bf16.msra.mxu1 %v7808_v48  ;;  %5302 = vmatprep.subr.bf16.mxu0 %v7813_v49  ;;  %v7851_v48 = vld [vmem:[%s11435_s1 + $0x1440] ss:$16 sps:$4 sm:$0xff]  }
 0x13d   :  { %5343 = vmatprep.subr.bf16.mxu1 %v7816_v50  ;;  %v7854_v49 = vld [vmem:[%s11435_s1 + $0x1640] ss:$16 sps:$4 sm:$0xff]   ;;  %v7859_v50 = vld [vmem:[%s11435_s1 + $0x1424] ss:$16 sps:$4 sm:$0xff]  }
 0x13f   :  { %5303 = vmatpush2.bf16.msra.mxu0 %v7811_v52  ;;  %v7862_v52 = vld [vmem:[%s11435_s1 + $0x1624] ss:$16 sps:$4 sm:$0xff]  }
 0x140   :  { %5344 = vmatpush2.bf16.msra.mxu1 %v7814_v53  ;;  %5354 = vmatprep.subr.bf16.mxu0 %v7823_v55  ;;  %v7857_v53 = vld [vmem:[%s11435_s1 + $0x1420] ss:$16 sps:$4 sm:$0xff]  }
 0x141   :  { %5395 = vmatprep.subr.bf16.mxu1 %v7826_v56  ;;  %v7860_v55 = vld [vmem:[%s11435_s1 + $0x1620] ss:$16 sps:$4 sm:$0xff]   ;;  %v7865_v56 = vld [vmem:[%s11435_s1 + $0x1404] ss:$16 sps:$4 sm:$0xff]  }
 0x142   :  { %v5060_v5 = vpop.f32.mrf.mxu0  ;;  %5305 = vmatmul.mubr.bf16.vlgmr.msra.gmra.mxu0 %v9750_v61 }
 0x143   :  { %v5101_v8 = vpop.f32.mrf.mxu1  ;;  %5346 = vmatmul.mubr.bf16.vlgmr.msra.gmra.mxu1 %v9754_v62  ;;  %v5061_v11 = vadd.f32 %v5060_v5, %v9558_v26  ;;  %5355 = vmatpush1.bf16.msra.mxu0 %v7821_v59  ;;  %v7833_v26 = vld [vmem:[%s11435_s1 + $0x14a0] ss:$16 sps:$4 sm:$0xff]   ;;  %v7868_v59 = vld [vmem:[%s11435_s1 + $0x1604] ss:$16 sps:$4 sm:$0xff]  }
 0x144   :  { %5396 = vmatpush1.bf16.msra.mxu1 %v7824_v60  ;;  %v5062_v12 = vpop.f32.mrf.mxu0  ;;  %5356 = vmatprep.subr.bf16.mxu0 %v7829_v63  ;;  %v7863_v60 = vld [vmem:[%s11435_s1 + $0x1400] ss:$16 sps:$4 sm:$0xff]  }
 0x145   :  { %v5103_v13 = vpop.f32.mrf.mxu1  ;;  %5397 = vmatprep.subr.bf16.mxu1 %v7832_v4  ;;  %v9785_v18 = vadd.f32 %v5101_v8, %v5061_v11  ;;  %v5063_v19 = vadd.f32 %v5062_v12, %v9565_v31  ;;  %5386 = vmatprep.mubr.bf16.mxu0 %v9770_v35  ;;  %v7866_v63 = vld [vmem:[%s11435_s1 + $0x1600] ss:$16 sps:$4 sm:$0xff]   ;;  %v7871_v4 = vld [vmem:[%s11435_s1 + $0x15e4] ss:$16 sps:$4 sm:$0xff]  }
 0x146   :  { %5427 = vmatprep.mubr.bf16.mxu1 %v9774_v40  ;;  %v5064_v21 = vpop.f32.mrf.mxu0  ;;  %v7872_v5 = vld [vmem:[%s11435_s1 + $0x17e0] ss:$16 sps:$4 sm:$0xff]   ;;  %v7877_v8 = vld [vmem:[%s11435_s1 + $0x15c4] ss:$16 sps:$4 sm:$0xff]  }
 0x147   :  { %v5105_v27 = vpop.f32.mrf.mxu1  ;;  %v9796_v28 = vadd.f32 %v5103_v13, %v5063_v19  ;;  %5357 = vmatpush1.bf16.msra.mxu0 %v7827_v2  ;;  %v7874_v2 = vld [vmem:[%s11435_s1 + $0x17e4] ss:$16 sps:$4 sm:$0xff]   ;;  %v7875_v12 = vld [vmem:[%s11435_s1 + $0x15c0] ss:$16 sps:$4 sm:$0xff]  }
 0x148   :  { %5398 = vmatpush1.bf16.msra.mxu1 %v7830_v3  ;;  %v5065_v29 = vpop.f32.mrf.mxu0  ;;  %5358 = vmatprep.subr.bf16.mxu0 %v7835_v14  ;;  %v7869_v3 = vld [vmem:[%s11435_s1 + $0x15e0] ss:$16 sps:$4 sm:$0xff]   ;;  %v7880_v11 = vld [vmem:[%s11435_s1 + $0x17c4] ss:$16 sps:$4 sm:$0xff]  }
 0x149   :  { %v5106_v31 = vpop.f32.mrf.mxu1  ;;  %5399 = vmatprep.subr.bf16.mxu1 %v7838_v15  ;;  %v7878_v13 = vld [vmem:[%s11435_s1 + $0x17c0] ss:$16 sps:$4 sm:$0xff]   ;;  %v7883_v14 = vld [vmem:[%s11435_s1 + $0x15a4] ss:$16 sps:$4 sm:$0xff]  }
 0x14a   :  { %v7886_v15 = vld [vmem:[%s11435_s1 + $0x17a4] ss:$16 sps:$4 sm:$0xff]   ;;  %v7881_v19 = vld [vmem:[%s11435_s1 + $0x15a0] ss:$16 sps:$4 sm:$0xff]  }
 0x14b   :  { %5359 = vmatpush1.bf16.msra.mxu0 %v7833_v26  ;;  %v7884_v26 = vld [vmem:[%s11435_s1 + $0x17a0] ss:$16 sps:$4 sm:$0xff]   ;;  %v7892_v21 = vld [vmem:[%s11435_s1 + $0x1784] ss:$16 sps:$4 sm:$0xff]  }
 0x14c   :  { %5400 = vmatpush1.bf16.msra.mxu1 %v7836_v20  ;;  %5360 = vmatprep.subr.bf16.mxu0 %v7841_v30  ;;  %v7889_v20 = vld [vmem:[%s11435_s1 + $0x1584] ss:$16 sps:$4 sm:$0xff]   ;;  %v7887_v27 = vld [vmem:[%s11435_s1 + $0x1580] ss:$16 sps:$4 sm:$0xff]  }
 0x14d   :  { %5401 = vmatprep.subr.bf16.mxu1 %v7844_v32  ;;  %v7890_v29 = vld [vmem:[%s11435_s1 + $0x1780] ss:$16 sps:$4 sm:$0xff]   ;;  %v7895_v31 = vld [vmem:[%s11435_s1 + $0x1564] ss:$16 sps:$4 sm:$0xff]  }
 0x14e   :  { %v7898_v30 = vld [vmem:[%s11435_s1 + $0x1764] ss:$16 sps:$4 sm:$0xff]   ;;  %v7893_v32 = vld [vmem:[%s11435_s1 + $0x1560] ss:$16 sps:$4 sm:$0xff]  }
 0x14f   :  { %5361 = vmatpush1.bf16.msra.mxu0 %v7839_v33  ;;  %v7896_v33 = vld [vmem:[%s11435_s1 + $0x1760] ss:$16 sps:$4 sm:$0xff]  }
 0x150   :  { %5402 = vmatpush1.bf16.msra.mxu1 %v7842_v34  ;;  %5362 = vmatprep.subr.bf16.mxu0 %v7847_v41  ;;  %v7901_v34 = vld [vmem:[%s11435_s1 + $0x1544] ss:$16 sps:$4 sm:$0xff]  }
 0x151   :  { %5403 = vmatprep.subr.bf16.mxu1 %v7850_v22  ;;  %v7904_v41 = vld [vmem:[%s11435_s1 + $0x1744] ss:$16 sps:$4 sm:$0xff]   ;;  %v7899_v22 = vld [vmem:[%s11435_s1 + $0x1540] ss:$16 sps:$4 sm:$0xff]  }
 0x153   :  { %5363 = vmatpush1.bf16.msra.mxu0 %v7845_v23  ;;  %v7902_v23 = vld [vmem:[%s11435_s1 + $0x1740] ss:$16 sps:$4 sm:$0xff]  }
 0x154   :  { %5404 = vmatpush1.bf16.msra.mxu1 %v7848_v44  ;;  %5364 = vmatprep.subr.bf16.mxu0 %v7853_v45  ;;  %v7907_v44 = vld [vmem:[%s11435_s1 + $0x1524] ss:$16 sps:$4 sm:$0xff]  }
 0x155   :  { %5405 = vmatprep.subr.bf16.mxu1 %v7856_v46  ;;  %v7910_v45 = vld [vmem:[%s11435_s1 + $0x1724] ss:$16 sps:$4 sm:$0xff]   ;;  %v7905_v46 = vld [vmem:[%s11435_s1 + $0x1520] ss:$16 sps:$4 sm:$0xff]  }
 0x157   :  { %5365 = vmatpush1.bf16.msra.mxu0 %v7851_v48  ;;  %v7908_v48 = vld [vmem:[%s11435_s1 + $0x1720] ss:$16 sps:$4 sm:$0xff]  }
 0x158   :  { %5406 = vmatpush1.bf16.msra.mxu1 %v7854_v49  ;;  %5366 = vmatprep.subr.bf16.mxu0 %v7859_v50  ;;  %v7913_v49 = vld [vmem:[%s11435_s1 + $0x1504] ss:$16 sps:$4 sm:$0xff]  }
 0x159   :  { %5407 = vmatprep.subr.bf16.mxu1 %v7862_v52  ;;  %v7916_v50 = vld [vmem:[%s11435_s1 + $0x1704] ss:$16 sps:$4 sm:$0xff]   ;;  %v7911_v52 = vld [vmem:[%s11435_s1 + $0x1500] ss:$16 sps:$4 sm:$0xff]  }
 0x15b   :  { %5367 = vmatpush1.bf16.msra.mxu0 %v7857_v53  ;;  %v7914_v53 = vld [vmem:[%s11435_s1 + $0x1700] ss:$16 sps:$4 sm:$0xff]  }
 0x15c   :  { %5408 = vmatpush1.bf16.msra.mxu1 %v7860_v55  ;;  %5368 = vmatprep.subr.bf16.mxu0 %v7865_v56  ;;  %v7923_v55 = vld [vmem:[%s11435_s1 + $0x18e4] ss:$16 sps:$4 sm:$0xff]   ;;  %v7926_v56 = vld [vmem:[%s11435_s1 + $0xec] ss:$16 sps:$4 sm:$0xff]  }
 0x15d   :  { %5409 = vmatprep.subr.bf16.mxu1 %v7868_v59  ;;  %v7921_v59 = vld [vmem:[%s11435_s1 + $0x18e0] ss:$16 sps:$4 sm:$0xff]  }
 0x15f   :  { %5369 = vmatpush1.bf16.msra.mxu0 %v7863_v60  ;;  %v7924_v60 = vld [vmem:[%s11435_s1 + $0xe8] ss:$16 sps:$4 sm:$0xff]  }
 0x160   :  { %5410 = vmatpush1.bf16.msra.mxu1 %v7866_v63  ;;  %5370 = vmatprep.subr.bf16.mxu0 %v7871_v4  ;;  %v9968_v63 = vcombine.low %v9735_v57, %v9735_v57  ;;  %v9972_v4 = vcombine.low %v9740_v58, %v9740_v58  ;;  %v7927_v57 = vld [vmem:[%s11435_s1 + $0x18c0] ss:$16 sps:$4 sm:$0xff]   ;;  %v7930_v58 = vld [vmem:[%s11435_s1 + $0xc8] ss:$16 sps:$4 sm:$0xff]  }
 0x161   :  { %5411 = vmatprep.subr.bf16.mxu1 %v7874_v2  ;;  %v7929_v2 = vld [vmem:[%s11435_s1 + $0x18c4] ss:$16 sps:$4 sm:$0xff]  }
 0x163   :  { %5371 = vmatpush2.bf16.msra.mxu0 %v7869_v3  ;;  %v7932_v3 = vld [vmem:[%s11435_s1 + $0xcc] ss:$16 sps:$4 sm:$0xff]  }
 0x164   :  { %5412 = vmatpush2.bf16.msra.mxu1 %v7872_v5  ;;  %5372 = vmatprep.subr.bf16.mxu0 %v7877_v8 }
 0x165   :  { %5413 = vmatprep.subr.bf16.mxu1 %v7880_v11 }
 0x167   :  { %5373 = vmatpush2.bf16.msra.mxu0 %v7875_v12 }
 0x168   :  { %5414 = vmatpush2.bf16.msra.mxu1 %v7878_v13  ;;  %5374 = vmatprep.subr.bf16.mxu0 %v7883_v14  ;;  %v7935_v14 = vld [vmem:[%s11435_s1 + $0x18a4] ss:$16 sps:$4 sm:$0xff]  }
 0x169   :  { %5415 = vmatprep.subr.bf16.mxu1 %v7886_v15  ;;  %v7938_v15 = vld [vmem:[%s11435_s1 + $0xac] ss:$16 sps:$4 sm:$0xff]  }
 0x16b   :  { %5375 = vmatpush2.bf16.msra.mxu0 %v7881_v19 }
 0x16c   :  { %5416 = vmatpush2.bf16.msra.mxu1 %v7884_v26  ;;  %5376 = vmatprep.subr.bf16.mxu0 %v7889_v20  ;;  %v7936_v20 = vld [vmem:[%s11435_s1 + $0xa8] ss:$16 sps:$4 sm:$0xff]  }
 0x16d   :  { %5417 = vmatprep.subr.bf16.mxu1 %v7892_v21  ;;  %v8596_v21 = vmov 0  }
 0x16f   :  { %5377 = vmatpush2.bf16.msra.mxu0 %v7887_v27 }
 0x170   :  { %5418 = vmatpush2.bf16.msra.mxu1 %v7890_v29  ;;  %5378 = vmatprep.subr.bf16.mxu0 %v7895_v31 }
 0x171   :  { %5419 = vmatprep.subr.bf16.mxu1 %v7898_v30 }
 0x173   :  { %5379 = vmatpush2.bf16.msra.mxu0 %v7893_v32  ;;  %v7941_v32 = vld [vmem:[%s11435_s1 + $0x1884] ss:$16 sps:$4 sm:$0xff]  }
 0x174   :  { %5420 = vmatpush2.bf16.msra.mxu1 %v7896_v33  ;;  %5380 = vmatprep.subr.bf16.mxu0 %v7901_v34  ;;  %v7944_v33 = vld [vmem:[%s11435_s1 + $0x8c] ss:$16 sps:$4 sm:$0xff]   ;;  %v7942_v34 = vld [vmem:[%s11435_s1 + $0x88] ss:$16 sps:$4 sm:$0xff]  }
 0x175   :  { %5421 = vmatprep.subr.bf16.mxu1 %v7904_v41  ;;  %v7947_v41 = vld [vmem:[%s11435_s1 + $0x1864] ss:$16 sps:$4 sm:$0xff]  }
 0x177   :  { %5381 = vmatpush2.bf16.msra.mxu0 %v7899_v22  ;;  %v7950_v22 = vld [vmem:[%s11435_s1 + $0x6c] ss:$16 sps:$4 sm:$0xff]  }
 0x178   :  { %5422 = vmatpush2.bf16.msra.mxu1 %v7902_v23  ;;  %5382 = vmatprep.subr.bf16.mxu0 %v7907_v44  ;;  %v7945_v23 = vld [vmem:[%s11435_s1 + $0x1860] ss:$16 sps:$4 sm:$0xff]   ;;  %v7948_v44 = vld [vmem:[%s11435_s1 + $0x68] ss:$16 sps:$4 sm:$0xff]  }
 0x179   :  { %5423 = vmatprep.subr.bf16.mxu1 %v7910_v45  ;;  %v7953_v45 = vld [vmem:[%s11435_s1 + $0x1844] ss:$16 sps:$4 sm:$0xff]  }
 0x17b   :  { %5383 = vmatpush2.bf16.msra.mxu0 %v7905_v46  ;;  %v7956_v46 = vld [vmem:[%s11435_s1 + $0x4c] ss:$16 sps:$4 sm:$0xff]  }
 0x17c   :  { %5424 = vmatpush2.bf16.msra.mxu1 %v7908_v48  ;;  %5384 = vmatprep.subr.bf16.mxu0 %v7913_v49  ;;  %v7951_v48 = vld [vmem:[%s11435_s1 + $0x1840] ss:$16 sps:$4 sm:$0xff]   ;;  %v7954_v49 = vld [vmem:[%s11435_s1 + $0x48] ss:$16 sps:$4 sm:$0xff]  }
 0x17d   :  { %5425 = vmatprep.subr.bf16.mxu1 %v7916_v50  ;;  %v7959_v50 = vld [vmem:[%s11435_s1 + $0x1824] ss:$16 sps:$4 sm:$0xff]  }
 0x17f   :  { %5385 = vmatpush2.bf16.msra.mxu0 %v7911_v52  ;;  %v7962_v52 = vld [vmem:[%s11435_s1 + $0x2c] ss:$16 sps:$4 sm:$0xff]  }
 0x180   :  { %5426 = vmatpush2.bf16.msra.mxu1 %v7914_v53  ;;  %5436 = vmatprep.subr.bf16.mxu0 %v7923_v55  ;;  %v7957_v53 = vld [vmem:[%s11435_s1 + $0x1820] ss:$16 sps:$4 sm:$0xff]   ;;  %v7960_v55 = vld [vmem:[%s11435_s1 + $0x28] ss:$16 sps:$4 sm:$0xff]  }
 0x181   :  { %5477 = vmatprep.subr.bf16.mxu1 %v7926_v56  ;;  %v7965_v56 = vld [vmem:[%s11435_s1 + $0x1804] ss:$16 sps:$4 sm:$0xff]  }
 0x182   :  { %v5142_v5 = vpop.f32.mrf.mxu0  ;;  %5387 = vmatmul.mubr.bf16.vlgmr.msra.gmra.mxu0 %v9968_v63 }
 0x183   :  { %v5183_v8 = vpop.f32.mrf.mxu1  ;;  %5428 = vmatmul.mubr.bf16.vlgmr.msra.gmra.mxu1 %v9972_v4  ;;  %v5143_v11 = vadd.f32 %v5142_v5, %v9785_v18  ;;  %5437 = vmatpush1.bf16.msra.mxu0 %v7921_v59  ;;  %v7933_v18 = vld [vmem:[%s11435_s1 + $0x18a0] ss:$16 sps:$4 sm:$0xff]   ;;  %v7968_v59 = vld [vmem:[%s11435_s1 + $0xc] ss:$16 sps:$4 sm:$0xff]   ;;  %v7970_v5 = vld [vmem:[%s11435_s1 + $0x1e8] ss:$16 sps:$4 sm:$0xff]  }
 0x184   :  { %5478 = vmatpush1.bf16.msra.mxu1 %v7924_v60  ;;  %v5144_v12 = vpop.f32.mrf.mxu0  ;;  %5438 = vmatprep.subr.bf16.mxu0 %v7929_v2  ;;  %v7963_v60 = vld [vmem:[%s11435_s1 + $0x1800] ss:$16 sps:$4 sm:$0xff]   ;;  %v7966_v2 = vld [vmem:[%s11435_s1 + $0x8] ss:$16 sps:$4 sm:$0xff]  }
 0x185   :  { %v5185_v13 = vpop.f32.mrf.mxu1  ;;  %5479 = vmatprep.subr.bf16.mxu1 %v7932_v3  ;;  %v9995_v19 = vadd.f32 %v5183_v8, %v5143_v11  ;;  %v5145_v26 = vadd.f32 %v5144_v12, %v9796_v28  ;;  %5468 = vmatprep.mubr.bf16.mxu0 %v8596_v21  ;;  %v7969_v3 = vld [vmem:[%s11436_s0 + $0x60] ss:$0 sps:$4 sm:$0xff]   ;;  %v7973_v8 = vld [vmem:[%s11435_s1 + $0x2e8] ss:$16 sps:$4 sm:$0xff]   ;;  %v7978_v11 = vld [vmem:[%s11435_s1 + $0x1cc] ss:$16 sps:$4 sm:$0xff]  }
 0x186   :  { %5509 = vmatprep.mubr.bf16.mxu1 %v8768_v47  ;;  %v5146_v27 = vpop.f32.mrf.mxu0  ;;  %v7939_v47 = vld [vmem:[%s11435_s1 + $0x1880] ss:$16 sps:$4 sm:$0xff]   ;;  %v7981_v12 = vld [vmem:[%s11435_s1 + $0x2cc] ss:$16 sps:$4 sm:$0xff]  }
 0x187   :  { %v5187_v29 = vpop.f32.mrf.mxu1  ;;  %v10006_v31 = vadd.f32 %v5185_v13, %v5145_v26  ;;  %5439 = vmatpush1.bf16.msra.mxu0 %v7927_v57  ;;  %v7972_v57 = vld [vmem:[%s11435_s1 + $0x1ec] ss:$16 sps:$4 sm:$0xff]   ;;  %v7976_v13 = vld [vmem:[%s11435_s1 + $0x1c8] ss:$16 sps:$4 sm:$0xff]  }
 0x188   :  { %5480 = vmatpush1.bf16.msra.mxu1 %v7930_v58  ;;  %v5147_v28 = vpop.f32.mrf.mxu0  ;;  %5440 = vmatprep.subr.bf16.mxu0 %v7935_v14  ;;  %v7975_v58 = vld [vmem:[%s11435_s1 + $0x2ec] ss:$16 sps:$4 sm:$0xff]   ;;  %v7979_v14 = vld [vmem:[%s11435_s1 + $0x2c8] ss:$16 sps:$4 sm:$0xff]  }
 0x189   :  { %v5188_v30 = vpop.f32.mrf.mxu1  ;;  %5481 = vmatprep.subr.bf16.mxu1 %v7938_v15  ;;  %v7984_v15 = vld [vmem:[%s11435_s1 + $0x1ac] ss:$16 sps:$4 sm:$0xff]   ;;  %v7988_v29 = vld [vmem:[%s11435_s1 + $0x188] ss:$16 sps:$4 sm:$0xff]  }
 0x18a   :  { %v7987_v26 = vld [vmem:[%s11435_s1 + $0x2ac] ss:$16 sps:$4 sm:$0xff]   ;;  %v7991_v28 = vld [vmem:[%s11435_s1 + $0x288] ss:$16 sps:$4 sm:$0xff]  }
 0x18b   :  { %5441 = vmatpush1.bf16.msra.mxu0 %v7933_v18  ;;  %v7982_v18 = vld [vmem:[%s11435_s1 + $0x1a8] ss:$16 sps:$4 sm:$0xff]   ;;  %v7990_v27 = vld [vmem:[%s11435_s1 + $0x18c] ss:$16 sps:$4 sm:$0xff]  }
 0x18c   :  { %5482 = vmatpush1.bf16.msra.mxu1 %v7936_v20  ;;  %5442 = vmatprep.subr.bf16.mxu0 %v7941_v32  ;;  %v7985_v20 = vld [vmem:[%s11435_s1 + $0x2a8] ss:$16 sps:$4 sm:$0xff]   ;;  %v7996_v30 = vld [vmem:[%s11435_s1 + $0x16c] ss:$16 sps:$4 sm:$0xff]  }
 0x18d   :  { %5483 = vmatprep.subr.bf16.mxu1 %v7944_v33  ;;  %v7999_v32 = vld [vmem:[%s11435_s1 + $0x26c] ss:$16 sps:$4 sm:$0xff]   ;;  %v7994_v33 = vld [vmem:[%s11435_s1 + $0x168] ss:$16 sps:$4 sm:$0xff]  }
 0x18f   :  { %5443 = vmatpush1.bf16.msra.mxu0 %v7939_v47  ;;  %v7997_v47 = vld [vmem:[%s11435_s1 + $0x268] ss:$16 sps:$4 sm:$0xff]  }
 0x190   :  { %5484 = vmatpush1.bf16.msra.mxu1 %v7942_v34  ;;  %5444 = vmatprep.subr.bf16.mxu0 %v7947_v41  ;;  %v8002_v34 = vld [vmem:[%s11435_s1 + $0x14c] ss:$16 sps:$4 sm:$0xff]  }
 0x191   :  { %5485 = vmatprep.subr.bf16.mxu1 %v7950_v22  ;;  %v8005_v41 = vld [vmem:[%s11435_s1 + $0x24c] ss:$16 sps:$4 sm:$0xff]   ;;  %v8000_v22 = vld [vmem:[%s11435_s1 + $0x148] ss:$16 sps:$4 sm:$0xff]  }
 0x193   :  { %5445 = vmatpush1.bf16.msra.mxu0 %v7945_v23  ;;  %v8003_v23 = vld [vmem:[%s11435_s1 + $0x248] ss:$16 sps:$4 sm:$0xff]  }
 0x194   :  { %5486 = vmatpush1.bf16.msra.mxu1 %v7948_v44  ;;  %5446 = vmatprep.subr.bf16.mxu0 %v7953_v45  ;;  %v8008_v44 = vld [vmem:[%s11435_s1 + $0x12c] ss:$16 sps:$4 sm:$0xff]  }
 0x195   :  { %5487 = vmatprep.subr.bf16.mxu1 %v7956_v46  ;;  %v8011_v45 = vld [vmem:[%s11435_s1 + $0x22c] ss:$16 sps:$4 sm:$0xff]   ;;  %v8006_v46 = vld [vmem:[%s11435_s1 + $0x128] ss:$16 sps:$4 sm:$0xff]  }
 0x197   :  { %5447 = vmatpush1.bf16.msra.mxu0 %v7951_v48  ;;  %v8009_v48 = vld [vmem:[%s11435_s1 + $0x228] ss:$16 sps:$4 sm:$0xff]  }
 0x198   :  { %5488 = vmatpush1.bf16.msra.mxu1 %v7954_v49  ;;  %5448 = vmatprep.subr.bf16.mxu0 %v7959_v50  ;;  %v8014_v49 = vld [vmem:[%s11435_s1 + $0x10c] ss:$16 sps:$4 sm:$0xff]  }
 0x199   :  { %5489 = vmatprep.subr.bf16.mxu1 %v7962_v52  ;;  %v8017_v50 = vld [vmem:[%s11435_s1 + $0x20c] ss:$16 sps:$4 sm:$0xff]   ;;  %v8012_v52 = vld [vmem:[%s11435_s1 + $0x108] ss:$16 sps:$4 sm:$0xff]  }
 0x19b   :  { %5449 = vmatpush1.bf16.msra.mxu0 %v7957_v53  ;;  %v8015_v53 = vld [vmem:[%s11435_s1 + $0x208] ss:$16 sps:$4 sm:$0xff]  }
 0x19c   :  { %5490 = vmatpush1.bf16.msra.mxu1 %v7960_v55  ;;  %5450 = vmatprep.subr.bf16.mxu0 %v7965_v56  ;;  %v8020_v55 = vld [vmem:[%s11435_s1 + $0x3ec] ss:$16 sps:$4 sm:$0xff]  }
 0x19d   :  { %5491 = vmatprep.subr.bf16.mxu1 %v7968_v59  ;;  %v8023_v56 = vld [vmem:[%s11435_s1 + $0x4ec] ss:$16 sps:$4 sm:$0xff]   ;;  %v8018_v59 = vld [vmem:[%s11435_s1 + $0x3e8] ss:$16 sps:$4 sm:$0xff]  }
 0x19f   :  { %5451 = vmatpush1.bf16.msra.mxu0 %v7963_v60  ;;  %v8021_v60 = vld [vmem:[%s11435_s1 + $0x4e8] ss:$16 sps:$4 sm:$0xff]  }
 0x1a0   :  { %5492 = vmatpush1.bf16.msra.mxu1 %v7966_v2  ;;  %5518 = vmatprep.subr.bf16.mxu0 %v7975_v58  ;;  %v8026_v2 = vld [vmem:[%s11435_s1 + $0x3cc] ss:$16 sps:$4 sm:$0xff]   ;;  %v8027_v58 = vld [vmem:[%s11435_s1 + $0x4c8] ss:$16 sps:$4 sm:$0xff]  }
 0x1a1   :  { %5493 = vmatprep.subr.bf16.mxu1 %v7972_v57  ;;  %v8024_v57 = vld [vmem:[%s11435_s1 + $0x3c8] ss:$16 sps:$4 sm:$0xff]  }
 0x1a2   :  { %5469 = vmatmul.mubr.bf16.vlgmr.msra.gmra.mxu0 %v7969_v3  ;;  %v8029_v3 = vld [vmem:[%s11435_s1 + $0x4cc] ss:$16 sps:$4 sm:$0xff]  }
 0x1a3   :  { %5519 = vmatpush1.bf16.msra.mxu0 %v7973_v8  ;;  %5550 = vmatprep.mubr.bf16.mxu0 %v8779_v51  ;;  %v7993_v51 = vld [vmem:[%s11435_s1 + $0x28c] ss:$16 sps:$4 sm:$0xff]  }
 0x1a4   :  { %5494 = vmatpush2.bf16.msra.mxu1 %v7970_v5  ;;  %5520 = vmatprep.subr.bf16.mxu0 %v7981_v12 }
 0x1a5   :  { %5495 = vmatprep.subr.bf16.mxu1 %v7978_v11 }
 0x1a7   :  { %5521 = vmatpush1.bf16.msra.mxu0 %v7979_v14  ;;  %v8032_v14 = vld [vmem:[%s11435_s1 + $0x3ac] ss:$16 sps:$4 sm:$0xff]  }
 0x1a8   :  { %5496 = vmatpush2.bf16.msra.mxu1 %v7976_v13  ;;  %5522 = vmatprep.subr.bf16.mxu0 %v7987_v26 }
 0x1a9   :  { %5497 = vmatprep.subr.bf16.mxu1 %v7984_v15  ;;  %v8035_v15 = vld [vmem:[%s11435_s1 + $0x4ac] ss:$16 sps:$4 sm:$0xff]  }
 0x1ab   :  { %5523 = vmatpush1.bf16.msra.mxu0 %v7985_v20 }
 0x1ac   :  { %5498 = vmatpush2.bf16.msra.mxu1 %v7982_v18  ;;  %5524 = vmatprep.subr.bf16.mxu0 %v7993_v51  ;;  %v8033_v18 = vld [vmem:[%s11435_s1 + $0x4a8] ss:$16 sps:$4 sm:$0xff]  }
 0x1ad   :  { %5499 = vmatprep.subr.bf16.mxu1 %v7990_v27 }
 0x1af   :  { %5525 = vmatpush1.bf16.msra.mxu0 %v7991_v28 }
 0x1b0   :  { %5500 = vmatpush2.bf16.msra.mxu1 %v7988_v29  ;;  %5526 = vmatprep.subr.bf16.mxu0 %v7999_v32  ;;  %v8039_v32 = vld [vmem:[%s11435_s1 + $0x488] ss:$16 sps:$4 sm:$0xff]  }
 0x1b1   :  { %5501 = vmatprep.subr.bf16.mxu1 %v7996_v30  ;;  %v8041_v30 = vld [vmem:[%s11435_s1 + $0x48c] ss:$16 sps:$4 sm:$0xff]  }
 0x1b3   :  { %5527 = vmatpush1.bf16.msra.mxu0 %v7997_v47  ;;  %v8047_v47 = vld [vmem:[%s11435_s1 + $0x46c] ss:$16 sps:$4 sm:$0xff]  }
 0x1b4   :  { %5502 = vmatpush2.bf16.msra.mxu1 %v7994_v33  ;;  %5528 = vmatprep.subr.bf16.mxu0 %v8005_v41  ;;  %v8044_v33 = vld [vmem:[%s11435_s1 + $0x36c] ss:$16 sps:$4 sm:$0xff]   ;;  %v8045_v41 = vld [vmem:[%s11435_s1 + $0x468] ss:$16 sps:$4 sm:$0xff]  }
 0x1b5   :  { %5503 = vmatprep.subr.bf16.mxu1 %v8002_v34  ;;  %v8042_v34 = vld [vmem:[%s11435_s1 + $0x368] ss:$16 sps:$4 sm:$0xff]  }
 0x1b7   :  { %5529 = vmatpush1.bf16.msra.mxu0 %v8003_v23  ;;  %v8053_v23 = vld [vmem:[%s11435_s1 + $0x44c] ss:$16 sps:$4 sm:$0xff]  }
 0x1b8   :  { %5504 = vmatpush2.bf16.msra.mxu1 %v8000_v22  ;;  %5530 = vmatprep.subr.bf16.mxu0 %v8011_v45  ;;  %v8050_v22 = vld [vmem:[%s11435_s1 + $0x34c] ss:$16 sps:$4 sm:$0xff]   ;;  %v8051_v45 = vld [vmem:[%s11435_s1 + $0x448] ss:$16 sps:$4 sm:$0xff]  }
 0x1b9   :  { %5505 = vmatprep.subr.bf16.mxu1 %v8008_v44  ;;  %v8048_v44 = vld [vmem:[%s11435_s1 + $0x348] ss:$16 sps:$4 sm:$0xff]  }
 0x1bb   :  { %5531 = vmatpush1.bf16.msra.mxu0 %v8009_v48  ;;  %v8059_v48 = vld [vmem:[%s11435_s1 + $0x42c] ss:$16 sps:$4 sm:$0xff]  }
 0x1bc   :  { %5506 = vmatpush2.bf16.msra.mxu1 %v8006_v46  ;;  %5532 = vmatprep.subr.bf16.mxu0 %v8017_v50  ;;  %v8056_v46 = vld [vmem:[%s11435_s1 + $0x32c] ss:$16 sps:$4 sm:$0xff]   ;;  %v8057_v50 = vld [vmem:[%s11435_s1 + $0x428] ss:$16 sps:$4 sm:$0xff]  }
 0x1bd   :  { %5507 = vmatprep.subr.bf16.mxu1 %v8014_v49  ;;  %v8054_v49 = vld [vmem:[%s11435_s1 + $0x328] ss:$16 sps:$4 sm:$0xff]  }
 0x1bf   :  { %5533 = vmatpush1.bf16.msra.mxu0 %v8015_v53  ;;  %v8065_v53 = vld [vmem:[%s11435_s1 + $0x40c] ss:$16 sps:$4 sm:$0xff]  }
 0x1c0   :  { %5508 = vmatpush2.bf16.msra.mxu1 %v8012_v52  ;;  %5534 = vmatprep.subr.bf16.mxu0 %v8020_v55  ;;  %v8062_v52 = vld [vmem:[%s11435_s1 + $0x30c] ss:$16 sps:$4 sm:$0xff]   ;;  %v8060_v55 = vld [vmem:[%s11435_s1 + $0x308] ss:$16 sps:$4 sm:$0xff]  }
 0x1c1   :  { %5559 = vmatprep.subr.bf16.mxu1 %v8023_v56  ;;  %v8063_v56 = vld [vmem:[%s11435_s1 + $0x408] ss:$16 sps:$4 sm:$0xff]  }
 0x1c2   :  { %v5224_v5 = vpop.f32.mrf.mxu0 }
 0x1c3   :  { %v5265_v8 = vpop.f32.mrf.mxu1  ;;  %5510 = vmatmul.mubr.bf16.vlgmr.msra.gmra.mxu1 %v8837_v6  ;;  %v5225_v11 = vadd.f32 %v5224_v5, %v9995_v19  ;;  %5535 = vmatpush2.bf16.msra.mxu0 %v8018_v59  ;;  %v8030_v19 = vld [vmem:[%s11435_s1 + $0x3a8] ss:$16 sps:$4 sm:$0xff]   ;;  %v8068_v59 = vld [vmem:[%s11435_s1 + $0x5ec] ss:$16 sps:$4 sm:$0xff]  }
 0x1c4   :  { %5560 = vmatpush1.bf16.msra.mxu1 %v8021_v60  ;;  %v5226_v12 = vpop.f32.mrf.mxu0  ;;  %5536 = vmatprep.subr.bf16.mxu0 %v8026_v2  ;;  %v8071_v60 = vld [vmem:[%s11435_s1 + $0x6ec] ss:$16 sps:$4 sm:$0xff]   ;;  %v8066_v2 = vld [vmem:[%s11435_s1 + $0x5e8] ss:$16 sps:$4 sm:$0xff]  }
 0x1c5   :  { %v5267_v13 = vpop.f32.mrf.mxu1  ;;  %5561 = vmatprep.subr.bf16.mxu1 %v8029_v3  ;;  %v10200_v26 = vadd.f32 %v5265_v8, %v5225_v11  ;;  %v5227_v6 = vadd.f32 %v5226_v12, %v10006_v31  ;;  %5591 = vmatprep.mubr.bf16.mxu1 %v8933_v36  ;;  %v8038_v31 = vld [vmem:[%s11435_s1 + $0x38c] ss:$16 sps:$4 sm:$0xff]   ;;  %v8036_v36 = vld [vmem:[%s11435_s1 + $0x388] ss:$16 sps:$4 sm:$0xff]  }
 0x1c6   :  { %v5228_v20 = vpop.f32.mrf.mxu0  ;;  %v8069_v3 = vld [vmem:[%s11435_s1 + $0x6e8] ss:$16 sps:$4 sm:$0xff]   ;;  %v8080_v11 = vld [vmem:[%s11435_s1 + $0x5ac] ss:$16 sps:$4 sm:$0xff]  }
 0x1c7   :  { %v5269_v27 = vpop.f32.mrf.mxu1  ;;  %v10210_v51 = vadd.f32 %v5267_v13, %v5227_v6  ;;  %5537 = vmatpush2.bf16.msra.mxu0 %v8024_v57  ;;  %v8074_v57 = vld [vmem:[%s11435_s1 + $0x5cc] ss:$16 sps:$4 sm:$0xff]   ;;  %v8072_v5 = vld [vmem:[%s11435_s1 + $0x5c8] ss:$16 sps:$4 sm:$0xff]  }
 0x1c8   :  { %5562 = vmatpush1.bf16.msra.mxu1 %v8027_v58  ;;  %v5229_v29 = vpop.f32.mrf.mxu0  ;;  %5538 = vmatprep.subr.bf16.mxu0 %v8032_v14  ;;  %v8077_v58 = vld [vmem:[%s11435_s1 + $0x6cc] ss:$16 sps:$4 sm:$0xff]   ;;  %v8075_v8 = vld [vmem:[%s11435_s1 + $0x6c8] ss:$16 sps:$4 sm:$0xff]  }
 0x1c9   :  { %v5270_v28 = vpop.f32.mrf.mxu1  ;;  %5563 = vmatprep.subr.bf16.mxu1 %v8035_v15  ;;  %v8078_v12 = vld [vmem:[%s11435_s1 + $0x5a8] ss:$16 sps:$4 sm:$0xff]   ;;  %v8086_v14 = vld [vmem:[%s11435_s1 + $0x58c] ss:$16 sps:$4 sm:$0xff]  }
 0x1ca   :  { %v8081_v13 = vld [vmem:[%s11435_s1 + $0x6a8] ss:$16 sps:$4 sm:$0xff]   ;;  %v8098_v29 = vld [vmem:[%s11435_s1 + $0x54c] ss:$16 sps:$4 sm:$0xff]  }
 0x1cb   :  { %5539 = vmatpush2.bf16.msra.mxu0 %v8030_v19  ;;  %v8084_v15 = vld [vmem:[%s11435_s1 + $0x588] ss:$16 sps:$4 sm:$0xff]   ;;  %v8092_v19 = vld [vmem:[%s11435_s1 + $0x56c] ss:$16 sps:$4 sm:$0xff]  }
 0x1cc   :  { %5564 = vmatpush1.bf16.msra.mxu1 %v8033_v18  ;;  %5540 = vmatprep.subr.bf16.mxu0 %v8038_v31  ;;  %v8087_v6 = vld [vmem:[%s11435_s1 + $0x688] ss:$16 sps:$4 sm:$0xff]   ;;  %v8095_v18 = vld [vmem:[%s11435_s1 + $0x66c] ss:$16 sps:$4 sm:$0xff]  }
 0x1cd   :  { %5565 = vmatprep.subr.bf16.mxu1 %v8041_v30  ;;  %v8090_v20 = vld [vmem:[%s11435_s1 + $0x568] ss:$16 sps:$4 sm:$0xff]   ;;  %v8101_v28 = vld [vmem:[%s11435_s1 + $0x64c] ss:$16 sps:$4 sm:$0xff]  }
 0x1ce   :  { %v8093_v27 = vld [vmem:[%s11435_s1 + $0x668] ss:$16 sps:$4 sm:$0xff]  }
 0x1cf   :  { %5541 = vmatpush2.bf16.msra.mxu0 %v8036_v36  ;;  %v8096_v31 = vld [vmem:[%s11435_s1 + $0x548] ss:$16 sps:$4 sm:$0xff]   ;;  %v8104_v36 = vld [vmem:[%s11435_s1 + $0x52c] ss:$16 sps:$4 sm:$0xff]  }
 0x1d0   :  { %5566 = vmatpush1.bf16.msra.mxu1 %v8039_v32  ;;  %5542 = vmatprep.subr.bf16.mxu0 %v8044_v33  ;;  %v8099_v30 = vld [vmem:[%s11435_s1 + $0x648] ss:$16 sps:$4 sm:$0xff]   ;;  %v8107_v32 = vld [vmem:[%s11435_s1 + $0x62c] ss:$16 sps:$4 sm:$0xff]  }
 0x1d1   :  { %5567 = vmatprep.subr.bf16.mxu1 %v8047_v47  ;;  %v8102_v33 = vld [vmem:[%s11435_s1 + $0x528] ss:$16 sps:$4 sm:$0xff]  }
 0x1d2   :  { %v8105_v47 = vld [vmem:[%s11435_s1 + $0x628] ss:$16 sps:$4 sm:$0xff]  }
 0x1d3   :  { %5543 = vmatpush2.bf16.msra.mxu0 %v8042_v34  ;;  %v8110_v34 = vld [vmem:[%s11435_s1 + $0x50c] ss:$16 sps:$4 sm:$0xff]  }
 0x1d4   :  { %5568 = vmatpush1.bf16.msra.mxu1 %v8045_v41  ;;  %5544 = vmatprep.subr.bf16.mxu0 %v8050_v22  ;;  %v8113_v41 = vld [vmem:[%s11435_s1 + $0x60c] ss:$16 sps:$4 sm:$0xff]   ;;  %v8108_v22 = vld [vmem:[%s11435_s1 + $0x508] ss:$16 sps:$4 sm:$0xff]  }
 0x1d5   :  { %5569 = vmatprep.subr.bf16.mxu1 %v8053_v23  ;;  %v8111_v23 = vld [vmem:[%s11435_s1 + $0x608] ss:$16 sps:$4 sm:$0xff]  }
 0x1d7   :  { %5545 = vmatpush2.bf16.msra.mxu0 %v8048_v44  ;;  %v8116_v44 = vld [vmem:[%s11435_s1 + $0x7ec] ss:$16 sps:$4 sm:$0xff]  }
 0x1d8   :  { %5570 = vmatpush1.bf16.msra.mxu1 %v8051_v45  ;;  %5546 = vmatprep.subr.bf16.mxu0 %v8056_v46  ;;  %v8119_v45 = vld [vmem:[%s11435_s1 + $0x8ec] ss:$16 sps:$4 sm:$0xff]   ;;  %v8114_v46 = vld [vmem:[%s11435_s1 + $0x7e8] ss:$16 sps:$4 sm:$0xff]  }
 0x1d9   :  { %5571 = vmatprep.subr.bf16.mxu1 %v8059_v48  ;;  %v8117_v48 = vld [vmem:[%s11435_s1 + $0x8e8] ss:$16 sps:$4 sm:$0xff]  }
 0x1db   :  { %5547 = vmatpush2.bf16.msra.mxu0 %v8054_v49  ;;  %v8122_v49 = vld [vmem:[%s11435_s1 + $0x7cc] ss:$16 sps:$4 sm:$0xff]  }
 0x1dc   :  { %5572 = vmatpush1.bf16.msra.mxu1 %v8057_v50  ;;  %5548 = vmatprep.subr.bf16.mxu0 %v8062_v52  ;;  %v8125_v50 = vld [vmem:[%s11435_s1 + $0x8cc] ss:$16 sps:$4 sm:$0xff]  }
 0x1dd   :  { %5573 = vmatprep.subr.bf16.mxu1 %v8065_v53 }
 0x1df   :  { %5549 = vmatpush2.bf16.msra.mxu0 %v8060_v55 }
 0x1e0   :  { %5574 = vmatpush1.bf16.msra.mxu1 %v8063_v56  ;;  %5600 = vmatprep.subr.bf16.mxu0 %v8071_v60  ;;  %v8120_v56 = vld [vmem:[%s11435_s1 + $0x7c8] ss:$16 sps:$4 sm:$0xff]  }
 0x1e1   :  { %5575 = vmatprep.subr.bf16.mxu1 %v8068_v59  ;;  %v8123_v59 = vld [vmem:[%s11435_s1 + $0x8c8] ss:$16 sps:$4 sm:$0xff]  }
 0x1e2   :  { %5551 = vmatmul.mubr.bf16.vlgmr.msra.gmra.mxu0 %v8839_v7  ;;  %v8083_v7 = vld [vmem:[%s11435_s1 + $0x6ac] ss:$16 sps:$4 sm:$0xff]  }
 0x1e3   :  { %5601 = vmatpush1.bf16.msra.mxu0 %v8069_v3  ;;  %5632 = vmatprep.mubr.bf16.mxu0 %v8937_v37  ;;  %v8089_v37 = vld [vmem:[%s11435_s1 + $0x68c] ss:$16 sps:$4 sm:$0xff]  }
 0x1e4   :  { %5576 = vmatpush2.bf16.msra.mxu1 %v8066_v2  ;;  %5602 = vmatprep.subr.bf16.mxu0 %v8077_v58 }
 0x1e5   :  { %5577 = vmatprep.subr.bf16.mxu1 %v8074_v57 }
 0x1e7   :  { %5603 = vmatpush1.bf16.msra.mxu0 %v8075_v8 }
 0x1e8   :  { %5578 = vmatpush2.bf16.msra.mxu1 %v8072_v5  ;;  %5604 = vmatprep.subr.bf16.mxu0 %v8083_v7  ;;  %v8129_v7 = vld [vmem:[%s11435_s1 + $0x8a8] ss:$16 sps:$4 sm:$0xff]  }
 0x1e9   :  { %5579 = vmatprep.subr.bf16.mxu1 %v8080_v11  ;;  %v8126_v11 = vld [vmem:[%s11435_s1 + $0x7a8] ss:$16 sps:$4 sm:$0xff]  }
 0x1eb   :  { %5605 = vmatpush1.bf16.msra.mxu0 %v8081_v13 }
 0x1ec   :  { %5580 = vmatpush2.bf16.msra.mxu1 %v8078_v12  ;;  %5606 = vmatprep.subr.bf16.mxu0 %v8089_v37  ;;  %v8135_v37 = vld [vmem:[%s11435_s1 + $0x888] ss:$16 sps:$4 sm:$0xff]  }
 0x1ed   :  { %5581 = vmatprep.subr.bf16.mxu1 %v8086_v14  ;;  %v8132_v14 = vld [vmem:[%s11435_s1 + $0x788] ss:$16 sps:$4 sm:$0xff]  }
 0x1ef   :  { %5607 = vmatpush1.bf16.msra.mxu0 %v8087_v6  ;;  %v8143_v6 = vld [vmem:[%s11435_s1 + $0x86c] ss:$16 sps:$4 sm:$0xff]  }
 0x1f0   :  { %5582 = vmatpush2.bf16.msra.mxu1 %v8084_v15  ;;  %5608 = vmatprep.subr.bf16.mxu0 %v8095_v18  ;;  %v8140_v15 = vld [vmem:[%s11435_s1 + $0x76c] ss:$16 sps:$4 sm:$0xff]   ;;  %v8141_v18 = vld [vmem:[%s11435_s1 + $0x868] ss:$16 sps:$4 sm:$0xff]  }
 0x1f1   :  { %5583 = vmatprep.subr.bf16.mxu1 %v8092_v19  ;;  %v8138_v19 = vld [vmem:[%s11435_s1 + $0x768] ss:$16 sps:$4 sm:$0xff]  }
 0x1f3   :  { %5609 = vmatpush1.bf16.msra.mxu0 %v8093_v27  ;;  %v8149_v27 = vld [vmem:[%s11435_s1 + $0x84c] ss:$16 sps:$4 sm:$0xff]  }
 0x1f4   :  { %5584 = vmatpush2.bf16.msra.mxu1 %v8090_v20  ;;  %5610 = vmatprep.subr.bf16.mxu0 %v8101_v28  ;;  %v8146_v20 = vld [vmem:[%s11435_s1 + $0x74c] ss:$16 sps:$4 sm:$0xff]   ;;  %v8147_v28 = vld [vmem:[%s11435_s1 + $0x848] ss:$16 sps:$4 sm:$0xff]  }
 0x1f5   :  { %5585 = vmatprep.subr.bf16.mxu1 %v8098_v29  ;;  %v8144_v29 = vld [vmem:[%s11435_s1 + $0x748] ss:$16 sps:$4 sm:$0xff]  }
 0x1f7   :  { %5611 = vmatpush1.bf16.msra.mxu0 %v8099_v30  ;;  %v8155_v30 = vld [vmem:[%s11435_s1 + $0x82c] ss:$16 sps:$4 sm:$0xff]  }
 0x1f8   :  { %5586 = vmatpush2.bf16.msra.mxu1 %v8096_v31  ;;  %5612 = vmatprep.subr.bf16.mxu0 %v8107_v32  ;;  %v8152_v31 = vld [vmem:[%s11435_s1 + $0x72c] ss:$16 sps:$4 sm:$0xff]   ;;  %v8153_v32 = vld [vmem:[%s11435_s1 + $0x828] ss:$16 sps:$4 sm:$0xff]  }
 0x1f9   :  { %5587 = vmatprep.subr.bf16.mxu1 %v8104_v36  ;;  %v8150_v36 = vld [vmem:[%s11435_s1 + $0x728] ss:$16 sps:$4 sm:$0xff]  }
 0x1fb   :  { %5613 = vmatpush1.bf16.msra.mxu0 %v8105_v47  ;;  %v8161_v47 = vld [vmem:[%s11435_s1 + $0x80c] ss:$16 sps:$4 sm:$0xff]  }
 0x1fc   :  { %5588 = vmatpush2.bf16.msra.mxu1 %v8102_v33  ;;  %5614 = vmatprep.subr.bf16.mxu0 %v8113_v41  ;;  %v8158_v33 = vld [vmem:[%s11435_s1 + $0x70c] ss:$16 sps:$4 sm:$0xff]   ;;  %v8159_v41 = vld [vmem:[%s11435_s1 + $0x808] ss:$16 sps:$4 sm:$0xff]  }
 0x1fd   :  { %5589 = vmatprep.subr.bf16.mxu1 %v8110_v34  ;;  %v8156_v34 = vld [vmem:[%s11435_s1 + $0x708] ss:$16 sps:$4 sm:$0xff]  }
 0x1ff   :  { %5615 = vmatpush1.bf16.msra.mxu0 %v8111_v23  ;;  %v8167_v23 = vld [vmem:[%s11435_s1 + $0xaec] ss:$16 sps:$4 sm:$0xff]  }
 0x200   :  { %5590 = vmatpush2.bf16.msra.mxu1 %v8108_v22  ;;  %5616 = vmatprep.subr.bf16.mxu0 %v8116_v44  ;;  %v8164_v22 = vld [vmem:[%s11435_s1 + $0x9ec] ss:$16 sps:$4 sm:$0xff]   ;;  %v8162_v44 = vld [vmem:[%s11435_s1 + $0x9e8] ss:$16 sps:$4 sm:$0xff]  }
 0x201   :  { %5641 = vmatprep.subr.bf16.mxu1 %v8119_v45  ;;  %v8165_v45 = vld [vmem:[%s11435_s1 + $0xae8] ss:$16 sps:$4 sm:$0xff]  }
 0x202   :  { %v5306_v52 = vpop.f32.mrf.mxu0 }
 0x203   :  { %v5347_v53 = vpop.f32.mrf.mxu1  ;;  %5592 = vmatmul.mubr.bf16.vlgmr.msra.gmra.mxu1 %v9057_v16  ;;  %v5307_v55 = vadd.f32 %v5306_v52, %v10200_v26  ;;  %5617 = vmatpush2.bf16.msra.mxu0 %v8114_v46  ;;  %v8128_v16 = vld [vmem:[%s11435_s1 + $0x7ac] ss:$16 sps:$4 sm:$0xff]  }
 0x204   :  { %5642 = vmatpush1.bf16.msra.mxu1 %v8117_v48  ;;  %v5308_v60 = vpop.f32.mrf.mxu0  ;;  %5618 = vmatprep.subr.bf16.mxu0 %v8122_v49  ;;  %v8131_v26 = vld [vmem:[%s11435_s1 + $0x8ac] ss:$16 sps:$4 sm:$0xff]   ;;  %v8168_v49 = vld [vmem:[%s11435_s1 + $0x9c8] ss:$16 sps:$4 sm:$0xff]  }
 0x205   :  { %v5349_v2 = vpop.f32.mrf.mxu1  ;;  %5643 = vmatprep.subr.bf16.mxu1 %v8125_v50  ;;  %v10402_v3 = vadd.f32 %v5347_v53, %v5307_v55  ;;  %v5309_v57 = vadd.f32 %v5308_v60, %v10210_v51  ;;  %5673 = vmatprep.mubr.bf16.mxu1 %v9087_v24  ;;  %v8134_v24 = vld [vmem:[%s11435_s1 + $0x78c] ss:$16 sps:$4 sm:$0xff]   ;;  %v8171_v50 = vld [vmem:[%s11435_s1 + $0xac8] ss:$16 sps:$4 sm:$0xff]  }
 0x206   :  { %v5310_v58 = vpop.f32.mrf.mxu0  ;;  %v8137_v51 = vld [vmem:[%s11435_s1 + $0x88c] ss:$16 sps:$4 sm:$0xff]   ;;  %v8174_v53 = vld [vmem:[%s11435_s1 + $0x9a8] ss:$16 sps:$4 sm:$0xff]  }
 0x207   :  { %v5351_v5 = vpop.f32.mrf.mxu1  ;;  %v10406_v8 = vadd.f32 %v5349_v2, %v5309_v57  ;;  %5619 = vmatpush2.bf16.msra.mxu0 %v8120_v56  ;;  %v8170_v46 = vld [vmem:[%s11435_s1 + $0x9cc] ss:$16 sps:$4 sm:$0xff]   ;;  %v8177_v55 = vld [vmem:[%s11435_s1 + $0xaa8] ss:$16 sps:$4 sm:$0xff]  }
 0x208   :  { %5644 = vmatpush1.bf16.msra.mxu1 %v8123_v59  ;;  %v5311_v12 = vpop.f32.mrf.mxu0  ;;  %5620 = vmatprep.subr.bf16.mxu0 %v8128_v16  ;;  %v8173_v48 = vld [vmem:[%s11435_s1 + $0xacc] ss:$16 sps:$4 sm:$0xff]   ;;  %v8180_v59 = vld [vmem:[%s11435_s1 + $0x988] ss:$16 sps:$4 sm:$0xff]  }
 0x209   :  { %v5352_v13 = vpop.f32.mrf.mxu1  ;;  %5645 = vmatprep.subr.bf16.mxu1 %v8131_v26  ;;  %v8176_v52 = vld [vmem:[%s11435_s1 + $0x9ac] ss:$16 sps:$4 sm:$0xff]   ;;  %v8183_v60 = vld [vmem:[%s11435_s1 + $0xa88] ss:$16 sps:$4 sm:$0xff]  }
 0x20a   :  { %v8182_v56 = vld [vmem:[%s11435_s1 + $0x98c] ss:$16 sps:$4 sm:$0xff]   ;;  %v8186_v26 = vld [vmem:[%s11435_s1 + $0x968] ss:$16 sps:$4 sm:$0xff]  }
 0x20b   :  { %5621 = vmatpush2.bf16.msra.mxu0 %v8126_v11  ;;  %v8188_v2 = vld [vmem:[%s11435_s1 + $0x96c] ss:$16 sps:$4 sm:$0xff]   ;;  %v8189_v57 = vld [vmem:[%s11435_s1 + $0xa68] ss:$16 sps:$4 sm:$0xff]  }
 0x20c   :  { %5646 = vmatpush1.bf16.msra.mxu1 %v8129_v7  ;;  %5622 = vmatprep.subr.bf16.mxu0 %v8134_v24  ;;  %v8191_v16 = vld [vmem:[%s11435_s1 + $0xa6c] ss:$16 sps:$4 sm:$0xff]   ;;  %v8192_v11 = vld [vmem:[%s11435_s1 + $0x948] ss:$16 sps:$4 sm:$0xff]  }
 0x20d   :  { %5647 = vmatprep.subr.bf16.mxu1 %v8137_v51  ;;  %v8194_v58 = vld [vmem:[%s11435_s1 + $0x94c] ss:$16 sps:$4 sm:$0xff]   ;;  %v8195_v7 = vld [vmem:[%s11435_s1 + $0xa48] ss:$16 sps:$4 sm:$0xff]  }
 0x20e   :  { %v8197_v5 = vld [vmem:[%s11435_s1 + $0xa4c] ss:$16 sps:$4 sm:$0xff]   ;;  %v8198_v24 = vld [vmem:[%s11435_s1 + $0x928] ss:$16 sps:$4 sm:$0xff]  }
 0x20f   :  { %5623 = vmatpush2.bf16.msra.mxu0 %v8132_v14  ;;  %v8200_v12 = vld [vmem:[%s11435_s1 + $0x92c] ss:$16 sps:$4 sm:$0xff]   ;;  %v8201_v51 = vld [vmem:[%s11435_s1 + $0xa28] ss:$16 sps:$4 sm:$0xff]  }
 0x210   :  { %5648 = vmatpush1.bf16.msra.mxu1 %v8135_v37  ;;  %5624 = vmatprep.subr.bf16.mxu0 %v8140_v15  ;;  %v8203_v13 = vld [vmem:[%s11435_s1 + $0xa2c] ss:$16 sps:$4 sm:$0xff]   ;;  %v8204_v15 = vld [vmem:[%s11435_s1 + $0x908] ss:$16 sps:$4 sm:$0xff]  }
 0x211   :  { %5649 = vmatprep.subr.bf16.mxu1 %v8143_v6  ;;  %v8206_v14 = vld [vmem:[%s11435_s1 + $0x90c] ss:$16 sps:$4 sm:$0xff]   ;;  %v8207_v6 = vld [vmem:[%s11435_s1 + $0xa08] ss:$16 sps:$4 sm:$0xff]  }
 0x212   :  { %v8209_v37 = vld [vmem:[%s11435_s1 + $0xa0c] ss:$16 sps:$4 sm:$0xff]  }
 0x213   :  { %5625 = vmatpush2.bf16.msra.mxu0 %v8138_v19  ;;  %v8212_v19 = vld [vmem:[%s11435_s1 + $0xbec] ss:$16 sps:$4 sm:$0xff]  }
 0x214   :  { %5650 = vmatpush1.bf16.msra.mxu1 %v8141_v18  ;;  %5626 = vmatprep.subr.bf16.mxu0 %v8146_v20  ;;  %v8215_v18 = vld [vmem:[%s11435_s1 + $0xcec] ss:$16 sps:$4 sm:$0xff]   ;;  %v8210_v20 = vld [vmem:[%s11435_s1 + $0xbe8] ss:$16 sps:$4 sm:$0xff]  }
 0x215   :  { %5651 = vmatprep.subr.bf16.mxu1 %v8149_v27  ;;  %v8213_v27 = vld [vmem:[%s11435_s1 + $0xce8] ss:$16 sps:$4 sm:$0xff]  }
 0x217   :  { %5627 = vmatpush2.bf16.msra.mxu0 %v8144_v29  ;;  %v8218_v29 = vld [vmem:[%s11435_s1 + $0xbcc] ss:$16 sps:$4 sm:$0xff]  }
 0x218   :  { %5652 = vmatpush1.bf16.msra.mxu1 %v8147_v28  ;;  %5628 = vmatprep.subr.bf16.mxu0 %v8152_v31  ;;  %v8221_v28 = vld [vmem:[%s11435_s1 + $0xccc] ss:$16 sps:$4 sm:$0xff]  }
 0x219   :  { %5653 = vmatprep.subr.bf16.mxu1 %v8155_v30 }
 0x21b   :  { %5629 = vmatpush2.bf16.msra.mxu0 %v8150_v36 }
 0x21c   :  { %5654 = vmatpush1.bf16.msra.mxu1 %v8153_v32  ;;  %5630 = vmatprep.subr.bf16.mxu0 %v8158_v33  ;;  %v8216_v32 = vld [vmem:[%s11435_s1 + $0xbc8] ss:$16 sps:$4 sm:$0xff]  }
 0x21d   :  { %5655 = vmatprep.subr.bf16.mxu1 %v8161_v47  ;;  %v8219_v33 = vld [vmem:[%s11435_s1 + $0xcc8] ss:$16 sps:$4 sm:$0xff]  }
 0x21f   :  { %5631 = vmatpush2.bf16.msra.mxu0 %v8156_v34 }
 0x220   :  { %5656 = vmatpush1.bf16.msra.mxu1 %v8159_v41  ;;  %5682 = vmatprep.subr.bf16.mxu0 %v8167_v23 }
 0x221   :  { %5657 = vmatprep.subr.bf16.mxu1 %v8164_v22 }
 0x222   :  { %5633 = vmatmul.mubr.bf16.vlgmr.msra.gmra.mxu0 %v9061_v17  ;;  %v8179_v17 = vld [vmem:[%s11435_s1 + $0xaac] ss:$16 sps:$4 sm:$0xff]  }
 0x223   :  { %5683 = vmatpush1.bf16.msra.mxu0 %v8165_v45  ;;  %5714 = vmatprep.mubr.bf16.mxu0 %v9091_v25  ;;  %v8185_v25 = vld [vmem:[%s11435_s1 + $0xa8c] ss:$16 sps:$4 sm:$0xff]  }
 0x224   :  { %5658 = vmatpush2.bf16.msra.mxu1 %v8162_v44  ;;  %5684 = vmatprep.subr.bf16.mxu0 %v8173_v48  ;;  %v8225_v48 = vld [vmem:[%s11435_s1 + $0xca8] ss:$16 sps:$4 sm:$0xff]  }
 0x225   :  { %5659 = vmatprep.subr.bf16.mxu1 %v8170_v46  ;;  %v8222_v46 = vld [vmem:[%s11435_s1 + $0xba8] ss:$16 sps:$4 sm:$0xff]  }
 0x227   :  { %5685 = vmatpush1.bf16.msra.mxu0 %v8171_v50 }
 0x228   :  { %5660 = vmatpush2.bf16.msra.mxu1 %v8168_v49  ;;  %5686 = vmatprep.subr.bf16.mxu0 %v8179_v17  ;;  %v8231_v17 = vld [vmem:[%s11435_s1 + $0xc88] ss:$16 sps:$4 sm:$0xff]  }
 0x229   :  { %5661 = vmatprep.subr.bf16.mxu1 %v8176_v52  ;;  %v8228_v52 = vld [vmem:[%s11435_s1 + $0xb88] ss:$16 sps:$4 sm:$0xff]  }
 0x22b   :  { %5687 = vmatpush1.bf16.msra.mxu0 %v8177_v55  ;;  %v8239_v55 = vld [vmem:[%s11435_s1 + $0xc6c] ss:$16 sps:$4 sm:$0xff]  }
 0x22c   :  { %5662 = vmatpush2.bf16.msra.mxu1 %v8174_v53  ;;  %5688 = vmatprep.subr.bf16.mxu0 %v8185_v25  ;;  %v8236_v53 = vld [vmem:[%s11435_s1 + $0xb6c] ss:$16 sps:$4 sm:$0xff]   ;;  %v8237_v25 = vld [vmem:[%s11435_s1 + $0xc68] ss:$16 sps:$4 sm:$0xff]  }
 0x22d   :  { %5663 = vmatprep.subr.bf16.mxu1 %v8182_v56  ;;  %v8234_v56 = vld [vmem:[%s11435_s1 + $0xb68] ss:$16 sps:$4 sm:$0xff]  }
 0x22f   :  { %5689 = vmatpush1.bf16.msra.mxu0 %v8183_v60  ;;  %v8245_v60 = vld [vmem:[%s11435_s1 + $0xc4c] ss:$16 sps:$4 sm:$0xff]  }
 0x230   :  { %5664 = vmatpush2.bf16.msra.mxu1 %v8180_v59  ;;  %5690 = vmatprep.subr.bf16.mxu0 %v8191_v16  ;;  %v8242_v59 = vld [vmem:[%s11435_s1 + $0xb4c] ss:$16 sps:$4 sm:$0xff]   ;;  %v8243_v16 = vld [vmem:[%s11435_s1 + $0xc48] ss:$16 sps:$4 sm:$0xff]  }
 0x231   :  { %5665 = vmatprep.subr.bf16.mxu1 %v8188_v2  ;;  %v8240_v2 = vld [vmem:[%s11435_s1 + $0xb48] ss:$16 sps:$4 sm:$0xff]  }
 0x233   :  { %5691 = vmatpush1.bf16.msra.mxu0 %v8189_v57  ;;  %v8251_v57 = vld [vmem:[%s11435_s1 + $0xc2c] ss:$16 sps:$4 sm:$0xff]  }
 0x234   :  { %5666 = vmatpush2.bf16.msra.mxu1 %v8186_v26  ;;  %5692 = vmatprep.subr.bf16.mxu0 %v8197_v5  ;;  %v8248_v26 = vld [vmem:[%s11435_s1 + $0xb2c] ss:$16 sps:$4 sm:$0xff]   ;;  %v8249_v5 = vld [vmem:[%s11435_s1 + $0xc28] ss:$16 sps:$4 sm:$0xff]  }
 0x235   :  { %5667 = vmatprep.subr.bf16.mxu1 %v8194_v58  ;;  %v8246_v58 = vld [vmem:[%s11435_s1 + $0xb28] ss:$16 sps:$4 sm:$0xff]  }
 0x237   :  { %5693 = vmatpush1.bf16.msra.mxu0 %v8195_v7  ;;  %v8257_v7 = vld [vmem:[%s11435_s1 + $0xc0c] ss:$16 sps:$4 sm:$0xff]  }
 0x238   :  { %5668 = vmatpush2.bf16.msra.mxu1 %v8192_v11  ;;  %5694 = vmatprep.subr.bf16.mxu0 %v8203_v13  ;;  %v8254_v11 = vld [vmem:[%s11435_s1 + $0xb0c] ss:$16 sps:$4 sm:$0xff]   ;;  %v8255_v13 = vld [vmem:[%s11435_s1 + $0xc08] ss:$16 sps:$4 sm:$0xff]  }
 0x239   :  { %5669 = vmatprep.subr.bf16.mxu1 %v8200_v12  ;;  %v8252_v12 = vld [vmem:[%s11435_s1 + $0xb08] ss:$16 sps:$4 sm:$0xff]  }
 0x23b   :  { %5695 = vmatpush1.bf16.msra.mxu0 %v8201_v51  ;;  %v8263_v51 = vld [vmem:[%s11435_s1 + $0xeec] ss:$16 sps:$4 sm:$0xff]  }
 0x23c   :  { %5670 = vmatpush2.bf16.msra.mxu1 %v8198_v24  ;;  %5696 = vmatprep.subr.bf16.mxu0 %v8209_v37  ;;  %v8260_v24 = vld [vmem:[%s11435_s1 + $0xdec] ss:$16 sps:$4 sm:$0xff]   ;;  %v8261_v37 = vld [vmem:[%s11435_s1 + $0xee8] ss:$16 sps:$4 sm:$0xff]  }
 0x23d   :  { %5671 = vmatprep.subr.bf16.mxu1 %v8206_v14  ;;  %v8258_v14 = vld [vmem:[%s11435_s1 + $0xde8] ss:$16 sps:$4 sm:$0xff]  }
 0x23f   :  { %5697 = vmatpush1.bf16.msra.mxu0 %v8207_v6  ;;  %v8269_v6 = vld [vmem:[%s11435_s1 + $0xecc] ss:$16 sps:$4 sm:$0xff]  }
 0x240   :  { %5672 = vmatpush2.bf16.msra.mxu1 %v8204_v15  ;;  %5698 = vmatprep.subr.bf16.mxu0 %v8212_v19  ;;  %v8266_v15 = vld [vmem:[%s11435_s1 + $0xdcc] ss:$16 sps:$4 sm:$0xff]  }
 0x241   :  { %5723 = vmatprep.subr.bf16.mxu1 %v8215_v18 }
 0x242   :  { %v5388_v31 = vpop.f32.mrf.mxu0 }
 0x243   :  { %v5429_v30 = vpop.f32.mrf.mxu1  ;;  %5674 = vmatmul.mubr.bf16.vlgmr.msra.gmra.mxu1 %v9287_v38  ;;  %v5389_v36 = vadd.f32 %v5388_v31, %v10402_v3  ;;  %5699 = vmatpush2.bf16.msra.mxu0 %v8210_v20  ;;  %v8224_v38 = vld [vmem:[%s11435_s1 + $0xbac] ss:$16 sps:$4 sm:$0xff]   ;;  %v8264_v20 = vld [vmem:[%s11435_s1 + $0xdc8] ss:$16 sps:$4 sm:$0xff]  }
 0x244   :  { %5724 = vmatpush1.bf16.msra.mxu1 %v8213_v27  ;;  %v5390_v47 = vpop.f32.mrf.mxu0  ;;  %5700 = vmatprep.subr.bf16.mxu0 %v8218_v29  ;;  %v8227_v3 = vld [vmem:[%s11435_s1 + $0xcac] ss:$16 sps:$4 sm:$0xff]   ;;  %v8267_v27 = vld [vmem:[%s11435_s1 + $0xec8] ss:$16 sps:$4 sm:$0xff]  }
 0x245   :  { %v5431_v34 = vpop.f32.mrf.mxu1  ;;  %5725 = vmatprep.subr.bf16.mxu1 %v8221_v28  ;;  %v10604_v41 = vadd.f32 %v5429_v30, %v5389_v36  ;;  %v5391_v22 = vadd.f32 %v5390_v47, %v10406_v8  ;;  %5755 = vmatprep.mubr.bf16.mxu1 %v9309_v42  ;;  %v8230_v42 = vld [vmem:[%s11435_s1 + $0xb8c] ss:$16 sps:$4 sm:$0xff]   ;;  %v8270_v36 = vld [vmem:[%s11435_s1 + $0xda8] ss:$16 sps:$4 sm:$0xff]  }
 0x246   :  { %v5392_v23 = vpop.f32.mrf.mxu0  ;;  %v8233_v8 = vld [vmem:[%s11435_s1 + $0xc8c] ss:$16 sps:$4 sm:$0xff]  }
 0x247   :  { %v5433_v44 = vpop.f32.mrf.mxu1  ;;  %v10608_v45 = vadd.f32 %v5431_v34, %v5391_v22  ;;  %5701 = vmatpush2.bf16.msra.mxu0 %v8216_v32  ;;  %v8275_v28 = vld [vmem:[%s11435_s1 + $0xeac] ss:$16 sps:$4 sm:$0xff]   ;;  %v8273_v32 = vld [vmem:[%s11435_s1 + $0xea8] ss:$16 sps:$4 sm:$0xff]  }
 0x248   :  { %5726 = vmatpush1.bf16.msra.mxu1 %v8219_v33  ;;  %v5393_v49 = vpop.f32.mrf.mxu0  ;;  %5702 = vmatprep.subr.bf16.mxu0 %v8224_v38  ;;  %v8278_v47 = vld [vmem:[%s11435_s1 + $0xd8c] ss:$16 sps:$4 sm:$0xff]   ;;  %v8276_v34 = vld [vmem:[%s11435_s1 + $0xd88] ss:$16 sps:$4 sm:$0xff]  }
 0x249   :  { %v5434_v50 = vpop.f32.mrf.mxu1  ;;  %5727 = vmatprep.subr.bf16.mxu1 %v8227_v3  ;;  %v8279_v38 = vld [vmem:[%s11435_s1 + $0xe88] ss:$16 sps:$4 sm:$0xff]   ;;  %v8284_v3 = vld [vmem:[%s11435_s1 + $0xd6c] ss:$16 sps:$4 sm:$0xff]  }
 0x24a   :  { %v8282_v22 = vld [vmem:[%s11435_s1 + $0xd68] ss:$16 sps:$4 sm:$0xff]   ;;  %v8290_v44 = vld [vmem:[%s11435_s1 + $0xd4c] ss:$16 sps:$4 sm:$0xff]  }
 0x24b   :  { %5703 = vmatpush2.bf16.msra.mxu0 %v8222_v46  ;;  %v8285_v23 = vld [vmem:[%s11435_s1 + $0xe68] ss:$16 sps:$4 sm:$0xff]   ;;  %v8296_v49 = vld [vmem:[%s11435_s1 + $0xd2c] ss:$16 sps:$4 sm:$0xff]  }
 0x24c   :  { %5728 = vmatpush1.bf16.msra.mxu1 %v8225_v48  ;;  %5704 = vmatprep.subr.bf16.mxu0 %v8230_v42  ;;  %v8288_v46 = vld [vmem:[%s11435_s1 + $0xd48] ss:$16 sps:$4 sm:$0xff]   ;;  %v8299_v50 = vld [vmem:[%s11435_s1 + $0xe2c] ss:$16 sps:$4 sm:$0xff]  }
 0x24d   :  { %5729 = vmatprep.subr.bf16.mxu1 %v8233_v8  ;;  %v8291_v48 = vld [vmem:[%s11435_s1 + $0xe48] ss:$16 sps:$4 sm:$0xff]  }
 0x24e   :  { %v8294_v42 = vld [vmem:[%s11435_s1 + $0xd28] ss:$16 sps:$4 sm:$0xff]  }
 0x24f   :  { %5705 = vmatpush2.bf16.msra.mxu0 %v8228_v52  ;;  %v8297_v8 = vld [vmem:[%s11435_s1 + $0xe28] ss:$16 sps:$4 sm:$0xff]   ;;  %v8302_v52 = vld [vmem:[%s11435_s1 + $0xd0c] ss:$16 sps:$4 sm:$0xff]  }
 0x250   :  { %5730 = vmatpush1.bf16.msra.mxu1 %v8231_v17  ;;  %5706 = vmatprep.subr.bf16.mxu0 %v8236_v53  ;;  %v8305_v17 = vld [vmem:[%s11435_s1 + $0xe0c] ss:$16 sps:$4 sm:$0xff]   ;;  %v8300_v53 = vld [vmem:[%s11435_s1 + $0xd08] ss:$16 sps:$4 sm:$0xff]  }
 0x251   :  { %5731 = vmatprep.subr.bf16.mxu1 %v8239_v55  ;;  %v8303_v55 = vld [vmem:[%s11435_s1 + $0xe08] ss:$16 sps:$4 sm:$0xff]  }
 0x253   :  { %5707 = vmatpush2.bf16.msra.mxu0 %v8234_v56  ;;  %v8308_v56 = vld [vmem:[%s11435_s1 + $0xfec] ss:$16 sps:$4 sm:$0xff]  }
 0x254   :  { %5732 = vmatpush1.bf16.msra.mxu1 %v8237_v25  ;;  %5708 = vmatprep.subr.bf16.mxu0 %v8242_v59  ;;  %v8311_v25 = vld [vmem:[%s11435_s1 + $0x10ec] ss:$16 sps:$4 sm:$0xff]   ;;  %v8306_v59 = vld [vmem:[%s11435_s1 + $0xfe8] ss:$16 sps:$4 sm:$0xff]  }
 0x255   :  { %5733 = vmatprep.subr.bf16.mxu1 %v8245_v60  ;;  %v8309_v60 = vld [vmem:[%s11435_s1 + $0x10e8] ss:$16 sps:$4 sm:$0xff]  }
 0x257   :  { %5709 = vmatpush2.bf16.msra.mxu0 %v8240_v2  ;;  %v8314_v2 = vld [vmem:[%s11435_s1 + $0xfcc] ss:$16 sps:$4 sm:$0xff]  }
 0x258   :  { %5734 = vmatpush1.bf16.msra.mxu1 %v8243_v16  ;;  %5710 = vmatprep.subr.bf16.mxu0 %v8248_v26  ;;  %v8317_v16 = vld [vmem:[%s11435_s1 + $0x10cc] ss:$16 sps:$4 sm:$0xff]  }
 0x259   :  { %5735 = vmatprep.subr.bf16.mxu1 %v8251_v57  ;;  %v8312_v57 = vld [vmem:[%s11435_s1 + $0xfc8] ss:$16 sps:$4 sm:$0xff]  }
 0x25b   :  { %5711 = vmatpush2.bf16.msra.mxu0 %v8246_v58  ;;  %v8315_v58 = vld [vmem:[%s11435_s1 + $0x10c8] ss:$16 sps:$4 sm:$0xff]  }
 0x25c   :  { %5736 = vmatpush1.bf16.msra.mxu1 %v8249_v5  ;;  %5712 = vmatprep.subr.bf16.mxu0 %v8254_v11  ;;  %v8320_v11 = vld [vmem:[%s11435_s1 + $0xfac] ss:$16 sps:$4 sm:$0xff]  }
 0x25d   :  { %5737 = vmatprep.subr.bf16.mxu1 %v8257_v7 }
 0x25f   :  { %5713 = vmatpush2.bf16.msra.mxu0 %v8252_v12  ;;  %v8318_v12 = vld [vmem:[%s11435_s1 + $0xfa8] ss:$16 sps:$4 sm:$0xff]  }
 0x260   :  { %5738 = vmatpush1.bf16.msra.mxu1 %v8255_v13  ;;  %5764 = vmatprep.subr.bf16.mxu0 %v8263_v51  ;;  %v8321_v13 = vld [vmem:[%s11435_s1 + $0x10a8] ss:$16 sps:$4 sm:$0xff]   ;;  %v8326_v51 = vld [vmem:[%s11435_s1 + $0xf8c] ss:$16 sps:$4 sm:$0xff]  }
 0x261   :  { %5739 = vmatprep.subr.bf16.mxu1 %v8260_v24 }
 0x262   :  { %v5470_v19 = vpop.f32.mrf.mxu0  ;;  %5715 = vmatmul.mubr.bf16.vlgmr.msra.gmra.mxu0 %v9291_v39  ;;  %v8272_v39 = vld [vmem:[%s11435_s1 + $0xdac] ss:$16 sps:$4 sm:$0xff]  }
 0x263   :  { %v10696_v18 = vadd.f32 %v5470_v19, %v10604_v41  ;;  %5765 = vmatpush1.bf16.msra.mxu0 %v8261_v37  ;;  %5796 = vmatprep.mubr.bf16.mxu0 %v9313_v43  ;;  %v8281_v43 = vld [vmem:[%s11435_s1 + $0xe8c] ss:$16 sps:$4 sm:$0xff]   ;;  %v8327_v37 = vld [vmem:[%s11435_s1 + $0x1088] ss:$16 sps:$4 sm:$0xff]  }
 0x264   :  { %5740 = vmatpush2.bf16.msra.mxu1 %v8258_v14  ;;  %v5472_v29 = vpop.f32.mrf.mxu0  ;;  %5766 = vmatprep.subr.bf16.mxu0 %v8269_v6  ;;  %v8287_v41 = vld [vmem:[%s11435_s1 + $0xe6c] ss:$16 sps:$4 sm:$0xff]   ;;  %v8324_v14 = vld [vmem:[%s11435_s1 + $0xf88] ss:$16 sps:$4 sm:$0xff]  }
 0x265   :  { %5741 = vmatprep.subr.bf16.mxu1 %v8266_v15  ;;  %v10711_v31 = vadd.f32 %v5472_v29, %v10608_v45  ;;  %v8293_v45 = vld [vmem:[%s11435_s1 + $0xe4c] ss:$16 sps:$4 sm:$0xff]   ;;  %v8330_v19 = vld [vmem:[%s11435_s1 + $0xf68] ss:$16 sps:$4 sm:$0xff]   ;;  %vm6010_vm1 = vcmp.gt.f32.partialorder %v10696_v18, 20.0 }
 0x266   :  { %v5474_v30 = vpop.f32.mrf.mxu0  ;;  %v8332_v15 = vld [vmem:[%s11435_s1 + $0xf6c] ss:$16 sps:$4 sm:$0xff]  }
 0x267   :  { %5767 = vmatpush1.bf16.msra.mxu0 %v8267_v27  ;;  %v8335_v6 = vld [vmem:[%s11435_s1 + $0x106c] ss:$16 sps:$4 sm:$0xff]   ;;  %vm6011_vm0 = vcmp.gt.f32.partialorder %v10711_v31, 20.0 }
 0x268   :  { %5742 = vmatpush2.bf16.msra.mxu1 %v8264_v20  ;;  %v5475_v33 = vpop.f32.mrf.mxu0  ;;  %5768 = vmatprep.subr.bf16.mxu0 %v8275_v28  ;;  %v8333_v20 = vld [vmem:[%s11435_s1 + $0x1068] ss:$16 sps:$4 sm:$0xff]   ;;  %v8338_v27 = vld [vmem:[%s11435_s1 + $0xf4c] ss:$16 sps:$4 sm:$0xff]  }
 0x269   :  { %5743 = vmatprep.subr.bf16.mxu1 %v8272_v39  ;;  %v8341_v29 = vld [vmem:[%s11435_s1 + $0x104c] ss:$16 sps:$4 sm:$0xff]   ;;  %v8336_v39 = vld [vmem:[%s11435_s1 + $0xf48] ss:$16 sps:$4 sm:$0xff]  }
 0x26a   :  { %v8339_v28 = vld [vmem:[%s11435_s1 + $0x1048] ss:$16 sps:$4 sm:$0xff]   ;;  %v8344_v30 = vld [vmem:[%s11435_s1 + $0xf2c] ss:$16 sps:$4 sm:$0xff]  }
 0x26b   :  { %5769 = vmatpush1.bf16.msra.mxu0 %v8273_v32  ;;  %v8342_v32 = vld [vmem:[%s11435_s1 + $0xf28] ss:$16 sps:$4 sm:$0xff]  }
 0x26c   :  { %5744 = vmatpush2.bf16.msra.mxu1 %v8270_v36  ;;  %5770 = vmatprep.subr.bf16.mxu0 %v8281_v43  ;;  %v8347_v36 = vld [vmem:[%s11435_s1 + $0x102c] ss:$16 sps:$4 sm:$0xff]   ;;  %v8345_v33 = vld [vmem:[%s11435_s1 + $0x1028] ss:$16 sps:$4 sm:$0xff]  }
 0x26d   :  { %5745 = vmatprep.subr.bf16.mxu1 %v8278_v47  ;;  %v8350_v47 = vld [vmem:[%s11435_s1 + $0xf0c] ss:$16 sps:$4 sm:$0xff]  }
 0x26e   :  { %v8353_v43 = vld [vmem:[%s11435_s1 + $0x100c] ss:$16 sps:$4 sm:$0xff]  }
 0x26f   :  { %5771 = vmatpush1.bf16.msra.mxu0 %v8279_v38  ;;  %v850_v38 = vsub.s32 3, %v9484_v54 }
 0x270   :  { %5746 = vmatpush2.bf16.msra.mxu1 %v8276_v34  ;;  %5772 = vmatprep.subr.bf16.mxu0 %v8287_v41  ;;  %v846_v34 = vsub.s32 2, %v9484_v54  ;;  %v8351_v41 = vld [vmem:[%s11435_s1 + $0x1008] ss:$16 sps:$4 sm:$0xff]   ;;  %v8359_v54 = vld [vmem:[%s11435_s1 + $0x12ec] ss:$16 sps:$4 sm:$0xff]  }
 0x271   :  { %5747 = vmatprep.subr.bf16.mxu1 %v8284_v3  ;;  %v8348_v3 = vld [vmem:[%s11435_s1 + $0xf08] ss:$16 sps:$4 sm:$0xff]  }
 0x273   :  { %5773 = vmatpush1.bf16.msra.mxu0 %v8285_v23  ;;  %v8594_v23 = vld [vmem:[%s11437_s2] sm:$0xf] }
 0x274   :  { %5748 = vmatpush2.bf16.msra.mxu1 %v8282_v22  ;;  %5774 = vmatprep.subr.bf16.mxu0 %v8293_v45  ;;  %v8356_v22 = vld [vmem:[%s11435_s1 + $0x11ec] ss:$16 sps:$4 sm:$0xff]   ;;  %v851_v45 = vrot.slane %v8594_v23, %v850_v38  ;;  %v8411_v38 = vld [vmem:[%s11435_s1 + $0x14c8] ss:$16 sps:$4 sm:$0xff]  }
 0x275   :  { %5749 = vmatprep.subr.bf16.mxu1 %v8290_v44  ;;  %v847_v44 = vrot.slane %v8594_v23, %v846_v34  ;;  %v8408_v34 = vld [vmem:[%s11435_s1 + $0x13c8] ss:$16 sps:$4 sm:$0xff]  }
 0x276   :  { %v8414_v23 = vld [vmem:[%s11435_s1 + $0x13a8] ss:$16 sps:$4 sm:$0xff]  }
 0x277   :  { %5775 = vmatpush1.bf16.msra.mxu0 %v8291_v48  ;;  %v8357_v48 = vld [vmem:[%s11435_s1 + $0x12e8] ss:$16 sps:$4 sm:$0xff]  }
 0x278   :  { %5750 = vmatpush2.bf16.msra.mxu1 %v8288_v46  ;;  %5776 = vmatprep.subr.bf16.mxu0 %v8299_v50  ;;  %v8354_v46 = vld [vmem:[%s11435_s1 + $0x11e8] ss:$16 sps:$4 sm:$0xff]   ;;  %v8365_v50 = vld [vmem:[%s11435_s1 + $0x12cc] ss:$16 sps:$4 sm:$0xff]  }
 0x279   :  { %5751 = vmatprep.subr.bf16.mxu1 %v8296_v49  ;;  %v8362_v49 = vld [vmem:[%s11435_s1 + $0x11cc] ss:$16 sps:$4 sm:$0xff]  }
 0x27b   :  { %5777 = vmatpush1.bf16.msra.mxu0 %v8297_v8  ;;  %v8360_v8 = vld [vmem:[%s11435_s1 + $0x11c8] ss:$16 sps:$4 sm:$0xff]  }
 0x27c   :  { %5752 = vmatpush2.bf16.msra.mxu1 %v8294_v42  ;;  %5778 = vmatprep.subr.bf16.mxu0 %v8305_v17 }
 0x27d   :  { %5753 = vmatprep.subr.bf16.mxu1 %v8302_v52  ;;  %v8363_v52 = vld [vmem:[%s11435_s1 + $0x12c8] ss:$16 sps:$4 sm:$0xff]  }
 0x27f   :  { %5779 = vmatpush1.bf16.msra.mxu0 %v8303_v55  ;;  %v8371_v55 = vld [vmem:[%s11435_s1 + $0x12ac] ss:$16 sps:$4 sm:$0xff]  }
 0x280   :  { %5754 = vmatpush2.bf16.msra.mxu1 %v8300_v53  ;;  %5780 = vmatprep.subr.bf16.mxu0 %v8308_v56  ;;  %v8368_v53 = vld [vmem:[%s11435_s1 + $0x11ac] ss:$16 sps:$4 sm:$0xff]  }
 0x281   :  { %5805 = vmatprep.subr.bf16.mxu1 %v8311_v25 }
 0x283   :  { %v10798_v26 = vpop.f32.mrf.mxu1  ;;  %5756 = vmatmul.mubr.bf16.vlgmr.msra.gmra.mxu1 %v9511_v0  ;;  %5781 = vmatpush2.bf16.msra.mxu0 %v8306_v59  ;;  %v8323_v0 = vld [vmem:[%s11435_s1 + $0x10ac] ss:$16 sps:$4 sm:$0xff]  }
 0x284   :  { %5806 = vmatpush1.bf16.msra.mxu1 %v8309_v60  ;;  %5782 = vmatprep.subr.bf16.mxu0 %v8314_v2  ;;  %v5512_v42 = vadd.f32 %v10798_v26, %v847_v44  ;;  %v8366_v2 = vld [vmem:[%s11435_s1 + $0x11a8] ss:$16 sps:$4 sm:$0xff]  }
 0x285   :  { %v10807_v5 = vpop.f32.mrf.mxu1  ;;  %5807 = vmatprep.subr.bf16.mxu1 %v8317_v16  ;;  %5837 = vmatprep.mubr.bf16.mxu1 %v9538_v9  ;;  %v8329_v9 = vld [vmem:[%s11435_s1 + $0x108c] ss:$16 sps:$4 sm:$0xff]   ;;  %v8369_v16 = vld [vmem:[%s11435_s1 + $0x12a8] ss:$16 sps:$4 sm:$0xff]  }
 0x286   :  { %v5514_v56 = vadd.f32 %v10807_v5, %v851_v45  ;;  %v8375_v5 = vld [vmem:[%s11435_s1 + $0x1288] ss:$16 sps:$4 sm:$0xff]  }
 0x287   :  { %v5515_v7 = vpop.f32.mrf.mxu1  ;;  %5783 = vmatpush2.bf16.msra.mxu0 %v8312_v57  ;;  %v8374_v57 = vld [vmem:[%s11435_s1 + $0x118c] ss:$16 sps:$4 sm:$0xff]   ;;  %v8417_v44 = vld [vmem:[%s11435_s1 + $0x14a8] ss:$16 sps:$4 sm:$0xff]  }
 0x288   :  { %5808 = vmatpush1.bf16.msra.mxu1 %v8315_v58  ;;  %5784 = vmatprep.subr.bf16.mxu0 %v8320_v11  ;;  %v8372_v58 = vld [vmem:[%s11435_s1 + $0x1188] ss:$16 sps:$4 sm:$0xff]   ;;  %v8380_v11 = vld [vmem:[%s11435_s1 + $0x116c] ss:$16 sps:$4 sm:$0xff]  }
 0x289   :  { %v5516_v24 = vpop.f32.mrf.mxu1  ;;  %5809 = vmatprep.subr.bf16.mxu1 %v8323_v0  ;;  %v8383_v0 = vld [vmem:[%s11435_s1 + $0x126c] ss:$16 sps:$4 sm:$0xff]   ;;  %v8378_v7 = vld [vmem:[%s11435_s1 + $0x1168] ss:$16 sps:$4 sm:$0xff]  }
 0x28a   :  { %v8389_v24 = vld [vmem:[%s11435_s1 + $0x124c] ss:$16 sps:$4 sm:$0xff]  }
 0x28b   :  { %5785 = vmatpush2.bf16.msra.mxu0 %v8318_v12  ;;  %v8381_v12 = vld [vmem:[%s11435_s1 + $0x1268] ss:$16 sps:$4 sm:$0xff]  }
 0x28c   :  { %5810 = vmatpush1.bf16.msra.mxu1 %v8321_v13  ;;  %5786 = vmatprep.subr.bf16.mxu0 %v8326_v51  ;;  %v8386_v13 = vld [vmem:[%s11435_s1 + $0x114c] ss:$16 sps:$4 sm:$0xff]   ;;  %v8384_v51 = vld [vmem:[%s11435_s1 + $0x1148] ss:$16 sps:$4 sm:$0xff]  }
 0x28d   :  { %5811 = vmatprep.subr.bf16.mxu1 %v8329_v9  ;;  %v8387_v9 = vld [vmem:[%s11435_s1 + $0x1248] ss:$16 sps:$4 sm:$0xff]  }
 0x28f   :  { %5787 = vmatpush2.bf16.msra.mxu0 %v8324_v14  ;;  %v8392_v14 = vld [vmem:[%s11435_s1 + $0x112c] ss:$16 sps:$4 sm:$0xff]  }
 0x290   :  { %5812 = vmatpush1.bf16.msra.mxu1 %v8327_v37  ;;  %5788 = vmatprep.subr.bf16.mxu0 %v8332_v15  ;;  %v8395_v37 = vld [vmem:[%s11435_s1 + $0x122c] ss:$16 sps:$4 sm:$0xff]   ;;  %v8390_v15 = vld [vmem:[%s11435_s1 + $0x1128] ss:$16 sps:$4 sm:$0xff]  }
 0x291   :  { %5813 = vmatprep.subr.bf16.mxu1 %v8335_v6  ;;  %v8393_v6 = vld [vmem:[%s11435_s1 + $0x1228] ss:$16 sps:$4 sm:$0xff]  }
 0x293   :  { %5789 = vmatpush2.bf16.msra.mxu0 %v8330_v19  ;;  %v8398_v19 = vld [vmem:[%s11435_s1 + $0x110c] ss:$16 sps:$4 sm:$0xff]  }
 0x294   :  { %5814 = vmatpush1.bf16.msra.mxu1 %v8333_v20  ;;  %5790 = vmatprep.subr.bf16.mxu0 %v8338_v27  ;;  %v8401_v20 = vld [vmem:[%s11435_s1 + $0x120c] ss:$16 sps:$4 sm:$0xff]   ;;  %v8396_v27 = vld [vmem:[%s11435_s1 + $0x1108] ss:$16 sps:$4 sm:$0xff]  }
 0x295   :  { %5815 = vmatprep.subr.bf16.mxu1 %v8341_v29  ;;  %v8399_v29 = vld [vmem:[%s11435_s1 + $0x1208] ss:$16 sps:$4 sm:$0xff]  }
 0x297   :  { %5791 = vmatpush2.bf16.msra.mxu0 %v8336_v39  ;;  %v8404_v39 = vld [vmem:[%s11435_s1 + $0x13ec] ss:$16 sps:$4 sm:$0xff]  }
 0x298   :  { %5816 = vmatpush1.bf16.msra.mxu1 %v8339_v28  ;;  %5792 = vmatprep.subr.bf16.mxu0 %v8344_v30  ;;  %v8407_v28 = vld [vmem:[%s11435_s1 + $0x14ec] ss:$16 sps:$4 sm:$0xff]   ;;  %v8402_v30 = vld [vmem:[%s11435_s1 + $0x13e8] ss:$16 sps:$4 sm:$0xff]  }
 0x299   :  { %5817 = vmatprep.subr.bf16.mxu1 %v8347_v36  ;;  %v8405_v36 = vld [vmem:[%s11435_s1 + $0x14e8] ss:$16 sps:$4 sm:$0xff]  }
 0x29b   :  { %5793 = vmatpush2.bf16.msra.mxu0 %v8342_v32  ;;  %v8410_v32 = vld [vmem:[%s11435_s1 + $0x13cc] ss:$16 sps:$4 sm:$0xff]  }
 0x29c   :  { %5818 = vmatpush1.bf16.msra.mxu1 %v8345_v33  ;;  %5794 = vmatprep.subr.bf16.mxu0 %v8350_v47  ;;  %v8413_v33 = vld [vmem:[%s11435_s1 + $0x14cc] ss:$16 sps:$4 sm:$0xff]  }
 0x29d   :  { %5819 = vmatprep.subr.bf16.mxu1 %v8353_v43 }
 0x29f   :  { %5795 = vmatpush2.bf16.msra.mxu0 %v8348_v3 }
 0x2a0   :  { %5820 = vmatpush1.bf16.msra.mxu1 %v8351_v41  ;;  %5846 = vmatprep.subr.bf16.mxu0 %v8359_v54  ;;  %v8419_v41 = vld [vmem:[%s11435_s1 + $0x14ac] ss:$16 sps:$4 sm:$0xff]  }
 0x2a1   :  { %5821 = vmatprep.subr.bf16.mxu1 %v8356_v22 }
 0x2a2   :  { %v5552_v17 = vpop.f32.mrf.mxu0  ;;  %5797 = vmatmul.mubr.bf16.vlgmr.msra.gmra.mxu0 %v9515_v1 }
 0x2a3   :  { %v10920_v25 = vadd.f32 %v5552_v17, %v5512_v42  ;;  %5847 = vmatpush1.bf16.msra.mxu0 %v8357_v48  ;;  %5878 = vmatprep.mubr.bf16.mxu0 %v9542_v10  ;;  %v8377_v10 = vld [vmem:[%s11435_s1 + $0x128c] ss:$16 sps:$4 sm:$0xff]   ;;  %v8420_v48 = vld [vmem:[%s11435_s1 + $0x1388] ss:$16 sps:$4 sm:$0xff]  }
 0x2a4   :  { %5822 = vmatpush2.bf16.msra.mxu1 %v8354_v46  ;;  %v5554_v59 = vpop.f32.mrf.mxu0  ;;  %5848 = vmatprep.subr.bf16.mxu0 %v8365_v50  ;;  %v8422_v46 = vld [vmem:[%s11435_s1 + $0x138c] ss:$16 sps:$4 sm:$0xff]  }
 0x2a5   :  { %5823 = vmatprep.subr.bf16.mxu1 %v8362_v49  ;;  %v10922_v60 = vadd.f32 %v5554_v59, %v5514_v56  ;;  %v8423_v49 = vld [vmem:[%s11435_s1 + $0x1488] ss:$16 sps:$4 sm:$0xff]   ;;  %v8428_v50 = vld [vmem:[%s11435_s1 + $0x136c] ss:$16 sps:$4 sm:$0xff]  }
 0x2a6   :  { %v5556_v1 = vpop.f32.mrf.mxu0  ;;  %v8431_v42 = vld [vmem:[%s11435_s1 + $0x146c] ss:$16 sps:$4 sm:$0xff]   ;;  %v8435_v56 = vld [vmem:[%s11435_s1 + $0x1448] ss:$16 sps:$4 sm:$0xff]  }
 0x2a7   :  { %5849 = vmatpush1.bf16.msra.mxu0 %v8363_v52  ;;  %v8429_v52 = vld [vmem:[%s11435_s1 + $0x1468] ss:$16 sps:$4 sm:$0xff]   ;;  %v8434_v17 = vld [vmem:[%s11435_s1 + $0x134c] ss:$16 sps:$4 sm:$0xff]  }
 0x2a8   :  { %5824 = vmatpush2.bf16.msra.mxu1 %v8360_v8  ;;  %v5557_v26 = vpop.f32.mrf.mxu0  ;;  %5850 = vmatprep.subr.bf16.mxu0 %v8371_v55  ;;  %v8426_v8 = vld [vmem:[%s11435_s1 + $0x1368] ss:$16 sps:$4 sm:$0xff]   ;;  %v8443_v59 = vld [vmem:[%s11435_s1 + $0x142c] ss:$16 sps:$4 sm:$0xff]  }
 0x2a9   :  { %5825 = vmatprep.subr.bf16.mxu1 %v8368_v53  ;;  %v8437_v53 = vld [vmem:[%s11435_s1 + $0x144c] ss:$16 sps:$4 sm:$0xff]   ;;  %v8432_v55 = vld [vmem:[%s11435_s1 + $0x1348] ss:$16 sps:$4 sm:$0xff]  }
 0x2aa   :  { %v8441_v1 = vld [vmem:[%s11435_s1 + $0x1428] ss:$16 sps:$4 sm:$0xff]  }
 0x2ab   :  { %5851 = vmatpush1.bf16.msra.mxu0 %v8369_v16  ;;  %v8449_v16 = vld [vmem:[%s11435_s1 + $0x140c] ss:$16 sps:$4 sm:$0xff]   ;;  %v8444_v26 = vld [vmem:[%s11435_s1 + $0x1308] ss:$16 sps:$4 sm:$0xff]  }
 0x2ac   :  { %5826 = vmatpush2.bf16.msra.mxu1 %v8366_v2  ;;  %5852 = vmatprep.subr.bf16.mxu0 %v8377_v10  ;;  %v8446_v2 = vld [vmem:[%s11435_s1 + $0x130c] ss:$16 sps:$4 sm:$0xff]  }
 0x2ad   :  { %5827 = vmatprep.subr.bf16.mxu1 %v8374_v57  ;;  %v8447_v57 = vld [vmem:[%s11435_s1 + $0x1408] ss:$16 sps:$4 sm:$0xff]   ;;  %v8452_v10 = vld [vmem:[%s11435_s1 + $0x15ec] ss:$16 sps:$4 sm:$0xff]  }
 0x2af   :  { %5853 = vmatpush1.bf16.msra.mxu0 %v8375_v5  ;;  %v8450_v5 = vld [vmem:[%s11435_s1 + $0x15e8] ss:$16 sps:$4 sm:$0xff]  }
 0x2b0   :  { %5828 = vmatpush2.bf16.msra.mxu1 %v8372_v58  ;;  %5854 = vmatprep.subr.bf16.mxu0 %v8383_v0  ;;  %v8455_v58 = vld [vmem:[%s11435_s1 + $0x16ec] ss:$16 sps:$4 sm:$0xff]  }
 0x2b1   :  { %5829 = vmatprep.subr.bf16.mxu1 %v8380_v11  ;;  %v8453_v11 = vld [vmem:[%s11435_s1 + $0x16e8] ss:$16 sps:$4 sm:$0xff]   ;;  %v8458_v0 = vld [vmem:[%s11435_s1 + $0x15cc] ss:$16 sps:$4 sm:$0xff]  }
 0x2b3   :  { %5855 = vmatpush1.bf16.msra.mxu0 %v8381_v12 }
 0x2b4   :  { %5830 = vmatpush2.bf16.msra.mxu1 %v8378_v7  ;;  %5856 = vmatprep.subr.bf16.mxu0 %v8389_v24  ;;  %v8461_v7 = vld [vmem:[%s11435_s1 + $0x16cc] ss:$16 sps:$4 sm:$0xff]   ;;  %v8456_v24 = vld [vmem:[%s11435_s1 + $0x15c8] ss:$16 sps:$4 sm:$0xff]  }
 0x2b5   :  { %5831 = vmatprep.subr.bf16.mxu1 %v8386_v13 }
 0x2b7   :  { %5857 = vmatpush1.bf16.msra.mxu0 %v8387_v9 }
 0x2b8   :  { %5832 = vmatpush2.bf16.msra.mxu1 %v8384_v51  ;;  %5858 = vmatprep.subr.bf16.mxu0 %v8395_v37  ;;  %v8459_v51 = vld [vmem:[%s11435_s1 + $0x16c8] ss:$16 sps:$4 sm:$0xff]  }
 0x2b9   :  { %5833 = vmatprep.subr.bf16.mxu1 %v8392_v14  ;;  %v8467_v14 = vld [vmem:[%s11435_s1 + $0x16ac] ss:$16 sps:$4 sm:$0xff]  }
 0x2bb   :  { %5859 = vmatpush1.bf16.msra.mxu0 %v8393_v6  ;;  %v8462_v6 = vld [vmem:[%s11435_s1 + $0x15a8] ss:$16 sps:$4 sm:$0xff]  }
 0x2bc   :  { %5834 = vmatpush2.bf16.msra.mxu1 %v8390_v15  ;;  %5860 = vmatprep.subr.bf16.mxu0 %v8401_v20 }
 0x2bd   :  { %5835 = vmatprep.subr.bf16.mxu1 %v8398_v19  ;;  %v8465_v19 = vld [vmem:[%s11435_s1 + $0x16a8] ss:$16 sps:$4 sm:$0xff]  }
 0x2bf   :  { %5861 = vmatpush1.bf16.msra.mxu0 %v8399_v29  ;;  %v8468_v29 = vld [vmem:[%s11435_s1 + $0x1588] ss:$16 sps:$4 sm:$0xff]  }
 0x2c0   :  { %5836 = vmatpush2.bf16.msra.mxu1 %v8396_v27  ;;  %5862 = vmatprep.subr.bf16.mxu0 %v8404_v39  ;;  %v8470_v27 = vld [vmem:[%s11435_s1 + $0x158c] ss:$16 sps:$4 sm:$0xff]   ;;  %v8471_v39 = vld [vmem:[%s11435_s1 + $0x1688] ss:$16 sps:$4 sm:$0xff]  }
 0x2c1   :  { %5887 = vmatprep.subr.bf16.mxu1 %v8407_v28  ;;  %v6015_v28 = vsel %vm6011_vm0, 0.0, %v10711_v31 }
 0x2c3   :  { %v5593_v47 = vpop.f32.mrf.mxu1  ;;  %5838 = vmatmul.mubr.bf16.vlgmr.msra.gmra.mxu1 %v9750_v61  ;;  %5863 = vmatpush2.bf16.msra.mxu0 %v8402_v30  ;;  %v8416_v61 = vld [vmem:[%s11435_s1 + $0x13ac] ss:$16 sps:$4 sm:$0xff]  }
 0x2c4   :  { %v11011_v43 = vadd.f32 %v5593_v47, %v10920_v25  ;;  %5888 = vmatpush1.bf16.msra.mxu1 %v8405_v36  ;;  %5864 = vmatprep.subr.bf16.mxu0 %v8410_v32  ;;  %v8440_v25 = vld [vmem:[%s11435_s1 + $0x132c] ss:$16 sps:$4 sm:$0xff]   ;;  %v6020_v32 = vmul.f32 1.442695, %v6015_v28  ;;  %v8477_v47 = vld [vmem:[%s11435_s1 + $0x1668] ss:$16 sps:$4 sm:$0xff]  }
 0x2c5   :  { %v5595_v3 = vpop.f32.mrf.mxu1  ;;  %5889 = vmatprep.subr.bf16.mxu1 %v8413_v33  ;;  %5919 = vmatprep.mubr.bf16.mxu1 %v9770_v35  ;;  %v8425_v35 = vld [vmem:[%s11435_s1 + $0x148c] ss:$16 sps:$4 sm:$0xff]   ;;  %v8474_v33 = vld [vmem:[%s11435_s1 + $0x1568] ss:$16 sps:$4 sm:$0xff]  }
 0x2c6   :  { %v11026_v22 = vadd.f32 %v5595_v3, %v10922_v60  ;;  %v8438_v60 = vld [vmem:[%s11435_s1 + $0x1328] ss:$16 sps:$4 sm:$0xff]   ;;  %v8476_v30 = vld [vmem:[%s11435_s1 + $0x156c] ss:$16 sps:$4 sm:$0xff]   ;;  %8578 = vpow2.f32 %v6020_v32 }
 0x2c7   :  { %v5597_v54 = vpop.f32.mrf.mxu1  ;;  %5865 = vmatpush2.bf16.msra.mxu0 %v8408_v34  ;;  %v8479_v36 = vld [vmem:[%s11435_s1 + $0x166c] ss:$16 sps:$4 sm:$0xff]   ;;  %v8483_v3 = vld [vmem:[%s11435_s1 + $0x1648] ss:$16 sps:$4 sm:$0xff]  }
 0x2c8   :  { %5890 = vmatpush1.bf16.msra.mxu1 %v8411_v38  ;;  %5866 = vmatprep.subr.bf16.mxu0 %v8416_v61  ;;  %v8485_v34 = vld [vmem:[%s11435_s1 + $0x164c] ss:$16 sps:$4 sm:$0xff]   ;;  %v8480_v38 = vld [vmem:[%s11435_s1 + $0x1548] ss:$16 sps:$4 sm:$0xff]  }
 0x2c9   :  { %v5598_v45 = vpop.f32.mrf.mxu1  ;;  %5891 = vmatprep.subr.bf16.mxu1 %v8419_v41  ;;  %v8488_v61 = vld [vmem:[%s11435_s1 + $0x152c] ss:$16 sps:$4 sm:$0xff]   ;;  %v8489_v54 = vld [vmem:[%s11435_s1 + $0x1628] ss:$16 sps:$4 sm:$0xff]  }
 0x2ca   :  { %v8491_v41 = vld [vmem:[%s11435_s1 + $0x162c] ss:$16 sps:$4 sm:$0xff]   ;;  %v8492_v45 = vld [vmem:[%s11435_s1 + $0x1508] ss:$16 sps:$4 sm:$0xff]  }
 0x2cb   :  { %5867 = vmatpush2.bf16.msra.mxu0 %v8414_v23  ;;  %v8494_v23 = vld [vmem:[%s11435_s1 + $0x150c] ss:$16 sps:$4 sm:$0xff]   ;;  %v8540_v32 = vld [vmem:[%s11435_s1 + $0x1708] ss:$16 sps:$4 sm:$0xff]  }
 0x2cc   :  { %5892 = vmatpush1.bf16.msra.mxu1 %v8417_v44  ;;  %5868 = vmatprep.subr.bf16.mxu0 %v8422_v46  ;;  %v8497_v44 = vld [vmem:[%s11435_s1 + $0x160c] ss:$16 sps:$4 sm:$0xff]   ;;  %v8495_v46 = vld [vmem:[%s11435_s1 + $0x1608] ss:$16 sps:$4 sm:$0xff]  }
 0x2cd   :  { %5893 = vmatprep.subr.bf16.mxu1 %v8425_v35  ;;  %v8500_v35 = vld [vmem:[%s11435_s1 + $0x17ec] ss:$16 sps:$4 sm:$0xff]  }
 0x2ce   :  { %v8542_v28 = vld [vmem:[%s11435_s1 + $0x170c] ss:$16 sps:$4 sm:$0xff]  }
 0x2cf   :  { %5869 = vmatpush2.bf16.msra.mxu0 %v8420_v48  ;;  %v8503_v48 = vld [vmem:[%s11435_s1 + $0x18ec] ss:$16 sps:$4 sm:$0xff]  }
 0x2d0   :  { %5894 = vmatpush1.bf16.msra.mxu1 %v8423_v49  ;;  %5870 = vmatprep.subr.bf16.mxu0 %v8428_v50  ;;  %v8498_v49 = vld [vmem:[%s11435_s1 + $0x17e8] ss:$16 sps:$4 sm:$0xff]  }
 0x2d1   :  { %5895 = vmatprep.subr.bf16.mxu1 %v8431_v42  ;;  %v8501_v50 = vld [vmem:[%s11435_s1 + $0x18e8] ss:$16 sps:$4 sm:$0xff]  }
 0x2d3   :  { %5871 = vmatpush2.bf16.msra.mxu0 %v8426_v8  ;;  %v11215_v42 = vpop.eup %8578  ;;  %v8506_v8 = vld [vmem:[%s11435_s1 + $0x17cc] ss:$16 sps:$4 sm:$0xff]  }
 0x2d4   :  { %5896 = vmatpush1.bf16.msra.mxu1 %v8429_v52  ;;  %5872 = vmatprep.subr.bf16.mxu0 %v8434_v17  ;;  %v8509_v52 = vld [vmem:[%s11435_s1 + $0x18cc] ss:$16 sps:$4 sm:$0xff]  }
 0x2d5   :  { %5897 = vmatprep.subr.bf16.mxu1 %v8437_v53 }
 0x2d7   :  { %5873 = vmatpush2.bf16.msra.mxu0 %v8432_v55  ;;  %v8504_v55 = vld [vmem:[%s11435_s1 + $0x17c8] ss:$16 sps:$4 sm:$0xff]  }
 0x2d8   :  { %5898 = vmatpush1.bf16.msra.mxu1 %v8435_v56  ;;  %5874 = vmatprep.subr.bf16.mxu0 %v8440_v25  ;;  %v8507_v56 = vld [vmem:[%s11435_s1 + $0x18c8] ss:$16 sps:$4 sm:$0xff]   ;;  %v6035_v25 = vadd.f32 1.0, %v11215_v42 }
 0x2d9   :  { %5899 = vmatprep.subr.bf16.mxu1 %v8443_v59 }
 0x2da   :  { %8580 = vlog2.f32 %v6035_v25 }
 0x2db   :  { %5875 = vmatpush2.bf16.msra.mxu0 %v8438_v60  ;;  %v8515_v60 = vld [vmem:[%s11435_s1 + $0x18ac] ss:$16 sps:$4 sm:$0xff]  }
 0x2dc   :  { %5900 = vmatpush1.bf16.msra.mxu1 %v8441_v1  ;;  %5876 = vmatprep.subr.bf16.mxu0 %v8446_v2 }
 0x2dd   :  { %5901 = vmatprep.subr.bf16.mxu1 %v8449_v16  ;;  %v8510_v16 = vld [vmem:[%s11435_s1 + $0x17a8] ss:$16 sps:$4 sm:$0xff]  }
 0x2df   :  { %5877 = vmatpush2.bf16.msra.mxu0 %v8444_v26  ;;  %v8513_v26 = vld [vmem:[%s11435_s1 + $0x18a8] ss:$16 sps:$4 sm:$0xff]  }
 0x2e0   :  { %5902 = vmatpush1.bf16.msra.mxu1 %v8447_v57  ;;  %5928 = vmatprep.subr.bf16.mxu0 %v8455_v58  ;;  %v6014_v58 = vsel %vm6010_vm1, 0.0, %v10696_v18 }
 0x2e1   :  { %5903 = vmatprep.subr.bf16.mxu1 %v8452_v10  ;;  %v8521_v10 = vld [vmem:[%s11435_s1 + $0x188c] ss:$16 sps:$4 sm:$0xff]  }
 0x2e2   :  { %v5634_v12 = vpop.f32.mrf.mxu0  ;;  %5879 = vmatmul.mubr.bf16.vlgmr.msra.gmra.mxu0 %v9754_v62  ;;  %v8464_v62 = vld [vmem:[%s11435_s1 + $0x15ac] ss:$16 sps:$4 sm:$0xff]  }
 0x2e3   :  { %v11115_v13 = vadd.f32 %v5634_v12, %v11011_v43  ;;  %5929 = vmatpush1.bf16.msra.mxu0 %v8453_v11  ;;  %5960 = vmatprep.mubr.bf16.mxu0 %v9774_v40  ;;  %v8473_v40 = vld [vmem:[%s11435_s1 + $0x168c] ss:$16 sps:$4 sm:$0xff]   ;;  %v8519_v11 = vld [vmem:[%s11435_s1 + $0x1888] ss:$16 sps:$4 sm:$0xff]   ;;  %v6018_v12 = vmul.f32 1.442695, %v6014_v58 }
 0x2e4   :  { %5904 = vmatpush2.bf16.msra.mxu1 %v8450_v5  ;;  %v5636_v9 = vpop.f32.mrf.mxu0  ;;  %5930 = vmatprep.subr.bf16.mxu0 %v8461_v7  ;;  %v8482_v43 = vld [vmem:[%s11435_s1 + $0x154c] ss:$16 sps:$4 sm:$0xff]   ;;  %v8516_v5 = vld [vmem:[%s11435_s1 + $0x1788] ss:$16 sps:$4 sm:$0xff]  }
 0x2e5   :  { %5905 = vmatprep.subr.bf16.mxu1 %v8458_v0  ;;  %v11130_v37 = vadd.f32 %v5636_v9, %v11026_v22  ;;  %v8486_v22 = vld [vmem:[%s11435_s1 + $0x1528] ss:$16 sps:$4 sm:$0xff]   ;;  %v8524_v0 = vld [vmem:[%s11435_s1 + $0x176c] ss:$16 sps:$4 sm:$0xff]   ;;  %8582 = vpow2.f32 %v6018_v12 }
 0x2e6   :  { %v5638_v15 = vpop.f32.mrf.mxu0  ;;  %v8527_v7 = vld [vmem:[%s11435_s1 + $0x186c] ss:$16 sps:$4 sm:$0xff]  }
 0x2e7   :  { %5931 = vmatpush1.bf16.msra.mxu0 %v8459_v51  ;;  %v8530_v51 = vld [vmem:[%s11435_s1 + $0x174c] ss:$16 sps:$4 sm:$0xff]   ;;  %v8581_v15 = vpop.eup %8580 }
 0x2e8   :  { %5906 = vmatpush2.bf16.msra.mxu1 %v8456_v24  ;;  %v5639_v20 = vpop.f32.mrf.mxu0  ;;  %5932 = vmatprep.subr.bf16.mxu0 %v8467_v14  ;;  %v8525_v24 = vld [vmem:[%s11435_s1 + $0x1868] ss:$16 sps:$4 sm:$0xff]   ;;  %v8533_v9 = vld [vmem:[%s11435_s1 + $0x184c] ss:$16 sps:$4 sm:$0xff]  }
 0x2e9   :  { %5907 = vmatprep.subr.bf16.mxu1 %v8464_v62  ;;  %v6038_v62 = vmul.f32 -0.5, %v11215_v42  ;;  %v8528_v14 = vld [vmem:[%s11435_s1 + $0x1748] ss:$16 sps:$4 sm:$0xff]  }
 0x2eb   :  { %5933 = vmatpush1.bf16.msra.mxu0 %v8465_v19  ;;  %v8539_v19 = vld [vmem:[%s11435_s1 + $0x182c] ss:$16 sps:$4 sm:$0xff]   ;;  %v6039_v20 = vadd.f32 1.0, %v6038_v62 }
 0x2ec   :  { %5908 = vmatpush2.bf16.msra.mxu1 %v8462_v6  ;;  %5934 = vmatprep.subr.bf16.mxu0 %v8473_v40  ;;  %v8536_v6 = vld [vmem:[%s11435_s1 + $0x172c] ss:$16 sps:$4 sm:$0xff]   ;;  %v8534_v40 = vld [vmem:[%s11435_s1 + $0x1728] ss:$16 sps:$4 sm:$0xff]  }
 0x2ed   :  { %5909 = vmatprep.subr.bf16.mxu1 %v8470_v27  ;;  %v6041_v27 = vand.u32 2147483647, %v11215_v42 }
 0x2ef   :  { %5935 = vmatpush1.bf16.msra.mxu0 %v8471_v39  ;;  %v6037_v39 = vmul.f32 0.6931472, %v8581_v15  ;;  %vm6042_vm2 = vcmp.lt.f32.partialorder %v6041_v27, 0.0004427343  ;;  %v8564_v15 = vld [vmem:[%s11438_s3 + $0xf0] sm:$0xff]   ;;  %v8568_v27 = vld [vmem:[%s11438_s3 + $0xe0] sm:$0xff]  }
 0x2f0   :  { %5910 = vmatpush2.bf16.msra.mxu1 %v8468_v29  ;;  %5936 = vmatprep.subr.bf16.mxu0 %v8479_v36  ;;  %v8537_v29 = vld [vmem:[%s11435_s1 + $0x1828] ss:$16 sps:$4 sm:$0xff]   ;;  %v6040_v36 = vmul.f32 %v11215_v42, %v6039_v20  ;;  %v8553_v42 = vld [vmem:[%s11438_s3 + $0x20] sm:$0xff]  }
 0x2f1   :  { %5911 = vmatprep.subr.bf16.mxu1 %v8476_v30  ;;  %v8545_v30 = vld [vmem:[%s11435_s1 + $0x180c] ss:$16 sps:$4 sm:$0xff]  }
 0x2f2   :  { %v8567_v20 = vld [vmem:[%s11438_s3 + $0xa8] sm:$0xff]  }
 0x2f3   :  { %5937 = vmatpush1.bf16.msra.mxu0 %v8477_v47  ;;  %v6043_v47 = vsel %vm6042_vm2, %v6040_v36, %v6037_v39  ;;  %v8570_v39 = vld [vmem:[%s11438_s3 + $0xd8] sm:$0xff]  }
 0x2f4   :  { %5912 = vmatpush2.bf16.msra.mxu1 %v8474_v33  ;;  %5938 = vmatprep.subr.bf16.mxu0 %v8485_v34  ;;  %v8543_v33 = vld [vmem:[%s11435_s1 + $0x1808] ss:$16 sps:$4 sm:$0xff]   ;;  %v6063_v34 = vsel %vm6011_vm0, %v10711_v31, %v6043_v47  ;;  %v8595_v31 = vld [vmem:[%s11436_s0 + $0x60] ss:$0 sps:$4 sm:$0xff]   ;;  %v8572_v47 = vld [vmem:[%s11438_s3 + $0xd0] sm:$0xff]  }
 0x2f5   :  { %5913 = vmatprep.subr.bf16.mxu1 %v8482_v43  ;;  %v8546_v43 = vld [vmem:[%s11438_s3 + $0x78] sm:$0xff]  }
 0x2f7   :  { %5939 = vmatpush1.bf16.msra.mxu0 %v8483_v3  ;;  %v8547_v3 = vld [vmem:[%s11438_s3 + $0x38] sm:$0xff]  }
 0x2f8   :  { %5914 = vmatpush2.bf16.msra.mxu1 %v8480_v38  ;;  %5940 = vmatprep.subr.bf16.mxu0 %v8491_v41  ;;  %v8583_v38 = vpop.eup %8582  ;;  %v6067_v41 = vpack.c.bf16 %v6063_v34, %v6063_v34 }
 0x2f9   :  { %5915 = vmatprep.subr.bf16.mxu1 %v8488_v61  ;;  %v8548_v61 = vld [vmem:[%s11438_s3 + $0x70] sm:$0xff]  }
 0x2fb   :  { %5941 = vmatpush1.bf16.msra.mxu0 %v8489_v54 }
 0x2fc   :  { %5916 = vmatpush2.bf16.msra.mxu1 %v8486_v22  ;;  %5942 = vmatprep.subr.bf16.mxu0 %v8497_v44  ;;  %v6026_v22 = vadd.f32 1.0, %v8583_v38  ;;  %v8549_v44 = vld [vmem:[%s11438_s3 + $0x30] sm:$0xff]  }
 0x2fd   :  { %5917 = vmatprep.subr.bf16.mxu1 %v8494_v23 }
 0x2fe   :  { %8584 = vlog2.f32 %v6026_v22 }
 0x2ff   :  { %5943 = vmatpush1.bf16.msra.mxu0 %v8495_v46  ;;  %v8550_v46 = vld [vmem:[%s11438_s3 + $0x68] sm:$0xff]  }
 0x300   :  { %5918 = vmatpush2.bf16.msra.mxu1 %v8492_v45  ;;  %5944 = vmatprep.subr.bf16.mxu0 %v8500_v35 }
 0x301   :  { %5969 = vmatprep.subr.bf16.mxu1 %v8503_v48  ;;  %v8551_v48 = vld [vmem:[%s11438_s3 + $0x28] sm:$0xff]  }
 0x303   :  { %v5675_v17 = vpop.f32.mrf.mxu1  ;;  %5920 = vmatmul.mubr.bf16.vlgmr.msra.gmra.mxu1 %v9968_v63  ;;  %5945 = vmatpush2.bf16.msra.mxu0 %v8498_v49  ;;  %v8512_v63 = vld [vmem:[%s11435_s1 + $0x17ac] ss:$16 sps:$4 sm:$0xff]  }
 0x304   :  { %v11225_v53 = vadd.f32 %v5675_v17, %v11115_v13  ;;  %5970 = vmatpush1.bf16.msra.mxu1 %v8501_v50  ;;  %5946 = vmatprep.subr.bf16.mxu0 %v8506_v8  ;;  %v8522_v13 = vld [vmem:[%s11435_s1 + $0x1768] ss:$16 sps:$4 sm:$0xff]   ;;  %v8552_v50 = vld [vmem:[%s11438_s3 + $0x60] sm:$0xff]   ;;  %v6029_v17 = vmul.f32 -0.5, %v8583_v38 }
 0x305   :  { %v5677_v59 = vpop.f32.mrf.mxu1  ;;  %5971 = vmatprep.subr.bf16.mxu1 %v8509_v52  ;;  %6001 = vmatprep.mubr.bf16.mxu1 %v8596_v21  ;;  %v8518_v21 = vld [vmem:[%s11435_s1 + $0x178c] ss:$16 sps:$4 sm:$0xff]  }
 0x306   :  { %v11241_v1 = vadd.f32 %v5677_v59, %v11130_v37  ;;  %v8531_v37 = vld [vmem:[%s11435_s1 + $0x1848] ss:$16 sps:$4 sm:$0xff]   ;;  %v6030_v25 = vadd.f32 1.0, %v6029_v17 }
 0x307   :  { %v5679_v2 = vpop.f32.mrf.mxu1  ;;  %5947 = vmatpush2.bf16.msra.mxu0 %v8504_v55  ;;  %v8554_v8 = vld [vmem:[%s11438_s3 + $0x58] sm:$0xff]   ;;  %v8558_v59 = vld [vmem:[%s11438_s3 + $0x48] sm:$0xff]  }
 0x308   :  { %5972 = vmatpush1.bf16.msra.mxu1 %v8507_v56  ;;  %5948 = vmatprep.subr.bf16.mxu0 %v8512_v63  ;;  %v8555_v52 = vld [vmem:[%s11438_s3 + $0x18] sm:$0xff]   ;;  %v8557_v56 = vld [vmem:[%s11438_s3 + $0x10] sm:$0xff]   ;;  %v6032_v63 = vand.u32 2147483647, %v8583_v38  ;;  %v6031_v2 = vmul.f32 %v8583_v38, %v6030_v25  ;;  %v8574_v38 = vld [vmem:[%s11438_s3 + $0xc8] sm:$0xff]  }
 0x309   :  { %v5680_v57 = vpop.f32.mrf.mxu1  ;;  %5973 = vmatprep.subr.bf16.mxu1 %v8515_v60 }
 0x30a   :  { %vm6033_vm3 = vcmp.lt.f32.partialorder %v6032_v63, 0.0004427343  ;;  %v8561_v57 = vld [vmem:[%s11438_s3] sm:$0xff]  }
 0x30b   :  { %5949 = vmatpush2.bf16.msra.mxu0 %v8510_v16  ;;  %v8585_v55 = vpop.eup %8584  ;;  %v8560_v16 = vld [vmem:[%s11438_s3 + $0x40] sm:$0xff]  }
 0x30c   :  { %5974 = vmatpush1.bf16.msra.mxu1 %v8513_v26  ;;  %5950 = vmatprep.subr.bf16.mxu0 %v8518_v21  ;;  %v6028_v60 = vmul.f32 0.6931472, %v8585_v55 }
 0x30d   :  { %5975 = vmatprep.subr.bf16.mxu1 %v8521_v10 }
 0x30e   :  { %v6034_v26 = vsel %vm6033_vm3, %v6031_v2, %v6028_v60 }
 0x30f   :  { %5951 = vmatpush2.bf16.msra.mxu0 %v8516_v5  ;;  %v6062_v21 = vsel %vm6010_vm1, %v10696_v18, %v6034_v26  ;;  %v8563_v18 = vld [vmem:[%s11438_s3 + $0xb8] sm:$0xff]  }
 0x310   :  { %5976 = vmatpush1.bf16.msra.mxu1 %v8519_v11  ;;  %5952 = vmatprep.subr.bf16.mxu0 %v8524_v0  ;;  %v6066_v10 = vpack.c.bf16 %v6062_v21, %v6062_v21 }
 0x311   :  { %5977 = vmatprep.subr.bf16.mxu1 %v8527_v7 }
 0x313   :  { %5953 = vmatpush2.bf16.msra.mxu0 %v8522_v13 }
 0x314   :  { %5978 = vmatpush1.bf16.msra.mxu1 %v8525_v24  ;;  %5954 = vmatprep.subr.bf16.mxu0 %v8530_v51 }
 0x315   :  { %5979 = vmatprep.subr.bf16.mxu1 %v8533_v9 }
 0x317   :  { %5955 = vmatpush2.bf16.msra.mxu0 %v8528_v14 }
 0x318   :  { %5980 = vmatpush1.bf16.msra.mxu1 %v8531_v37  ;;  %5956 = vmatprep.subr.bf16.mxu0 %v8536_v6  ;;  %v8562_v37 = vld [vmem:[%s11438_s3 + $0xf8] sm:$0xff]   ;;  %v8565_v6 = vld [vmem:[%s11438_s3 + $0xb0] sm:$0xff]  }
 0x319   :  { %5981 = vmatprep.subr.bf16.mxu1 %v8539_v19  ;;  %v8566_v19 = vld [vmem:[%s11438_s3 + $0xe8] sm:$0xff]  }
 0x31b   :  { %5957 = vmatpush2.bf16.msra.mxu0 %v8534_v40  ;;  %v8569_v40 = vld [vmem:[%s11438_s3 + $0xa0] sm:$0xff]  }
 0x31c   :  { %5982 = vmatpush1.bf16.msra.mxu1 %v8537_v29  ;;  %5958 = vmatprep.subr.bf16.mxu0 %v8542_v28 }
 0x31d   :  { %5983 = vmatprep.subr.bf16.mxu1 %v8545_v30  ;;  %v8571_v30 = vld [vmem:[%s11438_s3 + $0x98] sm:$0xff]  }
 0x31f   :  { %5959 = vmatpush2.bf16.msra.mxu0 %v8540_v32 }
 0x320   :  { %5984 = vmatpush1.bf16.msra.mxu1 %v8543_v33  ;;  %7276 = vmatprep.subr.bf16.mxu0 %v8546_v43  ;;  %v8573_v43 = vld [vmem:[%s11438_s3 + $0x90] sm:$0xff]  }
 0x321   :  { %7298 = vmatprep.subr.bf16.mxu1 %v8562_v37 }
 0x322   :  { %v5716_v54 = vpop.f32.mrf.mxu0  ;;  %5961 = vmatmul.mubr.bf16.vlgmr.msra.gmra.mxu0 %v9972_v4 }
 0x323   :  { %6002 = vmatmul.mubr.bf16.vlgmr.msra.gmra.mxu1 %v8595_v31  ;;  %v5717_v23 = vadd.f32 %v5716_v54, %v11225_v53  ;;  %7277 = vmatpush3.bf16.msra.mxu0 %v8547_v3  ;;  %v8556_v53 = vld [vmem:[%s11438_s3 + $0x50] sm:$0xff]   ;;  %v8575_v3 = vld [vmem:[%s11438_s3 + $0x88] sm:$0xff]  }
 0x324   :  { %6365 = vmatprep.mubr.bf16.mxu0 %v6067_v41  ;;  %v5718_v45 = vpop.f32.mrf.mxu0  ;;  %7278 = vmatprep.subr.bf16.mxu0 %v8548_v61  ;;  %v8576_v61 = vld [vmem:[%s11438_s3 + $0xc0] sm:$0xff]  }
 0x325   :  { %v5719_v4 = vadd.f32 %v5718_v45, %v11241_v1  ;;  %v8559_v1 = vld [vmem:[%s11438_s3 + $0x8] sm:$0xff]   ;;  %7299 = vmatpush3.bf16.msra.mxu1 %v8563_v18  ;;  %v8577_v41 = vld [vmem:[%s11438_s3 + $0x80] sm:$0xff]  }
 0x326   :  { %v5720_v35 = vpop.f32.mrf.mxu0  ;;  %7300 = vmatprep.subr.bf16.mxu1 %v8564_v15 }
 0x327   :  { %7279 = vmatpush3.bf16.msra.mxu0 %v8549_v44 }
 0x328   :  { %v5721_v49 = vpop.f32.mrf.mxu0  ;;  %7280 = vmatprep.subr.bf16.mxu0 %v8550_v46 }
 0x329   :  { %7301 = vmatpush3.bf16.msra.mxu1 %v8565_v6 }
 0x32a   :  { %7302 = vmatprep.subr.bf16.mxu1 %v8566_v19 }
 0x32b   :  { %7281 = vmatpush3.bf16.msra.mxu0 %v8551_v48 }
 0x32c   :  { %7282 = vmatprep.subr.bf16.mxu0 %v8552_v50 }
 0x32d   :  { %7303 = vmatpush3.bf16.msra.mxu1 %v8567_v20 }
 0x32e   :  { %7304 = vmatprep.subr.bf16.mxu1 %v8568_v27 }
 0x32f   :  { %7283 = vmatpush3.bf16.msra.mxu0 %v8553_v42 }
 0x330   :  { %7284 = vmatprep.subr.bf16.mxu0 %v8554_v8 }
 0x331   :  { %7305 = vmatpush3.bf16.msra.mxu1 %v8569_v40 }
 0x332   :  { %7306 = vmatprep.subr.bf16.mxu1 %v8570_v39 }
 0x333   :  { %7285 = vmatpush3.bf16.msra.mxu0 %v8555_v52 }
 0x334   :  { %7286 = vmatprep.subr.bf16.mxu0 %v8556_v53 }
 0x335   :  { %7307 = vmatpush3.bf16.msra.mxu1 %v8571_v30 }
 0x336   :  { %7308 = vmatprep.subr.bf16.mxu1 %v8572_v47 }
 0x337   :  { %7287 = vmatpush3.bf16.msra.mxu0 %v8557_v56 }
 0x338   :  { %7288 = vmatprep.subr.bf16.mxu0 %v8558_v59 }
 0x339   :  { %7309 = vmatpush3.bf16.msra.mxu1 %v8573_v43 }
 0x33a   :  { %7310 = vmatprep.subr.bf16.mxu1 %v8574_v38 }
 0x33b   :  { %7289 = vmatpush3.bf16.msra.mxu0 %v8559_v1 }
 0x33c   :  { %7290 = vmatprep.subr.bf16.mxu0 %v8560_v16 }
 0x33d   :  { %7311 = vmatpush3.bf16.msra.mxu1 %v8575_v3 }
 0x33e   :  { %7312 = vmatprep.subr.bf16.mxu1 %v8576_v61 }
 0x33f   :  { %7291 = vmatpush3.bf16.msra.mxu0 %v8561_v57 }
 0x341   :  { %7313 = vmatpush3.bf16.msra.mxu1 %v8577_v41 }
 0x342   :  { %6366 = vmatmul.mubr.bf16.vlgmr.msra.gmra.mxu0 %v6066_v10 }
 0x343   :  { %v5757_v58 = vpop.f32.mrf.mxu1 }
 0x344   :  { %v5758_v5 = vadd.f32 %v5757_v58, %v5717_v23 }
 0x345   :  { %v5759_v11 = vpop.f32.mrf.mxu1 }
 0x346   :  { %v5760_v0 = vadd.f32 %v5759_v11, %v5719_v4 }
 0x347   :  { %v5761_v7 = vpop.f32.mrf.mxu1 }
 0x349   :  { %v5762_v12 = vpop.f32.mrf.mxu1 }
 0x362   :  { %v5798_v13 = vpop.f32.mrf.mxu0 }
 0x363   :  { %v5799_v24 = vadd.f32 %v5798_v13, %v5758_v5 }
 0x364   :  { %v5800_v51 = vpop.f32.mrf.mxu0 }
 0x365   :  { %v5801_v9 = vadd.f32 %v5800_v51, %v5760_v0 }
 0x366   :  { %v5802_v62 = vpop.f32.mrf.mxu0 }
 0x368   :  { %v5803_v14 = vpop.f32.mrf.mxu0 }
 0x383   :  { %v5839_v29 = vpop.f32.mrf.mxu1 }
 0x384   :  { %v5840_v28 = vadd.f32 %v5839_v29, %v5799_v24 }
 0x385   :  { %v5841_v36 = vpop.f32.mrf.mxu1 }
 0x386   :  { %v5842_v32 = vadd.f32 %v5841_v36, %v5801_v9 }
 0x387   :  { %v5843_v33 = vpop.f32.mrf.mxu1 }
 0x389   :  { %v5844_v34 = vpop.f32.mrf.mxu1 }
 0x3a2   :  { %v5880_v22 = vpop.f32.mrf.mxu0 }
 0x3a3   :  { %v5881_v35 = vadd.f32 %v5880_v22, %v5840_v28 }
 0x3a4   :  { %v5882_v54 = vpop.f32.mrf.mxu0 }
 0x3a5   :  { %v5883_v48 = vadd.f32 %v5882_v54, %v5842_v32  ;;  %v7243_v32 = vld [vmem:[%s11439_s4] ss:$0 sm:$0xff] }
 0x3a6   :  { %v5884_v31 = vpop.f32.mrf.mxu0 }
 0x3a8   :  { %v5885_v23 = vpop.f32.mrf.mxu0 }
 0x3c3   :  { %v5921_v44 = vpop.f32.mrf.mxu1 }
 0x3c4   :  { %v5922_v49 = vadd.f32 %v5921_v44, %v5881_v35 }
 0x3c5   :  { %v5923_v45 = vpop.f32.mrf.mxu1 }
 0x3c6   :  { %v5924_v8 = vadd.f32 %v5923_v45, %v5883_v48 }
 0x3c7   :  { %v5925_v46 = vpop.f32.mrf.mxu1 }
 0x3c9   :  { %v5926_v4 = vpop.f32.mrf.mxu1 }
 0x3e2   :  { %v5962_v50 = vpop.f32.mrf.mxu0 }
 0x3e3   :  { %v6003_v42 = vpop.f32.mrf.mxu1  ;;  %v5963_v52 = vadd.f32 %v5962_v50, %v5922_v49 }
 0x3e4   :  { %v5964_v17 = vpop.f32.mrf.mxu0 }
 0x3e5   :  { %v6005_v53 = vpop.f32.mrf.mxu1  ;;  %v6004_v55 = vadd.f32 %v6003_v42, %v5963_v52  ;;  %v5965_v56 = vadd.f32 %v5964_v17, %v5924_v8 }
 0x3e6   :  { %v5966_v25 = vpop.f32.mrf.mxu0 }
 0x3e7   :  { %v6007_v59 = vpop.f32.mrf.mxu1  ;;  %vm6012_vm4 = vcmp.gt.f32.partialorder %v6004_v55, 20.0  ;;  %v6006_v63 = vadd.f32 %v6005_v53, %v5965_v56 }
 0x3e8   :  { %v6016_v60 = vsel %vm6012_vm4, 0.0, %v6004_v55  ;;  %v5967_v1 = vpop.f32.mrf.mxu0 }
 0x3e9   :  { %v6008_v2 = vpop.f32.mrf.mxu1  ;;  %v6022_v16 = vmul.f32 1.442695, %v6016_v60  ;;  %vm6013_vm5 = vcmp.gt.f32.partialorder %v6006_v63, 20.0 }
 0x3ea   :  { %v6017_v26 = vsel %vm6013_vm5, 0.0, %v6006_v63 }
 0x3eb   :  { %8586 = vpow2.f32 %v6022_v16  ;;  %v6024_v57 = vmul.f32 1.442695, %v6017_v26 }
 0x3ed   :  { %8588 = vpow2.f32 %v6024_v57 }
 0x3f8   :  { %v8587_v21 = vpop.eup %8586 }
 0x3f9   :  { %v6044_v10 = vadd.f32 1.0, %v8587_v21  ;;  %v6047_v11 = vmul.f32 -0.5, %v8587_v21  ;;  %v6050_v51 = vand.u32 2147483647, %v8587_v21 }
 0x3fa   :  { %v8589_v58 = vpop.eup %8588 }
 0x3fb   :  { %8590 = vlog2.f32 %v6044_v10  ;;  %v6053_v5 = vadd.f32 1.0, %v8589_v58  ;;  %v6056_v7 = vmul.f32 -0.5, %v8589_v58  ;;  %v6048_v13 = vadd.f32 1.0, %v6047_v11 }
 0x3fc   :  { %v6059_v18 = vand.u32 2147483647, %v8589_v58  ;;  %vm6051_vm6 = vcmp.lt.f32.partialorder %v6050_v51, 0.0004427343 }
 0x3fd   :  { %8592 = vlog2.f32 %v6053_v5  ;;  %v6057_v62 = vadd.f32 1.0, %v6056_v7  ;;  %v6049_v6 = vmul.f32 %v8587_v21, %v6048_v13 }
 0x3fe   :  { %vm6060_vm7 = vcmp.lt.f32.partialorder %v6059_v18, 0.0004427343 }
 0x3ff   :  { %v6058_v40 = vmul.f32 %v8589_v58, %v6057_v62 }
 0x402   :  { %v7292_v0 = vpop.f32.mrf.mxu0 }
 0x404   :  { %v7293_v12 = vpop.f32.mrf.mxu0 }
 0x405   :  { %v7294_v24 = vadd.f32 %v7293_v12, %v7292_v0 }
 0x406   :  { %v7295_v9 = vpop.f32.mrf.mxu0 }
 0x407   :  { %v6368_v43 = vadd.f32 %v7294_v24, %v7243_v32 }
 0x408   :  { %v8591_v14 = vpop.eup %8590  ;;  %v7296_v37 = vpop.f32.mrf.mxu0 }
 0x409   :  { %v6046_v15 = vmul.f32 0.6931472, %v8591_v14 }
 0x40a   :  { %v8593_v19 = vpop.eup %8592 }
 0x40b   :  { %v6052_v20 = vsel %vm6051_vm6, %v6049_v6, %v6046_v15  ;;  %v6055_v27 = vmul.f32 0.6931472, %v8593_v19 }
 0x40c   :  { %v6064_v29 = vsel %vm6012_vm4, %v6004_v55, %v6052_v20 }
 0x40d   :  { %v6061_v39 = vsel %vm6060_vm7, %v6058_v40, %v6055_v27  ;;  %v6068_v36 = vpack.c.bf16 %v6064_v29, %v6064_v29 }
 0x40e   :  { %v6065_v28 = vsel %vm6013_vm5, %v6006_v63, %v6061_v39 }
 0x40f   :  { %v6069_v30 = vpack.c.bf16 %v6065_v28, %v6065_v28 }
 0x411   :  { %6405 = vmatprep.mubr.bf16.mxu1 %v6069_v30 }
 0x412   :  { %6406 = vmatmul.mubr.bf16.vlgmr.msra.gmra.mxu1 %v6068_v36 }
 0x4d2   :  { %v7314_v33 = vpop.f32.mrf.mxu1 }
 0x4d4   :  { %v7315_v47 = vpop.f32.mrf.mxu1 }
 0x4d5   :  { %v7316_v34 = vadd.f32 %v7315_v47, %v7314_v33 }
 0x4d6   :  { %v7317_v38 = vpop.f32.mrf.mxu1 }
 0x4d7   :  { %v6408_v3 = vadd.f32 %v7316_v34, %v6368_v43 }
 0x4d8   :  { %v7318_v61 = vpop.f32.mrf.mxu1 }
 0x4d9   :  { %6413 = vst [vmem:[%s11440_s5] sm:$0xff] %v6408_v3 }

</bundles_post_ra>
